<compile_context>
chip_gen: v6e
topology: v6e:2x2x1
jax: 0.10.0
libtpu: 0.0.40
codegen_flags: <defaults>
</compile_context>

<pallas_src>
import math
import functools

import jax
import jax.numpy as jnp
import numpy as np
from jax import lax
from jax.experimental import pallas as pl
from jax.experimental.pallas import tpu as pltpu


def _round_up(x, m):
    return ((x + m - 1) // m) * m


def _pad_to(x, shape):
    return jnp.pad(x, [(0, s - d) for d, s in zip(x.shape, shape)])


# --------------------------------------------------------------------------------------
# Stage 1: serial GRU recurrence (time-major, padded & lane-aligned shapes)
# --------------------------------------------------------------------------------------
def _gru_recurrence_kernel(flags_ref,      # SMEM [T] int32 teacher-forcing flags
                           sos_ref,        # VMEM [Bp, Hp] f32 embedded SOS (* sqrt(H))
                           tgt_emb_ref,    # VMEM [T*Bp, Hp] bf16 embedded targets (* sqrt(H))
                           h0_ref,         # VMEM [L, Bp, Hp] f32 encoder final hidden
                           w_ih_ref,       # VMEM [L, Hp, 3Hp] bf16 (pre-transposed, gate-block padded)
                           w_hh_ref,       # VMEM [L, Hp, 3Hp] bf16
                           b_ih_ref,       # VMEM [L, 1, 3Hp] f32
                           b_hh_ref,       # VMEM [L, 1, 3Hp] f32
                           outs_ref,       # VMEM [T, Bp, Hp] f32 (top-layer GRU outputs)
                           h_scr,          # VMEM [L, Bp, Hp] f32 hidden state (updated in place)
                           gxtf_scr,       # VMEM [T*Bp, 3Hp] f32 precomputed TF input-gate preacts
                           gx0_scr,        # VMEM [Bp, 3Hp] f32 layer-0 input gates for next step
                           *, n_layers, hidden_pad, unroll):
    T = outs_ref.shape[0]
    B = sos_ref.shape[0]
    Hp = hidden_pad
    bf16 = jnp.bfloat16

    # Carried hidden state (no per-step stack/unstack of layers).
    h_scr[...] = h0_ref[...]

    # decoder_outputs[0] is the embedded SOS token.
    sos = sos_ref[...]
    outs_ref[0] = sos

    # One MXU-efficient [T*B, Hp] @ [Hp, 3Hp] matmul: layer-0 input-gate pre-activations for
    # every possible teacher-forced input (off the serial chain).
    # TODO(synk): for very large T, stream tgt_emb from HBM (memory_space=pl.ANY +
    # double-buffered pltpu.make_async_copy) instead of holding it fully VMEM-resident.
    gxtf_scr[...] = (jnp.dot(tgt_emb_ref[...], w_ih_ref[0],
                             preferred_element_type=jnp.float32) + b_ih_ref[0])

    # Layer-0 input-gate pre-activation for step 1 (input = SOS embedding).
    gx0_scr[...] = (jnp.dot(sos.astype(bf16), w_ih_ref[0],
                            preferred_element_type=jnp.float32) + b_ih_ref[0])

    def gru_gates(gx, gh, h_prev):
        # PyTorch GRU gate order: r, z, n. Slices are multiples of 128 (lane-aligned).
        r = jax.nn.sigmoid(gx[:, 0:Hp] + gh[:, 0:Hp])
        z = jax.nn.sigmoid(gx[:, Hp:2 * Hp] + gh[:, Hp:2 * Hp])
        n = jnp.tanh(gx[:, 2 * Hp:3 * Hp] + r * gh[:, 2 * Hp:3 * Hp])
        return (1.0 - z) * n + z * h_prev

    def step(i, _):
        # ---- layer 0: input projection was prepared at the end of the previous step ----
        h_prev = h_scr[0]
        gh = (jnp.dot(h_prev.astype(bf16), w_hh_ref[0],
                      preferred_element_type=jnp.float32) + b_hh_ref[0])
        hn = gru_gates(gx0_scr[...], gh, h_prev)
        h_scr[0] = jnp.maximum(hn, 0.0)     # forward_step: relu(dropout(hidden)); dropout = identity
        inp = hn
        # ---- layers 1 .. L-1 (statically unrolled) ----
        for l in range(1, n_layers):
            h_prev = h_scr[l]
            gx = (jnp.dot(inp.astype(bf16), w_ih_ref[l],
                          preferred_element_type=jnp.float32) + b_ih_ref[l])
            gh = (jnp.dot(h_prev.astype(bf16), w_hh_ref[l],
                          preferred_element_type=jnp.float32) + b_hh_ref[l])
            hn = gru_gates(gx, gh, h_prev)
            h_scr[l] = jnp.maximum(hn, 0.0)
            inp = hn
        output = inp                        # top-layer GRU output (pre-ReLU)
        outs_ref[i] = output

        # ---- prepare the layer-0 input projection for step i+1 ----
        use_tf = flags_ref[i] > 0

        @pl.when(use_tf)
        def _():
            row = pl.multiple_of(i * B, 8)
            gx0_scr[...] = gxtf_scr[pl.ds(row, B), :]      # precomputed: no dependent matmul

        @pl.when(jnp.logical_not(use_tf))
        def _():
            gx0_scr[...] = (jnp.dot(output.astype(bf16), w_ih_ref[0],
                                    preferred_element_type=jnp.float32) + b_ih_ref[0])

        return 0

    # Unrolling gives the scheduler cross-step visibility (overlap W_hh matmuls of step i+1
    # with the non-dependent tail of step i).
    lax.fori_loop(1, T, step, 0, unroll=unroll)


# --------------------------------------------------------------------------------------
# Stage 2: LayerNorm + ReLU + Linear, tiled over (rows, vocab).
# LN/affine/ReLU/bf16-cast computed once per row tile (j == 0) and reused over all V tiles.
# --------------------------------------------------------------------------------------
def _ln_relu_fc_kernel(y_ref, g_ref, b_ref, w_ref, bias_ref, out_ref, yn_scr, *, h_true):
    @pl.when(pl.program_id(1) == 0)
    def _():
        y = y_ref[...]                                        # [RT, Hp] f32 (padded lanes zero)
        inv_h = 1.0 / h_true
        mean = jnp.sum(y, axis=-1, keepdims=True) * inv_h     # E[x]  (zero-padding-correct)
        var = jnp.sum(y * y, axis=-1, keepdims=True) * inv_h - mean * mean
        yn = (y - mean) * lax.rsqrt(var + 1e-5)
        yn = yn * g_ref[...] + b_ref[...]                     # padded lanes -> 0 (g, b padded w/ 0)
        yn_scr[...] = jnp.maximum(yn, 0.0).astype(jnp.bfloat16)

    out_ref[...] = (jnp.dot(yn_scr[...], w_ref[...],
                            preferred_element_type=jnp.float32) + bias_ref[...])


# --------------------------------------------------------------------------------------
# Wrapper
# --------------------------------------------------------------------------------------
def rnn_decoder_forward(params, encoder_outputs, encoder_final_hidden,
                        target_tensor, tf_key, teaching_force=0.3):
    """Mirrors RnnDecoder.forward (eval-mode dropout, deterministic TF flags)."""
    B = encoder_outputs.shape[0]
    T = target_tensor.shape[1]
    H = params["hidden_dim"]
    L = params["n_layers"]
    V = params["vocab_size"]

    Bp = _round_up(B, 8)            # f32 sublane tile
    Hp = _round_up(H, 128)          # lane tile (each gate block individually 128-aligned)
    Vp = _round_up(V, 128)          # lane-dense FC output (no masked vst)

    f32, bf16 = jnp.float32, jnp.bfloat16
    emb = params["embedding"].astype(f32)
    scale = math.sqrt(H)

    # Deterministic stand-in for torch.rand(1) < self.tf at each loop iteration.
    flags = (jax.random.uniform(tf_key, (T,)) < teaching_force).astype(jnp.int32)

    sos = _pad_to(emb[params["sos_token"]] * scale, (Hp,))
    sos = jnp.broadcast_to(sos, (Bp, Hp)).astype(f32)

    tgt = jnp.transpose(emb[target_tensor] * scale, (1, 0, 2))      # [T, B, H]
    tgt = _pad_to(tgt, (T, Bp, Hp)).reshape(T * Bp, Hp).astype(bf16)

    h0 = _pad_to(encoder_final_hidden.astype(f32), (L, Bp, Hp))

    # GRU weights [L, 3H, H] -> gate-block padded, pre-transposed [L, Hp, 3Hp] bf16.
    def prep_w(w):
        w = w.astype(f32).reshape(L, 3, H, H)        # [L, gate, out, in]
        w = jnp.transpose(w, (0, 3, 1, 2))           # [L, in, gate, out]
        w = _pad_to(w, (L, Hp, 3, Hp))
        return w.reshape(L, Hp, 3 * Hp).astype(bf16)

    def prep_b(b):
        b = _pad_to(b.astype(f32).reshape(L, 3, H), (L, 3, Hp))
        return b.reshape(L, 1, 3 * Hp)

    w_ih, w_hh = prep_w(params["w_ih"]), prep_w(params["w_hh"])
    b_ih, b_hh = prep_b(params["b_ih"]), prep_b(params["b_hh"])

    ln_g = _pad_to(params["ln_g"].astype(f32), (Hp,))[None, :]
    ln_b = _pad_to(params["ln_b"].astype(f32), (Hp,))[None, :]
    w_fc = _pad_to(params["w_fc"].astype(f32).T, (Hp, Vp)).astype(bf16)
    b_fc = _pad_to(params["b_fc"].astype(f32), (Vp,))[None, :]

    # ---------------- stage 1: serial GRU recurrence ----------------
    est = (T * Bp * Hp * 2 + Bp * Hp * 4 + L * Bp * Hp * 4
           + 2 * L * Hp * 3 * Hp * 2 + 2 * L * 3 * Hp * 4
           + T * Bp * Hp * 4                       # output
           + L * Bp * Hp * 4 + T * Bp * 3 * Hp * 4 + Bp * 3 * Hp * 4)   # scratches
    vmem_limit = int(min(max(2 * est, 16 * 2 ** 20), 48 * 2 ** 20))

    n_steps = max(T - 1, 1)
    unroll = True if n_steps <= 8 else 2           # small T: full unroll; else modest

    outs = pl.pallas_call(
        functools.partial(_gru_recurrence_kernel, n_layers=L, hidden_pad=Hp, unroll=unroll),
        out_shape=jax.ShapeDtypeStruct((T, Bp, Hp), f32),
        in_specs=[pl.BlockSpec(memory_space=pltpu.MemorySpace.SMEM)]
                 + [pl.BlockSpec(memory_space=pltpu.MemorySpace.VMEM)] * 7,
        out_specs=pl.BlockSpec(memory_space=pltpu.MemorySpace.VMEM),
        scratch_shapes=[pltpu.VMEM((L, Bp, Hp), f32),
                        pltpu.VMEM((T * Bp, 3 * Hp), f32),
                        pltpu.VMEM((Bp, 3 * Hp), f32)],
        compiler_params=pltpu.CompilerParams(vmem_limit_bytes=vmem_limit),
    )(flags, sos, tgt, h0, w_ih, w_hh, b_ih, b_hh)

    # ---------------- stage 2: LayerNorm + ReLU + Linear (gridded) ----------------
    rows = T * Bp                                  # multiple of 8
    RT = 128 if rows >= 128 else rows
    Rp = _round_up(rows, RT)
    VT = 256 if Vp % 256 == 0 else 128             # 256-wide N fills the v6e/v7x MXU
    y = outs.reshape(rows, Hp)
    if Rp != rows:
        y = jnp.pad(y, ((0, Rp - rows), (0, 0)))

    logits = pl.pallas_call(
        functools.partial(_ln_relu_fc_kernel, h_true=float(H)),
        out_shape=jax.ShapeDtypeStruct((Rp, Vp), f32),
        grid=(Rp // RT, Vp // VT),
        in_specs=[pl.BlockSpec((RT, Hp), lambda i, j: (i, 0)),
                  pl.BlockSpec((1, Hp), lambda i, j: (0, 0)),
                  pl.BlockSpec((1, Hp), lambda i, j: (0, 0)),
                  pl.BlockSpec((Hp, VT), lambda i, j: (0, j)),
                  pl.BlockSpec((1, VT), lambda i, j: (0, j))],
        out_specs=pl.BlockSpec((RT, VT), lambda i, j: (i, j)),
        scratch_shapes=[pltpu.VMEM((RT, Hp), bf16)],
        compiler_params=pltpu.CompilerParams(
            dimension_semantics=("parallel", "arbitrary")),
    )(y, ln_g, ln_b, w_fc, b_fc)

    logits = logits[:rows, :V].reshape(T, Bp, V)[:, :B]
    return jnp.transpose(logits, (1, 0, 2)), flags      # [B, T, V] (batch_first)


# --------------------------------------------------------------------------------------
# Pure-JAX reference (same eval-mode semantics, same bf16-operand mixed precision)
# --------------------------------------------------------------------------------------
def rnn_decoder_reference(params, encoder_final_hidden, target_tensor, flags):
    H = params["hidden_dim"]
    L = params["n_layers"]
    emb = params["embedding"].astype(jnp.float32)
    scale = math.sqrt(H)
    B, T = target_tensor.shape
    bf16 = jnp.bfloat16

    def mm(a, b):
        return jnp.dot(a.astype(bf16), b.astype(bf16), preferred_element_type=jnp.float32)

    sos = jnp.broadcast_to(emb[params["sos_token"]] * scale, (B, H)).astype(jnp.float32)
    tgt_emb = (emb[target_tensor] * scale).astype(jnp.float32)      # [B, T, H]

    outs = [sos]
    x = sos
    h = [encoder_final_hidden[l].astype(jnp.float32) for l in range(L)]
    for i in range(1, T):
        inp = x
        new_h = []
        for l in range(L):
            gx = mm(inp, params["w_ih"][l].T) + params["b_ih"][l]
            gh = mm(h[l], params["w_hh"][l].T) + params["b_hh"][l]
            r = jax.nn.sigmoid(gx[:, :H] + gh[:, :H])
            z = jax.nn.sigmoid(gx[:, H:2 * H] + gh[:, H:2 * H])
            n = jnp.tanh(gx[:, 2 * H:] + r * gh[:, 2 * H:])
            hn = (1.0 - z) * n + z * h[l]
            new_h.append(jnp.maximum(hn, 0.0))
            inp = hn
        output = inp
        outs.append(output)
        h = new_h
        x = jnp.where(flags[i] > 0, tgt_emb[:, i], output)

    y = jnp.stack(outs, axis=1)                                     # [B, T, H]
    mean = jnp.mean(y, axis=-1, keepdims=True)
    var = jnp.mean((y - mean) ** 2, axis=-1, keepdims=True)
    y = (y - mean) * lax.rsqrt(var + 1e-5)
    y = y * params["ln_g"] + params["ln_b"]
    y = jnp.maximum(y, 0.0)
    return mm(y, params["w_fc"].T) + params["b_fc"]


if __name__ == "__main__":
    B, T, H, L, V = 2, 8, 32, 2, 16
    SOS, EOS, PAD = 1, 2, 0

    key = jax.random.PRNGKey(0)
    ks = iter(jax.random.split(key, 16))

    def init(k, shape, scale=0.1):
        return (jax.random.normal(k, shape) * scale).astype(jnp.float32)

    params = dict(
        hidden_dim=H, n_layers=L, vocab_size=V, sos_token=SOS,
        embedding=init(next(ks), (V, H)),
        w_ih=init(next(ks), (L, 3 * H, H)),
        w_hh=init(next(ks), (L, 3 * H, H)),
        b_ih=init(next(ks), (L, 3 * H)),
        b_hh=init(next(ks), (L, 3 * H)),
        ln_g=jnp.ones((H,), jnp.float32),
        ln_b=jnp.zeros((H,), jnp.float32),
        w_fc=init(next(ks), (V, H)),
        b_fc=init(next(ks), (V,)),
    )

    encoder_outputs = init(next(ks), (B, T, H), 1.0)          # only batch size is used
    encoder_final_hidden = init(next(ks), (L, B, H), 1.0)
    target_tensor = jax.random.randint(next(ks), (B, T), 0, V)
    tf_key = next(ks)

    logits, flags = rnn_decoder_forward(params, encoder_outputs, encoder_final_hidden,
                                        target_tensor, tf_key, teaching_force=0.3)
    logits = jax.block_until_ready(logits)
    assert logits.shape == (B, T, V)

    ref = rnn_decoder_reference(params, encoder_final_hidden, target_tensor, flags)
    np.testing.assert_allclose(np.asarray(logits), np.asarray(ref), rtol=5e-3, atol=5e-3)

    print("KERNEL_OK")
</pallas_src>

<mosaic_0001>
module attributes {stable_mosaic.version = 11 : i64} {
  func.func @_gru_recurrence_kernel(%arg0: memref<8xi32, #tpu.memory_space<smem>>, %arg1: memref<8x128xf32, #tpu.memory_space<vmem>>, %arg2: memref<64x128xbf16, #tpu.memory_space<vmem>>, %arg3: memref<2x8x128xf32, #tpu.memory_space<vmem>>, %arg4: memref<2x128x384xbf16, #tpu.memory_space<vmem>>, %arg5: memref<2x128x384xbf16, #tpu.memory_space<vmem>>, %arg6: memref<2x1x384xf32, #tpu.memory_space<vmem>>, %arg7: memref<2x1x384xf32, #tpu.memory_space<vmem>>, %arg8: memref<8x8x128xf32, #tpu.memory_space<vmem>>, %arg9: memref<2x8x128xf32, #tpu.memory_space<vmem>>, %arg10: memref<64x384xf32, #tpu.memory_space<vmem>>, %arg11: memref<8x384xf32, #tpu.memory_space<vmem>>) attributes {dimension_semantics = [], scalar_prefetch = 0 : i64, scratch_operands = 3 : i64, tpu.core_type = #tpu.core_type<tc>} {
    %c0 = arith.constant 0 : index
    %c0_0 = arith.constant 0 : index
    %c0_1 = arith.constant 0 : index
    %0 = vector.load %arg3[%c0, %c0_0, %c0_1] : memref<2x8x128xf32, #tpu.memory_space<vmem>>, vector<2x8x128xf32>
    %c0_2 = arith.constant 0 : index
    %c0_3 = arith.constant 0 : index
    %c0_4 = arith.constant 0 : index
    %1 = vector.load %arg9[%c0_2, %c0_3, %c0_4] : memref<2x8x128xf32, #tpu.memory_space<vmem>>, vector<2x8x128xf32>
    tpu.vector_store %arg9[%c0_2, %c0_3, %c0_4], %0 {strides = array<i32>} : memref<2x8x128xf32, #tpu.memory_space<vmem>>, vector<2x8x128xf32>,
    %c0_5 = arith.constant 0 : index
    %c0_6 = arith.constant 0 : index
    %2 = vector.load %arg1[%c0_5, %c0_6] : memref<8x128xf32, #tpu.memory_space<vmem>>, vector<8x128xf32>
    %c0_7 = arith.constant 0 : index
    %c0_8 = arith.constant 0 : index
    %c0_9 = arith.constant 0 : index
    %3 = vector.load %arg8[%c0_7, %c0_8, %c0_9] : memref<8x8x128xf32, #tpu.memory_space<vmem>>, vector<1x8x128xf32>
    %4 = vector.shape_cast %3 : vector<1x8x128xf32> to vector<8x128xf32>
    %5 = vector.shape_cast %2 : vector<8x128xf32> to vector<1x8x128xf32>
    tpu.vector_store %arg8[%c0_7, %c0_8, %c0_9], %5 {strides = array<i32>} : memref<8x8x128xf32, #tpu.memory_space<vmem>>, vector<1x8x128xf32>,
    %c0_10 = arith.constant 0 : index
    %c0_11 = arith.constant 0 : index
    %6 = vector.load %arg2[%c0_10, %c0_11] : memref<64x128xbf16, #tpu.memory_space<vmem>>, vector<64x128xbf16>
    %c0_12 = arith.constant 0 : index
    %c0_13 = arith.constant 0 : index
    %c0_14 = arith.constant 0 : index
    %7 = vector.load %arg4[%c0_12, %c0_13, %c0_14] : memref<2x128x384xbf16, #tpu.memory_space<vmem>>, vector<1x128x384xbf16>
    %8 = vector.shape_cast %7 : vector<1x128x384xbf16> to vector<128x384xbf16>
    %cst = arith.constant dense<0.000000e+00> : vector<64x384xf32>
    %9 = tpu.matmul %6, %8, %cst {dimension_numbers = #tpu.dot_dimension_numbers<[1], [0], [0], [1], [0, 0, 1, 1], [], []>} : vector<64x128xbf16>, vector<128x384xbf16>, vector<64x384xf32> -> vector<64x384xf32>
    %c0_15 = arith.constant 0 : index
    %c0_16 = arith.constant 0 : index
    %c0_17 = arith.constant 0 : index
    %10 = vector.load %arg6[%c0_15, %c0_16, %c0_17] : memref<2x1x384xf32, #tpu.memory_space<vmem>>, vector<1x1x384xf32>
    %11 = vector.shape_cast %10 : vector<1x1x384xf32> to vector<1x384xf32>
    %12 = vector.broadcast %11 : vector<1x384xf32> to vector<64x384xf32>
    %13 = arith.addf %9, %12 : vector<64x384xf32>
    %c0_18 = arith.constant 0 : index
    %c0_19 = arith.constant 0 : index
    %14 = vector.load %arg10[%c0_18, %c0_19] : memref<64x384xf32, #tpu.memory_space<vmem>>, vector<64x384xf32>
    tpu.vector_store %arg10[%c0_18, %c0_19], %13 {strides = array<i32>} : memref<64x384xf32, #tpu.memory_space<vmem>>, vector<64x384xf32>,
    %15 = arith.truncf %2 : vector<8x128xf32> to vector<8x128xbf16>
    %c0_20 = arith.constant 0 : index
    %c0_21 = arith.constant 0 : index
    %c0_22 = arith.constant 0 : index
    %16 = vector.load %arg4[%c0_20, %c0_21, %c0_22] : memref<2x128x384xbf16, #tpu.memory_space<vmem>>, vector<1x128x384xbf16>
    %17 = vector.shape_cast %16 : vector<1x128x384xbf16> to vector<128x384xbf16>
    %cst_23 = arith.constant dense<0.000000e+00> : vector<8x384xf32>
    %18 = tpu.matmul %15, %17, %cst_23 {dimension_numbers = #tpu.dot_dimension_numbers<[1], [0], [0], [1], [0, 0, 1, 1], [], []>} : vector<8x128xbf16>, vector<128x384xbf16>, vector<8x384xf32> -> vector<8x384xf32>
    %c0_24 = arith.constant 0 : index
    %c0_25 = arith.constant 0 : index
    %c0_26 = arith.constant 0 : index
    %19 = vector.load %arg6[%c0_24, %c0_25, %c0_26] : memref<2x1x384xf32, #tpu.memory_space<vmem>>, vector<1x1x384xf32>
    %20 = vector.shape_cast %19 : vector<1x1x384xf32> to vector<1x384xf32>
    %21 = vector.broadcast %20 : vector<1x384xf32> to vector<8x384xf32>
    %22 = arith.addf %18, %21 : vector<8x384xf32>
    %c0_27 = arith.constant 0 : index
    %c0_28 = arith.constant 0 : index
    %23 = vector.load %arg11[%c0_27, %c0_28] : memref<8x384xf32, #tpu.memory_space<vmem>>, vector<8x384xf32>
    tpu.vector_store %arg11[%c0_27, %c0_28], %22 {strides = array<i32>} : memref<8x384xf32, #tpu.memory_space<vmem>>, vector<8x384xf32>,
    %c1_i32 = arith.constant 1 : i32
    %c0_29 = arith.constant 0 : index
    %c0_30 = arith.constant 0 : index
    %c0_31 = arith.constant 0 : index
    %24 = vector.load %arg9[%c0_29, %c0_30, %c0_31] : memref<2x8x128xf32, #tpu.memory_space<vmem>>, vector<1x8x128xf32>
    %25 = vector.shape_cast %24 : vector<1x8x128xf32> to vector<8x128xf32>
    %26 = arith.truncf %25 : vector<8x128xf32> to vector<8x128xbf16>
    %c0_32 = arith.constant 0 : index
    %c0_33 = arith.constant 0 : index
    %c0_34 = arith.constant 0 : index
    %27 = vector.load %arg5[%c0_32, %c0_33, %c0_34] : memref<2x128x384xbf16, #tpu.memory_space<vmem>>, vector<1x128x384xbf16>
    %28 = vector.shape_cast %27 : vector<1x128x384xbf16> to vector<128x384xbf16>
    %cst_35 = arith.constant dense<0.000000e+00> : vector<8x384xf32>
    %29 = tpu.matmul %26, %28, %cst_35 {dimension_numbers = #tpu.dot_dimension_numbers<[1], [0], [0], [1], [0, 0, 1, 1], [], []>} : vector<8x128xbf16>, vector<128x384xbf16>, vector<8x384xf32> -> vector<8x384xf32>
    %c0_36 = arith.constant 0 : index
    %c0_37 = arith.constant 0 : index
    %c0_38 = arith.constant 0 : index
    %30 = vector.load %arg7[%c0_36, %c0_37, %c0_38] : memref<2x1x384xf32, #tpu.memory_space<vmem>>, vector<1x1x384xf32>
    %31 = vector.shape_cast %30 : vector<1x1x384xf32> to vector<1x384xf32>
    %32 = vector.broadcast %31 : vector<1x384xf32> to vector<8x384xf32>
    %33 = arith.addf %29, %32 : vector<8x384xf32>
    %c0_39 = arith.constant 0 : index
    %c0_40 = arith.constant 0 : index
    %34 = vector.load %arg11[%c0_39, %c0_40] : memref<8x384xf32, #tpu.memory_space<vmem>>, vector<8x384xf32>
    %35 = vector.extract_strided_slice %34 {offsets = [0, 0], sizes = [8, 128], strides = [1, 1]} : vector<8x384xf32> to vector<8x128xf32>
    %36 = vector.extract_strided_slice %33 {offsets = [0, 0], sizes = [8, 128], strides = [1, 1]} : vector<8x384xf32> to vector<8x128xf32>
    %37 = arith.addf %35, %36 : vector<8x128xf32>
    %38 = arith.negf %37 : vector<8x128xf32>
    %39 = math.exp %38 : vector<8x128xf32>
    %cst_41 = arith.constant 1.000000e+00 : f32
    %40 = vector.broadcast %cst_41 : f32 to vector<8x128xf32>
    %41 = arith.addf %40, %39 : vector<8x128xf32>
    %42 = arith.divf %40, %41 : vector<8x128xf32>
    %43 = vector.extract_strided_slice %34 {offsets = [0, 128], sizes = [8, 128], strides = [1, 1]} : vector<8x384xf32> to vector<8x128xf32>
    %44 = vector.extract_strided_slice %33 {offsets = [0, 128], sizes = [8, 128], strides = [1, 1]} : vector<8x384xf32> to vector<8x128xf32>
    %45 = arith.addf %43, %44 : vector<8x128xf32>
    %46 = arith.negf %45 : vector<8x128xf32>
    %47 = math.exp %46 : vector<8x128xf32>
    %cst_42 = arith.constant 1.000000e+00 : f32
    %48 = vector.broadcast %cst_42 : f32 to vector<8x128xf32>
    %49 = arith.addf %48, %47 : vector<8x128xf32>
    %50 = arith.divf %48, %49 : vector<8x128xf32>
    %51 = vector.extract_strided_slice %34 {offsets = [0, 256], sizes = [8, 128], strides = [1, 1]} : vector<8x384xf32> to vector<8x128xf32>
    %52 = vector.extract_strided_slice %33 {offsets = [0, 256], sizes = [8, 128], strides = [1, 1]} : vector<8x384xf32> to vector<8x128xf32>
    %53 = arith.mulf %42, %52 : vector<8x128xf32>
    %54 = arith.addf %51, %53 : vector<8x128xf32>
    %55 = math.tanh %54 : vector<8x128xf32>
    %cst_43 = arith.constant 1.000000e+00 : f32
    %56 = vector.broadcast %cst_43 : f32 to vector<8x128xf32>
    %57 = arith.subf %56, %50 : vector<8x128xf32>
    %58 = arith.mulf %57, %55 : vector<8x128xf32>
    %59 = arith.mulf %50, %25 : vector<8x128xf32>
    %60 = arith.addf %58, %59 : vector<8x128xf32>
    %cst_44 = arith.constant 0.000000e+00 : f32
    %61 = vector.broadcast %cst_44 : f32 to vector<8x128xf32>
    %62 = arith.maximumf %60, %61 : vector<8x128xf32>
    %c0_45 = arith.constant 0 : index
    %c0_46 = arith.constant 0 : index
    %c0_47 = arith.constant 0 : index
    %63 = vector.load %arg9[%c0_45, %c0_46, %c0_47] : memref<2x8x128xf32, #tpu.memory_space<vmem>>, vector<1x8x128xf32>
    %64 = vector.shape_cast %63 : vector<1x8x128xf32> to vector<8x128xf32>
    %65 = vector.shape_cast %62 : vector<8x128xf32> to vector<1x8x128xf32>
    tpu.vector_store %arg9[%c0_45, %c0_46, %c0_47], %65 {strides = array<i32>} : memref<2x8x128xf32, #tpu.memory_space<vmem>>, vector<1x8x128xf32>,
    %c1 = arith.constant 1 : index
    %c0_48 = arith.constant 0 : index
    %c0_49 = arith.constant 0 : index
    %66 = vector.load %arg9[%c1, %c0_48, %c0_49] : memref<2x8x128xf32, #tpu.memory_space<vmem>>, vector<1x8x128xf32>
    %67 = vector.shape_cast %66 : vector<1x8x128xf32> to vector<8x128xf32>
    %68 = arith.truncf %60 : vector<8x128xf32> to vector<8x128xbf16>
    %c1_50 = arith.constant 1 : index
    %c0_51 = arith.constant 0 : index
    %c0_52 = arith.constant 0 : index
    %69 = vector.load %arg4[%c1_50, %c0_51, %c0_52] : memref<2x128x384xbf16, #tpu.memory_space<vmem>>, vector<1x128x384xbf16>
    %70 = vector.shape_cast %69 : vector<1x128x384xbf16> to vector<128x384xbf16>
    %cst_53 = arith.constant dense<0.000000e+00> : vector<8x384xf32>
    %71 = tpu.matmul %68, %70, %cst_53 {dimension_numbers = #tpu.dot_dimension_numbers<[1], [0], [0], [1], [0, 0, 1, 1], [], []>} : vector<8x128xbf16>, vector<128x384xbf16>, vector<8x384xf32> -> vector<8x384xf32>
    %c1_54 = arith.constant 1 : index
    %c0_55 = arith.constant 0 : index
    %c0_56 = arith.constant 0 : index
    %72 = vector.load %arg6[%c1_54, %c0_55, %c0_56] : memref<2x1x384xf32, #tpu.memory_space<vmem>>, vector<1x1x384xf32>
    %73 = vector.shape_cast %72 : vector<1x1x384xf32> to vector<1x384xf32>
    %74 = vector.broadcast %73 : vector<1x384xf32> to vector<8x384xf32>
    %75 = arith.addf %71, %74 : vector<8x384xf32>
    %76 = arith.truncf %67 : vector<8x128xf32> to vector<8x128xbf16>
    %c1_57 = arith.constant 1 : index
    %c0_58 = arith.constant 0 : index
    %c0_59 = arith.constant 0 : index
    %77 = vector.load %arg5[%c1_57, %c0_58, %c0_59] : memref<2x128x384xbf16, #tpu.memory_space<vmem>>, vector<1x128x384xbf16>
    %78 = vector.shape_cast %77 : vector<1x128x384xbf16> to vector<128x384xbf16>
    %cst_60 = arith.constant dense<0.000000e+00> : vector<8x384xf32>
    %79 = tpu.matmul %76, %78, %cst_60 {dimension_numbers = #tpu.dot_dimension_numbers<[1], [0], [0], [1], [0, 0, 1, 1], [], []>} : vector<8x128xbf16>, vector<128x384xbf16>, vector<8x384xf32> -> vector<8x384xf32>
    %c1_61 = arith.constant 1 : index
    %c0_62 = arith.constant 0 : index
    %c0_63 = arith.constant 0 : index
    %80 = vector.load %arg7[%c1_61, %c0_62, %c0_63] : memref<2x1x384xf32, #tpu.memory_space<vmem>>, vector<1x1x384xf32>
    %81 = vector.shape_cast %80 : vector<1x1x384xf32> to vector<1x384xf32>
    %82 = vector.broadcast %81 : vector<1x384xf32> to vector<8x384xf32>
    %83 = arith.addf %79, %82 : vector<8x384xf32>
    %84 = vector.extract_strided_slice %75 {offsets = [0, 0], sizes = [8, 128], strides = [1, 1]} : vector<8x384xf32> to vector<8x128xf32>
    %85 = vector.extract_strided_slice %83 {offsets = [0, 0], sizes = [8, 128], strides = [1, 1]} : vector<8x384xf32> to vector<8x128xf32>
    %86 = arith.addf %84, %85 : vector<8x128xf32>
    %87 = arith.negf %86 : vector<8x128xf32>
    %88 = math.exp %87 : vector<8x128xf32>
    %cst_64 = arith.constant 1.000000e+00 : f32
    %89 = vector.broadcast %cst_64 : f32 to vector<8x128xf32>
    %90 = arith.addf %89, %88 : vector<8x128xf32>
    %91 = arith.divf %89, %90 : vector<8x128xf32>
    %92 = vector.extract_strided_slice %75 {offsets = [0, 128], sizes = [8, 128], strides = [1, 1]} : vector<8x384xf32> to vector<8x128xf32>
    %93 = vector.extract_strided_slice %83 {offsets = [0, 128], sizes = [8, 128], strides = [1, 1]} : vector<8x384xf32> to vector<8x128xf32>
    %94 = arith.addf %92, %93 : vector<8x128xf32>
    %95 = arith.negf %94 : vector<8x128xf32>
    %96 = math.exp %95 : vector<8x128xf32>
    %cst_65 = arith.constant 1.000000e+00 : f32
    %97 = vector.broadcast %cst_65 : f32 to vector<8x128xf32>
    %98 = arith.addf %97, %96 : vector<8x128xf32>
    %99 = arith.divf %97, %98 : vector<8x128xf32>
    %100 = vector.extract_strided_slice %75 {offsets = [0, 256], sizes = [8, 128], strides = [1, 1]} : vector<8x384xf32> to vector<8x128xf32>
    %101 = vector.extract_strided_slice %83 {offsets = [0, 256], sizes = [8, 128], strides = [1, 1]} : vector<8x384xf32> to vector<8x128xf32>
    %102 = arith.mulf %91, %101 : vector<8x128xf32>
    %103 = arith.addf %100, %102 : vector<8x128xf32>
    %104 = math.tanh %103 : vector<8x128xf32>
    %cst_66 = arith.constant 1.000000e+00 : f32
    %105 = vector.broadcast %cst_66 : f32 to vector<8x128xf32>
    %106 = arith.subf %105, %99 : vector<8x128xf32>
    %107 = arith.mulf %106, %104 : vector<8x128xf32>
    %108 = arith.mulf %99, %67 : vector<8x128xf32>
    %109 = arith.addf %107, %108 : vector<8x128xf32>
    %cst_67 = arith.constant 0.000000e+00 : f32
    %110 = vector.broadcast %cst_67 : f32 to vector<8x128xf32>
    %111 = arith.maximumf %109, %110 : vector<8x128xf32>
    %c1_68 = arith.constant 1 : index
    %c0_69 = arith.constant 0 : index
    %c0_70 = arith.constant 0 : index
    %112 = vector.load %arg9[%c1_68, %c0_69, %c0_70] : memref<2x8x128xf32, #tpu.memory_space<vmem>>, vector<1x8x128xf32>
    %113 = vector.shape_cast %112 : vector<1x8x128xf32> to vector<8x128xf32>
    %114 = vector.shape_cast %111 : vector<8x128xf32> to vector<1x8x128xf32>
    tpu.vector_store %arg9[%c1_68, %c0_69, %c0_70], %114 {strides = array<i32>} : memref<2x8x128xf32, #tpu.memory_space<vmem>>, vector<1x8x128xf32>,
    %115 = arith.index_cast %c1_i32 : i32 to index
    %c0_71 = arith.constant 0 : index
    %c0_72 = arith.constant 0 : index
    %116 = vector.load %arg8[%115, %c0_71, %c0_72] : memref<8x8x128xf32, #tpu.memory_space<vmem>>, vector<1x8x128xf32>
    %117 = vector.shape_cast %116 : vector<1x8x128xf32> to vector<8x128xf32>
    %118 = vector.shape_cast %109 : vector<8x128xf32> to vector<1x8x128xf32>
    tpu.vector_store %arg8[%115, %c0_71, %c0_72], %118 {strides = array<i32>} : memref<8x8x128xf32, #tpu.memory_space<vmem>>, vector<1x8x128xf32>,
    %119 = arith.index_cast %c1_i32 : i32 to index
    %120 = memref.load %arg0[%119] : memref<8xi32, #tpu.memory_space<smem>>
    %c0_i32 = arith.constant 0 : i32
    %121 = arith.cmpi sgt, %120, %c0_i32 : i32
    %122 = arith.extui %121 : i1 to i32
    %c0_i32_73 = arith.constant 0 : i32
    %123 = arith.cmpi ne, %122, %c0_i32_73 : i32
    scf.if %123 {
      %c8_i32 = arith.constant 8 : i32
      %745 = arith.muli %c1_i32, %c8_i32 : i32
      %746 = tpu.assume_multiple %745, 8 : i32
      %747 = arith.index_cast %746 : i32 to index
      %c0_370 = arith.constant 0 : index
      %748 = vector.load %arg10[%747, %c0_370] : memref<64x384xf32, #tpu.memory_space<vmem>>, vector<8x384xf32>
      %c0_371 = arith.constant 0 : index
      %c0_372 = arith.constant 0 : index
      %749 = vector.load %arg11[%c0_371, %c0_372] : memref<8x384xf32, #tpu.memory_space<vmem>>, vector<8x384xf32>
      tpu.vector_store %arg11[%c0_371, %c0_372], %748 {strides = array<i32>} : memref<8x384xf32, #tpu.memory_space<vmem>>, vector<8x384xf32>,
    } else {
    }
    %true = arith.constant true
    %124 = arith.xori %121, %true : i1
    %125 = arith.extui %124 : i1 to i32
    %c0_i32_74 = arith.constant 0 : i32
    %126 = arith.cmpi ne, %125, %c0_i32_74 : i32
    scf.if %126 {
      %745 = arith.truncf %109 : vector<8x128xf32> to vector<8x128xbf16>
      %c0_370 = arith.constant 0 : index
      %c0_371 = arith.constant 0 : index
      %c0_372 = arith.constant 0 : index
      %746 = vector.load %arg4[%c0_370, %c0_371, %c0_372] : memref<2x128x384xbf16, #tpu.memory_space<vmem>>, vector<1x128x384xbf16>
      %747 = vector.shape_cast %746 : vector<1x128x384xbf16> to vector<128x384xbf16>
      %cst_373 = arith.constant dense<0.000000e+00> : vector<8x384xf32>
      %748 = tpu.matmul %745, %747, %cst_373 {dimension_numbers = #tpu.dot_dimension_numbers<[1], [0], [0], [1], [0, 0, 1, 1], [], []>} : vector<8x128xbf16>, vector<128x384xbf16>, vector<8x384xf32> -> vector<8x384xf32>
      %c0_374 = arith.constant 0 : index
      %c0_375 = arith.constant 0 : index
      %c0_376 = arith.constant 0 : index
      %749 = vector.load %arg6[%c0_374, %c0_375, %c0_376] : memref<2x1x384xf32, #tpu.memory_space<vmem>>, vector<1x1x384xf32>
      %750 = vector.shape_cast %749 : vector<1x1x384xf32> to vector<1x384xf32>
      %751 = vector.broadcast %750 : vector<1x384xf32> to vector<8x384xf32>
      %752 = arith.addf %748, %751 : vector<8x384xf32>
      %c0_377 = arith.constant 0 : index
      %c0_378 = arith.constant 0 : index
      %753 = vector.load %arg11[%c0_377, %c0_378] : memref<8x384xf32, #tpu.memory_space<vmem>>, vector<8x384xf32>
      tpu.vector_store %arg11[%c0_377, %c0_378], %752 {strides = array<i32>} : memref<8x384xf32, #tpu.memory_space<vmem>>, vector<8x384xf32>,
    } else {
    }
    %c2_i32 = arith.constant 2 : i32
    %c0_75 = arith.constant 0 : index
    %c0_76 = arith.constant 0 : index
    %c0_77 = arith.constant 0 : index
    %127 = vector.load %arg9[%c0_75, %c0_76, %c0_77] : memref<2x8x128xf32, #tpu.memory_space<vmem>>, vector<1x8x128xf32>
    %128 = vector.shape_cast %127 : vector<1x8x128xf32> to vector<8x128xf32>
    %129 = arith.truncf %128 : vector<8x128xf32> to vector<8x128xbf16>
    %c0_78 = arith.constant 0 : index
    %c0_79 = arith.constant 0 : index
    %c0_80 = arith.constant 0 : index
    %130 = vector.load %arg5[%c0_78, %c0_79, %c0_80] : memref<2x128x384xbf16, #tpu.memory_space<vmem>>, vector<1x128x384xbf16>
    %131 = vector.shape_cast %130 : vector<1x128x384xbf16> to vector<128x384xbf16>
    %cst_81 = arith.constant dense<0.000000e+00> : vector<8x384xf32>
    %132 = tpu.matmul %129, %131, %cst_81 {dimension_numbers = #tpu.dot_dimension_numbers<[1], [0], [0], [1], [0, 0, 1, 1], [], []>} : vector<8x128xbf16>, vector<128x384xbf16>, vector<8x384xf32> -> vector<8x384xf32>
    %c0_82 = arith.constant 0 : index
    %c0_83 = arith.constant 0 : index
    %c0_84 = arith.constant 0 : index
    %133 = vector.load %arg7[%c0_82, %c0_83, %c0_84] : memref<2x1x384xf32, #tpu.memory_space<vmem>>, vector<1x1x384xf32>
    %134 = vector.shape_cast %133 : vector<1x1x384xf32> to vector<1x384xf32>
    %135 = vector.broadcast %134 : vector<1x384xf32> to vector<8x384xf32>
    %136 = arith.addf %132, %135 : vector<8x384xf32>
    %c0_85 = arith.constant 0 : index
    %c0_86 = arith.constant 0 : index
    %137 = vector.load %arg11[%c0_85, %c0_86] : memref<8x384xf32, #tpu.memory_space<vmem>>, vector<8x384xf32>
    %138 = vector.extract_strided_slice %137 {offsets = [0, 0], sizes = [8, 128], strides = [1, 1]} : vector<8x384xf32> to vector<8x128xf32>
    %139 = vector.extract_strided_slice %136 {offsets = [0, 0], sizes = [8, 128], strides = [1, 1]} : vector<8x384xf32> to vector<8x128xf32>
    %140 = arith.addf %138, %139 : vector<8x128xf32>
    %141 = arith.negf %140 : vector<8x128xf32>
    %142 = math.exp %141 : vector<8x128xf32>
    %cst_87 = arith.constant 1.000000e+00 : f32
    %143 = vector.broadcast %cst_87 : f32 to vector<8x128xf32>
    %144 = arith.addf %143, %142 : vector<8x128xf32>
    %145 = arith.divf %143, %144 : vector<8x128xf32>
    %146 = vector.extract_strided_slice %137 {offsets = [0, 128], sizes = [8, 128], strides = [1, 1]} : vector<8x384xf32> to vector<8x128xf32>
    %147 = vector.extract_strided_slice %136 {offsets = [0, 128], sizes = [8, 128], strides = [1, 1]} : vector<8x384xf32> to vector<8x128xf32>
    %148 = arith.addf %146, %147 : vector<8x128xf32>
    %149 = arith.negf %148 : vector<8x128xf32>
    %150 = math.exp %149 : vector<8x128xf32>
    %cst_88 = arith.constant 1.000000e+00 : f32
    %151 = vector.broadcast %cst_88 : f32 to vector<8x128xf32>
    %152 = arith.addf %151, %150 : vector<8x128xf32>
    %153 = arith.divf %151, %152 : vector<8x128xf32>
    %154 = vector.extract_strided_slice %137 {offsets = [0, 256], sizes = [8, 128], strides = [1, 1]} : vector<8x384xf32> to vector<8x128xf32>
    %155 = vector.extract_strided_slice %136 {offsets = [0, 256], sizes = [8, 128], strides = [1, 1]} : vector<8x384xf32> to vector<8x128xf32>
    %156 = arith.mulf %145, %155 : vector<8x128xf32>
    %157 = arith.addf %154, %156 : vector<8x128xf32>
    %158 = math.tanh %157 : vector<8x128xf32>
    %cst_89 = arith.constant 1.000000e+00 : f32
    %159 = vector.broadcast %cst_89 : f32 to vector<8x128xf32>
    %160 = arith.subf %159, %153 : vector<8x128xf32>
    %161 = arith.mulf %160, %158 : vector<8x128xf32>
    %162 = arith.mulf %153, %128 : vector<8x128xf32>
    %163 = arith.addf %161, %162 : vector<8x128xf32>
    %cst_90 = arith.constant 0.000000e+00 : f32
    %164 = vector.broadcast %cst_90 : f32 to vector<8x128xf32>
    %165 = arith.maximumf %163, %164 : vector<8x128xf32>
    %c0_91 = arith.constant 0 : index
    %c0_92 = arith.constant 0 : index
    %c0_93 = arith.constant 0 : index
    %166 = vector.load %arg9[%c0_91, %c0_92, %c0_93] : memref<2x8x128xf32, #tpu.memory_space<vmem>>, vector<1x8x128xf32>
    %167 = vector.shape_cast %166 : vector<1x8x128xf32> to vector<8x128xf32>
    %168 = vector.shape_cast %165 : vector<8x128xf32> to vector<1x8x128xf32>
    tpu.vector_store %arg9[%c0_91, %c0_92, %c0_93], %168 {strides = array<i32>} : memref<2x8x128xf32, #tpu.memory_space<vmem>>, vector<1x8x128xf32>,
    %c1_94 = arith.constant 1 : index
    %c0_95 = arith.constant 0 : index
    %c0_96 = arith.constant 0 : index
    %169 = vector.load %arg9[%c1_94, %c0_95, %c0_96] : memref<2x8x128xf32, #tpu.memory_space<vmem>>, vector<1x8x128xf32>
    %170 = vector.shape_cast %169 : vector<1x8x128xf32> to vector<8x128xf32>
    %171 = arith.truncf %163 : vector<8x128xf32> to vector<8x128xbf16>
    %c1_97 = arith.constant 1 : index
    %c0_98 = arith.constant 0 : index
    %c0_99 = arith.constant 0 : index
    %172 = vector.load %arg4[%c1_97, %c0_98, %c0_99] : memref<2x128x384xbf16, #tpu.memory_space<vmem>>, vector<1x128x384xbf16>
    %173 = vector.shape_cast %172 : vector<1x128x384xbf16> to vector<128x384xbf16>
    %cst_100 = arith.constant dense<0.000000e+00> : vector<8x384xf32>
    %174 = tpu.matmul %171, %173, %cst_100 {dimension_numbers = #tpu.dot_dimension_numbers<[1], [0], [0], [1], [0, 0, 1, 1], [], []>} : vector<8x128xbf16>, vector<128x384xbf16>, vector<8x384xf32> -> vector<8x384xf32>
    %c1_101 = arith.constant 1 : index
    %c0_102 = arith.constant 0 : index
    %c0_103 = arith.constant 0 : index
    %175 = vector.load %arg6[%c1_101, %c0_102, %c0_103] : memref<2x1x384xf32, #tpu.memory_space<vmem>>, vector<1x1x384xf32>
    %176 = vector.shape_cast %175 : vector<1x1x384xf32> to vector<1x384xf32>
    %177 = vector.broadcast %176 : vector<1x384xf32> to vector<8x384xf32>
    %178 = arith.addf %174, %177 : vector<8x384xf32>
    %179 = arith.truncf %170 : vector<8x128xf32> to vector<8x128xbf16>
    %c1_104 = arith.constant 1 : index
    %c0_105 = arith.constant 0 : index
    %c0_106 = arith.constant 0 : index
    %180 = vector.load %arg5[%c1_104, %c0_105, %c0_106] : memref<2x128x384xbf16, #tpu.memory_space<vmem>>, vector<1x128x384xbf16>
    %181 = vector.shape_cast %180 : vector<1x128x384xbf16> to vector<128x384xbf16>
    %cst_107 = arith.constant dense<0.000000e+00> : vector<8x384xf32>
    %182 = tpu.matmul %179, %181, %cst_107 {dimension_numbers = #tpu.dot_dimension_numbers<[1], [0], [0], [1], [0, 0, 1, 1], [], []>} : vector<8x128xbf16>, vector<128x384xbf16>, vector<8x384xf32> -> vector<8x384xf32>
    %c1_108 = arith.constant 1 : index
    %c0_109 = arith.constant 0 : index
    %c0_110 = arith.constant 0 : index
    %183 = vector.load %arg7[%c1_108, %c0_109, %c0_110] : memref<2x1x384xf32, #tpu.memory_space<vmem>>, vector<1x1x384xf32>
    %184 = vector.shape_cast %183 : vector<1x1x384xf32> to vector<1x384xf32>
    %185 = vector.broadcast %184 : vector<1x384xf32> to vector<8x384xf32>
    %186 = arith.addf %182, %185 : vector<8x384xf32>
    %187 = vector.extract_strided_slice %178 {offsets = [0, 0], sizes = [8, 128], strides = [1, 1]} : vector<8x384xf32> to vector<8x128xf32>
    %188 = vector.extract_strided_slice %186 {offsets = [0, 0], sizes = [8, 128], strides = [1, 1]} : vector<8x384xf32> to vector<8x128xf32>
    %189 = arith.addf %187, %188 : vector<8x128xf32>
    %190 = arith.negf %189 : vector<8x128xf32>
    %191 = math.exp %190 : vector<8x128xf32>
    %cst_111 = arith.constant 1.000000e+00 : f32
    %192 = vector.broadcast %cst_111 : f32 to vector<8x128xf32>
    %193 = arith.addf %192, %191 : vector<8x128xf32>
    %194 = arith.divf %192, %193 : vector<8x128xf32>
    %195 = vector.extract_strided_slice %178 {offsets = [0, 128], sizes = [8, 128], strides = [1, 1]} : vector<8x384xf32> to vector<8x128xf32>
    %196 = vector.extract_strided_slice %186 {offsets = [0, 128], sizes = [8, 128], strides = [1, 1]} : vector<8x384xf32> to vector<8x128xf32>
    %197 = arith.addf %195, %196 : vector<8x128xf32>
    %198 = arith.negf %197 : vector<8x128xf32>
    %199 = math.exp %198 : vector<8x128xf32>
    %cst_112 = arith.constant 1.000000e+00 : f32
    %200 = vector.broadcast %cst_112 : f32 to vector<8x128xf32>
    %201 = arith.addf %200, %199 : vector<8x128xf32>
    %202 = arith.divf %200, %201 : vector<8x128xf32>
    %203 = vector.extract_strided_slice %178 {offsets = [0, 256], sizes = [8, 128], strides = [1, 1]} : vector<8x384xf32> to vector<8x128xf32>
    %204 = vector.extract_strided_slice %186 {offsets = [0, 256], sizes = [8, 128], strides = [1, 1]} : vector<8x384xf32> to vector<8x128xf32>
    %205 = arith.mulf %194, %204 : vector<8x128xf32>
    %206 = arith.addf %203, %205 : vector<8x128xf32>
    %207 = math.tanh %206 : vector<8x128xf32>
    %cst_113 = arith.constant 1.000000e+00 : f32
    %208 = vector.broadcast %cst_113 : f32 to vector<8x128xf32>
    %209 = arith.subf %208, %202 : vector<8x128xf32>
    %210 = arith.mulf %209, %207 : vector<8x128xf32>
    %211 = arith.mulf %202, %170 : vector<8x128xf32>
    %212 = arith.addf %210, %211 : vector<8x128xf32>
    %cst_114 = arith.constant 0.000000e+00 : f32
    %213 = vector.broadcast %cst_114 : f32 to vector<8x128xf32>
    %214 = arith.maximumf %212, %213 : vector<8x128xf32>
    %c1_115 = arith.constant 1 : index
    %c0_116 = arith.constant 0 : index
    %c0_117 = arith.constant 0 : index
    %215 = vector.load %arg9[%c1_115, %c0_116, %c0_117] : memref<2x8x128xf32, #tpu.memory_space<vmem>>, vector<1x8x128xf32>
    %216 = vector.shape_cast %215 : vector<1x8x128xf32> to vector<8x128xf32>
    %217 = vector.shape_cast %214 : vector<8x128xf32> to vector<1x8x128xf32>
    tpu.vector_store %arg9[%c1_115, %c0_116, %c0_117], %217 {strides = array<i32>} : memref<2x8x128xf32, #tpu.memory_space<vmem>>, vector<1x8x128xf32>,
    %218 = arith.index_cast %c2_i32 : i32 to index
    %c0_118 = arith.constant 0 : index
    %c0_119 = arith.constant 0 : index
    %219 = vector.load %arg8[%218, %c0_118, %c0_119] : memref<8x8x128xf32, #tpu.memory_space<vmem>>, vector<1x8x128xf32>
    %220 = vector.shape_cast %219 : vector<1x8x128xf32> to vector<8x128xf32>
    %221 = vector.shape_cast %212 : vector<8x128xf32> to vector<1x8x128xf32>
    tpu.vector_store %arg8[%218, %c0_118, %c0_119], %221 {strides = array<i32>} : memref<8x8x128xf32, #tpu.memory_space<vmem>>, vector<1x8x128xf32>,
    %222 = arith.index_cast %c2_i32 : i32 to index
    %223 = memref.load %arg0[%222] : memref<8xi32, #tpu.memory_space<smem>>
    %c0_i32_120 = arith.constant 0 : i32
    %224 = arith.cmpi sgt, %223, %c0_i32_120 : i32
    %225 = arith.extui %224 : i1 to i32
    %c0_i32_121 = arith.constant 0 : i32
    %226 = arith.cmpi ne, %225, %c0_i32_121 : i32
    scf.if %226 {
      %c8_i32 = arith.constant 8 : i32
      %745 = arith.muli %c2_i32, %c8_i32 : i32
      %746 = tpu.assume_multiple %745, 8 : i32
      %747 = arith.index_cast %746 : i32 to index
      %c0_370 = arith.constant 0 : index
      %748 = vector.load %arg10[%747, %c0_370] : memref<64x384xf32, #tpu.memory_space<vmem>>, vector<8x384xf32>
      %c0_371 = arith.constant 0 : index
      %c0_372 = arith.constant 0 : index
      %749 = vector.load %arg11[%c0_371, %c0_372] : memref<8x384xf32, #tpu.memory_space<vmem>>, vector<8x384xf32>
      tpu.vector_store %arg11[%c0_371, %c0_372], %748 {strides = array<i32>} : memref<8x384xf32, #tpu.memory_space<vmem>>, vector<8x384xf32>,
    } else {
    }
    %true_122 = arith.constant true
    %227 = arith.xori %224, %true_122 : i1
    %228 = arith.extui %227 : i1 to i32
    %c0_i32_123 = arith.constant 0 : i32
    %229 = arith.cmpi ne, %228, %c0_i32_123 : i32
    scf.if %229 {
      %745 = arith.truncf %212 : vector<8x128xf32> to vector<8x128xbf16>
      %c0_370 = arith.constant 0 : index
      %c0_371 = arith.constant 0 : index
      %c0_372 = arith.constant 0 : index
      %746 = vector.load %arg4[%c0_370, %c0_371, %c0_372] : memref<2x128x384xbf16, #tpu.memory_space<vmem>>, vector<1x128x384xbf16>
      %747 = vector.shape_cast %746 : vector<1x128x384xbf16> to vector<128x384xbf16>
      %cst_373 = arith.constant dense<0.000000e+00> : vector<8x384xf32>
      %748 = tpu.matmul %745, %747, %cst_373 {dimension_numbers = #tpu.dot_dimension_numbers<[1], [0], [0], [1], [0, 0, 1, 1], [], []>} : vector<8x128xbf16>, vector<128x384xbf16>, vector<8x384xf32> -> vector<8x384xf32>
      %c0_374 = arith.constant 0 : index
      %c0_375 = arith.constant 0 : index
      %c0_376 = arith.constant 0 : index
      %749 = vector.load %arg6[%c0_374, %c0_375, %c0_376] : memref<2x1x384xf32, #tpu.memory_space<vmem>>, vector<1x1x384xf32>
      %750 = vector.shape_cast %749 : vector<1x1x384xf32> to vector<1x384xf32>
      %751 = vector.broadcast %750 : vector<1x384xf32> to vector<8x384xf32>
      %752 = arith.addf %748, %751 : vector<8x384xf32>
      %c0_377 = arith.constant 0 : index
      %c0_378 = arith.constant 0 : index
      %753 = vector.load %arg11[%c0_377, %c0_378] : memref<8x384xf32, #tpu.memory_space<vmem>>, vector<8x384xf32>
      tpu.vector_store %arg11[%c0_377, %c0_378], %752 {strides = array<i32>} : memref<8x384xf32, #tpu.memory_space<vmem>>, vector<8x384xf32>,
    } else {
    }
    %c3_i32 = arith.constant 3 : i32
    %c0_124 = arith.constant 0 : index
    %c0_125 = arith.constant 0 : index
    %c0_126 = arith.constant 0 : index
    %230 = vector.load %arg9[%c0_124, %c0_125, %c0_126] : memref<2x8x128xf32, #tpu.memory_space<vmem>>, vector<1x8x128xf32>
    %231 = vector.shape_cast %230 : vector<1x8x128xf32> to vector<8x128xf32>
    %232 = arith.truncf %231 : vector<8x128xf32> to vector<8x128xbf16>
    %c0_127 = arith.constant 0 : index
    %c0_128 = arith.constant 0 : index
    %c0_129 = arith.constant 0 : index
    %233 = vector.load %arg5[%c0_127, %c0_128, %c0_129] : memref<2x128x384xbf16, #tpu.memory_space<vmem>>, vector<1x128x384xbf16>
    %234 = vector.shape_cast %233 : vector<1x128x384xbf16> to vector<128x384xbf16>
    %cst_130 = arith.constant dense<0.000000e+00> : vector<8x384xf32>
    %235 = tpu.matmul %232, %234, %cst_130 {dimension_numbers = #tpu.dot_dimension_numbers<[1], [0], [0], [1], [0, 0, 1, 1], [], []>} : vector<8x128xbf16>, vector<128x384xbf16>, vector<8x384xf32> -> vector<8x384xf32>
    %c0_131 = arith.constant 0 : index
    %c0_132 = arith.constant 0 : index
    %c0_133 = arith.constant 0 : index
    %236 = vector.load %arg7[%c0_131, %c0_132, %c0_133] : memref<2x1x384xf32, #tpu.memory_space<vmem>>, vector<1x1x384xf32>
    %237 = vector.shape_cast %236 : vector<1x1x384xf32> to vector<1x384xf32>
    %238 = vector.broadcast %237 : vector<1x384xf32> to vector<8x384xf32>
    %239 = arith.addf %235, %238 : vector<8x384xf32>
    %c0_134 = arith.constant 0 : index
    %c0_135 = arith.constant 0 : index
    %240 = vector.load %arg11[%c0_134, %c0_135] : memref<8x384xf32, #tpu.memory_space<vmem>>, vector<8x384xf32>
    %241 = vector.extract_strided_slice %240 {offsets = [0, 0], sizes = [8, 128], strides = [1, 1]} : vector<8x384xf32> to vector<8x128xf32>
    %242 = vector.extract_strided_slice %239 {offsets = [0, 0], sizes = [8, 128], strides = [1, 1]} : vector<8x384xf32> to vector<8x128xf32>
    %243 = arith.addf %241, %242 : vector<8x128xf32>
    %244 = arith.negf %243 : vector<8x128xf32>
    %245 = math.exp %244 : vector<8x128xf32>
    %cst_136 = arith.constant 1.000000e+00 : f32
    %246 = vector.broadcast %cst_136 : f32 to vector<8x128xf32>
    %247 = arith.addf %246, %245 : vector<8x128xf32>
    %248 = arith.divf %246, %247 : vector<8x128xf32>
    %249 = vector.extract_strided_slice %240 {offsets = [0, 128], sizes = [8, 128], strides = [1, 1]} : vector<8x384xf32> to vector<8x128xf32>
    %250 = vector.extract_strided_slice %239 {offsets = [0, 128], sizes = [8, 128], strides = [1, 1]} : vector<8x384xf32> to vector<8x128xf32>
    %251 = arith.addf %249, %250 : vector<8x128xf32>
    %252 = arith.negf %251 : vector<8x128xf32>
    %253 = math.exp %252 : vector<8x128xf32>
    %cst_137 = arith.constant 1.000000e+00 : f32
    %254 = vector.broadcast %cst_137 : f32 to vector<8x128xf32>
    %255 = arith.addf %254, %253 : vector<8x128xf32>
    %256 = arith.divf %254, %255 : vector<8x128xf32>
    %257 = vector.extract_strided_slice %240 {offsets = [0, 256], sizes = [8, 128], strides = [1, 1]} : vector<8x384xf32> to vector<8x128xf32>
    %258 = vector.extract_strided_slice %239 {offsets = [0, 256], sizes = [8, 128], strides = [1, 1]} : vector<8x384xf32> to vector<8x128xf32>
    %259 = arith.mulf %248, %258 : vector<8x128xf32>
    %260 = arith.addf %257, %259 : vector<8x128xf32>
    %261 = math.tanh %260 : vector<8x128xf32>
    %cst_138 = arith.constant 1.000000e+00 : f32
    %262 = vector.broadcast %cst_138 : f32 to vector<8x128xf32>
    %263 = arith.subf %262, %256 : vector<8x128xf32>
    %264 = arith.mulf %263, %261 : vector<8x128xf32>
    %265 = arith.mulf %256, %231 : vector<8x128xf32>
    %266 = arith.addf %264, %265 : vector<8x128xf32>
    %cst_139 = arith.constant 0.000000e+00 : f32
    %267 = vector.broadcast %cst_139 : f32 to vector<8x128xf32>
    %268 = arith.maximumf %266, %267 : vector<8x128xf32>
    %c0_140 = arith.constant 0 : index
    %c0_141 = arith.constant 0 : index
    %c0_142 = arith.constant 0 : index
    %269 = vector.load %arg9[%c0_140, %c0_141, %c0_142] : memref<2x8x128xf32, #tpu.memory_space<vmem>>, vector<1x8x128xf32>
    %270 = vector.shape_cast %269 : vector<1x8x128xf32> to vector<8x128xf32>
    %271 = vector.shape_cast %268 : vector<8x128xf32> to vector<1x8x128xf32>
    tpu.vector_store %arg9[%c0_140, %c0_141, %c0_142], %271 {strides = array<i32>} : memref<2x8x128xf32, #tpu.memory_space<vmem>>, vector<1x8x128xf32>,
    %c1_143 = arith.constant 1 : index
    %c0_144 = arith.constant 0 : index
    %c0_145 = arith.constant 0 : index
    %272 = vector.load %arg9[%c1_143, %c0_144, %c0_145] : memref<2x8x128xf32, #tpu.memory_space<vmem>>, vector<1x8x128xf32>
    %273 = vector.shape_cast %272 : vector<1x8x128xf32> to vector<8x128xf32>
    %274 = arith.truncf %266 : vector<8x128xf32> to vector<8x128xbf16>
    %c1_146 = arith.constant 1 : index
    %c0_147 = arith.constant 0 : index
    %c0_148 = arith.constant 0 : index
    %275 = vector.load %arg4[%c1_146, %c0_147, %c0_148] : memref<2x128x384xbf16, #tpu.memory_space<vmem>>, vector<1x128x384xbf16>
    %276 = vector.shape_cast %275 : vector<1x128x384xbf16> to vector<128x384xbf16>
    %cst_149 = arith.constant dense<0.000000e+00> : vector<8x384xf32>
    %277 = tpu.matmul %274, %276, %cst_149 {dimension_numbers = #tpu.dot_dimension_numbers<[1], [0], [0], [1], [0, 0, 1, 1], [], []>} : vector<8x128xbf16>, vector<128x384xbf16>, vector<8x384xf32> -> vector<8x384xf32>
    %c1_150 = arith.constant 1 : index
    %c0_151 = arith.constant 0 : index
    %c0_152 = arith.constant 0 : index
    %278 = vector.load %arg6[%c1_150, %c0_151, %c0_152] : memref<2x1x384xf32, #tpu.memory_space<vmem>>, vector<1x1x384xf32>
    %279 = vector.shape_cast %278 : vector<1x1x384xf32> to vector<1x384xf32>
    %280 = vector.broadcast %279 : vector<1x384xf32> to vector<8x384xf32>
    %281 = arith.addf %277, %280 : vector<8x384xf32>
    %282 = arith.truncf %273 : vector<8x128xf32> to vector<8x128xbf16>
    %c1_153 = arith.constant 1 : index
    %c0_154 = arith.constant 0 : index
    %c0_155 = arith.constant 0 : index
    %283 = vector.load %arg5[%c1_153, %c0_154, %c0_155] : memref<2x128x384xbf16, #tpu.memory_space<vmem>>, vector<1x128x384xbf16>
    %284 = vector.shape_cast %283 : vector<1x128x384xbf16> to vector<128x384xbf16>
    %cst_156 = arith.constant dense<0.000000e+00> : vector<8x384xf32>
    %285 = tpu.matmul %282, %284, %cst_156 {dimension_numbers = #tpu.dot_dimension_numbers<[1], [0], [0], [1], [0, 0, 1, 1], [], []>} : vector<8x128xbf16>, vector<128x384xbf16>, vector<8x384xf32> -> vector<8x384xf32>
    %c1_157 = arith.constant 1 : index
    %c0_158 = arith.constant 0 : index
    %c0_159 = arith.constant 0 : index
    %286 = vector.load %arg7[%c1_157, %c0_158, %c0_159] : memref<2x1x384xf32, #tpu.memory_space<vmem>>, vector<1x1x384xf32>
    %287 = vector.shape_cast %286 : vector<1x1x384xf32> to vector<1x384xf32>
    %288 = vector.broadcast %287 : vector<1x384xf32> to vector<8x384xf32>
    %289 = arith.addf %285, %288 : vector<8x384xf32>
    %290 = vector.extract_strided_slice %281 {offsets = [0, 0], sizes = [8, 128], strides = [1, 1]} : vector<8x384xf32> to vector<8x128xf32>
    %291 = vector.extract_strided_slice %289 {offsets = [0, 0], sizes = [8, 128], strides = [1, 1]} : vector<8x384xf32> to vector<8x128xf32>
    %292 = arith.addf %290, %291 : vector<8x128xf32>
    %293 = arith.negf %292 : vector<8x128xf32>
    %294 = math.exp %293 : vector<8x128xf32>
    %cst_160 = arith.constant 1.000000e+00 : f32
    %295 = vector.broadcast %cst_160 : f32 to vector<8x128xf32>
    %296 = arith.addf %295, %294 : vector<8x128xf32>
    %297 = arith.divf %295, %296 : vector<8x128xf32>
    %298 = vector.extract_strided_slice %281 {offsets = [0, 128], sizes = [8, 128], strides = [1, 1]} : vector<8x384xf32> to vector<8x128xf32>
    %299 = vector.extract_strided_slice %289 {offsets = [0, 128], sizes = [8, 128], strides = [1, 1]} : vector<8x384xf32> to vector<8x128xf32>
    %300 = arith.addf %298, %299 : vector<8x128xf32>
    %301 = arith.negf %300 : vector<8x128xf32>
    %302 = math.exp %301 : vector<8x128xf32>
    %cst_161 = arith.constant 1.000000e+00 : f32
    %303 = vector.broadcast %cst_161 : f32 to vector<8x128xf32>
    %304 = arith.addf %303, %302 : vector<8x128xf32>
    %305 = arith.divf %303, %304 : vector<8x128xf32>
    %306 = vector.extract_strided_slice %281 {offsets = [0, 256], sizes = [8, 128], strides = [1, 1]} : vector<8x384xf32> to vector<8x128xf32>
    %307 = vector.extract_strided_slice %289 {offsets = [0, 256], sizes = [8, 128], strides = [1, 1]} : vector<8x384xf32> to vector<8x128xf32>
    %308 = arith.mulf %297, %307 : vector<8x128xf32>
    %309 = arith.addf %306, %308 : vector<8x128xf32>
    %310 = math.tanh %309 : vector<8x128xf32>
    %cst_162 = arith.constant 1.000000e+00 : f32
    %311 = vector.broadcast %cst_162 : f32 to vector<8x128xf32>
    %312 = arith.subf %311, %305 : vector<8x128xf32>
    %313 = arith.mulf %312, %310 : vector<8x128xf32>
    %314 = arith.mulf %305, %273 : vector<8x128xf32>
    %315 = arith.addf %313, %314 : vector<8x128xf32>
    %cst_163 = arith.constant 0.000000e+00 : f32
    %316 = vector.broadcast %cst_163 : f32 to vector<8x128xf32>
    %317 = arith.maximumf %315, %316 : vector<8x128xf32>
    %c1_164 = arith.constant 1 : index
    %c0_165 = arith.constant 0 : index
    %c0_166 = arith.constant 0 : index
    %318 = vector.load %arg9[%c1_164, %c0_165, %c0_166] : memref<2x8x128xf32, #tpu.memory_space<vmem>>, vector<1x8x128xf32>
    %319 = vector.shape_cast %318 : vector<1x8x128xf32> to vector<8x128xf32>
    %320 = vector.shape_cast %317 : vector<8x128xf32> to vector<1x8x128xf32>
    tpu.vector_store %arg9[%c1_164, %c0_165, %c0_166], %320 {strides = array<i32>} : memref<2x8x128xf32, #tpu.memory_space<vmem>>, vector<1x8x128xf32>,
    %321 = arith.index_cast %c3_i32 : i32 to index
    %c0_167 = arith.constant 0 : index
    %c0_168 = arith.constant 0 : index
    %322 = vector.load %arg8[%321, %c0_167, %c0_168] : memref<8x8x128xf32, #tpu.memory_space<vmem>>, vector<1x8x128xf32>
    %323 = vector.shape_cast %322 : vector<1x8x128xf32> to vector<8x128xf32>
    %324 = vector.shape_cast %315 : vector<8x128xf32> to vector<1x8x128xf32>
    tpu.vector_store %arg8[%321, %c0_167, %c0_168], %324 {strides = array<i32>} : memref<8x8x128xf32, #tpu.memory_space<vmem>>, vector<1x8x128xf32>,
    %325 = arith.index_cast %c3_i32 : i32 to index
    %326 = memref.load %arg0[%325] : memref<8xi32, #tpu.memory_space<smem>>
    %c0_i32_169 = arith.constant 0 : i32
    %327 = arith.cmpi sgt, %326, %c0_i32_169 : i32
    %328 = arith.extui %327 : i1 to i32
    %c0_i32_170 = arith.constant 0 : i32
    %329 = arith.cmpi ne, %328, %c0_i32_170 : i32
    scf.if %329 {
      %c8_i32 = arith.constant 8 : i32
      %745 = arith.muli %c3_i32, %c8_i32 : i32
      %746 = tpu.assume_multiple %745, 8 : i32
      %747 = arith.index_cast %746 : i32 to index
      %c0_370 = arith.constant 0 : index
      %748 = vector.load %arg10[%747, %c0_370] : memref<64x384xf32, #tpu.memory_space<vmem>>, vector<8x384xf32>
      %c0_371 = arith.constant 0 : index
      %c0_372 = arith.constant 0 : index
      %749 = vector.load %arg11[%c0_371, %c0_372] : memref<8x384xf32, #tpu.memory_space<vmem>>, vector<8x384xf32>
      tpu.vector_store %arg11[%c0_371, %c0_372], %748 {strides = array<i32>} : memref<8x384xf32, #tpu.memory_space<vmem>>, vector<8x384xf32>,
    } else {
    }
    %true_171 = arith.constant true
    %330 = arith.xori %327, %true_171 : i1
    %331 = arith.extui %330 : i1 to i32
    %c0_i32_172 = arith.constant 0 : i32
    %332 = arith.cmpi ne, %331, %c0_i32_172 : i32
    scf.if %332 {
      %745 = arith.truncf %315 : vector<8x128xf32> to vector<8x128xbf16>
      %c0_370 = arith.constant 0 : index
      %c0_371 = arith.constant 0 : index
      %c0_372 = arith.constant 0 : index
      %746 = vector.load %arg4[%c0_370, %c0_371, %c0_372] : memref<2x128x384xbf16, #tpu.memory_space<vmem>>, vector<1x128x384xbf16>
      %747 = vector.shape_cast %746 : vector<1x128x384xbf16> to vector<128x384xbf16>
      %cst_373 = arith.constant dense<0.000000e+00> : vector<8x384xf32>
      %748 = tpu.matmul %745, %747, %cst_373 {dimension_numbers = #tpu.dot_dimension_numbers<[1], [0], [0], [1], [0, 0, 1, 1], [], []>} : vector<8x128xbf16>, vector<128x384xbf16>, vector<8x384xf32> -> vector<8x384xf32>
      %c0_374 = arith.constant 0 : index
      %c0_375 = arith.constant 0 : index
      %c0_376 = arith.constant 0 : index
      %749 = vector.load %arg6[%c0_374, %c0_375, %c0_376] : memref<2x1x384xf32, #tpu.memory_space<vmem>>, vector<1x1x384xf32>
      %750 = vector.shape_cast %749 : vector<1x1x384xf32> to vector<1x384xf32>
      %751 = vector.broadcast %750 : vector<1x384xf32> to vector<8x384xf32>
      %752 = arith.addf %748, %751 : vector<8x384xf32>
      %c0_377 = arith.constant 0 : index
      %c0_378 = arith.constant 0 : index
      %753 = vector.load %arg11[%c0_377, %c0_378] : memref<8x384xf32, #tpu.memory_space<vmem>>, vector<8x384xf32>
      tpu.vector_store %arg11[%c0_377, %c0_378], %752 {strides = array<i32>} : memref<8x384xf32, #tpu.memory_space<vmem>>, vector<8x384xf32>,
    } else {
    }
    %c4_i32 = arith.constant 4 : i32
    %c0_173 = arith.constant 0 : index
    %c0_174 = arith.constant 0 : index
    %c0_175 = arith.constant 0 : index
    %333 = vector.load %arg9[%c0_173, %c0_174, %c0_175] : memref<2x8x128xf32, #tpu.memory_space<vmem>>, vector<1x8x128xf32>
    %334 = vector.shape_cast %333 : vector<1x8x128xf32> to vector<8x128xf32>
    %335 = arith.truncf %334 : vector<8x128xf32> to vector<8x128xbf16>
    %c0_176 = arith.constant 0 : index
    %c0_177 = arith.constant 0 : index
    %c0_178 = arith.constant 0 : index
    %336 = vector.load %arg5[%c0_176, %c0_177, %c0_178] : memref<2x128x384xbf16, #tpu.memory_space<vmem>>, vector<1x128x384xbf16>
    %337 = vector.shape_cast %336 : vector<1x128x384xbf16> to vector<128x384xbf16>
    %cst_179 = arith.constant dense<0.000000e+00> : vector<8x384xf32>
    %338 = tpu.matmul %335, %337, %cst_179 {dimension_numbers = #tpu.dot_dimension_numbers<[1], [0], [0], [1], [0, 0, 1, 1], [], []>} : vector<8x128xbf16>, vector<128x384xbf16>, vector<8x384xf32> -> vector<8x384xf32>
    %c0_180 = arith.constant 0 : index
    %c0_181 = arith.constant 0 : index
    %c0_182 = arith.constant 0 : index
    %339 = vector.load %arg7[%c0_180, %c0_181, %c0_182] : memref<2x1x384xf32, #tpu.memory_space<vmem>>, vector<1x1x384xf32>
    %340 = vector.shape_cast %339 : vector<1x1x384xf32> to vector<1x384xf32>
    %341 = vector.broadcast %340 : vector<1x384xf32> to vector<8x384xf32>
    %342 = arith.addf %338, %341 : vector<8x384xf32>
    %c0_183 = arith.constant 0 : index
    %c0_184 = arith.constant 0 : index
    %343 = vector.load %arg11[%c0_183, %c0_184] : memref<8x384xf32, #tpu.memory_space<vmem>>, vector<8x384xf32>
    %344 = vector.extract_strided_slice %343 {offsets = [0, 0], sizes = [8, 128], strides = [1, 1]} : vector<8x384xf32> to vector<8x128xf32>
    %345 = vector.extract_strided_slice %342 {offsets = [0, 0], sizes = [8, 128], strides = [1, 1]} : vector<8x384xf32> to vector<8x128xf32>
    %346 = arith.addf %344, %345 : vector<8x128xf32>
    %347 = arith.negf %346 : vector<8x128xf32>
    %348 = math.exp %347 : vector<8x128xf32>
    %cst_185 = arith.constant 1.000000e+00 : f32
    %349 = vector.broadcast %cst_185 : f32 to vector<8x128xf32>
    %350 = arith.addf %349, %348 : vector<8x128xf32>
    %351 = arith.divf %349, %350 : vector<8x128xf32>
    %352 = vector.extract_strided_slice %343 {offsets = [0, 128], sizes = [8, 128], strides = [1, 1]} : vector<8x384xf32> to vector<8x128xf32>
    %353 = vector.extract_strided_slice %342 {offsets = [0, 128], sizes = [8, 128], strides = [1, 1]} : vector<8x384xf32> to vector<8x128xf32>
    %354 = arith.addf %352, %353 : vector<8x128xf32>
    %355 = arith.negf %354 : vector<8x128xf32>
    %356 = math.exp %355 : vector<8x128xf32>
    %cst_186 = arith.constant 1.000000e+00 : f32
    %357 = vector.broadcast %cst_186 : f32 to vector<8x128xf32>
    %358 = arith.addf %357, %356 : vector<8x128xf32>
    %359 = arith.divf %357, %358 : vector<8x128xf32>
    %360 = vector.extract_strided_slice %343 {offsets = [0, 256], sizes = [8, 128], strides = [1, 1]} : vector<8x384xf32> to vector<8x128xf32>
    %361 = vector.extract_strided_slice %342 {offsets = [0, 256], sizes = [8, 128], strides = [1, 1]} : vector<8x384xf32> to vector<8x128xf32>
    %362 = arith.mulf %351, %361 : vector<8x128xf32>
    %363 = arith.addf %360, %362 : vector<8x128xf32>
    %364 = math.tanh %363 : vector<8x128xf32>
    %cst_187 = arith.constant 1.000000e+00 : f32
    %365 = vector.broadcast %cst_187 : f32 to vector<8x128xf32>
    %366 = arith.subf %365, %359 : vector<8x128xf32>
    %367 = arith.mulf %366, %364 : vector<8x128xf32>
    %368 = arith.mulf %359, %334 : vector<8x128xf32>
    %369 = arith.addf %367, %368 : vector<8x128xf32>
    %cst_188 = arith.constant 0.000000e+00 : f32
    %370 = vector.broadcast %cst_188 : f32 to vector<8x128xf32>
    %371 = arith.maximumf %369, %370 : vector<8x128xf32>
    %c0_189 = arith.constant 0 : index
    %c0_190 = arith.constant 0 : index
    %c0_191 = arith.constant 0 : index
    %372 = vector.load %arg9[%c0_189, %c0_190, %c0_191] : memref<2x8x128xf32, #tpu.memory_space<vmem>>, vector<1x8x128xf32>
    %373 = vector.shape_cast %372 : vector<1x8x128xf32> to vector<8x128xf32>
    %374 = vector.shape_cast %371 : vector<8x128xf32> to vector<1x8x128xf32>
    tpu.vector_store %arg9[%c0_189, %c0_190, %c0_191], %374 {strides = array<i32>} : memref<2x8x128xf32, #tpu.memory_space<vmem>>, vector<1x8x128xf32>,
    %c1_192 = arith.constant 1 : index
    %c0_193 = arith.constant 0 : index
    %c0_194 = arith.constant 0 : index
    %375 = vector.load %arg9[%c1_192, %c0_193, %c0_194] : memref<2x8x128xf32, #tpu.memory_space<vmem>>, vector<1x8x128xf32>
    %376 = vector.shape_cast %375 : vector<1x8x128xf32> to vector<8x128xf32>
    %377 = arith.truncf %369 : vector<8x128xf32> to vector<8x128xbf16>
    %c1_195 = arith.constant 1 : index
    %c0_196 = arith.constant 0 : index
    %c0_197 = arith.constant 0 : index
    %378 = vector.load %arg4[%c1_195, %c0_196, %c0_197] : memref<2x128x384xbf16, #tpu.memory_space<vmem>>, vector<1x128x384xbf16>
    %379 = vector.shape_cast %378 : vector<1x128x384xbf16> to vector<128x384xbf16>
    %cst_198 = arith.constant dense<0.000000e+00> : vector<8x384xf32>
    %380 = tpu.matmul %377, %379, %cst_198 {dimension_numbers = #tpu.dot_dimension_numbers<[1], [0], [0], [1], [0, 0, 1, 1], [], []>} : vector<8x128xbf16>, vector<128x384xbf16>, vector<8x384xf32> -> vector<8x384xf32>
    %c1_199 = arith.constant 1 : index
    %c0_200 = arith.constant 0 : index
    %c0_201 = arith.constant 0 : index
    %381 = vector.load %arg6[%c1_199, %c0_200, %c0_201] : memref<2x1x384xf32, #tpu.memory_space<vmem>>, vector<1x1x384xf32>
    %382 = vector.shape_cast %381 : vector<1x1x384xf32> to vector<1x384xf32>
    %383 = vector.broadcast %382 : vector<1x384xf32> to vector<8x384xf32>
    %384 = arith.addf %380, %383 : vector<8x384xf32>
    %385 = arith.truncf %376 : vector<8x128xf32> to vector<8x128xbf16>
    %c1_202 = arith.constant 1 : index
    %c0_203 = arith.constant 0 : index
    %c0_204 = arith.constant 0 : index
    %386 = vector.load %arg5[%c1_202, %c0_203, %c0_204] : memref<2x128x384xbf16, #tpu.memory_space<vmem>>, vector<1x128x384xbf16>
    %387 = vector.shape_cast %386 : vector<1x128x384xbf16> to vector<128x384xbf16>
    %cst_205 = arith.constant dense<0.000000e+00> : vector<8x384xf32>
    %388 = tpu.matmul %385, %387, %cst_205 {dimension_numbers = #tpu.dot_dimension_numbers<[1], [0], [0], [1], [0, 0, 1, 1], [], []>} : vector<8x128xbf16>, vector<128x384xbf16>, vector<8x384xf32> -> vector<8x384xf32>
    %c1_206 = arith.constant 1 : index
    %c0_207 = arith.constant 0 : index
    %c0_208 = arith.constant 0 : index
    %389 = vector.load %arg7[%c1_206, %c0_207, %c0_208] : memref<2x1x384xf32, #tpu.memory_space<vmem>>, vector<1x1x384xf32>
    %390 = vector.shape_cast %389 : vector<1x1x384xf32> to vector<1x384xf32>
    %391 = vector.broadcast %390 : vector<1x384xf32> to vector<8x384xf32>
    %392 = arith.addf %388, %391 : vector<8x384xf32>
    %393 = vector.extract_strided_slice %384 {offsets = [0, 0], sizes = [8, 128], strides = [1, 1]} : vector<8x384xf32> to vector<8x128xf32>
    %394 = vector.extract_strided_slice %392 {offsets = [0, 0], sizes = [8, 128], strides = [1, 1]} : vector<8x384xf32> to vector<8x128xf32>
    %395 = arith.addf %393, %394 : vector<8x128xf32>
    %396 = arith.negf %395 : vector<8x128xf32>
    %397 = math.exp %396 : vector<8x128xf32>
    %cst_209 = arith.constant 1.000000e+00 : f32
    %398 = vector.broadcast %cst_209 : f32 to vector<8x128xf32>
    %399 = arith.addf %398, %397 : vector<8x128xf32>
    %400 = arith.divf %398, %399 : vector<8x128xf32>
    %401 = vector.extract_strided_slice %384 {offsets = [0, 128], sizes = [8, 128], strides = [1, 1]} : vector<8x384xf32> to vector<8x128xf32>
    %402 = vector.extract_strided_slice %392 {offsets = [0, 128], sizes = [8, 128], strides = [1, 1]} : vector<8x384xf32> to vector<8x128xf32>
    %403 = arith.addf %401, %402 : vector<8x128xf32>
    %404 = arith.negf %403 : vector<8x128xf32>
    %405 = math.exp %404 : vector<8x128xf32>
    %cst_210 = arith.constant 1.000000e+00 : f32
    %406 = vector.broadcast %cst_210 : f32 to vector<8x128xf32>
    %407 = arith.addf %406, %405 : vector<8x128xf32>
    %408 = arith.divf %406, %407 : vector<8x128xf32>
    %409 = vector.extract_strided_slice %384 {offsets = [0, 256], sizes = [8, 128], strides = [1, 1]} : vector<8x384xf32> to vector<8x128xf32>
    %410 = vector.extract_strided_slice %392 {offsets = [0, 256], sizes = [8, 128], strides = [1, 1]} : vector<8x384xf32> to vector<8x128xf32>
    %411 = arith.mulf %400, %410 : vector<8x128xf32>
    %412 = arith.addf %409, %411 : vector<8x128xf32>
    %413 = math.tanh %412 : vector<8x128xf32>
    %cst_211 = arith.constant 1.000000e+00 : f32
    %414 = vector.broadcast %cst_211 : f32 to vector<8x128xf32>
    %415 = arith.subf %414, %408 : vector<8x128xf32>
    %416 = arith.mulf %415, %413 : vector<8x128xf32>
    %417 = arith.mulf %408, %376 : vector<8x128xf32>
    %418 = arith.addf %416, %417 : vector<8x128xf32>
    %cst_212 = arith.constant 0.000000e+00 : f32
    %419 = vector.broadcast %cst_212 : f32 to vector<8x128xf32>
    %420 = arith.maximumf %418, %419 : vector<8x128xf32>
    %c1_213 = arith.constant 1 : index
    %c0_214 = arith.constant 0 : index
    %c0_215 = arith.constant 0 : index
    %421 = vector.load %arg9[%c1_213, %c0_214, %c0_215] : memref<2x8x128xf32, #tpu.memory_space<vmem>>, vector<1x8x128xf32>
    %422 = vector.shape_cast %421 : vector<1x8x128xf32> to vector<8x128xf32>
    %423 = vector.shape_cast %420 : vector<8x128xf32> to vector<1x8x128xf32>
    tpu.vector_store %arg9[%c1_213, %c0_214, %c0_215], %423 {strides = array<i32>} : memref<2x8x128xf32, #tpu.memory_space<vmem>>, vector<1x8x128xf32>,
    %424 = arith.index_cast %c4_i32 : i32 to index
    %c0_216 = arith.constant 0 : index
    %c0_217 = arith.constant 0 : index
    %425 = vector.load %arg8[%424, %c0_216, %c0_217] : memref<8x8x128xf32, #tpu.memory_space<vmem>>, vector<1x8x128xf32>
    %426 = vector.shape_cast %425 : vector<1x8x128xf32> to vector<8x128xf32>
    %427 = vector.shape_cast %418 : vector<8x128xf32> to vector<1x8x128xf32>
    tpu.vector_store %arg8[%424, %c0_216, %c0_217], %427 {strides = array<i32>} : memref<8x8x128xf32, #tpu.memory_space<vmem>>, vector<1x8x128xf32>,
    %428 = arith.index_cast %c4_i32 : i32 to index
    %429 = memref.load %arg0[%428] : memref<8xi32, #tpu.memory_space<smem>>
    %c0_i32_218 = arith.constant 0 : i32
    %430 = arith.cmpi sgt, %429, %c0_i32_218 : i32
    %431 = arith.extui %430 : i1 to i32
    %c0_i32_219 = arith.constant 0 : i32
    %432 = arith.cmpi ne, %431, %c0_i32_219 : i32
    scf.if %432 {
      %c8_i32 = arith.constant 8 : i32
      %745 = arith.muli %c4_i32, %c8_i32 : i32
      %746 = tpu.assume_multiple %745, 8 : i32
      %747 = arith.index_cast %746 : i32 to index
      %c0_370 = arith.constant 0 : index
      %748 = vector.load %arg10[%747, %c0_370] : memref<64x384xf32, #tpu.memory_space<vmem>>, vector<8x384xf32>
      %c0_371 = arith.constant 0 : index
      %c0_372 = arith.constant 0 : index
      %749 = vector.load %arg11[%c0_371, %c0_372] : memref<8x384xf32, #tpu.memory_space<vmem>>, vector<8x384xf32>
      tpu.vector_store %arg11[%c0_371, %c0_372], %748 {strides = array<i32>} : memref<8x384xf32, #tpu.memory_space<vmem>>, vector<8x384xf32>,
    } else {
    }
    %true_220 = arith.constant true
    %433 = arith.xori %430, %true_220 : i1
    %434 = arith.extui %433 : i1 to i32
    %c0_i32_221 = arith.constant 0 : i32
    %435 = arith.cmpi ne, %434, %c0_i32_221 : i32
    scf.if %435 {
      %745 = arith.truncf %418 : vector<8x128xf32> to vector<8x128xbf16>
      %c0_370 = arith.constant 0 : index
      %c0_371 = arith.constant 0 : index
      %c0_372 = arith.constant 0 : index
      %746 = vector.load %arg4[%c0_370, %c0_371, %c0_372] : memref<2x128x384xbf16, #tpu.memory_space<vmem>>, vector<1x128x384xbf16>
      %747 = vector.shape_cast %746 : vector<1x128x384xbf16> to vector<128x384xbf16>
      %cst_373 = arith.constant dense<0.000000e+00> : vector<8x384xf32>
      %748 = tpu.matmul %745, %747, %cst_373 {dimension_numbers = #tpu.dot_dimension_numbers<[1], [0], [0], [1], [0, 0, 1, 1], [], []>} : vector<8x128xbf16>, vector<128x384xbf16>, vector<8x384xf32> -> vector<8x384xf32>
      %c0_374 = arith.constant 0 : index
      %c0_375 = arith.constant 0 : index
      %c0_376 = arith.constant 0 : index
      %749 = vector.load %arg6[%c0_374, %c0_375, %c0_376] : memref<2x1x384xf32, #tpu.memory_space<vmem>>, vector<1x1x384xf32>
      %750 = vector.shape_cast %749 : vector<1x1x384xf32> to vector<1x384xf32>
      %751 = vector.broadcast %750 : vector<1x384xf32> to vector<8x384xf32>
      %752 = arith.addf %748, %751 : vector<8x384xf32>
      %c0_377 = arith.constant 0 : index
      %c0_378 = arith.constant 0 : index
      %753 = vector.load %arg11[%c0_377, %c0_378] : memref<8x384xf32, #tpu.memory_space<vmem>>, vector<8x384xf32>
      tpu.vector_store %arg11[%c0_377, %c0_378], %752 {strides = array<i32>} : memref<8x384xf32, #tpu.memory_space<vmem>>, vector<8x384xf32>,
    } else {
    }
    %c5_i32 = arith.constant 5 : i32
    %c0_222 = arith.constant 0 : index
    %c0_223 = arith.constant 0 : index
    %c0_224 = arith.constant 0 : index
    %436 = vector.load %arg9[%c0_222, %c0_223, %c0_224] : memref<2x8x128xf32, #tpu.memory_space<vmem>>, vector<1x8x128xf32>
    %437 = vector.shape_cast %436 : vector<1x8x128xf32> to vector<8x128xf32>
    %438 = arith.truncf %437 : vector<8x128xf32> to vector<8x128xbf16>
    %c0_225 = arith.constant 0 : index
    %c0_226 = arith.constant 0 : index
    %c0_227 = arith.constant 0 : index
    %439 = vector.load %arg5[%c0_225, %c0_226, %c0_227] : memref<2x128x384xbf16, #tpu.memory_space<vmem>>, vector<1x128x384xbf16>
    %440 = vector.shape_cast %439 : vector<1x128x384xbf16> to vector<128x384xbf16>
    %cst_228 = arith.constant dense<0.000000e+00> : vector<8x384xf32>
    %441 = tpu.matmul %438, %440, %cst_228 {dimension_numbers = #tpu.dot_dimension_numbers<[1], [0], [0], [1], [0, 0, 1, 1], [], []>} : vector<8x128xbf16>, vector<128x384xbf16>, vector<8x384xf32> -> vector<8x384xf32>
    %c0_229 = arith.constant 0 : index
    %c0_230 = arith.constant 0 : index
    %c0_231 = arith.constant 0 : index
    %442 = vector.load %arg7[%c0_229, %c0_230, %c0_231] : memref<2x1x384xf32, #tpu.memory_space<vmem>>, vector<1x1x384xf32>
    %443 = vector.shape_cast %442 : vector<1x1x384xf32> to vector<1x384xf32>
    %444 = vector.broadcast %443 : vector<1x384xf32> to vector<8x384xf32>
    %445 = arith.addf %441, %444 : vector<8x384xf32>
    %c0_232 = arith.constant 0 : index
    %c0_233 = arith.constant 0 : index
    %446 = vector.load %arg11[%c0_232, %c0_233] : memref<8x384xf32, #tpu.memory_space<vmem>>, vector<8x384xf32>
    %447 = vector.extract_strided_slice %446 {offsets = [0, 0], sizes = [8, 128], strides = [1, 1]} : vector<8x384xf32> to vector<8x128xf32>
    %448 = vector.extract_strided_slice %445 {offsets = [0, 0], sizes = [8, 128], strides = [1, 1]} : vector<8x384xf32> to vector<8x128xf32>
    %449 = arith.addf %447, %448 : vector<8x128xf32>
    %450 = arith.negf %449 : vector<8x128xf32>
    %451 = math.exp %450 : vector<8x128xf32>
    %cst_234 = arith.constant 1.000000e+00 : f32
    %452 = vector.broadcast %cst_234 : f32 to vector<8x128xf32>
    %453 = arith.addf %452, %451 : vector<8x128xf32>
    %454 = arith.divf %452, %453 : vector<8x128xf32>
    %455 = vector.extract_strided_slice %446 {offsets = [0, 128], sizes = [8, 128], strides = [1, 1]} : vector<8x384xf32> to vector<8x128xf32>
    %456 = vector.extract_strided_slice %445 {offsets = [0, 128], sizes = [8, 128], strides = [1, 1]} : vector<8x384xf32> to vector<8x128xf32>
    %457 = arith.addf %455, %456 : vector<8x128xf32>
    %458 = arith.negf %457 : vector<8x128xf32>
    %459 = math.exp %458 : vector<8x128xf32>
    %cst_235 = arith.constant 1.000000e+00 : f32
    %460 = vector.broadcast %cst_235 : f32 to vector<8x128xf32>
    %461 = arith.addf %460, %459 : vector<8x128xf32>
    %462 = arith.divf %460, %461 : vector<8x128xf32>
    %463 = vector.extract_strided_slice %446 {offsets = [0, 256], sizes = [8, 128], strides = [1, 1]} : vector<8x384xf32> to vector<8x128xf32>
    %464 = vector.extract_strided_slice %445 {offsets = [0, 256], sizes = [8, 128], strides = [1, 1]} : vector<8x384xf32> to vector<8x128xf32>
    %465 = arith.mulf %454, %464 : vector<8x128xf32>
    %466 = arith.addf %463, %465 : vector<8x128xf32>
    %467 = math.tanh %466 : vector<8x128xf32>
    %cst_236 = arith.constant 1.000000e+00 : f32
    %468 = vector.broadcast %cst_236 : f32 to vector<8x128xf32>
    %469 = arith.subf %468, %462 : vector<8x128xf32>
    %470 = arith.mulf %469, %467 : vector<8x128xf32>
    %471 = arith.mulf %462, %437 : vector<8x128xf32>
    %472 = arith.addf %470, %471 : vector<8x128xf32>
    %cst_237 = arith.constant 0.000000e+00 : f32
    %473 = vector.broadcast %cst_237 : f32 to vector<8x128xf32>
    %474 = arith.maximumf %472, %473 : vector<8x128xf32>
    %c0_238 = arith.constant 0 : index
    %c0_239 = arith.constant 0 : index
    %c0_240 = arith.constant 0 : index
    %475 = vector.load %arg9[%c0_238, %c0_239, %c0_240] : memref<2x8x128xf32, #tpu.memory_space<vmem>>, vector<1x8x128xf32>
    %476 = vector.shape_cast %475 : vector<1x8x128xf32> to vector<8x128xf32>
    %477 = vector.shape_cast %474 : vector<8x128xf32> to vector<1x8x128xf32>
    tpu.vector_store %arg9[%c0_238, %c0_239, %c0_240], %477 {strides = array<i32>} : memref<2x8x128xf32, #tpu.memory_space<vmem>>, vector<1x8x128xf32>,
    %c1_241 = arith.constant 1 : index
    %c0_242 = arith.constant 0 : index
    %c0_243 = arith.constant 0 : index
    %478 = vector.load %arg9[%c1_241, %c0_242, %c0_243] : memref<2x8x128xf32, #tpu.memory_space<vmem>>, vector<1x8x128xf32>
    %479 = vector.shape_cast %478 : vector<1x8x128xf32> to vector<8x128xf32>
    %480 = arith.truncf %472 : vector<8x128xf32> to vector<8x128xbf16>
    %c1_244 = arith.constant 1 : index
    %c0_245 = arith.constant 0 : index
    %c0_246 = arith.constant 0 : index
    %481 = vector.load %arg4[%c1_244, %c0_245, %c0_246] : memref<2x128x384xbf16, #tpu.memory_space<vmem>>, vector<1x128x384xbf16>
    %482 = vector.shape_cast %481 : vector<1x128x384xbf16> to vector<128x384xbf16>
    %cst_247 = arith.constant dense<0.000000e+00> : vector<8x384xf32>
    %483 = tpu.matmul %480, %482, %cst_247 {dimension_numbers = #tpu.dot_dimension_numbers<[1], [0], [0], [1], [0, 0, 1, 1], [], []>} : vector<8x128xbf16>, vector<128x384xbf16>, vector<8x384xf32> -> vector<8x384xf32>
    %c1_248 = arith.constant 1 : index
    %c0_249 = arith.constant 0 : index
    %c0_250 = arith.constant 0 : index
    %484 = vector.load %arg6[%c1_248, %c0_249, %c0_250] : memref<2x1x384xf32, #tpu.memory_space<vmem>>, vector<1x1x384xf32>
    %485 = vector.shape_cast %484 : vector<1x1x384xf32> to vector<1x384xf32>
    %486 = vector.broadcast %485 : vector<1x384xf32> to vector<8x384xf32>
    %487 = arith.addf %483, %486 : vector<8x384xf32>
    %488 = arith.truncf %479 : vector<8x128xf32> to vector<8x128xbf16>
    %c1_251 = arith.constant 1 : index
    %c0_252 = arith.constant 0 : index
    %c0_253 = arith.constant 0 : index
    %489 = vector.load %arg5[%c1_251, %c0_252, %c0_253] : memref<2x128x384xbf16, #tpu.memory_space<vmem>>, vector<1x128x384xbf16>
    %490 = vector.shape_cast %489 : vector<1x128x384xbf16> to vector<128x384xbf16>
    %cst_254 = arith.constant dense<0.000000e+00> : vector<8x384xf32>
    %491 = tpu.matmul %488, %490, %cst_254 {dimension_numbers = #tpu.dot_dimension_numbers<[1], [0], [0], [1], [0, 0, 1, 1], [], []>} : vector<8x128xbf16>, vector<128x384xbf16>, vector<8x384xf32> -> vector<8x384xf32>
    %c1_255 = arith.constant 1 : index
    %c0_256 = arith.constant 0 : index
    %c0_257 = arith.constant 0 : index
    %492 = vector.load %arg7[%c1_255, %c0_256, %c0_257] : memref<2x1x384xf32, #tpu.memory_space<vmem>>, vector<1x1x384xf32>
    %493 = vector.shape_cast %492 : vector<1x1x384xf32> to vector<1x384xf32>
    %494 = vector.broadcast %493 : vector<1x384xf32> to vector<8x384xf32>
    %495 = arith.addf %491, %494 : vector<8x384xf32>
    %496 = vector.extract_strided_slice %487 {offsets = [0, 0], sizes = [8, 128], strides = [1, 1]} : vector<8x384xf32> to vector<8x128xf32>
    %497 = vector.extract_strided_slice %495 {offsets = [0, 0], sizes = [8, 128], strides = [1, 1]} : vector<8x384xf32> to vector<8x128xf32>
    %498 = arith.addf %496, %497 : vector<8x128xf32>
    %499 = arith.negf %498 : vector<8x128xf32>
    %500 = math.exp %499 : vector<8x128xf32>
    %cst_258 = arith.constant 1.000000e+00 : f32
    %501 = vector.broadcast %cst_258 : f32 to vector<8x128xf32>
    %502 = arith.addf %501, %500 : vector<8x128xf32>
    %503 = arith.divf %501, %502 : vector<8x128xf32>
    %504 = vector.extract_strided_slice %487 {offsets = [0, 128], sizes = [8, 128], strides = [1, 1]} : vector<8x384xf32> to vector<8x128xf32>
    %505 = vector.extract_strided_slice %495 {offsets = [0, 128], sizes = [8, 128], strides = [1, 1]} : vector<8x384xf32> to vector<8x128xf32>
    %506 = arith.addf %504, %505 : vector<8x128xf32>
    %507 = arith.negf %506 : vector<8x128xf32>
    %508 = math.exp %507 : vector<8x128xf32>
    %cst_259 = arith.constant 1.000000e+00 : f32
    %509 = vector.broadcast %cst_259 : f32 to vector<8x128xf32>
    %510 = arith.addf %509, %508 : vector<8x128xf32>
    %511 = arith.divf %509, %510 : vector<8x128xf32>
    %512 = vector.extract_strided_slice %487 {offsets = [0, 256], sizes = [8, 128], strides = [1, 1]} : vector<8x384xf32> to vector<8x128xf32>
    %513 = vector.extract_strided_slice %495 {offsets = [0, 256], sizes = [8, 128], strides = [1, 1]} : vector<8x384xf32> to vector<8x128xf32>
    %514 = arith.mulf %503, %513 : vector<8x128xf32>
    %515 = arith.addf %512, %514 : vector<8x128xf32>
    %516 = math.tanh %515 : vector<8x128xf32>
    %cst_260 = arith.constant 1.000000e+00 : f32
    %517 = vector.broadcast %cst_260 : f32 to vector<8x128xf32>
    %518 = arith.subf %517, %511 : vector<8x128xf32>
    %519 = arith.mulf %518, %516 : vector<8x128xf32>
    %520 = arith.mulf %511, %479 : vector<8x128xf32>
    %521 = arith.addf %519, %520 : vector<8x128xf32>
    %cst_261 = arith.constant 0.000000e+00 : f32
    %522 = vector.broadcast %cst_261 : f32 to vector<8x128xf32>
    %523 = arith.maximumf %521, %522 : vector<8x128xf32>
    %c1_262 = arith.constant 1 : index
    %c0_263 = arith.constant 0 : index
    %c0_264 = arith.constant 0 : index
    %524 = vector.load %arg9[%c1_262, %c0_263, %c0_264] : memref<2x8x128xf32, #tpu.memory_space<vmem>>, vector<1x8x128xf32>
    %525 = vector.shape_cast %524 : vector<1x8x128xf32> to vector<8x128xf32>
    %526 = vector.shape_cast %523 : vector<8x128xf32> to vector<1x8x128xf32>
    tpu.vector_store %arg9[%c1_262, %c0_263, %c0_264], %526 {strides = array<i32>} : memref<2x8x128xf32, #tpu.memory_space<vmem>>, vector<1x8x128xf32>,
    %527 = arith.index_cast %c5_i32 : i32 to index
    %c0_265 = arith.constant 0 : index
    %c0_266 = arith.constant 0 : index
    %528 = vector.load %arg8[%527, %c0_265, %c0_266] : memref<8x8x128xf32, #tpu.memory_space<vmem>>, vector<1x8x128xf32>
    %529 = vector.shape_cast %528 : vector<1x8x128xf32> to vector<8x128xf32>
    %530 = vector.shape_cast %521 : vector<8x128xf32> to vector<1x8x128xf32>
    tpu.vector_store %arg8[%527, %c0_265, %c0_266], %530 {strides = array<i32>} : memref<8x8x128xf32, #tpu.memory_space<vmem>>, vector<1x8x128xf32>,
    %531 = arith.index_cast %c5_i32 : i32 to index
    %532 = memref.load %arg0[%531] : memref<8xi32, #tpu.memory_space<smem>>
    %c0_i32_267 = arith.constant 0 : i32
    %533 = arith.cmpi sgt, %532, %c0_i32_267 : i32
    %534 = arith.extui %533 : i1 to i32
    %c0_i32_268 = arith.constant 0 : i32
    %535 = arith.cmpi ne, %534, %c0_i32_268 : i32
    scf.if %535 {
      %c8_i32 = arith.constant 8 : i32
      %745 = arith.muli %c5_i32, %c8_i32 : i32
      %746 = tpu.assume_multiple %745, 8 : i32
      %747 = arith.index_cast %746 : i32 to index
      %c0_370 = arith.constant 0 : index
      %748 = vector.load %arg10[%747, %c0_370] : memref<64x384xf32, #tpu.memory_space<vmem>>, vector<8x384xf32>
      %c0_371 = arith.constant 0 : index
      %c0_372 = arith.constant 0 : index
      %749 = vector.load %arg11[%c0_371, %c0_372] : memref<8x384xf32, #tpu.memory_space<vmem>>, vector<8x384xf32>
      tpu.vector_store %arg11[%c0_371, %c0_372], %748 {strides = array<i32>} : memref<8x384xf32, #tpu.memory_space<vmem>>, vector<8x384xf32>,
    } else {
    }
    %true_269 = arith.constant true
    %536 = arith.xori %533, %true_269 : i1
    %537 = arith.extui %536 : i1 to i32
    %c0_i32_270 = arith.constant 0 : i32
    %538 = arith.cmpi ne, %537, %c0_i32_270 : i32
    scf.if %538 {
      %745 = arith.truncf %521 : vector<8x128xf32> to vector<8x128xbf16>
      %c0_370 = arith.constant 0 : index
      %c0_371 = arith.constant 0 : index
      %c0_372 = arith.constant 0 : index
      %746 = vector.load %arg4[%c0_370, %c0_371, %c0_372] : memref<2x128x384xbf16, #tpu.memory_space<vmem>>, vector<1x128x384xbf16>
      %747 = vector.shape_cast %746 : vector<1x128x384xbf16> to vector<128x384xbf16>
      %cst_373 = arith.constant dense<0.000000e+00> : vector<8x384xf32>
      %748 = tpu.matmul %745, %747, %cst_373 {dimension_numbers = #tpu.dot_dimension_numbers<[1], [0], [0], [1], [0, 0, 1, 1], [], []>} : vector<8x128xbf16>, vector<128x384xbf16>, vector<8x384xf32> -> vector<8x384xf32>
      %c0_374 = arith.constant 0 : index
      %c0_375 = arith.constant 0 : index
      %c0_376 = arith.constant 0 : index
      %749 = vector.load %arg6[%c0_374, %c0_375, %c0_376] : memref<2x1x384xf32, #tpu.memory_space<vmem>>, vector<1x1x384xf32>
      %750 = vector.shape_cast %749 : vector<1x1x384xf32> to vector<1x384xf32>
      %751 = vector.broadcast %750 : vector<1x384xf32> to vector<8x384xf32>
      %752 = arith.addf %748, %751 : vector<8x384xf32>
      %c0_377 = arith.constant 0 : index
      %c0_378 = arith.constant 0 : index
      %753 = vector.load %arg11[%c0_377, %c0_378] : memref<8x384xf32, #tpu.memory_space<vmem>>, vector<8x384xf32>
      tpu.vector_store %arg11[%c0_377, %c0_378], %752 {strides = array<i32>} : memref<8x384xf32, #tpu.memory_space<vmem>>, vector<8x384xf32>,
    } else {
    }
    %c6_i32 = arith.constant 6 : i32
    %c0_271 = arith.constant 0 : index
    %c0_272 = arith.constant 0 : index
    %c0_273 = arith.constant 0 : index
    %539 = vector.load %arg9[%c0_271, %c0_272, %c0_273] : memref<2x8x128xf32, #tpu.memory_space<vmem>>, vector<1x8x128xf32>
    %540 = vector.shape_cast %539 : vector<1x8x128xf32> to vector<8x128xf32>
    %541 = arith.truncf %540 : vector<8x128xf32> to vector<8x128xbf16>
    %c0_274 = arith.constant 0 : index
    %c0_275 = arith.constant 0 : index
    %c0_276 = arith.constant 0 : index
    %542 = vector.load %arg5[%c0_274, %c0_275, %c0_276] : memref<2x128x384xbf16, #tpu.memory_space<vmem>>, vector<1x128x384xbf16>
    %543 = vector.shape_cast %542 : vector<1x128x384xbf16> to vector<128x384xbf16>
    %cst_277 = arith.constant dense<0.000000e+00> : vector<8x384xf32>
    %544 = tpu.matmul %541, %543, %cst_277 {dimension_numbers = #tpu.dot_dimension_numbers<[1], [0], [0], [1], [0, 0, 1, 1], [], []>} : vector<8x128xbf16>, vector<128x384xbf16>, vector<8x384xf32> -> vector<8x384xf32>
    %c0_278 = arith.constant 0 : index
    %c0_279 = arith.constant 0 : index
    %c0_280 = arith.constant 0 : index
    %545 = vector.load %arg7[%c0_278, %c0_279, %c0_280] : memref<2x1x384xf32, #tpu.memory_space<vmem>>, vector<1x1x384xf32>
    %546 = vector.shape_cast %545 : vector<1x1x384xf32> to vector<1x384xf32>
    %547 = vector.broadcast %546 : vector<1x384xf32> to vector<8x384xf32>
    %548 = arith.addf %544, %547 : vector<8x384xf32>
    %c0_281 = arith.constant 0 : index
    %c0_282 = arith.constant 0 : index
    %549 = vector.load %arg11[%c0_281, %c0_282] : memref<8x384xf32, #tpu.memory_space<vmem>>, vector<8x384xf32>
    %550 = vector.extract_strided_slice %549 {offsets = [0, 0], sizes = [8, 128], strides = [1, 1]} : vector<8x384xf32> to vector<8x128xf32>
    %551 = vector.extract_strided_slice %548 {offsets = [0, 0], sizes = [8, 128], strides = [1, 1]} : vector<8x384xf32> to vector<8x128xf32>
    %552 = arith.addf %550, %551 : vector<8x128xf32>
    %553 = arith.negf %552 : vector<8x128xf32>
    %554 = math.exp %553 : vector<8x128xf32>
    %cst_283 = arith.constant 1.000000e+00 : f32
    %555 = vector.broadcast %cst_283 : f32 to vector<8x128xf32>
    %556 = arith.addf %555, %554 : vector<8x128xf32>
    %557 = arith.divf %555, %556 : vector<8x128xf32>
    %558 = vector.extract_strided_slice %549 {offsets = [0, 128], sizes = [8, 128], strides = [1, 1]} : vector<8x384xf32> to vector<8x128xf32>
    %559 = vector.extract_strided_slice %548 {offsets = [0, 128], sizes = [8, 128], strides = [1, 1]} : vector<8x384xf32> to vector<8x128xf32>
    %560 = arith.addf %558, %559 : vector<8x128xf32>
    %561 = arith.negf %560 : vector<8x128xf32>
    %562 = math.exp %561 : vector<8x128xf32>
    %cst_284 = arith.constant 1.000000e+00 : f32
    %563 = vector.broadcast %cst_284 : f32 to vector<8x128xf32>
    %564 = arith.addf %563, %562 : vector<8x128xf32>
    %565 = arith.divf %563, %564 : vector<8x128xf32>
    %566 = vector.extract_strided_slice %549 {offsets = [0, 256], sizes = [8, 128], strides = [1, 1]} : vector<8x384xf32> to vector<8x128xf32>
    %567 = vector.extract_strided_slice %548 {offsets = [0, 256], sizes = [8, 128], strides = [1, 1]} : vector<8x384xf32> to vector<8x128xf32>
    %568 = arith.mulf %557, %567 : vector<8x128xf32>
    %569 = arith.addf %566, %568 : vector<8x128xf32>
    %570 = math.tanh %569 : vector<8x128xf32>
    %cst_285 = arith.constant 1.000000e+00 : f32
    %571 = vector.broadcast %cst_285 : f32 to vector<8x128xf32>
    %572 = arith.subf %571, %565 : vector<8x128xf32>
    %573 = arith.mulf %572, %570 : vector<8x128xf32>
    %574 = arith.mulf %565, %540 : vector<8x128xf32>
    %575 = arith.addf %573, %574 : vector<8x128xf32>
    %cst_286 = arith.constant 0.000000e+00 : f32
    %576 = vector.broadcast %cst_286 : f32 to vector<8x128xf32>
    %577 = arith.maximumf %575, %576 : vector<8x128xf32>
    %c0_287 = arith.constant 0 : index
    %c0_288 = arith.constant 0 : index
    %c0_289 = arith.constant 0 : index
    %578 = vector.load %arg9[%c0_287, %c0_288, %c0_289] : memref<2x8x128xf32, #tpu.memory_space<vmem>>, vector<1x8x128xf32>
    %579 = vector.shape_cast %578 : vector<1x8x128xf32> to vector<8x128xf32>
    %580 = vector.shape_cast %577 : vector<8x128xf32> to vector<1x8x128xf32>
    tpu.vector_store %arg9[%c0_287, %c0_288, %c0_289], %580 {strides = array<i32>} : memref<2x8x128xf32, #tpu.memory_space<vmem>>, vector<1x8x128xf32>,
    %c1_290 = arith.constant 1 : index
    %c0_291 = arith.constant 0 : index
    %c0_292 = arith.constant 0 : index
    %581 = vector.load %arg9[%c1_290, %c0_291, %c0_292] : memref<2x8x128xf32, #tpu.memory_space<vmem>>, vector<1x8x128xf32>
    %582 = vector.shape_cast %581 : vector<1x8x128xf32> to vector<8x128xf32>
    %583 = arith.truncf %575 : vector<8x128xf32> to vector<8x128xbf16>
    %c1_293 = arith.constant 1 : index
    %c0_294 = arith.constant 0 : index
    %c0_295 = arith.constant 0 : index
    %584 = vector.load %arg4[%c1_293, %c0_294, %c0_295] : memref<2x128x384xbf16, #tpu.memory_space<vmem>>, vector<1x128x384xbf16>
    %585 = vector.shape_cast %584 : vector<1x128x384xbf16> to vector<128x384xbf16>
    %cst_296 = arith.constant dense<0.000000e+00> : vector<8x384xf32>
    %586 = tpu.matmul %583, %585, %cst_296 {dimension_numbers = #tpu.dot_dimension_numbers<[1], [0], [0], [1], [0, 0, 1, 1], [], []>} : vector<8x128xbf16>, vector<128x384xbf16>, vector<8x384xf32> -> vector<8x384xf32>
    %c1_297 = arith.constant 1 : index
    %c0_298 = arith.constant 0 : index
    %c0_299 = arith.constant 0 : index
    %587 = vector.load %arg6[%c1_297, %c0_298, %c0_299] : memref<2x1x384xf32, #tpu.memory_space<vmem>>, vector<1x1x384xf32>
    %588 = vector.shape_cast %587 : vector<1x1x384xf32> to vector<1x384xf32>
    %589 = vector.broadcast %588 : vector<1x384xf32> to vector<8x384xf32>
    %590 = arith.addf %586, %589 : vector<8x384xf32>
    %591 = arith.truncf %582 : vector<8x128xf32> to vector<8x128xbf16>
    %c1_300 = arith.constant 1 : index
    %c0_301 = arith.constant 0 : index
    %c0_302 = arith.constant 0 : index
    %592 = vector.load %arg5[%c1_300, %c0_301, %c0_302] : memref<2x128x384xbf16, #tpu.memory_space<vmem>>, vector<1x128x384xbf16>
    %593 = vector.shape_cast %592 : vector<1x128x384xbf16> to vector<128x384xbf16>
    %cst_303 = arith.constant dense<0.000000e+00> : vector<8x384xf32>
    %594 = tpu.matmul %591, %593, %cst_303 {dimension_numbers = #tpu.dot_dimension_numbers<[1], [0], [0], [1], [0, 0, 1, 1], [], []>} : vector<8x128xbf16>, vector<128x384xbf16>, vector<8x384xf32> -> vector<8x384xf32>
    %c1_304 = arith.constant 1 : index
    %c0_305 = arith.constant 0 : index
    %c0_306 = arith.constant 0 : index
    %595 = vector.load %arg7[%c1_304, %c0_305, %c0_306] : memref<2x1x384xf32, #tpu.memory_space<vmem>>, vector<1x1x384xf32>
    %596 = vector.shape_cast %595 : vector<1x1x384xf32> to vector<1x384xf32>
    %597 = vector.broadcast %596 : vector<1x384xf32> to vector<8x384xf32>
    %598 = arith.addf %594, %597 : vector<8x384xf32>
    %599 = vector.extract_strided_slice %590 {offsets = [0, 0], sizes = [8, 128], strides = [1, 1]} : vector<8x384xf32> to vector<8x128xf32>
    %600 = vector.extract_strided_slice %598 {offsets = [0, 0], sizes = [8, 128], strides = [1, 1]} : vector<8x384xf32> to vector<8x128xf32>
    %601 = arith.addf %599, %600 : vector<8x128xf32>
    %602 = arith.negf %601 : vector<8x128xf32>
    %603 = math.exp %602 : vector<8x128xf32>
    %cst_307 = arith.constant 1.000000e+00 : f32
    %604 = vector.broadcast %cst_307 : f32 to vector<8x128xf32>
    %605 = arith.addf %604, %603 : vector<8x128xf32>
    %606 = arith.divf %604, %605 : vector<8x128xf32>
    %607 = vector.extract_strided_slice %590 {offsets = [0, 128], sizes = [8, 128], strides = [1, 1]} : vector<8x384xf32> to vector<8x128xf32>
    %608 = vector.extract_strided_slice %598 {offsets = [0, 128], sizes = [8, 128], strides = [1, 1]} : vector<8x384xf32> to vector<8x128xf32>
    %609 = arith.addf %607, %608 : vector<8x128xf32>
    %610 = arith.negf %609 : vector<8x128xf32>
    %611 = math.exp %610 : vector<8x128xf32>
    %cst_308 = arith.constant 1.000000e+00 : f32
    %612 = vector.broadcast %cst_308 : f32 to vector<8x128xf32>
    %613 = arith.addf %612, %611 : vector<8x128xf32>
    %614 = arith.divf %612, %613 : vector<8x128xf32>
    %615 = vector.extract_strided_slice %590 {offsets = [0, 256], sizes = [8, 128], strides = [1, 1]} : vector<8x384xf32> to vector<8x128xf32>
    %616 = vector.extract_strided_slice %598 {offsets = [0, 256], sizes = [8, 128], strides = [1, 1]} : vector<8x384xf32> to vector<8x128xf32>
    %617 = arith.mulf %606, %616 : vector<8x128xf32>
    %618 = arith.addf %615, %617 : vector<8x128xf32>
    %619 = math.tanh %618 : vector<8x128xf32>
    %cst_309 = arith.constant 1.000000e+00 : f32
    %620 = vector.broadcast %cst_309 : f32 to vector<8x128xf32>
    %621 = arith.subf %620, %614 : vector<8x128xf32>
    %622 = arith.mulf %621, %619 : vector<8x128xf32>
    %623 = arith.mulf %614, %582 : vector<8x128xf32>
    %624 = arith.addf %622, %623 : vector<8x128xf32>
    %cst_310 = arith.constant 0.000000e+00 : f32
    %625 = vector.broadcast %cst_310 : f32 to vector<8x128xf32>
    %626 = arith.maximumf %624, %625 : vector<8x128xf32>
    %c1_311 = arith.constant 1 : index
    %c0_312 = arith.constant 0 : index
    %c0_313 = arith.constant 0 : index
    %627 = vector.load %arg9[%c1_311, %c0_312, %c0_313] : memref<2x8x128xf32, #tpu.memory_space<vmem>>, vector<1x8x128xf32>
    %628 = vector.shape_cast %627 : vector<1x8x128xf32> to vector<8x128xf32>
    %629 = vector.shape_cast %626 : vector<8x128xf32> to vector<1x8x128xf32>
    tpu.vector_store %arg9[%c1_311, %c0_312, %c0_313], %629 {strides = array<i32>} : memref<2x8x128xf32, #tpu.memory_space<vmem>>, vector<1x8x128xf32>,
    %630 = arith.index_cast %c6_i32 : i32 to index
    %c0_314 = arith.constant 0 : index
    %c0_315 = arith.constant 0 : index
    %631 = vector.load %arg8[%630, %c0_314, %c0_315] : memref<8x8x128xf32, #tpu.memory_space<vmem>>, vector<1x8x128xf32>
    %632 = vector.shape_cast %631 : vector<1x8x128xf32> to vector<8x128xf32>
    %633 = vector.shape_cast %624 : vector<8x128xf32> to vector<1x8x128xf32>
    tpu.vector_store %arg8[%630, %c0_314, %c0_315], %633 {strides = array<i32>} : memref<8x8x128xf32, #tpu.memory_space<vmem>>, vector<1x8x128xf32>,
    %634 = arith.index_cast %c6_i32 : i32 to index
    %635 = memref.load %arg0[%634] : memref<8xi32, #tpu.memory_space<smem>>
    %c0_i32_316 = arith.constant 0 : i32
    %636 = arith.cmpi sgt, %635, %c0_i32_316 : i32
    %637 = arith.extui %636 : i1 to i32
    %c0_i32_317 = arith.constant 0 : i32
    %638 = arith.cmpi ne, %637, %c0_i32_317 : i32
    scf.if %638 {
      %c8_i32 = arith.constant 8 : i32
      %745 = arith.muli %c6_i32, %c8_i32 : i32
      %746 = tpu.assume_multiple %745, 8 : i32
      %747 = arith.index_cast %746 : i32 to index
      %c0_370 = arith.constant 0 : index
      %748 = vector.load %arg10[%747, %c0_370] : memref<64x384xf32, #tpu.memory_space<vmem>>, vector<8x384xf32>
      %c0_371 = arith.constant 0 : index
      %c0_372 = arith.constant 0 : index
      %749 = vector.load %arg11[%c0_371, %c0_372] : memref<8x384xf32, #tpu.memory_space<vmem>>, vector<8x384xf32>
      tpu.vector_store %arg11[%c0_371, %c0_372], %748 {strides = array<i32>} : memref<8x384xf32, #tpu.memory_space<vmem>>, vector<8x384xf32>,
    } else {
    }
    %true_318 = arith.constant true
    %639 = arith.xori %636, %true_318 : i1
    %640 = arith.extui %639 : i1 to i32
    %c0_i32_319 = arith.constant 0 : i32
    %641 = arith.cmpi ne, %640, %c0_i32_319 : i32
    scf.if %641 {
      %745 = arith.truncf %624 : vector<8x128xf32> to vector<8x128xbf16>
      %c0_370 = arith.constant 0 : index
      %c0_371 = arith.constant 0 : index
      %c0_372 = arith.constant 0 : index
      %746 = vector.load %arg4[%c0_370, %c0_371, %c0_372] : memref<2x128x384xbf16, #tpu.memory_space<vmem>>, vector<1x128x384xbf16>
      %747 = vector.shape_cast %746 : vector<1x128x384xbf16> to vector<128x384xbf16>
      %cst_373 = arith.constant dense<0.000000e+00> : vector<8x384xf32>
      %748 = tpu.matmul %745, %747, %cst_373 {dimension_numbers = #tpu.dot_dimension_numbers<[1], [0], [0], [1], [0, 0, 1, 1], [], []>} : vector<8x128xbf16>, vector<128x384xbf16>, vector<8x384xf32> -> vector<8x384xf32>
      %c0_374 = arith.constant 0 : index
      %c0_375 = arith.constant 0 : index
      %c0_376 = arith.constant 0 : index
      %749 = vector.load %arg6[%c0_374, %c0_375, %c0_376] : memref<2x1x384xf32, #tpu.memory_space<vmem>>, vector<1x1x384xf32>
      %750 = vector.shape_cast %749 : vector<1x1x384xf32> to vector<1x384xf32>
      %751 = vector.broadcast %750 : vector<1x384xf32> to vector<8x384xf32>
      %752 = arith.addf %748, %751 : vector<8x384xf32>
      %c0_377 = arith.constant 0 : index
      %c0_378 = arith.constant 0 : index
      %753 = vector.load %arg11[%c0_377, %c0_378] : memref<8x384xf32, #tpu.memory_space<vmem>>, vector<8x384xf32>
      tpu.vector_store %arg11[%c0_377, %c0_378], %752 {strides = array<i32>} : memref<8x384xf32, #tpu.memory_space<vmem>>, vector<8x384xf32>,
    } else {
    }
    %c7_i32 = arith.constant 7 : i32
    %c0_320 = arith.constant 0 : index
    %c0_321 = arith.constant 0 : index
    %c0_322 = arith.constant 0 : index
    %642 = vector.load %arg9[%c0_320, %c0_321, %c0_322] : memref<2x8x128xf32, #tpu.memory_space<vmem>>, vector<1x8x128xf32>
    %643 = vector.shape_cast %642 : vector<1x8x128xf32> to vector<8x128xf32>
    %644 = arith.truncf %643 : vector<8x128xf32> to vector<8x128xbf16>
    %c0_323 = arith.constant 0 : index
    %c0_324 = arith.constant 0 : index
    %c0_325 = arith.constant 0 : index
    %645 = vector.load %arg5[%c0_323, %c0_324, %c0_325] : memref<2x128x384xbf16, #tpu.memory_space<vmem>>, vector<1x128x384xbf16>
    %646 = vector.shape_cast %645 : vector<1x128x384xbf16> to vector<128x384xbf16>
    %cst_326 = arith.constant dense<0.000000e+00> : vector<8x384xf32>
    %647 = tpu.matmul %644, %646, %cst_326 {dimension_numbers = #tpu.dot_dimension_numbers<[1], [0], [0], [1], [0, 0, 1, 1], [], []>} : vector<8x128xbf16>, vector<128x384xbf16>, vector<8x384xf32> -> vector<8x384xf32>
    %c0_327 = arith.constant 0 : index
    %c0_328 = arith.constant 0 : index
    %c0_329 = arith.constant 0 : index
    %648 = vector.load %arg7[%c0_327, %c0_328, %c0_329] : memref<2x1x384xf32, #tpu.memory_space<vmem>>, vector<1x1x384xf32>
    %649 = vector.shape_cast %648 : vector<1x1x384xf32> to vector<1x384xf32>
    %650 = vector.broadcast %649 : vector<1x384xf32> to vector<8x384xf32>
    %651 = arith.addf %647, %650 : vector<8x384xf32>
    %c0_330 = arith.constant 0 : index
    %c0_331 = arith.constant 0 : index
    %652 = vector.load %arg11[%c0_330, %c0_331] : memref<8x384xf32, #tpu.memory_space<vmem>>, vector<8x384xf32>
    %653 = vector.extract_strided_slice %652 {offsets = [0, 0], sizes = [8, 128], strides = [1, 1]} : vector<8x384xf32> to vector<8x128xf32>
    %654 = vector.extract_strided_slice %651 {offsets = [0, 0], sizes = [8, 128], strides = [1, 1]} : vector<8x384xf32> to vector<8x128xf32>
    %655 = arith.addf %653, %654 : vector<8x128xf32>
    %656 = arith.negf %655 : vector<8x128xf32>
    %657 = math.exp %656 : vector<8x128xf32>
    %cst_332 = arith.constant 1.000000e+00 : f32
    %658 = vector.broadcast %cst_332 : f32 to vector<8x128xf32>
    %659 = arith.addf %658, %657 : vector<8x128xf32>
    %660 = arith.divf %658, %659 : vector<8x128xf32>
    %661 = vector.extract_strided_slice %652 {offsets = [0, 128], sizes = [8, 128], strides = [1, 1]} : vector<8x384xf32> to vector<8x128xf32>
    %662 = vector.extract_strided_slice %651 {offsets = [0, 128], sizes = [8, 128], strides = [1, 1]} : vector<8x384xf32> to vector<8x128xf32>
    %663 = arith.addf %661, %662 : vector<8x128xf32>
    %664 = arith.negf %663 : vector<8x128xf32>
    %665 = math.exp %664 : vector<8x128xf32>
    %cst_333 = arith.constant 1.000000e+00 : f32
    %666 = vector.broadcast %cst_333 : f32 to vector<8x128xf32>
    %667 = arith.addf %666, %665 : vector<8x128xf32>
    %668 = arith.divf %666, %667 : vector<8x128xf32>
    %669 = vector.extract_strided_slice %652 {offsets = [0, 256], sizes = [8, 128], strides = [1, 1]} : vector<8x384xf32> to vector<8x128xf32>
    %670 = vector.extract_strided_slice %651 {offsets = [0, 256], sizes = [8, 128], strides = [1, 1]} : vector<8x384xf32> to vector<8x128xf32>
    %671 = arith.mulf %660, %670 : vector<8x128xf32>
    %672 = arith.addf %669, %671 : vector<8x128xf32>
    %673 = math.tanh %672 : vector<8x128xf32>
    %cst_334 = arith.constant 1.000000e+00 : f32
    %674 = vector.broadcast %cst_334 : f32 to vector<8x128xf32>
    %675 = arith.subf %674, %668 : vector<8x128xf32>
    %676 = arith.mulf %675, %673 : vector<8x128xf32>
    %677 = arith.mulf %668, %643 : vector<8x128xf32>
    %678 = arith.addf %676, %677 : vector<8x128xf32>
    %cst_335 = arith.constant 0.000000e+00 : f32
    %679 = vector.broadcast %cst_335 : f32 to vector<8x128xf32>
    %680 = arith.maximumf %678, %679 : vector<8x128xf32>
    %c0_336 = arith.constant 0 : index
    %c0_337 = arith.constant 0 : index
    %c0_338 = arith.constant 0 : index
    %681 = vector.load %arg9[%c0_336, %c0_337, %c0_338] : memref<2x8x128xf32, #tpu.memory_space<vmem>>, vector<1x8x128xf32>
    %682 = vector.shape_cast %681 : vector<1x8x128xf32> to vector<8x128xf32>
    %683 = vector.shape_cast %680 : vector<8x128xf32> to vector<1x8x128xf32>
    tpu.vector_store %arg9[%c0_336, %c0_337, %c0_338], %683 {strides = array<i32>} : memref<2x8x128xf32, #tpu.memory_space<vmem>>, vector<1x8x128xf32>,
    %c1_339 = arith.constant 1 : index
    %c0_340 = arith.constant 0 : index
    %c0_341 = arith.constant 0 : index
    %684 = vector.load %arg9[%c1_339, %c0_340, %c0_341] : memref<2x8x128xf32, #tpu.memory_space<vmem>>, vector<1x8x128xf32>
    %685 = vector.shape_cast %684 : vector<1x8x128xf32> to vector<8x128xf32>
    %686 = arith.truncf %678 : vector<8x128xf32> to vector<8x128xbf16>
    %c1_342 = arith.constant 1 : index
    %c0_343 = arith.constant 0 : index
    %c0_344 = arith.constant 0 : index
    %687 = vector.load %arg4[%c1_342, %c0_343, %c0_344] : memref<2x128x384xbf16, #tpu.memory_space<vmem>>, vector<1x128x384xbf16>
    %688 = vector.shape_cast %687 : vector<1x128x384xbf16> to vector<128x384xbf16>
    %cst_345 = arith.constant dense<0.000000e+00> : vector<8x384xf32>
    %689 = tpu.matmul %686, %688, %cst_345 {dimension_numbers = #tpu.dot_dimension_numbers<[1], [0], [0], [1], [0, 0, 1, 1], [], []>} : vector<8x128xbf16>, vector<128x384xbf16>, vector<8x384xf32> -> vector<8x384xf32>
    %c1_346 = arith.constant 1 : index
    %c0_347 = arith.constant 0 : index
    %c0_348 = arith.constant 0 : index
    %690 = vector.load %arg6[%c1_346, %c0_347, %c0_348] : memref<2x1x384xf32, #tpu.memory_space<vmem>>, vector<1x1x384xf32>
    %691 = vector.shape_cast %690 : vector<1x1x384xf32> to vector<1x384xf32>
    %692 = vector.broadcast %691 : vector<1x384xf32> to vector<8x384xf32>
    %693 = arith.addf %689, %692 : vector<8x384xf32>
    %694 = arith.truncf %685 : vector<8x128xf32> to vector<8x128xbf16>
    %c1_349 = arith.constant 1 : index
    %c0_350 = arith.constant 0 : index
    %c0_351 = arith.constant 0 : index
    %695 = vector.load %arg5[%c1_349, %c0_350, %c0_351] : memref<2x128x384xbf16, #tpu.memory_space<vmem>>, vector<1x128x384xbf16>
    %696 = vector.shape_cast %695 : vector<1x128x384xbf16> to vector<128x384xbf16>
    %cst_352 = arith.constant dense<0.000000e+00> : vector<8x384xf32>
    %697 = tpu.matmul %694, %696, %cst_352 {dimension_numbers = #tpu.dot_dimension_numbers<[1], [0], [0], [1], [0, 0, 1, 1], [], []>} : vector<8x128xbf16>, vector<128x384xbf16>, vector<8x384xf32> -> vector<8x384xf32>
    %c1_353 = arith.constant 1 : index
    %c0_354 = arith.constant 0 : index
    %c0_355 = arith.constant 0 : index
    %698 = vector.load %arg7[%c1_353, %c0_354, %c0_355] : memref<2x1x384xf32, #tpu.memory_space<vmem>>, vector<1x1x384xf32>
    %699 = vector.shape_cast %698 : vector<1x1x384xf32> to vector<1x384xf32>
    %700 = vector.broadcast %699 : vector<1x384xf32> to vector<8x384xf32>
    %701 = arith.addf %697, %700 : vector<8x384xf32>
    %702 = vector.extract_strided_slice %693 {offsets = [0, 0], sizes = [8, 128], strides = [1, 1]} : vector<8x384xf32> to vector<8x128xf32>
    %703 = vector.extract_strided_slice %701 {offsets = [0, 0], sizes = [8, 128], strides = [1, 1]} : vector<8x384xf32> to vector<8x128xf32>
    %704 = arith.addf %702, %703 : vector<8x128xf32>
    %705 = arith.negf %704 : vector<8x128xf32>
    %706 = math.exp %705 : vector<8x128xf32>
    %cst_356 = arith.constant 1.000000e+00 : f32
    %707 = vector.broadcast %cst_356 : f32 to vector<8x128xf32>
    %708 = arith.addf %707, %706 : vector<8x128xf32>
    %709 = arith.divf %707, %708 : vector<8x128xf32>
    %710 = vector.extract_strided_slice %693 {offsets = [0, 128], sizes = [8, 128], strides = [1, 1]} : vector<8x384xf32> to vector<8x128xf32>
    %711 = vector.extract_strided_slice %701 {offsets = [0, 128], sizes = [8, 128], strides = [1, 1]} : vector<8x384xf32> to vector<8x128xf32>
    %712 = arith.addf %710, %711 : vector<8x128xf32>
    %713 = arith.negf %712 : vector<8x128xf32>
    %714 = math.exp %713 : vector<8x128xf32>
    %cst_357 = arith.constant 1.000000e+00 : f32
    %715 = vector.broadcast %cst_357 : f32 to vector<8x128xf32>
    %716 = arith.addf %715, %714 : vector<8x128xf32>
    %717 = arith.divf %715, %716 : vector<8x128xf32>
    %718 = vector.extract_strided_slice %693 {offsets = [0, 256], sizes = [8, 128], strides = [1, 1]} : vector<8x384xf32> to vector<8x128xf32>
    %719 = vector.extract_strided_slice %701 {offsets = [0, 256], sizes = [8, 128], strides = [1, 1]} : vector<8x384xf32> to vector<8x128xf32>
    %720 = arith.mulf %709, %719 : vector<8x128xf32>
    %721 = arith.addf %718, %720 : vector<8x128xf32>
    %722 = math.tanh %721 : vector<8x128xf32>
    %cst_358 = arith.constant 1.000000e+00 : f32
    %723 = vector.broadcast %cst_358 : f32 to vector<8x128xf32>
    %724 = arith.subf %723, %717 : vector<8x128xf32>
    %725 = arith.mulf %724, %722 : vector<8x128xf32>
    %726 = arith.mulf %717, %685 : vector<8x128xf32>
    %727 = arith.addf %725, %726 : vector<8x128xf32>
    %cst_359 = arith.constant 0.000000e+00 : f32
    %728 = vector.broadcast %cst_359 : f32 to vector<8x128xf32>
    %729 = arith.maximumf %727, %728 : vector<8x128xf32>
    %c1_360 = arith.constant 1 : index
    %c0_361 = arith.constant 0 : index
    %c0_362 = arith.constant 0 : index
    %730 = vector.load %arg9[%c1_360, %c0_361, %c0_362] : memref<2x8x128xf32, #tpu.memory_space<vmem>>, vector<1x8x128xf32>
    %731 = vector.shape_cast %730 : vector<1x8x128xf32> to vector<8x128xf32>
    %732 = vector.shape_cast %729 : vector<8x128xf32> to vector<1x8x128xf32>
    tpu.vector_store %arg9[%c1_360, %c0_361, %c0_362], %732 {strides = array<i32>} : memref<2x8x128xf32, #tpu.memory_space<vmem>>, vector<1x8x128xf32>,
    %733 = arith.index_cast %c7_i32 : i32 to index
    %c0_363 = arith.constant 0 : index
    %c0_364 = arith.constant 0 : index
    %734 = vector.load %arg8[%733, %c0_363, %c0_364] : memref<8x8x128xf32, #tpu.memory_space<vmem>>, vector<1x8x128xf32>
    %735 = vector.shape_cast %734 : vector<1x8x128xf32> to vector<8x128xf32>
    %736 = vector.shape_cast %727 : vector<8x128xf32> to vector<1x8x128xf32>
    tpu.vector_store %arg8[%733, %c0_363, %c0_364], %736 {strides = array<i32>} : memref<8x8x128xf32, #tpu.memory_space<vmem>>, vector<1x8x128xf32>,
    %737 = arith.index_cast %c7_i32 : i32 to index
    %738 = memref.load %arg0[%737] : memref<8xi32, #tpu.memory_space<smem>>
    %c0_i32_365 = arith.constant 0 : i32
    %739 = arith.cmpi sgt, %738, %c0_i32_365 : i32
    %740 = arith.extui %739 : i1 to i32
    %c0_i32_366 = arith.constant 0 : i32
    %741 = arith.cmpi ne, %740, %c0_i32_366 : i32
    scf.if %741 {
      %c8_i32 = arith.constant 8 : i32
      %745 = arith.muli %c7_i32, %c8_i32 : i32
      %746 = tpu.assume_multiple %745, 8 : i32
      %747 = arith.index_cast %746 : i32 to index
      %c0_370 = arith.constant 0 : index
      %748 = vector.load %arg10[%747, %c0_370] : memref<64x384xf32, #tpu.memory_space<vmem>>, vector<8x384xf32>
      %c0_371 = arith.constant 0 : index
      %c0_372 = arith.constant 0 : index
      %749 = vector.load %arg11[%c0_371, %c0_372] : memref<8x384xf32, #tpu.memory_space<vmem>>, vector<8x384xf32>
      tpu.vector_store %arg11[%c0_371, %c0_372], %748 {strides = array<i32>} : memref<8x384xf32, #tpu.memory_space<vmem>>, vector<8x384xf32>,
    } else {
    }
    %true_367 = arith.constant true
    %742 = arith.xori %739, %true_367 : i1
    %743 = arith.extui %742 : i1 to i32
    %c0_i32_368 = arith.constant 0 : i32
    %744 = arith.cmpi ne, %743, %c0_i32_368 : i32
    scf.if %744 {
      %745 = arith.truncf %727 : vector<8x128xf32> to vector<8x128xbf16>
      %c0_370 = arith.constant 0 : index
      %c0_371 = arith.constant 0 : index
      %c0_372 = arith.constant 0 : index
      %746 = vector.load %arg4[%c0_370, %c0_371, %c0_372] : memref<2x128x384xbf16, #tpu.memory_space<vmem>>, vector<1x128x384xbf16>
      %747 = vector.shape_cast %746 : vector<1x128x384xbf16> to vector<128x384xbf16>
      %cst_373 = arith.constant dense<0.000000e+00> : vector<8x384xf32>
      %748 = tpu.matmul %745, %747, %cst_373 {dimension_numbers = #tpu.dot_dimension_numbers<[1], [0], [0], [1], [0, 0, 1, 1], [], []>} : vector<8x128xbf16>, vector<128x384xbf16>, vector<8x384xf32> -> vector<8x384xf32>
      %c0_374 = arith.constant 0 : index
      %c0_375 = arith.constant 0 : index
      %c0_376 = arith.constant 0 : index
      %749 = vector.load %arg6[%c0_374, %c0_375, %c0_376] : memref<2x1x384xf32, #tpu.memory_space<vmem>>, vector<1x1x384xf32>
      %750 = vector.shape_cast %749 : vector<1x1x384xf32> to vector<1x384xf32>
      %751 = vector.broadcast %750 : vector<1x384xf32> to vector<8x384xf32>
      %752 = arith.addf %748, %751 : vector<8x384xf32>
      %c0_377 = arith.constant 0 : index
      %c0_378 = arith.constant 0 : index
      %753 = vector.load %arg11[%c0_377, %c0_378] : memref<8x384xf32, #tpu.memory_space<vmem>>, vector<8x384xf32>
      tpu.vector_store %arg11[%c0_377, %c0_378], %752 {strides = array<i32>} : memref<8x384xf32, #tpu.memory_space<vmem>>, vector<8x384xf32>,
    } else {
    }
    %c7_i32_369 = arith.constant 7 : i32
    return
  }
}

</mosaic_0001>

<bundles_post_ra>
// kernel: tpu_custom_call.1
= control target key start
LH: loop header
LB: loop body
LE: loop exit
PB: predicated region body
PF: predicated region fallthrough
CT: control target
= control target key end

     0   :  { %13 = vsyncpa [#allocation8], 0  ;;  %s12171_s0 = inlined_call_operand.hbm [shape: s32[8], index: 0, kind: input, shape index: {}]   ;;  %s12172_s1 = inlined_call_operand.hbm [shape: f32[8,128], index: 1, kind: input, shape index: {}]   ;;  %s12173_s2 = inlined_call_operand.hbm [shape: bf16[64,128], index: 2, kind: input, shape index: {}]   ;;  %s12174_s3 = inlined_call_operand.hbm [shape: f32[2,8,128], index: 3, kind: input, shape index: {}]   ;;  %s12175_s4 = inlined_call_operand.hbm [shape: bf16[2,128,384], index: 4, kind: input, shape index: {}]   ;;  %s12176_s5 = inlined_call_operand.hbm [shape: bf16[2,128,384], index: 5, kind: input, shape index: {}]   ;;  %s12177_s6 = inlined_call_operand.vmem [shape: f32[2,1,384], index: 6, kind: input, shape index: {}]   ;;  %s12178_s7 = inlined_call_operand.vmem [shape: f32[2,1,384], index: 7, kind: input, shape index: {}]   ;;  %s12179_s8 = inlined_call_operand.hbm [shape: f32[8,8,128], index: 8, kind: output, shape index: {}]  }
   0x1   :  { %14 = vsyncpa [#allocation6], 0 }
   0x2   :  { %15 = vsyncpa [#allocation11], 0 }
   0x3   :  { %16 = vsyncpa [#allocation14], 0 }
   0x4   :  { %17 = vsyncpa [#allocation7], 0  ;;  %s11468_s27 = smov [#allocation10]  }
   0x5   :  { %s41_s28 = sshll.u32 %s11468_s27, 4  ;;  %s42_s28 = int_to_ptr.vmem [resolvable:$true] %s41_s28 }
   0x6   :  { %s11338_s29 = scalar_lea.vmem %s42_s28, 512  ;;  %p11343_p1 = scmp.lt.s32.totalorder %s42_s28, %s42_s28 }
   0x7   :  { %p11339_p0 = scmp.ne.s32.totalorder %s42_s28, %s11338_s29  ;;  %p11344_p2 = scmp.lt.s32.totalorder %s11338_s29, %s11338_s29 }
   0x9   :  { %p11345_p3 = por %p11344_p2, %p11343_p1 }
   0xb   :  { %p11346_p4 = pnand %p11345_p3, %p11339_p0 }
   0xd   :  { %11349 = shalt.err (!%p11346_p4)
}
   0xe   :  { %s11469_s30 = smov 64   ;;  %s11470_s9 = smov 4  }
   0xf   :  { %47 = dma.hbm_to_vmem [thread:$0]  %s12173_s2, 512, %s42_s28, [#allocation11], %s11469_s30, %s11469_s30, %s11470_s9  }
  0x10   :  { %s11471_s12 = smov [#allocation13]  }
  0x11   :  { %s65_s13 = sshll.u32 %s11471_s12, 4  ;;  %s66_s13 = int_to_ptr.vmem [resolvable:$true] %s65_s13 }
  0x12   :  { %s11358_s14 = scalar_lea.vmem %s66_s13, 6144  ;;  %p11363_p6 = scmp.lt.s32.totalorder %s66_s13, %s66_s13 }
  0x13   :  { %p11359_p5 = scmp.ne.s32.totalorder %s66_s13, %s11358_s14  ;;  %p11364_p7 = scmp.lt.s32.totalorder %s11358_s14, %s11358_s14 }
  0x15   :  { %p11365_p8 = por %p11364_p7, %p11363_p6 }
  0x17   :  { %p11366_p9 = pnand %p11365_p8, %p11359_p5 }
  0x19   :  { %11369 = shalt.err (!%p11366_p9)
}
  0x1a   :  { %s11472_s15 = smov 192   ;;  %s11473_s16 = smov 12  }
  0x1b   :  { %71 = dma.hbm_to_vmem [thread:$0]  %s12175_s4, 6144, %s66_s13, [#allocation14], %s11472_s15, %s11472_s15, %s11473_s16  }
  0x1c   :  { %s11474_s2 = smov [#allocation5]   ;;  %s11475_s21 = smov [#allocation9]  }
  0x1d   :  { %25 = dma.hbm_to_smem %s12171_s0, 16, %s11474_s2, [#allocation8]  }
  0x1e   :  { %s32_s22 = sshll.u32 %s11475_s21, 4  ;;  %s11476_s23 = smov [#allocation12]   ;;  %s33_s22 = int_to_ptr.vmem [resolvable:$true] %s32_s22 }
  0x1f   :  { %s53_s24 = sshll.u32 %s11476_s23, 4  ;;  %s11386_s25 = scalar_lea.vmem %s33_s22, 128  ;;  %s54_s24 = int_to_ptr.vmem [resolvable:$true] %s53_s24 }
  0x20   :  { %p11387_p10 = scmp.ne.s32.totalorder %s33_s22, %s11386_s25  ;;  %p11391_p11 = scmp.lt.s32.totalorder %s33_s22, %s33_s22 }
  0x21   :  { %p11392_p12 = scmp.lt.s32.totalorder %s11386_s25, %s11386_s25 }
  0x23   :  { %p11393_p13 = por %p11392_p12, %p11391_p11 }
  0x25   :  { %p11394_p0 = pnand %p11393_p13, %p11387_p10 }
  0x27   :  { %11397 = shalt.err (!%p11394_p0)
}
  0x28   :  { %35 = dma.hbm_to_vmem [thread:$0]  %s12172_s1, 128, %s33_s22, [#allocation6]  }
  0x29   :  { %s11406_s4 = scalar_lea.vmem %s54_s24, 256  ;;  %p11411_p2 = scmp.lt.s32.totalorder %s54_s24, %s54_s24 }
  0x2a   :  { %p11407_p1 = scmp.ne.s32.totalorder %s54_s24, %s11406_s4  ;;  %p11412_p3 = scmp.lt.s32.totalorder %s11406_s4, %s11406_s4 }
  0x2c   :  { %p11413_p4 = por %p11412_p3, %p11411_p2 }
  0x2e   :  { %p11414_p5 = pnand %p11413_p4, %p11407_p1 }
  0x30   :  { %11417 = shalt.err (!%p11414_p5)
}
  0x31   :  { %s11477_s0 = smov 128   ;;  %s11478_s28 = smov 8  }
  0x32   :  { %59 = dma.hbm_to_vmem [thread:$0]  %s12174_s3, 256, %s54_s24, [#allocation11], %s11477_s0, %s11477_s0, %s11478_s28  }
  0x33   :  { %s11479_s9 = smov [#allocation15]  }
  0x34   :  { %s77_s10 = sshll.u32 %s11479_s9, 4  ;;  %s78_s10 = int_to_ptr.vmem [resolvable:$true] %s77_s10 }
  0x35   :  { %s11426_s1 = scalar_lea.vmem %s78_s10, 6144  ;;  %p11431_p7 = scmp.lt.s32.totalorder %s78_s10, %s78_s10 }
  0x36   :  { %p11427_p6 = scmp.ne.s32.totalorder %s78_s10, %s11426_s1  ;;  %p11432_p8 = scmp.lt.s32.totalorder %s11426_s1, %s11426_s1 }
  0x38   :  { %p11433_p9 = por %p11432_p8, %p11431_p7 }
  0x3a   :  { %p11434_p10 = pnand %p11433_p9, %p11427_p6 }
  0x3c   :  { %11437 = shalt.err (!%p11434_p10)
}
  0x3d   :  { %83 = dma.hbm_to_vmem [thread:$0]  %s12176_s5, 6144, %s78_s10, [#allocation14], %s11472_s15, %s11472_s15, %s11473_s16  }
  0x3e   :  { %11458 = dma.done.wait [#allocation8], 16  }
  0x3f   :  { %11459 = vsyncadd [#allocation8], 4294967280 }
  0x40   :  { %11460 = dma.done.wait [#allocation6], 128  }
  0x41   :  { %11461 = vsyncadd [#allocation6], 4294967168 }
  0x42   :  { %11462 = dma.done.wait [#allocation11], 768  }
  0x43   :  { %11463 = vsyncadd [#allocation11], 4294966528 }
  0x44   :  { %11464 = dma.done.wait [#allocation14], 12288  }
  0x45   :  { %11465 = vsyncadd [#allocation14], 4294955008 }
  0x46   :  { %106 = sfence }
  0x47   :  { %v10250_v0 = vld [vmem:[#allocation13 + $0xac] ss:$12 sps:$4 sm:$0xff]   ;;  %v10252_v1 = vld [vmem:[#allocation13 + $0xa8] ss:$12 sps:$4 sm:$0xff]   ;;  %v11480_v2 = vmov 0   ;;  %v10281_v29 = vld [vmem:[#allocation10 + $0x10] sm:$0xff]  }
  0x48   :  { %355 = vmatprep.mubr.bf16.mxu0 %v11480_v2  ;;  %323 = vmatprep.subr.bf16.mxu0 %v10250_v0  ;;  %v10253_v3 = vld [vmem:[#allocation13 + $0x94] ss:$12 sps:$4 sm:$0xff]   ;;  %v10255_v4 = vld [vmem:[#allocation13 + $0x90] ss:$12 sps:$4 sm:$0xff]   ;;  %v10258_v6 = vld [vmem:[#allocation13 + $0x78] ss:$12 sps:$4 sm:$0xff]  }
  0x49   :  { %324 = vmatpush1.bf16.msra.mxu0 %v10252_v1  ;;  %v10256_v5 = vld [vmem:[#allocation13 + $0x7c] ss:$12 sps:$4 sm:$0xff]   ;;  %v10259_v7 = vld [vmem:[#allocation13 + $0x64] ss:$12 sps:$4 sm:$0xff]   ;;  %v11578_v8 = vld [vmem:[#allocation13 + $0x60] ss:$12 sps:$4 sm:$0xff]  }
  0x4a   :  { %325 = vmatprep.subr.bf16.mxu0 %v10253_v3  ;;  %v11580_v9 = vld [vmem:[#allocation13 + $0x4c] ss:$12 sps:$4 sm:$0xff]   ;;  %v10273_v10 = vld [vmem:[#allocation13 + $0xb0] ss:$12 sps:$4 sm:$0xff]   ;;  %v11582_v13 = vld [vmem:[#allocation13 + $0x48] ss:$12 sps:$4 sm:$0xff]  }
  0x4b   :  { %v10275_v11 = vld [vmem:[#allocation10] sm:$0xff]   ;;  %9609 = vmatprep.subr.bf16.mxu1 %v10273_v10  ;;  %v10276_v12 = vld [vmem:[#allocation13 + $0x98] ss:$12 sps:$4 sm:$0xff]   ;;  %v10277_v14 = vld [vmem:[#allocation13 + $0x80] ss:$12 sps:$4 sm:$0xff]   ;;  %v11481_v30 = vmov 0.0  }
  0x4c   :  { %9610 = vmatpush3.bf16.msra.mxu1 %v10273_v10  ;;  %9625 = vmatprep.mubr.bf16.mxu1 %v10275_v11  ;;  %v10265_v15 = vld [vmem:[#allocation13 + $0x34] ss:$12 sps:$4 sm:$0xff]   ;;  %v11586_v16 = vld [vmem:[#allocation13 + $0x30] ss:$12 sps:$4 sm:$0xff]   ;;  %v11591_v19 = vld [vmem:[#allocation13 + $0x18] ss:$12 sps:$4 sm:$0xff]  }
  0x4d   :  { %326 = vmatpush1.bf16.msra.mxu0 %v10255_v4  ;;  %9611 = vmatprep.subr.bf16.mxu1 %v10276_v12  ;;  %v10279_v17 = vld [vmem:[#allocation13 + $0x68] ss:$12 sps:$4 sm:$0xff]   ;;  %v10280_v20 = vld [vmem:[#allocation13 + $0x50] ss:$12 sps:$4 sm:$0xff]   ;;  %v11599_v23 = vld [vmem:[#allocation13] ss:$12 sps:$4 sm:$0xff]  }
  0x4e   :  { %327 = vmatprep.subr.bf16.mxu0 %v10256_v5  ;;  %v11589_v18 = vld [vmem:[#allocation13 + $0x1c] ss:$12 sps:$4 sm:$0xff]   ;;  %v10271_v22 = vld [vmem:[#allocation13 + $0x4] ss:$12 sps:$4 sm:$0xff]   ;;  %v10283_v25 = vld [vmem:[#allocation13 + $0x20] ss:$12 sps:$4 sm:$0xff]  }
  0x4f   :  { %v11594_v21 = vld [vmem:[#allocation9] sm:$0xff]  ;;  %v10282_v24 = vld [vmem:[#allocation13 + $0x38] ss:$12 sps:$4 sm:$0xff]   ;;  %v10286_v28 = vld [vmem:[#allocation13 + $0xb0] ss:$12 sps:$4 sm:$0xff]   ;;  %vm11482_vm0 = vmmov 0  }
  0x50   :  { %9612 = vmatpush3.bf16.msra.mxu1 %v10276_v12  ;;  %113 = vst [vmem:[#allocation16] sm:$0xff] %v11594_v21  ;;  %v10285_v26 = vld [vmem:[#allocation13 + $0x8] ss:$12 sps:$4 sm:$0xff]   ;;  %v10278_v27 = vld [vmem:[#allocation10 + $0x8] sm:$0xff]   ;;  %v10294_v33 = vld [vmem:[#allocation13 + $0x80] ss:$12 sps:$4 sm:$0xff]   ;;  %v485_v39 = vpack.c.bf16 %v11594_v21, %v11594_v21 }
  0x51   :  { %328 = vmatpush1.bf16.msra.mxu0 %v10258_v6  ;;  %9613 = vmatprep.subr.bf16.mxu1 %v10277_v14  ;;  %v10290_v31 = vld [vmem:[#allocation13 + $0x98] ss:$12 sps:$4 sm:$0xff]   ;;  %v10284_v32 = vld [vmem:[#allocation10 + $0x18] sm:$0xff]   ;;  %v10302_v35 = vld [vmem:[#allocation13 + $0x50] ss:$12 sps:$4 sm:$0xff]   ;;  %s11705_s17 = sld [smem:[#allocation5 + $0x1]] }
  0x52   :  { %329 = vmatprep.subr.bf16.mxu0 %v10259_v7  ;;  %v10298_v34 = vld [vmem:[#allocation13 + $0x68] ss:$12 sps:$4 sm:$0xff]   ;;  %v10289_v36 = vld [vmem:[#allocation15 + $0xac] ss:$12 sps:$4 sm:$0xff]   ;;  %v10291_v42 = vld [vmem:[#allocation15 + $0x90] ss:$12 sps:$4 sm:$0xff]  }
  0x53   :  { %v10306_v37 = vld [vmem:[#allocation13 + $0x38] ss:$12 sps:$4 sm:$0xff]   ;;  %v10287_v38 = vld [vmem:[#allocation15 + $0xa8] ss:$12 sps:$4 sm:$0xff]   ;;  %v10310_v41 = vld [vmem:[#allocation13 + $0x20] ss:$12 sps:$4 sm:$0xff]  }
  0x54   :  { %9614 = vmatpush3.bf16.msra.mxu1 %v10277_v14  ;;  %v10293_v40 = vld [vmem:[#allocation15 + $0x94] ss:$12 sps:$4 sm:$0xff]   ;;  %v10297_v43 = vld [vmem:[#allocation15 + $0x7c] ss:$12 sps:$4 sm:$0xff]   ;;  %v10295_v45 = vld [vmem:[#allocation15 + $0x78] ss:$12 sps:$4 sm:$0xff]  }
  0x55   :  { %330 = vmatpush1.bf16.msra.mxu0 %v11578_v8  ;;  %9615 = vmatprep.subr.bf16.mxu1 %v10279_v17  ;;  %v10314_v44 = vld [vmem:[#allocation13 + $0x8] ss:$12 sps:$4 sm:$0xff]   ;;  %v10301_v46 = vld [vmem:[#allocation15 + $0x64] ss:$12 sps:$4 sm:$0xff]   ;;  %v10299_v48 = vld [vmem:[#allocation15 + $0x60] ss:$12 sps:$4 sm:$0xff]  }
  0x56   :  { %331 = vmatprep.subr.bf16.mxu0 %v11580_v9  ;;  %v10318_v47 = vld [vmem:[#allocation15 + $0xb0] ss:$12 sps:$4 sm:$0xff]   ;;  %v10305_v49 = vld [vmem:[#allocation15 + $0x4c] ss:$12 sps:$4 sm:$0xff]   ;;  %v10303_v51 = vld [vmem:[#allocation15 + $0x48] ss:$12 sps:$4 sm:$0xff]  }
  0x57   :  { %v10319_v50 = vld [vmem:[#allocation15 + $0x98] ss:$12 sps:$4 sm:$0xff]   ;;  %v10309_v52 = vld [vmem:[#allocation15 + $0x34] ss:$12 sps:$4 sm:$0xff]   ;;  %v10307_v54 = vld [vmem:[#allocation15 + $0x30] ss:$12 sps:$4 sm:$0xff]  }
  0x58   :  { %9616 = vmatpush3.bf16.msra.mxu1 %v10279_v17  ;;  %v10320_v53 = vld [vmem:[#allocation15 + $0x80] ss:$12 sps:$4 sm:$0xff]   ;;  %v10313_v55 = vld [vmem:[#allocation15 + $0x1c] ss:$12 sps:$4 sm:$0xff]   ;;  %v10311_v57 = vld [vmem:[#allocation15 + $0x18] ss:$12 sps:$4 sm:$0xff]  }
  0x59   :  { %332 = vmatpush1.bf16.msra.mxu0 %v11582_v13  ;;  %9617 = vmatprep.subr.bf16.mxu1 %v10280_v20  ;;  %v10321_v56 = vld [vmem:[#allocation15 + $0x68] ss:$12 sps:$4 sm:$0xff]   ;;  %v10317_v58 = vld [vmem:[#allocation15 + $0x4] ss:$12 sps:$4 sm:$0xff]   ;;  %v10315_v60 = vld [vmem:[#allocation15] ss:$12 sps:$4 sm:$0xff]  }
  0x5a   :  { %333 = vmatprep.subr.bf16.mxu0 %v10265_v15  ;;  %v10322_v59 = vld [vmem:[#allocation15 + $0x50] ss:$12 sps:$4 sm:$0xff]   ;;  %v10323_v63 = vld [vmem:[#allocation15 + $0x38] ss:$12 sps:$4 sm:$0xff]   ;;  %v10341_v14 = vld [vmem:[#allocation13 + $0x128] ss:$12 sps:$4 sm:$0xff]  }
  0x5b   :  { %v11632_v61 = vld [vmem:[#allocation12] sm:$0xff]  ;;  %v10334_v10 = vld [vmem:[#allocation13 + $0x138] ss:$12 sps:$4 sm:$0xff]   ;;  %v10352_v21 = vld [vmem:[#allocation13 + $0xdc] ss:$12 sps:$4 sm:$0xff]   ;;  %p8680_p11 = scmp.le.s32.totalorder %s11705_s17, 0 }
  0x5c   :  { %9618 = vmatpush3.bf16.msra.mxu1 %v10280_v20  ;;  %v748_v62 = vpack.c.bf16 %v11632_v61, %v11632_v61  ;;  %v10340_v12 = vld [vmem:[#allocation13 + $0x124] ss:$12 sps:$4 sm:$0xff]  }
  0x5d   :  { %334 = vmatpush1.bf16.msra.mxu0 %v11586_v16  ;;  %9619 = vmatprep.subr.bf16.mxu1 %v10282_v24  ;;  %v10345_v17 = vld [vmem:[#allocation13 + $0x110] ss:$12 sps:$4 sm:$0xff]   ;;  %v10349_v20 = vld [vmem:[#allocation13 + $0xf8] ss:$12 sps:$4 sm:$0xff]  }
  0x5e   :  { %335 = vmatprep.subr.bf16.mxu0 %v11589_v18 }
  0x60   :  { %9620 = vmatpush3.bf16.msra.mxu1 %v10282_v24  ;;  %v10353_v24 = vld [vmem:[#allocation13 + $0xe0] ss:$12 sps:$4 sm:$0xff]  }
  0x61   :  { %336 = vmatpush1.bf16.msra.mxu0 %v11591_v19  ;;  %9621 = vmatprep.subr.bf16.mxu1 %v10283_v25 }
  0x62   :  { %337 = vmatprep.subr.bf16.mxu0 %v10271_v22 }
  0x64   :  { %9622 = vmatpush3.bf16.msra.mxu1 %v10283_v25  ;;  %v10356_v25 = vld [vmem:[#allocation13 + $0xc4] ss:$12 sps:$4 sm:$0xff]  }
  0x65   :  { %338 = vmatpush1.bf16.msra.mxu0 %v11599_v23  ;;  %9623 = vmatprep.subr.bf16.mxu1 %v10285_v26 }
  0x66   :  { %663 = vmatprep.subr.bf16.mxu0 %v10250_v0  ;;  %v10324_v0 = vld [vmem:[#allocation15 + $0x20] ss:$12 sps:$4 sm:$0xff]  }
  0x68   :  { %356 = vmatmul.mubr.bf16.vlgmr.msra.gmra.mxu0 %v10275_v11  ;;  %9624 = vmatpush3.bf16.msra.mxu1 %v10285_v26  ;;  %v10337_v11 = vld [vmem:[#allocation13 + $0x140] ss:$12 sps:$4 sm:$0xff]  }
  0x69   :  { %664 = vmatpush1.bf16.msra.mxu0 %v10252_v1  ;;  %365 = vmatprep.mubr.bf16.mxu0 %v11480_v2  ;;  %v10325_v1 = vld [vmem:[#allocation15 + $0x8] ss:$12 sps:$4 sm:$0xff]  }
  0x6a   :  { %665 = vmatprep.subr.bf16.mxu0 %v10253_v3  ;;  %9633 = vmatprep.subr.bf16.mxu1 %v11481_v30  ;;  %v10328_v3 = vld [vmem:[#allocation13 + $0x16c] ss:$12 sps:$4 sm:$0xff]  }
  0x6b   :  { %9626 = vmatmul.mubr.bf16.vlgmr.msra.gmra.mxu1 %v10278_v27 }
  0x6c   :  { %9634 = vmatpush3.bf16.msra.mxu1 %v10286_v28  ;;  %9629 = vmatprep.mubr.bf16.mxu1 %v10281_v29  ;;  %v10357_v28 = vld [vmem:[#allocation13 + $0xc8] ss:$12 sps:$4 sm:$0xff]  }
  0x6d   :  { %666 = vmatpush1.bf16.msra.mxu0 %v10255_v4  ;;  %9635 = vmatprep.subr.bf16.mxu1 %v11481_v30  ;;  %v10326_v4 = vld [vmem:[#allocation13 + $0x168] ss:$12 sps:$4 sm:$0xff]  }
  0x6e   :  { %667 = vmatprep.subr.bf16.mxu0 %v10256_v5  ;;  %v10329_v5 = vld [vmem:[#allocation13 + $0x170] ss:$12 sps:$4 sm:$0xff]  }
  0x70   :  { %366 = vmatmul.mubr.bf16.gmra.mxu0 %v10278_v27  ;;  %9636 = vmatpush3.bf16.msra.mxu1 %v10290_v31  ;;  %v10354_v27 = vld [vmem:[#allocation13 + $0xc0] ss:$12 sps:$4 sm:$0xff]  }
  0x71   :  { %668 = vmatpush1.bf16.msra.mxu0 %v10258_v6  ;;  %375 = vmatprep.mubr.bf16.mxu0 %v11480_v2  ;;  %v10332_v6 = vld [vmem:[#allocation13 + $0x154] ss:$12 sps:$4 sm:$0xff]  }
  0x72   :  { %669 = vmatprep.subr.bf16.mxu0 %v10259_v7  ;;  %9637 = vmatprep.subr.bf16.mxu1 %v11481_v30  ;;  %v10330_v7 = vld [vmem:[#allocation13 + $0x150] ss:$12 sps:$4 sm:$0xff]  }
  0x73   :  { %9630 = vmatmul.mubr.bf16.gmra.mxu1 %v10284_v32 }
  0x74   :  { %9638 = vmatpush3.bf16.msra.mxu1 %v10294_v33  ;;  %9649 = vmatprep.mubr.msk.bf16.mxu1 %vm11482_vm0, %v11481_v30 }
  0x75   :  { %670 = vmatpush1.bf16.msra.mxu0 %v11578_v8  ;;  %9639 = vmatprep.subr.bf16.mxu1 %v11481_v30  ;;  %v10333_v8 = vld [vmem:[#allocation13 + $0x158] ss:$12 sps:$4 sm:$0xff]  }
  0x76   :  { %671 = vmatprep.subr.bf16.mxu0 %v11580_v9  ;;  %v10336_v9 = vld [vmem:[#allocation13 + $0x13c] ss:$12 sps:$4 sm:$0xff]  }
  0x78   :  { %376 = vmatmul.mubr.bf16.gmra.mxu0 %v10281_v29  ;;  %9640 = vmatpush3.bf16.msra.mxu1 %v10298_v34  ;;  %v10360_v29 = vld [vmem:[#allocation15 + $0x16c] ss:$12 sps:$4 sm:$0xff]  }
  0x79   :  { %672 = vmatpush1.bf16.msra.mxu0 %v11582_v13  ;;  %385 = vmatprep.mubr.bf16.mxu0 %v11480_v2  ;;  %v10338_v13 = vld [vmem:[#allocation13 + $0x120] ss:$12 sps:$4 sm:$0xff]  }
  0x7a   :  { %673 = vmatprep.subr.bf16.mxu0 %v10265_v15  ;;  %9641 = vmatprep.subr.bf16.mxu1 %v11481_v30  ;;  %v10342_v15 = vld [vmem:[#allocation13 + $0x108] ss:$12 sps:$4 sm:$0xff]  }
  0x7c   :  { %9642 = vmatpush3.bf16.msra.mxu1 %v10302_v35 }
  0x7d   :  { %674 = vmatpush1.bf16.msra.mxu0 %v11586_v16  ;;  %9643 = vmatprep.subr.bf16.mxu1 %v11481_v30  ;;  %v10344_v16 = vld [vmem:[#allocation13 + $0x10c] ss:$12 sps:$4 sm:$0xff]  }
  0x7e   :  { %675 = vmatprep.subr.bf16.mxu0 %v11589_v18  ;;  %v10348_v18 = vld [vmem:[#allocation13 + $0xf4] ss:$12 sps:$4 sm:$0xff]  }
  0x80   :  { %386 = vmatmul.mubr.bf16.gmra.mxu0 %v10284_v32  ;;  %9644 = vmatpush3.bf16.msra.mxu1 %v10306_v37  ;;  %v154_v32 = vld [vmem:[%s12177_s6] sm:$0x7] }
  0x81   :  { %676 = vmatpush1.bf16.msra.mxu0 %v11591_v19  ;;  %695 = vmatprep.mubr.bf16.mxu0 %v11480_v2  ;;  %v10346_v19 = vld [vmem:[#allocation13 + $0xf0] ss:$12 sps:$4 sm:$0xff]  }
  0x82   :  { %677 = vmatprep.subr.bf16.mxu0 %v10271_v22  ;;  %9645 = vmatprep.subr.bf16.mxu1 %v11481_v30  ;;  %v156_v22 = vlaneseq }
  0x84   :  { %9646 = vmatpush3.bf16.msra.mxu1 %v10310_v41  ;;  %v157_v26 = vshrl.u32 %v156_v22, 7 }
  0x85   :  { %678 = vmatpush1.bf16.msra.mxu0 %v11599_v23  ;;  %9647 = vmatprep.subr.bf16.mxu1 %v11481_v30  ;;  %v10350_v23 = vld [vmem:[#allocation13 + $0xd8] ss:$12 sps:$4 sm:$0xff]  }
  0x86   :  { %926 = vmatprep.subr.bf16.mxu0 %v10289_v36  ;;  %v11651_v31 = vsub.s32 0, %v157_v26  ;;  %v11656_v33 = vsub.s32 1, %v157_v26 }
  0x88   :  { %696 = vmatmul.mubr.bf16.vlgmr.msra.gmra.mxu0 %v485_v39  ;;  %9648 = vmatpush3.bf16.msra.mxu1 %v10314_v44  ;;  %v11660_v34 = vrot.slane %v154_v32, %v11651_v31  ;;  %v11663_v35 = vrot.slane %v154_v32, %v11656_v33 }
  0x89   :  { %927 = vmatpush1.bf16.msra.mxu0 %v10287_v38  ;;  %958 = vmatprep.mubr.bf16.mxu0 %v11480_v2 }
  0x8a   :  { %928 = vmatprep.subr.bf16.mxu0 %v10293_v40  ;;  %9653 = vmatprep.subr.bf16.mxu1 %v11481_v30 }
  0x8b   :  { %9650 = vmatmul.mubr.bf16.vlgmr.msra.gmra.mxu1 %v485_v39  ;;  %v11665_v39 = vsub.s32 2, %v157_v26 }
  0x8c   :  { %9654 = vmatpush3.bf16.msra.mxu1 %v10318_v47  ;;  %9669 = vmatprep.mubr.msk.bf16.mxu1 %vm11482_vm0, %v11481_v30 }
  0x8d   :  { %929 = vmatpush1.bf16.msra.mxu0 %v10291_v42  ;;  %9655 = vmatprep.subr.bf16.mxu1 %v11481_v30  ;;  %v167_v44 = vrot.slane %v154_v32, %v11665_v39 }
  0x8e   :  { %930 = vmatprep.subr.bf16.mxu0 %v10297_v43 }
  0x90   :  { %9656 = vmatpush3.bf16.msra.mxu1 %v10319_v50 }
  0x91   :  { %931 = vmatpush1.bf16.msra.mxu0 %v10295_v45  ;;  %9657 = vmatprep.subr.bf16.mxu1 %v11481_v30 }
  0x92   :  { %932 = vmatprep.subr.bf16.mxu0 %v10301_v46 }
  0x94   :  { %9658 = vmatpush3.bf16.msra.mxu1 %v10320_v53 }
  0x95   :  { %933 = vmatpush1.bf16.msra.mxu0 %v10299_v48  ;;  %9659 = vmatprep.subr.bf16.mxu1 %v11481_v30 }
  0x96   :  { %934 = vmatprep.subr.bf16.mxu0 %v10305_v49 }
  0x98   :  { %9660 = vmatpush3.bf16.msra.mxu1 %v10321_v56 }
  0x99   :  { %935 = vmatpush1.bf16.msra.mxu0 %v10303_v51  ;;  %9661 = vmatprep.subr.bf16.mxu1 %v11481_v30 }
  0x9a   :  { %936 = vmatprep.subr.bf16.mxu0 %v10309_v52 }
  0x9c   :  { %9662 = vmatpush3.bf16.msra.mxu1 %v10322_v59 }
  0x9d   :  { %937 = vmatpush1.bf16.msra.mxu0 %v10307_v54  ;;  %9663 = vmatprep.subr.bf16.mxu1 %v11481_v30 }
  0x9e   :  { %938 = vmatprep.subr.bf16.mxu0 %v10313_v55 }
  0xa0   :  { %9664 = vmatpush3.bf16.msra.mxu1 %v10323_v63 }
  0xa1   :  { %939 = vmatpush1.bf16.msra.mxu0 %v10311_v57  ;;  %9665 = vmatprep.subr.bf16.mxu1 %v11481_v30 }
  0xa2   :  { %940 = vmatprep.subr.bf16.mxu0 %v10317_v58 }
  0xa4   :  { %9666 = vmatpush3.bf16.msra.mxu1 %v10324_v0 }
  0xa5   :  { %941 = vmatpush1.bf16.msra.mxu0 %v10315_v60  ;;  %9667 = vmatprep.subr.bf16.mxu1 %v11481_v30 }
  0xa6   :  { %1215 = vmatprep.subr.bf16.mxu0 %v10328_v3 }
  0xa8   :  { %959 = vmatmul.mubr.bf16.vlgmr.msra.gmra.mxu0 %v748_v62  ;;  %9668 = vmatpush3.bf16.msra.mxu1 %v10325_v1 }
  0xa9   :  { %1247 = vmatprep.mubr.bf16.mxu0 %v11480_v2  ;;  %9673 = vmatprep.subr.bf16.mxu1 %v11481_v30 }
  0xaa   :  { %1216 = vmatpush1.bf16.msra.mxu0 %v10326_v4 }
  0xab   :  { %9670 = vmatmul.mubr.bf16.vlgmr.msra.gmra.mxu1 %v748_v62  ;;  %1217 = vmatprep.subr.bf16.mxu0 %v10332_v6 }
  0xac   :  { %9689 = vmatprep.mubr.msk.bf16.mxu1 %vm11482_vm0, %v11481_v30  ;;  %9674 = vmatpush3.bf16.msra.mxu1 %v10329_v5 }
  0xad   :  { %9675 = vmatprep.subr.bf16.mxu1 %v11481_v30 }
  0xae   :  { %1218 = vmatpush1.bf16.msra.mxu0 %v10330_v7 }
  0xaf   :  { %1219 = vmatprep.subr.bf16.mxu0 %v10336_v9 }
  0xb0   :  { %9676 = vmatpush3.bf16.msra.mxu1 %v10333_v8 }
  0xb1   :  { %9677 = vmatprep.subr.bf16.mxu1 %v11481_v30 }
  0xb2   :  { %1220 = vmatpush1.bf16.msra.mxu0 %v10334_v10 }
  0xb3   :  { %1221 = vmatprep.subr.bf16.mxu0 %v10340_v12 }
  0xb4   :  { %9678 = vmatpush3.bf16.msra.mxu1 %v10337_v11 }
  0xb5   :  { %9679 = vmatprep.subr.bf16.mxu1 %v11481_v30 }
  0xb6   :  { %1222 = vmatpush1.bf16.msra.mxu0 %v10338_v13 }
  0xb7   :  { %1223 = vmatprep.subr.bf16.mxu0 %v10344_v16 }
  0xb8   :  { %9680 = vmatpush3.bf16.msra.mxu1 %v10341_v14 }
  0xb9   :  { %9681 = vmatprep.subr.bf16.mxu1 %v11481_v30 }
  0xba   :  { %1224 = vmatpush1.bf16.msra.mxu0 %v10342_v15  ;;  %v518_v15 = vld [vmem:[%s12177_s6] sm:$0x7] }
  0xbb   :  { %1225 = vmatprep.subr.bf16.mxu0 %v10348_v18  ;;  %v531_v32 = vrot.slane %v518_v15, %v11665_v39 }
  0xbc   :  { %9682 = vmatpush3.bf16.msra.mxu1 %v10345_v17 }
  0xbd   :  { %9683 = vmatprep.subr.bf16.mxu1 %v11481_v30 }
  0xbe   :  { %1226 = vmatpush1.bf16.msra.mxu0 %v10346_v19 }
  0xbf   :  { %1227 = vmatprep.subr.bf16.mxu0 %v10352_v21 }
  0xc0   :  { %9684 = vmatpush3.bf16.msra.mxu1 %v10349_v20  ;;  %v523_v20 = vrot.slane %v518_v15, %v11651_v31 }
  0xc1   :  { %9685 = vmatprep.subr.bf16.mxu1 %v11481_v30 }
  0xc2   :  { %1228 = vmatpush1.bf16.msra.mxu0 %v10350_v23  ;;  %v527_v23 = vrot.slane %v518_v15, %v11656_v33  ;;  %v10361_v15 = vld [vmem:[#allocation15 + $0x150] ss:$12 sps:$4 sm:$0xff]  }
  0xc3   :  { %1229 = vmatprep.subr.bf16.mxu0 %v10356_v25 }
  0xc4   :  { %9686 = vmatpush3.bf16.msra.mxu1 %v10353_v24 }
  0xc5   :  { %9687 = vmatprep.subr.bf16.mxu1 %v11481_v30 }
  0xc6   :  { %1230 = vmatpush1.bf16.msra.mxu0 %v10354_v27 }
  0xc7   :  { %1476 = vmatprep.subr.bf16.mxu0 %v10360_v29 }
  0xc8   :  { %9688 = vmatpush3.bf16.msra.mxu1 %v10357_v28 }
  0xc9   :  { %9693 = vmatprep.subr.bf16.mxu1 %v11481_v30 }
 0x128   :  { %v357_v36 = vpop.f32.mrf.mxu0 }
 0x12a   :  { %v359_v37 = vpop.f32.mrf.mxu0 }
 0x12b   :  { %v9627_v48 = vpop.f32.mrf.mxu1 }
 0x12c   :  { %v361_v38 = vpop.f32.mrf.mxu0  ;;  %v439_v50 = vadd.f32 %v9627_v48, %v167_v44 }
 0x12d   :  { %v362_v40 = vadd.f32 %v361_v38, %v11660_v34  ;;  %v430_v52 = vpop.f32.mrf.mxu1 }
 0x12e   :  { %v363_v41 = vpop.f32.mrf.mxu0  ;;  %469 = vst [vmem:[#allocation3 + $0x80] sm:$0xff] %v439_v50 }
 0x12f   :  { %464 = vst [vmem:[#allocation3 + $0x58] sm:$0xff] %v362_v40  ;;  %v364_v42 = vadd.f32 %v363_v41, %v11663_v35  ;;  %v9628_v55 = vpop.f32.mrf.mxu1 }
 0x130   :  { %v367_v43 = vpop.f32.mrf.mxu0  ;;  %v442_v57 = vadd.f32 %v9628_v55, %v167_v44 }
 0x131   :  { %465 = vst [vmem:[#allocation3 + $0x20] sm:$0xff] %v364_v42  ;;  %v368_v45 = vadd.f32 %v367_v43, %v11660_v34  ;;  %v433_v59 = vpop.f32.mrf.mxu1 }
 0x132   :  { %v369_v46 = vpop.f32.mrf.mxu0  ;;  %472 = vst [vmem:[#allocation3 + $0x10] sm:$0xff] %v442_v57  ;;  %v434_v62 = vadd.f32 %v433_v59, %v167_v44 }
 0x133   :  { %467 = vst [vmem:[#allocation3 + $0x70] sm:$0xff] %v368_v45  ;;  %v370_v47 = vadd.f32 %v369_v46, %v11663_v35  ;;  %v9631_v0 = vpop.f32.mrf.mxu1 }
 0x134   :  { %v371_v49 = vpop.f32.mrf.mxu0  ;;  %466 = vst [vmem:[#allocation3 + $0x38] sm:$0xff] %v434_v62  ;;  %v455_v3 = vadd.f32 %v9631_v0, %v167_v44 }
 0x135   :  { %468 = vst [vmem:[#allocation3 + $0x78] sm:$0xff] %v370_v47  ;;  %v372_v51 = vadd.f32 %v371_v49, %v11660_v34  ;;  %v446_v5 = vpop.f32.mrf.mxu1 }
 0x136   :  { %v373_v53 = vpop.f32.mrf.mxu0  ;;  %481 = vst [vmem:[#allocation3 + $0x48] sm:$0xff] %v455_v3  ;;  %v447_v7 = vadd.f32 %v446_v5, %v167_v44 }
 0x137   :  { %470 = vst [vmem:[#allocation3 + $0xb0] sm:$0xff] %v372_v51  ;;  %v374_v54 = vadd.f32 %v373_v53, %v11663_v35  ;;  %v9632_v9 = vpop.f32.mrf.mxu1 }
 0x138   :  { %v377_v56 = vpop.f32.mrf.mxu0  ;;  %475 = vst [vmem:[#allocation3 + $0x98] sm:$0xff] %v447_v7  ;;  %v458_v11 = vadd.f32 %v9632_v9, %v167_v44 }
 0x139   :  { %471 = vst [vmem:[#allocation3 + $0x68] sm:$0xff] %v374_v54  ;;  %v378_v58 = vadd.f32 %v377_v56, %v11660_v34  ;;  %v449_v13 = vpop.f32.mrf.mxu1 }
 0x13a   :  { %v379_v60 = vpop.f32.mrf.mxu0  ;;  %484 = vst [vmem:[#allocation3 + $0xb8] sm:$0xff] %v458_v11  ;;  %v450_v16 = vadd.f32 %v449_v13, %v167_v44  ;;  %v10382_v11 = vld [vmem:[#allocation15 + $0x170] ss:$12 sps:$4 sm:$0xff]  }
 0x13b   :  { %473 = vst [vmem:[#allocation3 + $0x60] sm:$0xff] %v378_v58  ;;  %v380_v63 = vadd.f32 %v379_v60, %v11663_v35 }
 0x13c   :  { %v381_v1 = vpop.f32.mrf.mxu0  ;;  %478 = vst [vmem:[#allocation3 + $0x88] sm:$0xff] %v450_v16  ;;  %v10383_v16 = vld [vmem:[#allocation15 + $0x158] ss:$12 sps:$4 sm:$0xff]  }
 0x13d   :  { %474 = vst [vmem:[#allocation3 + $0x90] sm:$0xff] %v380_v63  ;;  %v382_v4 = vadd.f32 %v381_v1, %v11660_v34 }
 0x13e   :  { %v383_v6 = vpop.f32.mrf.mxu0 }
 0x13f   :  { %476 = vst [vmem:[#allocation3 + $0x18] sm:$0xff] %v382_v4  ;;  %v384_v8 = vadd.f32 %v383_v6, %v11663_v35 }
 0x140   :  { %v387_v10 = vpop.f32.mrf.mxu0 }
 0x141   :  { %477 = vst [vmem:[#allocation3 + $0x28] sm:$0xff] %v384_v8  ;;  %v388_v12 = vadd.f32 %v387_v10, %v11660_v34  ;;  %v10358_v10 = vld [vmem:[#allocation15 + $0x168] ss:$12 sps:$4 sm:$0xff]  }
 0x142   :  { %v389_v14 = vpop.f32.mrf.mxu0 }
 0x143   :  { %479 = vst [vmem:[#allocation3 + $0x30] sm:$0xff] %v388_v12  ;;  %v390_v17 = vadd.f32 %v389_v14, %v11663_v35  ;;  %v10363_v14 = vld [vmem:[#allocation15 + $0x154] ss:$12 sps:$4 sm:$0xff]  }
 0x144   :  { %v391_v18 = vpop.f32.mrf.mxu0 }
 0x145   :  { %480 = vst [vmem:[#allocation3 + $0x50] sm:$0xff] %v390_v17  ;;  %v392_v19 = vadd.f32 %v391_v18, %v11660_v34  ;;  %v10366_v17 = vld [vmem:[#allocation15 + $0x13c] ss:$12 sps:$4 sm:$0xff]   ;;  %v10384_v18 = vld [vmem:[#allocation15 + $0x140] ss:$12 sps:$4 sm:$0xff]  }
 0x146   :  { %v393_v21 = vpop.f32.mrf.mxu0 }
 0x147   :  { %482 = vst [vmem:[#allocation3] sm:$0xff] %v392_v19  ;;  %v394_v22 = vadd.f32 %v393_v21, %v11663_v35  ;;  %v781_v35 = vld [vmem:[%s12178_s7] sm:$0x7]  ;;  %v10385_v21 = vld [vmem:[#allocation15 + $0x128] ss:$12 sps:$4 sm:$0xff]  }
 0x148   :  { %v697_v24 = vpop.f32.mrf.mxu0  ;;  %v786_v41 = vrot.slane %v781_v35, %v11651_v31  ;;  %v790_v44 = vrot.slane %v781_v35, %v11656_v33  ;;  %v794_v59 = vrot.slane %v781_v35, %v11665_v39  ;;  %v10369_v19 = vld [vmem:[#allocation15 + $0x124] ss:$12 sps:$4 sm:$0xff]  }
 0x149   :  { %483 = vst [vmem:[#allocation3 + $0xa0] sm:$0xff] %v394_v22  ;;  %v698_v25 = vadd.f32 %v697_v24, %v523_v20  ;;  %v10367_v20 = vld [vmem:[#allocation15 + $0x120] ss:$12 sps:$4 sm:$0xff]   ;;  %v10386_v24 = vld [vmem:[#allocation15 + $0x110] ss:$12 sps:$4 sm:$0xff]  }
 0x14a   :  { %v699_v26 = vpop.f32.mrf.mxu0  ;;  %v10372_v22 = vld [vmem:[#allocation15 + $0x10c] ss:$12 sps:$4 sm:$0xff]  }
 0x14b   :  { %744 = vst [vmem:[#allocation4 + $0x8] sm:$0xff] %v698_v25  ;;  %v700_v27 = vadd.f32 %v699_v26, %v527_v23  ;;  %v738_v34 = vpop.f32.mrf.mxu1  ;;  %v10370_v23 = vld [vmem:[#allocation15 + $0x108] ss:$12 sps:$4 sm:$0xff]   ;;  %v10373_v26 = vld [vmem:[#allocation15 + $0xf0] ss:$12 sps:$4 sm:$0xff]  }
 0x14c   :  { %v701_v28 = vpop.f32.mrf.mxu0  ;;  %v739_v36 = vadd.f32 %v738_v34, %v531_v32  ;;  %v10388_v32 = vld [vmem:[#allocation15 + $0xe0] ss:$12 sps:$4 sm:$0xff]   ;;  %v10381_v34 = vld [vmem:[#allocation15 + $0xc4] ss:$12 sps:$4 sm:$0xff]  }
 0x14d   :  { %745 = vst [vmem:[#allocation4] sm:$0xff] %v700_v27  ;;  %v9651_v37 = vpop.f32.mrf.mxu1  ;;  %v10378_v28 = vld [vmem:[#allocation15 + $0xdc] ss:$12 sps:$4 sm:$0xff]  }
 0x14e   :  { %v702_v29 = vpop.f32.mrf.mxu0  ;;  %746 = vst [vmem:[#allocation4 + $0x10] sm:$0xff] %v739_v36  ;;  %v109_v37 = vld [vmem:[#allocation12 + $0x8] sm:$0xff] }
 0x14f   :  { %v741_v38 = vpop.f32.mrf.mxu1  ;;  %v10376_v29 = vld [vmem:[#allocation15 + $0xd8] ss:$12 sps:$4 sm:$0xff]  }
 0x150   :  { %v10389_v38 = vld [vmem:[#allocation15 + $0xc8] ss:$12 sps:$4 sm:$0xff]  }
 0x151   :  { %v9652_v40 = vpop.f32.mrf.mxu1 }
 0x152   :  { %v1296_v40 = vpack.c.bf16 %v109_v37, %v109_v37 }
 0x168   :  { %v960_v42 = vpop.f32.mrf.mxu0 }
 0x169   :  { %v961_v43 = vadd.f32 %v960_v42, %v786_v41 }
 0x16a   :  { %v962_v45 = vpop.f32.mrf.mxu0 }
 0x16b   :  { %v1010_v46 = vadd.f32 %v961_v43, %v698_v25  ;;  %v963_v49 = vadd.f32 %v962_v45, %v790_v44  ;;  %v1001_v52 = vpop.f32.mrf.mxu1  ;;  %v10375_v25 = vld [vmem:[#allocation15 + $0xf4] ss:$12 sps:$4 sm:$0xff]  }
 0x16c   :  { %v964_v47 = vpop.f32.mrf.mxu0  ;;  %v1002_v63 = vadd.f32 %v1001_v52, %v794_v59 }
 0x16d   :  { %v8625_v48 = vmul.f32 -1.442695, %v1010_v46  ;;  %v1017_v51 = vadd.f32 %v963_v49, %v700_v27  ;;  %v9671_v54 = vpop.f32.mrf.mxu1  ;;  %v10387_v27 = vld [vmem:[#allocation15 + $0xf8] ss:$12 sps:$4 sm:$0xff]   ;;  %v8652_v49 = vld [vmem:[%s12178_s7 + $0x3] sm:$0x7] }
 0x16e   :  { %v965_v50 = vpop.f32.mrf.mxu0 }
 0x16f   :  { %10390 = vpow2.f32 %v8625_v48  ;;  %v8626_v53 = vmul.f32 -1.442695, %v1017_v51  ;;  %v1004_v55 = vpop.f32.mrf.mxu1  ;;  %v8627_v48 = vld [vmem:[%s12177_s6 + $0x3] sm:$0x7]  ;;  %v1336_v51 = vrot.slane %v8652_v49, %v11651_v31 }
 0x170   :  { %v1075_v50 = vrot.slane %v8627_v48, %v11651_v31  ;;  %v1079_v59 = vrot.slane %v8627_v48, %v11656_v33 }
 0x171   :  { %10392 = vpow2.f32 %v8626_v53  ;;  %v9672_v56 = vpop.f32.mrf.mxu1 }
 0x172   :  { %v1340_v56 = vrot.slane %v8652_v49, %v11656_v33 }
 0x17c   :  { %v10391_v57 = vpop.eup %10390 }
 0x17d   :  { %v1014_v58 = vadd.f32 1.0, %v10391_v57 }
 0x17e   :  { %v10393_v60 = vpop.eup %10392 }
 0x17f   :  { %10394 = vrcp.f32 %v1014_v58  ;;  %v1021_v62 = vadd.f32 1.0, %v10393_v60 }
 0x181   :  { %10396 = vrcp.f32 %v1021_v62 }
 0x18c   :  { %v10395_v0 = vpop.eup %10394 }
 0x18d   :  { %v1024_v1 = vmul.f32 %v10395_v0, %v1002_v63 }
 0x18e   :  { %v10397_v4 = vpop.eup %10396 }
 0x18f   :  { %v1025_v3 = vadd.f32 %v1024_v1, %v739_v36  ;;  %v1027_v5 = vsub.f32 1.0, %v10397_v4  ;;  %v1029_v8 = vmul.f32 %v10397_v4, %v11632_v61  ;;  %v10364_v61 = vld [vmem:[#allocation15 + $0x138] ss:$12 sps:$4 sm:$0xff]   ;;  %v10379_v36 = vld [vmem:[#allocation15 + $0xc0] ss:$12 sps:$4 sm:$0xff]  }
 0x191   :  { %10398 = vtanh.f32 %v1025_v3 }
 0x19e   :  { %v10399_v6 = vpop.eup %10398 }
 0x19f   :  { %v1028_v7 = vmul.f32 %v10399_v6, %v1027_v5 }
 0x1a1   :  { %v1030_v9 = vadd.f32 %v1029_v8, %v1028_v7 }
 0x1a3   :  { %v1031_v12 = vmax.f32 %v1030_v9, 0.0  ;;  %v1035_v13 = vpack.c.bf16 %v1030_v9, %v1030_v9 }
 0x1a5   :  { %1032 = vst [vmem:[#allocation2] sm:$0xff] %v1031_v12  ;;  %1248 = vmatmul.mubr.bf16.vlgmr.msra.gmra.mxu0 %v1035_v13  ;;  %9690 = vmatmul.mubr.bf16.vlgmr.msra.gmra.mxu1 %v1035_v13  ;;  %v1083_v12 = vrot.slane %v8627_v48, %v11665_v39 }
 0x1a6   :  { %1477 = vmatpush1.bf16.msra.mxu0 %v10358_v10  ;;  %9694 = vmatpush3.bf16.msra.mxu1 %v10382_v11  ;;  %v1344_v10 = vrot.slane %v8652_v49, %v11665_v39 }
 0x1a7   :  { %1478 = vmatprep.subr.bf16.mxu0 %v10363_v14  ;;  %1508 = vmatprep.mubr.bf16.mxu0 %v11480_v2 }
 0x1a8   :  { %9695 = vmatprep.subr.bf16.mxu1 %v11481_v30  ;;  %9709 = vmatprep.mubr.msk.bf16.mxu1 %vm11482_vm0, %v11481_v30 }
 0x1aa   :  { %1479 = vmatpush1.bf16.msra.mxu0 %v10361_v15  ;;  %9696 = vmatpush3.bf16.msra.mxu1 %v10383_v16 }
 0x1ab   :  { %1480 = vmatprep.subr.bf16.mxu0 %v10366_v17  ;;  %9697 = vmatprep.subr.bf16.mxu1 %v11481_v30 }
 0x1ae   :  { %1481 = vmatpush1.bf16.msra.mxu0 %v10364_v61  ;;  %9698 = vmatpush3.bf16.msra.mxu1 %v10384_v18 }
 0x1af   :  { %1482 = vmatprep.subr.bf16.mxu0 %v10369_v19  ;;  %9699 = vmatprep.subr.bf16.mxu1 %v11481_v30 }
 0x1b2   :  { %1483 = vmatpush1.bf16.msra.mxu0 %v10367_v20  ;;  %9700 = vmatpush3.bf16.msra.mxu1 %v10385_v21 }
 0x1b3   :  { %1484 = vmatprep.subr.bf16.mxu0 %v10372_v22  ;;  %9701 = vmatprep.subr.bf16.mxu1 %v11481_v30 }
 0x1b6   :  { %1485 = vmatpush1.bf16.msra.mxu0 %v10370_v23  ;;  %9702 = vmatpush3.bf16.msra.mxu1 %v10386_v24 }
 0x1b7   :  { %1486 = vmatprep.subr.bf16.mxu0 %v10375_v25  ;;  %9703 = vmatprep.subr.bf16.mxu1 %v11481_v30 }
 0x1ba   :  { %1487 = vmatpush1.bf16.msra.mxu0 %v10373_v26  ;;  %9704 = vmatpush3.bf16.msra.mxu1 %v10387_v27 }
 0x1bb   :  { %1488 = vmatprep.subr.bf16.mxu0 %v10378_v28  ;;  %9705 = vmatprep.subr.bf16.mxu1 %v11481_v30 }
 0x1be   :  { %1489 = vmatpush1.bf16.msra.mxu0 %v10376_v29  ;;  %9706 = vmatpush3.bf16.msra.mxu1 %v10388_v32 }
 0x1bf   :  { %1490 = vmatprep.subr.bf16.mxu0 %v10381_v34  ;;  %9707 = vmatprep.subr.bf16.mxu1 %v11481_v30 }
 0x1c2   :  { %1491 = vmatpush1.bf16.msra.mxu0 %v10379_v36  ;;  %9708 = vmatpush3.bf16.msra.mxu1 %v10389_v38 }
 0x1c5   :  { %1509 = vmatmul.mubr.bf16.vlgmr.msra.gmra.mxu0 %v1296_v40  ;;  %9710 = vmatmul.mubr.bf16.vlgmr.msra.gmra.mxu1 %v1296_v40 }
 0x265   :  { %v1249_v35 = vpop.f32.mrf.mxu0  ;;  %v1290_v41 = vpop.f32.mrf.mxu1 }
 0x266   :  { %v1250_v54 = vadd.f32 %v1249_v35, %v1075_v50  ;;  %v1291_v16 = vadd.f32 %v1290_v41, %v1083_v12 }
 0x267   :  { %v1251_v42 = vpop.f32.mrf.mxu0  ;;  %v9691_v43 = vpop.f32.mrf.mxu1 }
 0x268   :  { %v1252_v5 = vadd.f32 %v1251_v42, %v1079_v59 }
 0x269   :  { %v1253_v44 = vpop.f32.mrf.mxu0  ;;  %v1293_v45 = vpop.f32.mrf.mxu1 }
 0x26b   :  { %v1254_v46 = vpop.f32.mrf.mxu0  ;;  %v9692_v47 = vpop.f32.mrf.mxu1 }
 0x285   :  { %v1510_v52 = vpop.f32.mrf.mxu0  ;;  %v1551_v53 = vpop.f32.mrf.mxu1 }
 0x286   :  { %v1511_v55 = vadd.f32 %v1510_v52, %v1336_v51  ;;  %v1552_v14 = vadd.f32 %v1551_v53, %v1344_v10 }
 0x287   :  { %v1512_v57 = vpop.f32.mrf.mxu0  ;;  %v9711_v58 = vpop.f32.mrf.mxu1 }
 0x288   :  { %v1557_v60 = vadd.f32 %v1511_v55, %v1250_v54  ;;  %v1513_v1 = vadd.f32 %v1512_v57, %v1340_v56 }
 0x289   :  { %v1514_v62 = vpop.f32.mrf.mxu0  ;;  %v1554_v63 = vpop.f32.mrf.mxu1 }
 0x28a   :  { %v8677_v0 = vmul.f32 -1.442695, %v1557_v60  ;;  %v1564_v6 = vadd.f32 %v1513_v1, %v1252_v5 }
 0x28b   :  { %v1515_v3 = vpop.f32.mrf.mxu0  ;;  %v9712_v4 = vpop.f32.mrf.mxu1 }
 0x28c   :  { %10400 = vpow2.f32 %v8677_v0  ;;  %v8678_v7 = vmul.f32 -1.442695, %v1564_v6 }
 0x28e   :  { %10402 = vpow2.f32 %v8678_v7 }
 0x299   :  { %v10401_v8 = vpop.eup %10400 }
 0x29a   :  { %v1561_v9 = vadd.f32 1.0, %v10401_v8 }
 0x29b   :  { %v10403_v11 = vpop.eup %10402 }
 0x29c   :  { %10404 = vrcp.f32 %v1561_v9  ;;  %v1568_v13 = vadd.f32 1.0, %v10403_v11 }
 0x29e   :  { %10406 = vrcp.f32 %v1568_v13 }
 0x2a9   :  { %v10405_v15 = vpop.eup %10404 }
 0x2aa   :  { %v1571_v17 = vmul.f32 %v10405_v15, %v1552_v14 }
 0x2ab   :  { %v10407_v18 = vpop.eup %10406 }
 0x2ac   :  { %v1572_v61 = vadd.f32 %v1571_v17, %v1291_v16  ;;  %v1574_v19 = vsub.f32 1.0, %v10407_v18  ;;  %v1576_v21 = vmul.f32 %v10407_v18, %v109_v37 }
 0x2ae   :  { %10408 = vtanh.f32 %v1572_v61 }
 0x2bb   :  { %v10409_v20 = vpop.eup %10408 }
 0x2bc   :  { %v1575_v22 = vmul.f32 %v10409_v20, %v1574_v19 }
 0x2be   :  { %v11719_v23 = vadd.f32 %v1576_v21, %v1575_v22  ;;  %1586 = sbr.rel (%p8680_p11) target bundleno = 710 (0x2c6), region = 61 }
 0x2c0   :  { %v1578_v24 = vmax.f32 %v11719_v23, 0.0  ;;  %1581 = vst [vmem:[#allocation16 + $0x8] sm:$0xff] %v11719_v23 }
 0x2c2   :  { %1579 = vst [vmem:[#allocation2 + $0x8] sm:$0xff] %v1578_v24 }
 0x2c3   :  { %v1590_v25 = vld [vmem:[#allocation3 + $0x58] sm:$0xff]  ;;  %v1591_v26 = vld [vmem:[#allocation3 + $0x20] sm:$0xff] }
 0x2c4   :  { %v1592_v27 = vld [vmem:[#allocation3 + $0x38] sm:$0xff]  ;;  %1593 = vst [vmem:[#allocation4 + $0x8] sm:$0xff] %v1590_v25  ;;  %1594 = vst [vmem:[#allocation4] sm:$0xff] %v1591_v26 }
 0x2c5   :  { %1595 = vst [vmem:[#allocation4 + $0x10] sm:$0xff] %v1592_v27 }
 0x2c6 PF:  { %p8681_p12 = scmp.gt.s32.totalorder %s11705_s17, 0 }
 0x2c8   :  { %1599 = sbr.rel (%p8681_p12) target bundleno = 950 (0x3b6), region = 65 }
 0x2cd   :  { %v10410_v28 = vld [vmem:[#allocation13 + $0xac] ss:$12 sps:$4 sm:$0xff]   ;;  %v11483_v29 = vmov 0.0   ;;  %v10412_v32 = vld [vmem:[#allocation13 + $0xb0] ss:$12 sps:$4 sm:$0xff]   ;;  %vm11484_vm1 = vmmov 0   ;;  %v1600_v58 = vpack.c.bf16 %v11719_v23, %v11719_v23 }
 0x2ce   :  { %9713 = vmatprep.subr.bf16.mxu1 %v11483_v29  ;;  %9729 = vmatprep.mubr.msk.bf16.mxu1 %vm11484_vm1, %v11483_v29  ;;  %v10413_v34 = vld [vmem:[#allocation13 + $0xa8] ss:$12 sps:$4 sm:$0xff]   ;;  %v11485_v37 = vmov 0   ;;  %v10416_v38 = vld [vmem:[#allocation13 + $0x98] ss:$12 sps:$4 sm:$0xff]  }
 0x2cf   :  { %1778 = vmatprep.subr.bf16.mxu0 %v10410_v28  ;;  %9714 = vmatpush3.bf16.msra.mxu1 %v10412_v32  ;;  %v10414_v36 = vld [vmem:[#allocation13 + $0x94] ss:$12 sps:$4 sm:$0xff]   ;;  %v10417_v40 = vld [vmem:[#allocation13 + $0x90] ss:$12 sps:$4 sm:$0xff]   ;;  %v10421_v42 = vld [vmem:[#allocation13 + $0x78] ss:$12 sps:$4 sm:$0xff]  }
 0x2d0   :  { %1810 = vmatprep.mubr.bf16.mxu0 %v11485_v37  ;;  %1779 = vmatpush1.bf16.msra.mxu0 %v10413_v34  ;;  %v10418_v35 = vld [vmem:[#allocation13 + $0x7c] ss:$12 sps:$4 sm:$0xff]   ;;  %v10420_v41 = vld [vmem:[#allocation13 + $0x80] ss:$12 sps:$4 sm:$0xff]   ;;  %v10422_v43 = vld [vmem:[#allocation13 + $0x64] ss:$12 sps:$4 sm:$0xff]  }
 0x2d1   :  { %9715 = vmatprep.subr.bf16.mxu1 %v11483_v29  ;;  %1780 = vmatprep.subr.bf16.mxu0 %v10414_v36  ;;  %v10424_v44 = vld [vmem:[#allocation13 + $0x68] ss:$12 sps:$4 sm:$0xff]   ;;  %v10425_v45 = vld [vmem:[#allocation13 + $0x60] ss:$12 sps:$4 sm:$0xff]   ;;  %v10428_v47 = vld [vmem:[#allocation13 + $0x50] ss:$12 sps:$4 sm:$0xff]  }
 0x2d2   :  { %v10426_v46 = vld [vmem:[#allocation13 + $0x4c] ss:$12 sps:$4 sm:$0xff]   ;;  %v10429_v48 = vld [vmem:[#allocation13 + $0x48] ss:$12 sps:$4 sm:$0xff]   ;;  %v10433_v51 = vld [vmem:[#allocation13 + $0x30] ss:$12 sps:$4 sm:$0xff]  }
 0x2d3   :  { %9716 = vmatpush3.bf16.msra.mxu1 %v10416_v38  ;;  %v10430_v49 = vld [vmem:[#allocation13 + $0x34] ss:$12 sps:$4 sm:$0xff]   ;;  %v10432_v50 = vld [vmem:[#allocation13 + $0x38] ss:$12 sps:$4 sm:$0xff]   ;;  %v10434_v52 = vld [vmem:[#allocation13 + $0x1c] ss:$12 sps:$4 sm:$0xff]  }
 0x2d4   :  { %1781 = vmatpush1.bf16.msra.mxu0 %v10417_v40  ;;  %9717 = vmatprep.subr.bf16.mxu1 %v11483_v29  ;;  %v10436_v53 = vld [vmem:[#allocation13 + $0x20] ss:$12 sps:$4 sm:$0xff]   ;;  %v10437_v54 = vld [vmem:[#allocation13 + $0x18] ss:$12 sps:$4 sm:$0xff]   ;;  %v10440_v56 = vld [vmem:[#allocation13 + $0x8] ss:$12 sps:$4 sm:$0xff]  }
 0x2d5   :  { %1782 = vmatprep.subr.bf16.mxu0 %v10418_v35  ;;  %v10438_v55 = vld [vmem:[#allocation13 + $0x4] ss:$12 sps:$4 sm:$0xff]   ;;  %v10441_v57 = vld [vmem:[#allocation13] ss:$12 sps:$4 sm:$0xff]  }
 0x2d6   :  { %v1633_v59 = vld [vmem:[%s12177_s6] sm:$0x7] }
 0x2d7   :  { %9718 = vmatpush3.bf16.msra.mxu1 %v10420_v41  ;;  %v1646_v60 = vrot.slane %v1633_v59, %v11665_v39  ;;  %v1638_v62 = vrot.slane %v1633_v59, %v11651_v31  ;;  %v1642_v0 = vrot.slane %v1633_v59, %v11656_v33 }
 0x2d8   :  { %1783 = vmatpush1.bf16.msra.mxu0 %v10421_v42  ;;  %9719 = vmatprep.subr.bf16.mxu1 %v11483_v29 }
 0x2d9   :  { %1784 = vmatprep.subr.bf16.mxu0 %v10422_v43 }
 0x2db   :  { %9720 = vmatpush3.bf16.msra.mxu1 %v10424_v44 }
 0x2dc   :  { %1785 = vmatpush1.bf16.msra.mxu0 %v10425_v45  ;;  %9721 = vmatprep.subr.bf16.mxu1 %v11483_v29 }
 0x2dd   :  { %1786 = vmatprep.subr.bf16.mxu0 %v10426_v46 }
 0x2df   :  { %9722 = vmatpush3.bf16.msra.mxu1 %v10428_v47 }
 0x2e0   :  { %1787 = vmatpush1.bf16.msra.mxu0 %v10429_v48  ;;  %9723 = vmatprep.subr.bf16.mxu1 %v11483_v29 }
 0x2e1   :  { %1788 = vmatprep.subr.bf16.mxu0 %v10430_v49 }
 0x2e3   :  { %9724 = vmatpush3.bf16.msra.mxu1 %v10432_v50 }
 0x2e4   :  { %1789 = vmatpush1.bf16.msra.mxu0 %v10433_v51  ;;  %9725 = vmatprep.subr.bf16.mxu1 %v11483_v29 }
 0x2e5   :  { %1790 = vmatprep.subr.bf16.mxu0 %v10434_v52 }
 0x2e7   :  { %9726 = vmatpush3.bf16.msra.mxu1 %v10436_v53 }
 0x2e8   :  { %1791 = vmatpush1.bf16.msra.mxu0 %v10437_v54  ;;  %9727 = vmatprep.subr.bf16.mxu1 %v11483_v29 }
 0x2e9   :  { %1792 = vmatprep.subr.bf16.mxu0 %v10438_v55 }
 0x2eb   :  { %9728 = vmatpush3.bf16.msra.mxu1 %v10440_v56 }
 0x2ec   :  { %1793 = vmatpush1.bf16.msra.mxu0 %v10441_v57 }
 0x2ee   :  { %9730 = vmatmul.mubr.bf16.vlgmr.msra.gmra.mxu1 %v1600_v58 }
 0x2ef   :  { %1811 = vmatmul.mubr.bf16.vlgmr.msra.gmra.mxu0 %v1600_v58 }
 0x3ae   :  { %v1853_v63 = vpop.f32.mrf.mxu1 }
 0x3af   :  { %v1854_v1 = vadd.f32 %v1853_v63, %v1646_v60  ;;  %v1812_v3 = vpop.f32.mrf.mxu0 }
 0x3b0   :  { %v1813_v4 = vadd.f32 %v1812_v3, %v1638_v62  ;;  %v9731_v5 = vpop.f32.mrf.mxu1 }
 0x3b1   :  { %1861 = vst [vmem:[#allocation4 + $0x10] sm:$0xff] %v1854_v1  ;;  %v1814_v6 = vpop.f32.mrf.mxu0 }
 0x3b2   :  { %1859 = vst [vmem:[#allocation4 + $0x8] sm:$0xff] %v1813_v4  ;;  %v1815_v7 = vadd.f32 %v1814_v6, %v1642_v0  ;;  %v1856_v8 = vpop.f32.mrf.mxu1 }
 0x3b3   :  { %v1816_v9 = vpop.f32.mrf.mxu0 }
 0x3b4   :  { %1860 = vst [vmem:[#allocation4] sm:$0xff] %v1815_v7  ;;  %v9732_v10 = vpop.f32.mrf.mxu1 }
 0x3b5   :  { %v1817_v11 = vpop.f32.mrf.mxu0 }
 0x3b6 PF:  { %v10442_v12 = vld [vmem:[#allocation15 + $0xac] ss:$12 sps:$4 sm:$0xff]   ;;  %9733 = vmatprep.subr.bf16.mxu1 %v11481_v30  ;;  %2073 = vmatprep.mubr.bf16.mxu0 %v11480_v2  ;;  %v10444_v13 = vld [vmem:[#allocation15 + $0xa8] ss:$12 sps:$4 sm:$0xff]   ;;  %v10447_v15 = vld [vmem:[#allocation15 + $0x90] ss:$12 sps:$4 sm:$0xff]  }
 0x3b7   :  { %9749 = vmatprep.mubr.msk.bf16.mxu1 %vm11482_vm0, %v11481_v30  ;;  %2041 = vmatprep.subr.bf16.mxu0 %v10442_v12  ;;  %v10445_v14 = vld [vmem:[#allocation15 + $0x94] ss:$12 sps:$4 sm:$0xff]   ;;  %v10448_v16 = vld [vmem:[#allocation15 + $0x7c] ss:$12 sps:$4 sm:$0xff]   ;;  %v10450_v17 = vld [vmem:[#allocation15 + $0x78] ss:$12 sps:$4 sm:$0xff]  }
 0x3b8   :  { %2042 = vmatpush1.bf16.msra.mxu0 %v10444_v13  ;;  %v10451_v61 = vld [vmem:[#allocation15 + $0x64] ss:$12 sps:$4 sm:$0xff]   ;;  %v10453_v18 = vld [vmem:[#allocation15 + $0x60] ss:$12 sps:$4 sm:$0xff]   ;;  %v10456_v22 = vld [vmem:[#allocation15 + $0x48] ss:$12 sps:$4 sm:$0xff]  }
 0x3b9   :  { %2043 = vmatprep.subr.bf16.mxu0 %v10445_v14  ;;  %v10466_v19 = vld [vmem:[#allocation15 + $0xb0] ss:$12 sps:$4 sm:$0xff]   ;;  %v10454_v20 = vld [vmem:[#allocation15 + $0x4c] ss:$12 sps:$4 sm:$0xff]   ;;  %v10457_v23 = vld [vmem:[#allocation15 + $0x34] ss:$12 sps:$4 sm:$0xff]  }
 0x3ba   :  { %9734 = vmatpush3.bf16.msra.mxu1 %v10466_v19  ;;  %v10467_v21 = vld [vmem:[#allocation15 + $0x98] ss:$12 sps:$4 sm:$0xff]   ;;  %v10459_v24 = vld [vmem:[#allocation15 + $0x30] ss:$12 sps:$4 sm:$0xff]   ;;  %v10468_v25 = vld [vmem:[#allocation15 + $0x80] ss:$12 sps:$4 sm:$0xff]  }
 0x3bb   :  { %9735 = vmatprep.subr.bf16.mxu1 %v11481_v30  ;;  %v10460_v26 = vld [vmem:[#allocation15 + $0x1c] ss:$12 sps:$4 sm:$0xff]   ;;  %v10462_v28 = vld [vmem:[#allocation15 + $0x18] ss:$12 sps:$4 sm:$0xff]   ;;  %v10465_v34 = vld [vmem:[#allocation15] ss:$12 sps:$4 sm:$0xff]  }
 0x3bc   :  { %2044 = vmatpush1.bf16.msra.mxu0 %v10447_v15  ;;  %v10469_v27 = vld [vmem:[#allocation15 + $0x68] ss:$12 sps:$4 sm:$0xff]   ;;  %v10463_v29 = vld [vmem:[#allocation15 + $0x4] ss:$12 sps:$4 sm:$0xff]   ;;  %v10472_v40 = vld [vmem:[#allocation15 + $0x20] ss:$12 sps:$4 sm:$0xff]  }
 0x3bd   :  { %2045 = vmatprep.subr.bf16.mxu0 %v10448_v16  ;;  %v10470_v32 = vld [vmem:[#allocation15 + $0x50] ss:$12 sps:$4 sm:$0xff]   ;;  %v11740_v36 = vld [vmem:[#allocation2] sm:$0xff]  ;;  %v10473_v35 = vld [vmem:[#allocation15 + $0x8] ss:$12 sps:$4 sm:$0xff]   ;;  %s11777_s25 = sld [smem:[#allocation5 + $0x2]] }
 0x3be   :  { %9736 = vmatpush3.bf16.msra.mxu1 %v10467_v21  ;;  %v10471_v37 = vld [vmem:[#allocation15 + $0x38] ss:$12 sps:$4 sm:$0xff]   ;;  %v1863_v38 = vpack.c.bf16 %v11740_v36, %v11740_v36  ;;  %v10474_v42 = vld [vmem:[#allocation13 + $0x168] ss:$12 sps:$4 sm:$0xff]   ;;  %v10477_v43 = vld [vmem:[#allocation13 + $0x170] ss:$12 sps:$4 sm:$0xff]  }
 0x3bf   :  { %9737 = vmatprep.subr.bf16.mxu1 %v11481_v30  ;;  %v10476_v41 = vld [vmem:[#allocation13 + $0x16c] ss:$12 sps:$4 sm:$0xff]   ;;  %v10480_v44 = vld [vmem:[#allocation13 + $0x154] ss:$12 sps:$4 sm:$0xff]   ;;  %v10478_v45 = vld [vmem:[#allocation13 + $0x150] ss:$12 sps:$4 sm:$0xff]  }
 0x3c0   :  { %2046 = vmatpush1.bf16.msra.mxu0 %v10450_v17  ;;  %v10481_v46 = vld [vmem:[#allocation13 + $0x158] ss:$12 sps:$4 sm:$0xff]   ;;  %v10484_v47 = vld [vmem:[#allocation13 + $0x13c] ss:$12 sps:$4 sm:$0xff]   ;;  %v10485_v49 = vld [vmem:[#allocation13 + $0x140] ss:$12 sps:$4 sm:$0xff]  }
 0x3c1   :  { %2047 = vmatprep.subr.bf16.mxu0 %v10451_v61  ;;  %v10482_v48 = vld [vmem:[#allocation13 + $0x138] ss:$12 sps:$4 sm:$0xff]   ;;  %v10486_v51 = vld [vmem:[#allocation13 + $0x120] ss:$12 sps:$4 sm:$0xff]   ;;  %v10489_v52 = vld [vmem:[#allocation13 + $0x128] ss:$12 sps:$4 sm:$0xff]  }
 0x3c2   :  { %9738 = vmatpush3.bf16.msra.mxu1 %v10468_v25  ;;  %v10488_v50 = vld [vmem:[#allocation13 + $0x124] ss:$12 sps:$4 sm:$0xff]   ;;  %v10490_v53 = vld [vmem:[#allocation13 + $0x108] ss:$12 sps:$4 sm:$0xff]   ;;  %v10492_v54 = vld [vmem:[#allocation13 + $0x10c] ss:$12 sps:$4 sm:$0xff]  }
 0x3c3   :  { %9739 = vmatprep.subr.bf16.mxu1 %v11481_v30  ;;  %v10493_v55 = vld [vmem:[#allocation13 + $0x110] ss:$12 sps:$4 sm:$0xff]   ;;  %v10496_v56 = vld [vmem:[#allocation13 + $0xf4] ss:$12 sps:$4 sm:$0xff]   ;;  %v10497_v58 = vld [vmem:[#allocation13 + $0xf8] ss:$12 sps:$4 sm:$0xff]  }
 0x3c4   :  { %2048 = vmatpush1.bf16.msra.mxu0 %v10453_v18  ;;  %v10494_v57 = vld [vmem:[#allocation13 + $0xf0] ss:$12 sps:$4 sm:$0xff]   ;;  %v10498_v60 = vld [vmem:[#allocation13 + $0xd8] ss:$12 sps:$4 sm:$0xff]   ;;  %v10501_v62 = vld [vmem:[#allocation13 + $0xe0] ss:$12 sps:$4 sm:$0xff]  }
 0x3c5   :  { %2049 = vmatprep.subr.bf16.mxu0 %v10454_v20  ;;  %v10500_v59 = vld [vmem:[#allocation13 + $0xdc] ss:$12 sps:$4 sm:$0xff]   ;;  %v10504_v63 = vld [vmem:[#allocation13 + $0xc4] ss:$12 sps:$4 sm:$0xff]   ;;  %v10502_v0 = vld [vmem:[#allocation13 + $0xc0] ss:$12 sps:$4 sm:$0xff]  }
 0x3c6   :  { %9740 = vmatpush3.bf16.msra.mxu1 %v10469_v27  ;;  %v10505_v1 = vld [vmem:[#allocation13 + $0xc8] ss:$12 sps:$4 sm:$0xff]   ;;  %v10508_v3 = vld [vmem:[#allocation15 + $0x16c] ss:$12 sps:$4 sm:$0xff]   ;;  %v1896_v4 = vld [vmem:[%s12178_s7] sm:$0x7] }
 0x3c7   :  { %9741 = vmatprep.subr.bf16.mxu1 %v11481_v30  ;;  %v1901_v5 = vrot.slane %v1896_v4, %v11651_v31  ;;  %v2122_v7 = vld [vmem:[#allocation4 + $0x8] sm:$0xff]  ;;  %v1905_v9 = vrot.slane %v1896_v4, %v11656_v33  ;;  %v2123_v15 = vld [vmem:[#allocation4] sm:$0xff]  ;;  %p8785_p13 = scmp.le.s32.totalorder %s11777_s25, 0 }
 0x3c8   :  { %2050 = vmatpush1.bf16.msra.mxu0 %v10456_v22 }
 0x3c9   :  { %2051 = vmatprep.subr.bf16.mxu0 %v10457_v23 }
 0x3ca   :  { %9742 = vmatpush3.bf16.msra.mxu1 %v10470_v32 }
 0x3cb   :  { %9743 = vmatprep.subr.bf16.mxu1 %v11481_v30 }
 0x3cc   :  { %2052 = vmatpush1.bf16.msra.mxu0 %v10459_v24  ;;  %v1909_v24 = vrot.slane %v1896_v4, %v11665_v39  ;;  %v2148_v4 = vld [vmem:[#allocation2 + $0x8] sm:$0xff] }
 0x3cd   :  { %2053 = vmatprep.subr.bf16.mxu0 %v10460_v26 }
 0x3ce   :  { %9744 = vmatpush3.bf16.msra.mxu1 %v10471_v37 }
 0x3cf   :  { %9745 = vmatprep.subr.bf16.mxu1 %v11481_v30 }
 0x3d0   :  { %2054 = vmatpush1.bf16.msra.mxu0 %v10462_v28 }
 0x3d1   :  { %2055 = vmatprep.subr.bf16.mxu0 %v10463_v29  ;;  %v2124_v29 = vld [vmem:[#allocation4 + $0x10] sm:$0xff] }
 0x3d2   :  { %9746 = vmatpush3.bf16.msra.mxu1 %v10472_v40 }
 0x3d3   :  { %9747 = vmatprep.subr.bf16.mxu1 %v11481_v30 }
 0x3d4   :  { %2056 = vmatpush1.bf16.msra.mxu0 %v10465_v34 }
 0x3d5   :  { %2327 = vmatprep.subr.bf16.mxu0 %v10476_v41 }
 0x3d6   :  { %9748 = vmatpush3.bf16.msra.mxu1 %v10473_v35 }
 0x3d7   :  { %2074 = vmatmul.mubr.bf16.vlgmr.msra.gmra.mxu0 %v1863_v38  ;;  %9753 = vmatprep.subr.bf16.mxu1 %v11481_v30 }
 0x3d8   :  { %2359 = vmatprep.mubr.bf16.mxu0 %v11480_v2  ;;  %2328 = vmatpush1.bf16.msra.mxu0 %v10474_v42 }
 0x3d9   :  { %9750 = vmatmul.mubr.bf16.vlgmr.msra.gmra.mxu1 %v1863_v38  ;;  %2329 = vmatprep.subr.bf16.mxu0 %v10480_v44  ;;  %v10530_v44 = vld [vmem:[#allocation15 + $0x170] ss:$12 sps:$4 sm:$0xff]  }
 0x3da   :  { %9769 = vmatprep.mubr.msk.bf16.mxu1 %vm11482_vm0, %v11481_v30  ;;  %9754 = vmatpush3.bf16.msra.mxu1 %v10477_v43  ;;  %v10506_v43 = vld [vmem:[#allocation15 + $0x168] ss:$12 sps:$4 sm:$0xff]  }
 0x3db   :  { %9755 = vmatprep.subr.bf16.mxu1 %v11481_v30 }
 0x3dc   :  { %2330 = vmatpush1.bf16.msra.mxu0 %v10478_v45 }
 0x3dd   :  { %2331 = vmatprep.subr.bf16.mxu0 %v10484_v47  ;;  %v10511_v47 = vld [vmem:[#allocation15 + $0x154] ss:$12 sps:$4 sm:$0xff]  }
 0x3de   :  { %9756 = vmatpush3.bf16.msra.mxu1 %v10481_v46 }
 0x3df   :  { %9757 = vmatprep.subr.bf16.mxu1 %v11481_v30 }
 0x3e0   :  { %2332 = vmatpush1.bf16.msra.mxu0 %v10482_v48  ;;  %v10509_v48 = vld [vmem:[#allocation15 + $0x150] ss:$12 sps:$4 sm:$0xff]  }
 0x3e1   :  { %2333 = vmatprep.subr.bf16.mxu0 %v10488_v50  ;;  %v10514_v50 = vld [vmem:[#allocation15 + $0x13c] ss:$12 sps:$4 sm:$0xff]  }
 0x3e2   :  { %9758 = vmatpush3.bf16.msra.mxu1 %v10485_v49  ;;  %v10531_v49 = vld [vmem:[#allocation15 + $0x158] ss:$12 sps:$4 sm:$0xff]  }
 0x3e3   :  { %9759 = vmatprep.subr.bf16.mxu1 %v11481_v30 }
 0x3e4   :  { %2334 = vmatpush1.bf16.msra.mxu0 %v10486_v51  ;;  %v10532_v51 = vld [vmem:[#allocation15 + $0x140] ss:$12 sps:$4 sm:$0xff]  }
 0x3e5   :  { %2335 = vmatprep.subr.bf16.mxu0 %v10492_v54  ;;  %v10533_v54 = vld [vmem:[#allocation15 + $0x128] ss:$12 sps:$4 sm:$0xff]  }
 0x3e6   :  { %9760 = vmatpush3.bf16.msra.mxu1 %v10489_v52  ;;  %v10517_v52 = vld [vmem:[#allocation15 + $0x124] ss:$12 sps:$4 sm:$0xff]  }
 0x3e7   :  { %9761 = vmatprep.subr.bf16.mxu1 %v11481_v30 }
 0x3e8   :  { %2336 = vmatpush1.bf16.msra.mxu0 %v10490_v53  ;;  %v10515_v53 = vld [vmem:[#allocation15 + $0x120] ss:$12 sps:$4 sm:$0xff]  }
 0x3e9   :  { %2337 = vmatprep.subr.bf16.mxu0 %v10496_v56  ;;  %v10518_v56 = vld [vmem:[#allocation15 + $0x108] ss:$12 sps:$4 sm:$0xff]  }
 0x3ea   :  { %9762 = vmatpush3.bf16.msra.mxu1 %v10493_v55  ;;  %v10520_v55 = vld [vmem:[#allocation15 + $0x10c] ss:$12 sps:$4 sm:$0xff]  }
 0x3eb   :  { %9763 = vmatprep.subr.bf16.mxu1 %v11481_v30 }
 0x3ec   :  { %2338 = vmatpush1.bf16.msra.mxu0 %v10494_v57  ;;  %v10534_v57 = vld [vmem:[#allocation15 + $0x110] ss:$12 sps:$4 sm:$0xff]  }
 0x3ed   :  { %2339 = vmatprep.subr.bf16.mxu0 %v10500_v59  ;;  %v10521_v59 = vld [vmem:[#allocation15 + $0xf0] ss:$12 sps:$4 sm:$0xff]  }
 0x3ee   :  { %9764 = vmatpush3.bf16.msra.mxu1 %v10497_v58  ;;  %v10523_v58 = vld [vmem:[#allocation15 + $0xf4] ss:$12 sps:$4 sm:$0xff]  }
 0x3ef   :  { %9765 = vmatprep.subr.bf16.mxu1 %v11481_v30 }
 0x3f0   :  { %2340 = vmatpush1.bf16.msra.mxu0 %v10498_v60  ;;  %v10535_v60 = vld [vmem:[#allocation15 + $0xf8] ss:$12 sps:$4 sm:$0xff]  }
 0x3f1   :  { %2341 = vmatprep.subr.bf16.mxu0 %v10504_v63  ;;  %v10524_v63 = vld [vmem:[#allocation15 + $0xd8] ss:$12 sps:$4 sm:$0xff]  }
 0x3f2   :  { %9766 = vmatpush3.bf16.msra.mxu1 %v10501_v62  ;;  %v10526_v62 = vld [vmem:[#allocation15 + $0xdc] ss:$12 sps:$4 sm:$0xff]  }
 0x3f3   :  { %9767 = vmatprep.subr.bf16.mxu1 %v11481_v30 }
 0x3f4   :  { %2342 = vmatpush1.bf16.msra.mxu0 %v10502_v0  ;;  %v10536_v0 = vld [vmem:[#allocation15 + $0xe0] ss:$12 sps:$4 sm:$0xff]  }
 0x3f5   :  { %2586 = vmatprep.subr.bf16.mxu0 %v10508_v3  ;;  %v10527_v3 = vld [vmem:[#allocation15 + $0xc0] ss:$12 sps:$4 sm:$0xff]  }
 0x3f6   :  { %9768 = vmatpush3.bf16.msra.mxu1 %v10505_v1  ;;  %v10529_v1 = vld [vmem:[#allocation15 + $0xc4] ss:$12 sps:$4 sm:$0xff]  }
 0x3f7   :  { %9773 = vmatprep.subr.bf16.mxu1 %v11481_v30 }
 0x497   :  { %v2075_v6 = vpop.f32.mrf.mxu0 }
 0x498   :  { %v2076_v8 = vadd.f32 %v2075_v6, %v1901_v5  ;;  %v10537_v5 = vld [vmem:[#allocation15 + $0xc8] ss:$12 sps:$4 sm:$0xff]   ;;  %v2408_v6 = vpack.c.bf16 %v2148_v4, %v2148_v4 }
 0x499   :  { %v2077_v10 = vpop.f32.mrf.mxu0  ;;  %v2116_v61 = vpop.f32.mrf.mxu1 }
 0x49a   :  { %v2125_v11 = vadd.f32 %v2122_v7, %v2076_v8  ;;  %v2078_v14 = vadd.f32 %v2077_v10, %v1905_v9  ;;  %v2117_v27 = vadd.f32 %v2116_v61, %v1909_v24 }
 0x49b   :  { %v2079_v12 = vpop.f32.mrf.mxu0  ;;  %v9751_v18 = vpop.f32.mrf.mxu1 }
 0x49c   :  { %v8730_v13 = vmul.f32 -1.442695, %v2125_v11  ;;  %v2132_v17 = vadd.f32 %v2123_v15, %v2078_v14  ;;  %v8732_v15 = vld [vmem:[%s12177_s6 + $0x3] sm:$0x7] }
 0x49d   :  { %v2080_v16 = vpop.f32.mrf.mxu0  ;;  %v2119_v20 = vpop.f32.mrf.mxu1 }
 0x49e   :  { %10538 = vpow2.f32 %v8730_v13  ;;  %v8731_v19 = vmul.f32 -1.442695, %v2132_v17  ;;  %v8757_v16 = vld [vmem:[%s12178_s7 + $0x3] sm:$0x7]  ;;  %v2187_v17 = vrot.slane %v8732_v15, %v11651_v31 }
 0x49f   :  { %v9752_v21 = vpop.f32.mrf.mxu1  ;;  %v2446_v61 = vrot.slane %v8757_v16, %v11651_v31 }
 0x4a0   :  { %10540 = vpow2.f32 %v8731_v19 }
 0x4ab   :  { %v10539_v22 = vpop.eup %10538 }
 0x4ac   :  { %v2129_v23 = vadd.f32 1.0, %v10539_v22  ;;  %v2450_v22 = vrot.slane %v8757_v16, %v11656_v33 }
 0x4ad   :  { %v10541_v25 = vpop.eup %10540 }
 0x4ae   :  { %10542 = vrcp.f32 %v2129_v23  ;;  %v2136_v26 = vadd.f32 1.0, %v10541_v25  ;;  %v2191_v25 = vrot.slane %v8732_v15, %v11656_v33 }
 0x4b0   :  { %10544 = vrcp.f32 %v2136_v26 }
 0x4bb   :  { %v10543_v28 = vpop.eup %10542 }
 0x4bc   :  { %v2139_v32 = vmul.f32 %v10543_v28, %v2117_v27 }
 0x4bd   :  { %v10545_v37 = vpop.eup %10544 }
 0x4be   :  { %v2140_v34 = vadd.f32 %v2139_v32, %v2124_v29  ;;  %v2142_v38 = vsub.f32 1.0, %v10545_v37  ;;  %v2144_v41 = vmul.f32 %v10545_v37, %v11740_v36  ;;  %v10512_v36 = vld [vmem:[#allocation15 + $0x138] ss:$12 sps:$4 sm:$0xff]  }
 0x4c0   :  { %10546 = vtanh.f32 %v2140_v34 }
 0x4cd   :  { %v10547_v40 = vpop.eup %10546 }
 0x4ce   :  { %v2143_v35 = vmul.f32 %v10547_v40, %v2142_v38 }
 0x4d0   :  { %v2145_v42 = vadd.f32 %v2144_v41, %v2143_v35 }
 0x4d2   :  { %v2146_v45 = vmax.f32 %v2145_v42, 0.0  ;;  %v2149_v46 = vpack.c.bf16 %v2145_v42, %v2145_v42 }
 0x4d4   :  { %2147 = vst [vmem:[#allocation2] sm:$0xff] %v2146_v45  ;;  %2360 = vmatmul.mubr.bf16.vlgmr.msra.gmra.mxu0 %v2149_v46  ;;  %9770 = vmatmul.mubr.bf16.vlgmr.msra.gmra.mxu1 %v2149_v46  ;;  %v2195_v45 = vrot.slane %v8732_v15, %v11665_v39 }
 0x4d5   :  { %2587 = vmatpush1.bf16.msra.mxu0 %v10506_v43  ;;  %9774 = vmatpush3.bf16.msra.mxu1 %v10530_v44  ;;  %v2454_v43 = vrot.slane %v8757_v16, %v11665_v39 }
 0x4d6   :  { %2588 = vmatprep.subr.bf16.mxu0 %v10511_v47  ;;  %2618 = vmatprep.mubr.bf16.mxu0 %v11480_v2 }
 0x4d7   :  { %9775 = vmatprep.subr.bf16.mxu1 %v11481_v30  ;;  %9789 = vmatprep.mubr.msk.bf16.mxu1 %vm11482_vm0, %v11481_v30 }
 0x4d9   :  { %2589 = vmatpush1.bf16.msra.mxu0 %v10509_v48  ;;  %9776 = vmatpush3.bf16.msra.mxu1 %v10531_v49 }
 0x4da   :  { %2590 = vmatprep.subr.bf16.mxu0 %v10514_v50  ;;  %9777 = vmatprep.subr.bf16.mxu1 %v11481_v30 }
 0x4dd   :  { %2591 = vmatpush1.bf16.msra.mxu0 %v10512_v36  ;;  %9778 = vmatpush3.bf16.msra.mxu1 %v10532_v51 }
 0x4de   :  { %2592 = vmatprep.subr.bf16.mxu0 %v10517_v52  ;;  %9779 = vmatprep.subr.bf16.mxu1 %v11481_v30 }
 0x4e1   :  { %2593 = vmatpush1.bf16.msra.mxu0 %v10515_v53  ;;  %9780 = vmatpush3.bf16.msra.mxu1 %v10533_v54 }
 0x4e2   :  { %2594 = vmatprep.subr.bf16.mxu0 %v10520_v55  ;;  %9781 = vmatprep.subr.bf16.mxu1 %v11481_v30 }
 0x4e5   :  { %2595 = vmatpush1.bf16.msra.mxu0 %v10518_v56  ;;  %9782 = vmatpush3.bf16.msra.mxu1 %v10534_v57 }
 0x4e6   :  { %2596 = vmatprep.subr.bf16.mxu0 %v10523_v58  ;;  %9783 = vmatprep.subr.bf16.mxu1 %v11481_v30 }
 0x4e9   :  { %2597 = vmatpush1.bf16.msra.mxu0 %v10521_v59  ;;  %9784 = vmatpush3.bf16.msra.mxu1 %v10535_v60 }
 0x4ea   :  { %2598 = vmatprep.subr.bf16.mxu0 %v10526_v62  ;;  %9785 = vmatprep.subr.bf16.mxu1 %v11481_v30 }
 0x4ed   :  { %2599 = vmatpush1.bf16.msra.mxu0 %v10524_v63  ;;  %9786 = vmatpush3.bf16.msra.mxu1 %v10536_v0 }
 0x4ee   :  { %2600 = vmatprep.subr.bf16.mxu0 %v10529_v1  ;;  %9787 = vmatprep.subr.bf16.mxu1 %v11481_v30 }
 0x4f1   :  { %2601 = vmatpush1.bf16.msra.mxu0 %v10527_v3  ;;  %9788 = vmatpush3.bf16.msra.mxu1 %v10537_v5 }
 0x4f4   :  { %2619 = vmatmul.mubr.bf16.vlgmr.msra.gmra.mxu0 %v2408_v6  ;;  %9790 = vmatmul.mubr.bf16.vlgmr.msra.gmra.mxu1 %v2408_v6 }
 0x594   :  { %v2361_v7 = vpop.f32.mrf.mxu0  ;;  %v2402_v8 = vpop.f32.mrf.mxu1 }
 0x595   :  { %v2362_v20 = vadd.f32 %v2361_v7, %v2187_v17  ;;  %v2403_v49 = vadd.f32 %v2402_v8, %v2195_v45 }
 0x596   :  { %v2363_v9 = vpop.f32.mrf.mxu0  ;;  %v9771_v10 = vpop.f32.mrf.mxu1 }
 0x597   :  { %v2364_v38 = vadd.f32 %v2363_v9, %v2191_v25 }
 0x598   :  { %v2365_v11 = vpop.f32.mrf.mxu0  ;;  %v2405_v12 = vpop.f32.mrf.mxu1 }
 0x59a   :  { %v2366_v13 = vpop.f32.mrf.mxu0  ;;  %v9772_v14 = vpop.f32.mrf.mxu1 }
 0x5b4   :  { %v2620_v18 = vpop.f32.mrf.mxu0  ;;  %v2661_v19 = vpop.f32.mrf.mxu1 }
 0x5b5   :  { %v2621_v21 = vadd.f32 %v2620_v18, %v2446_v61  ;;  %v2662_v47 = vadd.f32 %v2661_v19, %v2454_v43 }
 0x5b6   :  { %v2622_v23 = vpop.f32.mrf.mxu0  ;;  %v9791_v24 = vpop.f32.mrf.mxu1 }
 0x5b7   :  { %v2667_v26 = vadd.f32 %v2621_v21, %v2362_v20  ;;  %v2623_v32 = vadd.f32 %v2622_v23, %v2450_v22 }
 0x5b8   :  { %v2624_v27 = vpop.f32.mrf.mxu0  ;;  %v2664_v28 = vpop.f32.mrf.mxu1 }
 0x5b9   :  { %v8782_v29 = vmul.f32 -1.442695, %v2667_v26  ;;  %v2674_v40 = vadd.f32 %v2623_v32, %v2364_v38 }
 0x5ba   :  { %v2625_v34 = vpop.f32.mrf.mxu0  ;;  %v9792_v37 = vpop.f32.mrf.mxu1 }
 0x5bb   :  { %10548 = vpow2.f32 %v8782_v29  ;;  %v8783_v35 = vmul.f32 -1.442695, %v2674_v40 }
 0x5bd   :  { %10550 = vpow2.f32 %v8783_v35 }
 0x5c8   :  { %v10549_v41 = vpop.eup %10548 }
 0x5c9   :  { %v2671_v42 = vadd.f32 1.0, %v10549_v41 }
 0x5ca   :  { %v10551_v44 = vpop.eup %10550 }
 0x5cb   :  { %10552 = vrcp.f32 %v2671_v42  ;;  %v2678_v46 = vadd.f32 1.0, %v10551_v44 }
 0x5cd   :  { %10554 = vrcp.f32 %v2678_v46 }
 0x5d8   :  { %v10553_v48 = vpop.eup %10552 }
 0x5d9   :  { %v2681_v50 = vmul.f32 %v10553_v48, %v2662_v47 }
 0x5da   :  { %v10555_v51 = vpop.eup %10554 }
 0x5db   :  { %v2682_v36 = vadd.f32 %v2681_v50, %v2403_v49  ;;  %v2684_v52 = vsub.f32 1.0, %v10555_v51  ;;  %v2686_v54 = vmul.f32 %v10555_v51, %v2148_v4 }
 0x5dd   :  { %10556 = vtanh.f32 %v2682_v36 }
 0x5ea   :  { %v10557_v53 = vpop.eup %10556 }
 0x5eb   :  { %v2685_v55 = vmul.f32 %v10557_v53, %v2684_v52 }
 0x5ed   :  { %v11791_v56 = vadd.f32 %v2686_v54, %v2685_v55  ;;  %2696 = sbr.rel (%p8785_p13) target bundleno = 1525 (0x5f5), region = 69 }
 0x5ef   :  { %v2688_v57 = vmax.f32 %v11791_v56, 0.0  ;;  %2691 = vst [vmem:[#allocation16 + $0x10] sm:$0xff] %v11791_v56 }
 0x5f1   :  { %2689 = vst [vmem:[#allocation2 + $0x8] sm:$0xff] %v2688_v57 }
 0x5f2   :  { %v2700_v58 = vld [vmem:[#allocation3 + $0x70] sm:$0xff]  ;;  %v2701_v59 = vld [vmem:[#allocation3 + $0x78] sm:$0xff]  ;;  %v2702_v60 = vld [vmem:[#allocation3 + $0x80] sm:$0xff] }
 0x5f3   :  { %2703 = vst [vmem:[#allocation4 + $0x8] sm:$0xff] %v2700_v58  ;;  %2704 = vst [vmem:[#allocation4] sm:$0xff] %v2701_v59 }
 0x5f4   :  { %2705 = vst [vmem:[#allocation4 + $0x10] sm:$0xff] %v2702_v60 }
 0x5f5 PF:  { %p8786_p0 = scmp.gt.s32.totalorder %s11777_s25, 0 }
 0x5f7   :  { %2709 = sbr.rel (%p8786_p0) target bundleno = 1765 (0x6e5), region = 73 }
 0x5fc   :  { %v10558_v62 = vld [vmem:[#allocation13 + $0xac] ss:$12 sps:$4 sm:$0xff]   ;;  %v11486_v63 = vmov 0.0   ;;  %v10560_v0 = vld [vmem:[#allocation13 + $0xb0] ss:$12 sps:$4 sm:$0xff]   ;;  %vm11487_vm2 = vmmov 0   ;;  %v2710_v24 = vpack.c.bf16 %v11791_v56, %v11791_v56 }
 0x5fd   :  { %9793 = vmatprep.subr.bf16.mxu1 %v11486_v63  ;;  %9809 = vmatprep.mubr.msk.bf16.mxu1 %vm11487_vm2, %v11486_v63  ;;  %v10561_v1 = vld [vmem:[#allocation13 + $0xa8] ss:$12 sps:$4 sm:$0xff]   ;;  %v11488_v4 = vmov 0   ;;  %v10564_v5 = vld [vmem:[#allocation13 + $0x98] ss:$12 sps:$4 sm:$0xff]  }
 0x5fe   :  { %2888 = vmatprep.subr.bf16.mxu0 %v10558_v62  ;;  %9794 = vmatpush3.bf16.msra.mxu1 %v10560_v0  ;;  %v10562_v3 = vld [vmem:[#allocation13 + $0x94] ss:$12 sps:$4 sm:$0xff]   ;;  %v10565_v6 = vld [vmem:[#allocation13 + $0x90] ss:$12 sps:$4 sm:$0xff]   ;;  %v10569_v9 = vld [vmem:[#allocation13 + $0x78] ss:$12 sps:$4 sm:$0xff]  }
 0x5ff   :  { %2920 = vmatprep.mubr.bf16.mxu0 %v11488_v4  ;;  %2889 = vmatpush1.bf16.msra.mxu0 %v10561_v1  ;;  %v10566_v7 = vld [vmem:[#allocation13 + $0x7c] ss:$12 sps:$4 sm:$0xff]   ;;  %v10568_v8 = vld [vmem:[#allocation13 + $0x80] ss:$12 sps:$4 sm:$0xff]   ;;  %v10570_v10 = vld [vmem:[#allocation13 + $0x64] ss:$12 sps:$4 sm:$0xff]  }
 0x600   :  { %9795 = vmatprep.subr.bf16.mxu1 %v11486_v63  ;;  %2890 = vmatprep.subr.bf16.mxu0 %v10562_v3  ;;  %v10572_v11 = vld [vmem:[#allocation13 + $0x68] ss:$12 sps:$4 sm:$0xff]   ;;  %v10573_v12 = vld [vmem:[#allocation13 + $0x60] ss:$12 sps:$4 sm:$0xff]   ;;  %v10576_v14 = vld [vmem:[#allocation13 + $0x50] ss:$12 sps:$4 sm:$0xff]  }
 0x601   :  { %v10574_v13 = vld [vmem:[#allocation13 + $0x4c] ss:$12 sps:$4 sm:$0xff]   ;;  %v10577_v15 = vld [vmem:[#allocation13 + $0x48] ss:$12 sps:$4 sm:$0xff]   ;;  %v10581_v61 = vld [vmem:[#allocation13 + $0x30] ss:$12 sps:$4 sm:$0xff]  }
 0x602   :  { %9796 = vmatpush3.bf16.msra.mxu1 %v10564_v5  ;;  %v10578_v16 = vld [vmem:[#allocation13 + $0x34] ss:$12 sps:$4 sm:$0xff]   ;;  %v10580_v17 = vld [vmem:[#allocation13 + $0x38] ss:$12 sps:$4 sm:$0xff]   ;;  %v10582_v18 = vld [vmem:[#allocation13 + $0x1c] ss:$12 sps:$4 sm:$0xff]  }
 0x603   :  { %2891 = vmatpush1.bf16.msra.mxu0 %v10565_v6  ;;  %9797 = vmatprep.subr.bf16.mxu1 %v11486_v63  ;;  %v10584_v19 = vld [vmem:[#allocation13 + $0x20] ss:$12 sps:$4 sm:$0xff]   ;;  %v10585_v20 = vld [vmem:[#allocation13 + $0x18] ss:$12 sps:$4 sm:$0xff]   ;;  %v10588_v22 = vld [vmem:[#allocation13 + $0x8] ss:$12 sps:$4 sm:$0xff]  }
 0x604   :  { %2892 = vmatprep.subr.bf16.mxu0 %v10566_v7  ;;  %v10586_v21 = vld [vmem:[#allocation13 + $0x4] ss:$12 sps:$4 sm:$0xff]   ;;  %v10589_v23 = vld [vmem:[#allocation13] ss:$12 sps:$4 sm:$0xff]  }
 0x605   :  { %v2743_v25 = vld [vmem:[%s12177_s6] sm:$0x7] }
 0x606   :  { %9798 = vmatpush3.bf16.msra.mxu1 %v10568_v8  ;;  %v2756_v26 = vrot.slane %v2743_v25, %v11665_v39  ;;  %v2748_v27 = vrot.slane %v2743_v25, %v11651_v31  ;;  %v2752_v29 = vrot.slane %v2743_v25, %v11656_v33 }
 0x607   :  { %2893 = vmatpush1.bf16.msra.mxu0 %v10569_v9  ;;  %9799 = vmatprep.subr.bf16.mxu1 %v11486_v63 }
 0x608   :  { %2894 = vmatprep.subr.bf16.mxu0 %v10570_v10 }
 0x60a   :  { %9800 = vmatpush3.bf16.msra.mxu1 %v10572_v11 }
 0x60b   :  { %2895 = vmatpush1.bf16.msra.mxu0 %v10573_v12  ;;  %9801 = vmatprep.subr.bf16.mxu1 %v11486_v63 }
 0x60c   :  { %2896 = vmatprep.subr.bf16.mxu0 %v10574_v13 }
 0x60e   :  { %9802 = vmatpush3.bf16.msra.mxu1 %v10576_v14 }
 0x60f   :  { %2897 = vmatpush1.bf16.msra.mxu0 %v10577_v15  ;;  %9803 = vmatprep.subr.bf16.mxu1 %v11486_v63 }
 0x610   :  { %2898 = vmatprep.subr.bf16.mxu0 %v10578_v16 }
 0x612   :  { %9804 = vmatpush3.bf16.msra.mxu1 %v10580_v17 }
 0x613   :  { %2899 = vmatpush1.bf16.msra.mxu0 %v10581_v61  ;;  %9805 = vmatprep.subr.bf16.mxu1 %v11486_v63 }
 0x614   :  { %2900 = vmatprep.subr.bf16.mxu0 %v10582_v18 }
 0x616   :  { %9806 = vmatpush3.bf16.msra.mxu1 %v10584_v19 }
 0x617   :  { %2901 = vmatpush1.bf16.msra.mxu0 %v10585_v20  ;;  %9807 = vmatprep.subr.bf16.mxu1 %v11486_v63 }
 0x618   :  { %2902 = vmatprep.subr.bf16.mxu0 %v10586_v21 }
 0x61a   :  { %9808 = vmatpush3.bf16.msra.mxu1 %v10588_v22 }
 0x61b   :  { %2903 = vmatpush1.bf16.msra.mxu0 %v10589_v23 }
 0x61d   :  { %9810 = vmatmul.mubr.bf16.vlgmr.msra.gmra.mxu1 %v2710_v24 }
 0x61e   :  { %2921 = vmatmul.mubr.bf16.vlgmr.msra.gmra.mxu0 %v2710_v24 }
 0x6dd   :  { %v2963_v28 = vpop.f32.mrf.mxu1 }
 0x6de   :  { %v2964_v32 = vadd.f32 %v2963_v28, %v2756_v26  ;;  %v2922_v34 = vpop.f32.mrf.mxu0 }
 0x6df   :  { %v2923_v37 = vadd.f32 %v2922_v34, %v2748_v27  ;;  %v9811_v38 = vpop.f32.mrf.mxu1 }
 0x6e0   :  { %2971 = vst [vmem:[#allocation4 + $0x10] sm:$0xff] %v2964_v32  ;;  %v2924_v40 = vpop.f32.mrf.mxu0 }
 0x6e1   :  { %2969 = vst [vmem:[#allocation4 + $0x8] sm:$0xff] %v2923_v37  ;;  %v2925_v35 = vadd.f32 %v2924_v40, %v2752_v29  ;;  %v2966_v41 = vpop.f32.mrf.mxu1 }
 0x6e2   :  { %v2926_v42 = vpop.f32.mrf.mxu0 }
 0x6e3   :  { %2970 = vst [vmem:[#allocation4] sm:$0xff] %v2925_v35  ;;  %v9812_v43 = vpop.f32.mrf.mxu1 }
 0x6e4   :  { %v2927_v44 = vpop.f32.mrf.mxu0 }
 0x6e5 PF:  { %v10590_v45 = vld [vmem:[#allocation15 + $0xac] ss:$12 sps:$4 sm:$0xff]   ;;  %9813 = vmatprep.subr.bf16.mxu1 %v11481_v30  ;;  %3183 = vmatprep.mubr.bf16.mxu0 %v11480_v2  ;;  %v10592_v46 = vld [vmem:[#allocation15 + $0xa8] ss:$12 sps:$4 sm:$0xff]   ;;  %v10595_v48 = vld [vmem:[#allocation15 + $0x90] ss:$12 sps:$4 sm:$0xff]  }
 0x6e6   :  { %9829 = vmatprep.mubr.msk.bf16.mxu1 %vm11482_vm0, %v11481_v30  ;;  %3151 = vmatprep.subr.bf16.mxu0 %v10590_v45  ;;  %v10593_v47 = vld [vmem:[#allocation15 + $0x94] ss:$12 sps:$4 sm:$0xff]   ;;  %v10596_v49 = vld [vmem:[#allocation15 + $0x7c] ss:$12 sps:$4 sm:$0xff]   ;;  %v10598_v50 = vld [vmem:[#allocation15 + $0x78] ss:$12 sps:$4 sm:$0xff]  }
 0x6e7   :  { %3152 = vmatpush1.bf16.msra.mxu0 %v10592_v46  ;;  %v10599_v36 = vld [vmem:[#allocation15 + $0x64] ss:$12 sps:$4 sm:$0xff]   ;;  %v10601_v51 = vld [vmem:[#allocation15 + $0x60] ss:$12 sps:$4 sm:$0xff]   ;;  %v10604_v55 = vld [vmem:[#allocation15 + $0x48] ss:$12 sps:$4 sm:$0xff]  }
 0x6e8   :  { %3153 = vmatprep.subr.bf16.mxu0 %v10593_v47  ;;  %v10614_v52 = vld [vmem:[#allocation15 + $0xb0] ss:$12 sps:$4 sm:$0xff]   ;;  %v10602_v53 = vld [vmem:[#allocation15 + $0x4c] ss:$12 sps:$4 sm:$0xff]   ;;  %v10605_v56 = vld [vmem:[#allocation15 + $0x34] ss:$12 sps:$4 sm:$0xff]  }
 0x6e9   :  { %9814 = vmatpush3.bf16.msra.mxu1 %v10614_v52  ;;  %v10615_v54 = vld [vmem:[#allocation15 + $0x98] ss:$12 sps:$4 sm:$0xff]   ;;  %v10607_v57 = vld [vmem:[#allocation15 + $0x30] ss:$12 sps:$4 sm:$0xff]   ;;  %v10616_v58 = vld [vmem:[#allocation15 + $0x80] ss:$12 sps:$4 sm:$0xff]  }
 0x6ea   :  { %9815 = vmatprep.subr.bf16.mxu1 %v11481_v30  ;;  %v10608_v59 = vld [vmem:[#allocation15 + $0x1c] ss:$12 sps:$4 sm:$0xff]   ;;  %v10610_v62 = vld [vmem:[#allocation15 + $0x18] ss:$12 sps:$4 sm:$0xff]   ;;  %v10613_v1 = vld [vmem:[#allocation15] ss:$12 sps:$4 sm:$0xff]  }
 0x6eb   :  { %3154 = vmatpush1.bf16.msra.mxu0 %v10595_v48  ;;  %v10617_v60 = vld [vmem:[#allocation15 + $0x68] ss:$12 sps:$4 sm:$0xff]   ;;  %v10611_v63 = vld [vmem:[#allocation15 + $0x4] ss:$12 sps:$4 sm:$0xff]   ;;  %v10620_v6 = vld [vmem:[#allocation15 + $0x20] ss:$12 sps:$4 sm:$0xff]  }
 0x6ec   :  { %3155 = vmatprep.subr.bf16.mxu0 %v10596_v49  ;;  %v10618_v0 = vld [vmem:[#allocation15 + $0x50] ss:$12 sps:$4 sm:$0xff]   ;;  %v11812_v3 = vld [vmem:[#allocation2] sm:$0xff]  ;;  %v10621_v7 = vld [vmem:[#allocation15 + $0x8] ss:$12 sps:$4 sm:$0xff]   ;;  %s11849_s11 = sld [smem:[#allocation5 + $0x3]] }
 0x6ed   :  { %9816 = vmatpush3.bf16.msra.mxu1 %v10615_v54  ;;  %v10619_v4 = vld [vmem:[#allocation15 + $0x38] ss:$12 sps:$4 sm:$0xff]   ;;  %v2973_v5 = vpack.c.bf16 %v11812_v3, %v11812_v3  ;;  %v10622_v9 = vld [vmem:[#allocation13 + $0x168] ss:$12 sps:$4 sm:$0xff]   ;;  %v10625_v10 = vld [vmem:[#allocation13 + $0x170] ss:$12 sps:$4 sm:$0xff]  }
 0x6ee   :  { %9817 = vmatprep.subr.bf16.mxu1 %v11481_v30  ;;  %v10624_v8 = vld [vmem:[#allocation13 + $0x16c] ss:$12 sps:$4 sm:$0xff]   ;;  %v10628_v11 = vld [vmem:[#allocation13 + $0x154] ss:$12 sps:$4 sm:$0xff]   ;;  %v10626_v12 = vld [vmem:[#allocation13 + $0x150] ss:$12 sps:$4 sm:$0xff]  }
 0x6ef   :  { %3156 = vmatpush1.bf16.msra.mxu0 %v10598_v50  ;;  %v10629_v13 = vld [vmem:[#allocation13 + $0x158] ss:$12 sps:$4 sm:$0xff]   ;;  %v10632_v14 = vld [vmem:[#allocation13 + $0x13c] ss:$12 sps:$4 sm:$0xff]   ;;  %v10633_v16 = vld [vmem:[#allocation13 + $0x140] ss:$12 sps:$4 sm:$0xff]  }
 0x6f0   :  { %3157 = vmatprep.subr.bf16.mxu0 %v10599_v36  ;;  %v10630_v15 = vld [vmem:[#allocation13 + $0x138] ss:$12 sps:$4 sm:$0xff]   ;;  %v10634_v61 = vld [vmem:[#allocation13 + $0x120] ss:$12 sps:$4 sm:$0xff]   ;;  %v10637_v18 = vld [vmem:[#allocation13 + $0x128] ss:$12 sps:$4 sm:$0xff]  }
 0x6f1   :  { %9818 = vmatpush3.bf16.msra.mxu1 %v10616_v58  ;;  %v10636_v17 = vld [vmem:[#allocation13 + $0x124] ss:$12 sps:$4 sm:$0xff]   ;;  %v10638_v19 = vld [vmem:[#allocation13 + $0x108] ss:$12 sps:$4 sm:$0xff]   ;;  %v10640_v20 = vld [vmem:[#allocation13 + $0x10c] ss:$12 sps:$4 sm:$0xff]  }
 0x6f2   :  { %9819 = vmatprep.subr.bf16.mxu1 %v11481_v30  ;;  %v10641_v21 = vld [vmem:[#allocation13 + $0x110] ss:$12 sps:$4 sm:$0xff]   ;;  %v10644_v22 = vld [vmem:[#allocation13 + $0xf4] ss:$12 sps:$4 sm:$0xff]   ;;  %v10645_v24 = vld [vmem:[#allocation13 + $0xf8] ss:$12 sps:$4 sm:$0xff]  }
 0x6f3   :  { %3158 = vmatpush1.bf16.msra.mxu0 %v10601_v51  ;;  %v10642_v23 = vld [vmem:[#allocation13 + $0xf0] ss:$12 sps:$4 sm:$0xff]   ;;  %v10646_v26 = vld [vmem:[#allocation13 + $0xd8] ss:$12 sps:$4 sm:$0xff]   ;;  %v10649_v27 = vld [vmem:[#allocation13 + $0xe0] ss:$12 sps:$4 sm:$0xff]  }
 0x6f4   :  { %3159 = vmatprep.subr.bf16.mxu0 %v10602_v53  ;;  %v10648_v25 = vld [vmem:[#allocation13 + $0xdc] ss:$12 sps:$4 sm:$0xff]   ;;  %v10652_v28 = vld [vmem:[#allocation13 + $0xc4] ss:$12 sps:$4 sm:$0xff]   ;;  %v10650_v29 = vld [vmem:[#allocation13 + $0xc0] ss:$12 sps:$4 sm:$0xff]  }
 0x6f5   :  { %9820 = vmatpush3.bf16.msra.mxu1 %v10617_v60  ;;  %v10653_v32 = vld [vmem:[#allocation13 + $0xc8] ss:$12 sps:$4 sm:$0xff]   ;;  %v10656_v34 = vld [vmem:[#allocation15 + $0x16c] ss:$12 sps:$4 sm:$0xff]   ;;  %v3006_v37 = vld [vmem:[%s12178_s7] sm:$0x7] }
 0x6f6   :  { %9821 = vmatprep.subr.bf16.mxu1 %v11481_v30  ;;  %v3011_v38 = vrot.slane %v3006_v37, %v11651_v31  ;;  %v3232_v35 = vld [vmem:[#allocation4 + $0x8] sm:$0xff]  ;;  %v3015_v42 = vrot.slane %v3006_v37, %v11656_v33  ;;  %v3233_v48 = vld [vmem:[#allocation4] sm:$0xff]  ;;  %p8890_p1 = scmp.le.s32.totalorder %s11849_s11, 0 }
 0x6f7   :  { %3160 = vmatpush1.bf16.msra.mxu0 %v10604_v55 }
 0x6f8   :  { %3161 = vmatprep.subr.bf16.mxu0 %v10605_v56 }
 0x6f9   :  { %9822 = vmatpush3.bf16.msra.mxu1 %v10618_v0 }
 0x6fa   :  { %9823 = vmatprep.subr.bf16.mxu1 %v11481_v30 }
 0x6fb   :  { %3162 = vmatpush1.bf16.msra.mxu0 %v10607_v57  ;;  %v3019_v57 = vrot.slane %v3006_v37, %v11665_v39  ;;  %v3258_v37 = vld [vmem:[#allocation2 + $0x8] sm:$0xff] }
 0x6fc   :  { %3163 = vmatprep.subr.bf16.mxu0 %v10608_v59 }
 0x6fd   :  { %9824 = vmatpush3.bf16.msra.mxu1 %v10619_v4 }
 0x6fe   :  { %9825 = vmatprep.subr.bf16.mxu1 %v11481_v30 }
 0x6ff   :  { %3164 = vmatpush1.bf16.msra.mxu0 %v10610_v62 }
 0x700   :  { %3165 = vmatprep.subr.bf16.mxu0 %v10611_v63  ;;  %v3234_v63 = vld [vmem:[#allocation4 + $0x10] sm:$0xff] }
 0x701   :  { %9826 = vmatpush3.bf16.msra.mxu1 %v10620_v6 }
 0x702   :  { %9827 = vmatprep.subr.bf16.mxu1 %v11481_v30 }
 0x703   :  { %3166 = vmatpush1.bf16.msra.mxu0 %v10613_v1 }
 0x704   :  { %3437 = vmatprep.subr.bf16.mxu0 %v10624_v8 }
 0x705   :  { %9828 = vmatpush3.bf16.msra.mxu1 %v10621_v7 }
 0x706   :  { %3184 = vmatmul.mubr.bf16.vlgmr.msra.gmra.mxu0 %v2973_v5  ;;  %9833 = vmatprep.subr.bf16.mxu1 %v11481_v30 }
 0x707   :  { %3469 = vmatprep.mubr.bf16.mxu0 %v11480_v2  ;;  %3438 = vmatpush1.bf16.msra.mxu0 %v10622_v9 }
 0x708   :  { %9830 = vmatmul.mubr.bf16.vlgmr.msra.gmra.mxu1 %v2973_v5  ;;  %3439 = vmatprep.subr.bf16.mxu0 %v10628_v11  ;;  %v10678_v11 = vld [vmem:[#allocation15 + $0x170] ss:$12 sps:$4 sm:$0xff]  }
 0x709   :  { %9849 = vmatprep.mubr.msk.bf16.mxu1 %vm11482_vm0, %v11481_v30  ;;  %9834 = vmatpush3.bf16.msra.mxu1 %v10625_v10  ;;  %v10654_v10 = vld [vmem:[#allocation15 + $0x168] ss:$12 sps:$4 sm:$0xff]  }
 0x70a   :  { %9835 = vmatprep.subr.bf16.mxu1 %v11481_v30 }
 0x70b   :  { %3440 = vmatpush1.bf16.msra.mxu0 %v10626_v12 }
 0x70c   :  { %3441 = vmatprep.subr.bf16.mxu0 %v10632_v14  ;;  %v10659_v14 = vld [vmem:[#allocation15 + $0x154] ss:$12 sps:$4 sm:$0xff]  }
 0x70d   :  { %9836 = vmatpush3.bf16.msra.mxu1 %v10629_v13 }
 0x70e   :  { %9837 = vmatprep.subr.bf16.mxu1 %v11481_v30 }
 0x70f   :  { %3442 = vmatpush1.bf16.msra.mxu0 %v10630_v15  ;;  %v10657_v15 = vld [vmem:[#allocation15 + $0x150] ss:$12 sps:$4 sm:$0xff]  }
 0x710   :  { %3443 = vmatprep.subr.bf16.mxu0 %v10636_v17  ;;  %v10662_v17 = vld [vmem:[#allocation15 + $0x13c] ss:$12 sps:$4 sm:$0xff]  }
 0x711   :  { %9838 = vmatpush3.bf16.msra.mxu1 %v10633_v16  ;;  %v10679_v16 = vld [vmem:[#allocation15 + $0x158] ss:$12 sps:$4 sm:$0xff]  }
 0x712   :  { %9839 = vmatprep.subr.bf16.mxu1 %v11481_v30 }
 0x713   :  { %3444 = vmatpush1.bf16.msra.mxu0 %v10634_v61  ;;  %v10680_v61 = vld [vmem:[#allocation15 + $0x140] ss:$12 sps:$4 sm:$0xff]  }
 0x714   :  { %3445 = vmatprep.subr.bf16.mxu0 %v10640_v20  ;;  %v10681_v20 = vld [vmem:[#allocation15 + $0x128] ss:$12 sps:$4 sm:$0xff]  }
 0x715   :  { %9840 = vmatpush3.bf16.msra.mxu1 %v10637_v18  ;;  %v10665_v18 = vld [vmem:[#allocation15 + $0x124] ss:$12 sps:$4 sm:$0xff]  }
 0x716   :  { %9841 = vmatprep.subr.bf16.mxu1 %v11481_v30 }
 0x717   :  { %3446 = vmatpush1.bf16.msra.mxu0 %v10638_v19  ;;  %v10663_v19 = vld [vmem:[#allocation15 + $0x120] ss:$12 sps:$4 sm:$0xff]  }
 0x718   :  { %3447 = vmatprep.subr.bf16.mxu0 %v10644_v22  ;;  %v10666_v22 = vld [vmem:[#allocation15 + $0x108] ss:$12 sps:$4 sm:$0xff]  }
 0x719   :  { %9842 = vmatpush3.bf16.msra.mxu1 %v10641_v21  ;;  %v10668_v21 = vld [vmem:[#allocation15 + $0x10c] ss:$12 sps:$4 sm:$0xff]  }
 0x71a   :  { %9843 = vmatprep.subr.bf16.mxu1 %v11481_v30 }
 0x71b   :  { %3448 = vmatpush1.bf16.msra.mxu0 %v10642_v23  ;;  %v10682_v23 = vld [vmem:[#allocation15 + $0x110] ss:$12 sps:$4 sm:$0xff]  }
 0x71c   :  { %3449 = vmatprep.subr.bf16.mxu0 %v10648_v25  ;;  %v10669_v25 = vld [vmem:[#allocation15 + $0xf0] ss:$12 sps:$4 sm:$0xff]  }
 0x71d   :  { %9844 = vmatpush3.bf16.msra.mxu1 %v10645_v24  ;;  %v10671_v24 = vld [vmem:[#allocation15 + $0xf4] ss:$12 sps:$4 sm:$0xff]  }
 0x71e   :  { %9845 = vmatprep.subr.bf16.mxu1 %v11481_v30 }
 0x71f   :  { %3450 = vmatpush1.bf16.msra.mxu0 %v10646_v26  ;;  %v10683_v26 = vld [vmem:[#allocation15 + $0xf8] ss:$12 sps:$4 sm:$0xff]  }
 0x720   :  { %3451 = vmatprep.subr.bf16.mxu0 %v10652_v28  ;;  %v10672_v28 = vld [vmem:[#allocation15 + $0xd8] ss:$12 sps:$4 sm:$0xff]  }
 0x721   :  { %9846 = vmatpush3.bf16.msra.mxu1 %v10649_v27  ;;  %v10674_v27 = vld [vmem:[#allocation15 + $0xdc] ss:$12 sps:$4 sm:$0xff]  }
 0x722   :  { %9847 = vmatprep.subr.bf16.mxu1 %v11481_v30 }
 0x723   :  { %3452 = vmatpush1.bf16.msra.mxu0 %v10650_v29  ;;  %v10684_v29 = vld [vmem:[#allocation15 + $0xe0] ss:$12 sps:$4 sm:$0xff]  }
 0x724   :  { %3696 = vmatprep.subr.bf16.mxu0 %v10656_v34  ;;  %v10675_v34 = vld [vmem:[#allocation15 + $0xc0] ss:$12 sps:$4 sm:$0xff]  }
 0x725   :  { %9848 = vmatpush3.bf16.msra.mxu1 %v10653_v32  ;;  %v10677_v32 = vld [vmem:[#allocation15 + $0xc4] ss:$12 sps:$4 sm:$0xff]  }
 0x726   :  { %9853 = vmatprep.subr.bf16.mxu1 %v11481_v30 }
 0x7c6   :  { %v3185_v40 = vpop.f32.mrf.mxu0 }
 0x7c7   :  { %v3186_v41 = vadd.f32 %v3185_v40, %v3011_v38  ;;  %v10685_v38 = vld [vmem:[#allocation15 + $0xc8] ss:$12 sps:$4 sm:$0xff]   ;;  %v3518_v40 = vpack.c.bf16 %v3258_v37, %v3258_v37 }
 0x7c8   :  { %v3187_v43 = vpop.f32.mrf.mxu0  ;;  %v3226_v36 = vpop.f32.mrf.mxu1 }
 0x7c9   :  { %v3235_v44 = vadd.f32 %v3232_v35, %v3186_v41  ;;  %v3188_v47 = vadd.f32 %v3187_v43, %v3015_v42  ;;  %v3227_v60 = vadd.f32 %v3226_v36, %v3019_v57 }
 0x7ca   :  { %v3189_v45 = vpop.f32.mrf.mxu0  ;;  %v9831_v51 = vpop.f32.mrf.mxu1 }
 0x7cb   :  { %v8835_v46 = vmul.f32 -1.442695, %v3235_v44  ;;  %v3242_v50 = vadd.f32 %v3233_v48, %v3188_v47  ;;  %v8837_v48 = vld [vmem:[%s12177_s6 + $0x3] sm:$0x7] }
 0x7cc   :  { %v3190_v49 = vpop.f32.mrf.mxu0  ;;  %v3229_v53 = vpop.f32.mrf.mxu1 }
 0x7cd   :  { %10686 = vpow2.f32 %v8835_v46  ;;  %v8836_v52 = vmul.f32 -1.442695, %v3242_v50  ;;  %v8862_v49 = vld [vmem:[%s12178_s7 + $0x3] sm:$0x7]  ;;  %v3297_v50 = vrot.slane %v8837_v48, %v11651_v31 }
 0x7ce   :  { %v9832_v54 = vpop.f32.mrf.mxu1  ;;  %v3556_v36 = vrot.slane %v8862_v49, %v11651_v31 }
 0x7cf   :  { %10688 = vpow2.f32 %v8836_v52 }
 0x7da   :  { %v10687_v55 = vpop.eup %10686 }
 0x7db   :  { %v3239_v56 = vadd.f32 1.0, %v10687_v55  ;;  %v3560_v55 = vrot.slane %v8862_v49, %v11656_v33 }
 0x7dc   :  { %v10689_v58 = vpop.eup %10688 }
 0x7dd   :  { %10690 = vrcp.f32 %v3239_v56  ;;  %v3246_v59 = vadd.f32 1.0, %v10689_v58  ;;  %v3301_v58 = vrot.slane %v8837_v48, %v11656_v33 }
 0x7df   :  { %10692 = vrcp.f32 %v3246_v59 }
 0x7ea   :  { %v10691_v62 = vpop.eup %10690 }
 0x7eb   :  { %v3249_v0 = vmul.f32 %v10691_v62, %v3227_v60 }
 0x7ec   :  { %v10693_v4 = vpop.eup %10692 }
 0x7ed   :  { %v3250_v1 = vadd.f32 %v3249_v0, %v3234_v63  ;;  %v3252_v5 = vsub.f32 1.0, %v10693_v4  ;;  %v3254_v8 = vmul.f32 %v10693_v4, %v11812_v3  ;;  %v10660_v3 = vld [vmem:[#allocation15 + $0x138] ss:$12 sps:$4 sm:$0xff]  }
 0x7ef   :  { %10694 = vtanh.f32 %v3250_v1 }
 0x7fc   :  { %v10695_v6 = vpop.eup %10694 }
 0x7fd   :  { %v3253_v7 = vmul.f32 %v10695_v6, %v3252_v5 }
 0x7ff   :  { %v3255_v9 = vadd.f32 %v3254_v8, %v3253_v7 }
 0x801   :  { %v3256_v12 = vmax.f32 %v3255_v9, 0.0  ;;  %v3259_v13 = vpack.c.bf16 %v3255_v9, %v3255_v9 }
 0x803   :  { %3257 = vst [vmem:[#allocation2] sm:$0xff] %v3256_v12  ;;  %3470 = vmatmul.mubr.bf16.vlgmr.msra.gmra.mxu0 %v3259_v13  ;;  %9850 = vmatmul.mubr.bf16.vlgmr.msra.gmra.mxu1 %v3259_v13  ;;  %v3305_v12 = vrot.slane %v8837_v48, %v11665_v39 }
 0x804   :  { %3697 = vmatpush1.bf16.msra.mxu0 %v10654_v10  ;;  %9854 = vmatpush3.bf16.msra.mxu1 %v10678_v11  ;;  %v3564_v10 = vrot.slane %v8862_v49, %v11665_v39 }
 0x805   :  { %3698 = vmatprep.subr.bf16.mxu0 %v10659_v14  ;;  %3728 = vmatprep.mubr.bf16.mxu0 %v11480_v2 }
 0x806   :  { %9855 = vmatprep.subr.bf16.mxu1 %v11481_v30  ;;  %9869 = vmatprep.mubr.msk.bf16.mxu1 %vm11482_vm0, %v11481_v30 }
 0x808   :  { %3699 = vmatpush1.bf16.msra.mxu0 %v10657_v15  ;;  %9856 = vmatpush3.bf16.msra.mxu1 %v10679_v16 }
 0x809   :  { %3700 = vmatprep.subr.bf16.mxu0 %v10662_v17  ;;  %9857 = vmatprep.subr.bf16.mxu1 %v11481_v30 }
 0x80c   :  { %3701 = vmatpush1.bf16.msra.mxu0 %v10660_v3  ;;  %9858 = vmatpush3.bf16.msra.mxu1 %v10680_v61 }
 0x80d   :  { %3702 = vmatprep.subr.bf16.mxu0 %v10665_v18  ;;  %9859 = vmatprep.subr.bf16.mxu1 %v11481_v30 }
 0x810   :  { %3703 = vmatpush1.bf16.msra.mxu0 %v10663_v19  ;;  %9860 = vmatpush3.bf16.msra.mxu1 %v10681_v20 }
 0x811   :  { %3704 = vmatprep.subr.bf16.mxu0 %v10668_v21  ;;  %9861 = vmatprep.subr.bf16.mxu1 %v11481_v30 }
 0x814   :  { %3705 = vmatpush1.bf16.msra.mxu0 %v10666_v22  ;;  %9862 = vmatpush3.bf16.msra.mxu1 %v10682_v23 }
 0x815   :  { %3706 = vmatprep.subr.bf16.mxu0 %v10671_v24  ;;  %9863 = vmatprep.subr.bf16.mxu1 %v11481_v30 }
 0x818   :  { %3707 = vmatpush1.bf16.msra.mxu0 %v10669_v25  ;;  %9864 = vmatpush3.bf16.msra.mxu1 %v10683_v26 }
 0x819   :  { %3708 = vmatprep.subr.bf16.mxu0 %v10674_v27  ;;  %9865 = vmatprep.subr.bf16.mxu1 %v11481_v30 }
 0x81c   :  { %3709 = vmatpush1.bf16.msra.mxu0 %v10672_v28  ;;  %9866 = vmatpush3.bf16.msra.mxu1 %v10684_v29 }
 0x81d   :  { %3710 = vmatprep.subr.bf16.mxu0 %v10677_v32  ;;  %9867 = vmatprep.subr.bf16.mxu1 %v11481_v30 }
 0x820   :  { %3711 = vmatpush1.bf16.msra.mxu0 %v10675_v34  ;;  %9868 = vmatpush3.bf16.msra.mxu1 %v10685_v38 }
 0x823   :  { %3729 = vmatmul.mubr.bf16.vlgmr.msra.gmra.mxu0 %v3518_v40  ;;  %9870 = vmatmul.mubr.bf16.vlgmr.msra.gmra.mxu1 %v3518_v40 }
 0x8c3   :  { %v3471_v35 = vpop.f32.mrf.mxu0  ;;  %v3512_v41 = vpop.f32.mrf.mxu1 }
 0x8c4   :  { %v3472_v53 = vadd.f32 %v3471_v35, %v3297_v50  ;;  %v3513_v16 = vadd.f32 %v3512_v41, %v3305_v12 }
 0x8c5   :  { %v3473_v42 = vpop.f32.mrf.mxu0  ;;  %v9851_v43 = vpop.f32.mrf.mxu1 }
 0x8c6   :  { %v3474_v5 = vadd.f32 %v3473_v42, %v3301_v58 }
 0x8c7   :  { %v3475_v44 = vpop.f32.mrf.mxu0  ;;  %v3515_v45 = vpop.f32.mrf.mxu1 }
 0x8c9   :  { %v3476_v46 = vpop.f32.mrf.mxu0  ;;  %v9852_v47 = vpop.f32.mrf.mxu1 }
 0x8e3   :  { %v3730_v51 = vpop.f32.mrf.mxu0  ;;  %v3771_v52 = vpop.f32.mrf.mxu1 }
 0x8e4   :  { %v3731_v54 = vadd.f32 %v3730_v51, %v3556_v36  ;;  %v3772_v14 = vadd.f32 %v3771_v52, %v3564_v10 }
 0x8e5   :  { %v3732_v56 = vpop.f32.mrf.mxu0  ;;  %v9871_v57 = vpop.f32.mrf.mxu1 }
 0x8e6   :  { %v3777_v59 = vadd.f32 %v3731_v54, %v3472_v53  ;;  %v3733_v0 = vadd.f32 %v3732_v56, %v3560_v55 }
 0x8e7   :  { %v3734_v60 = vpop.f32.mrf.mxu0  ;;  %v3774_v62 = vpop.f32.mrf.mxu1 }
 0x8e8   :  { %v8887_v63 = vmul.f32 -1.442695, %v3777_v59  ;;  %v3784_v6 = vadd.f32 %v3733_v0, %v3474_v5 }
 0x8e9   :  { %v3735_v1 = vpop.f32.mrf.mxu0  ;;  %v9872_v4 = vpop.f32.mrf.mxu1 }
 0x8ea   :  { %10696 = vpow2.f32 %v8887_v63  ;;  %v8888_v7 = vmul.f32 -1.442695, %v3784_v6 }
 0x8ec   :  { %10698 = vpow2.f32 %v8888_v7 }
 0x8f7   :  { %v10697_v8 = vpop.eup %10696 }
 0x8f8   :  { %v3781_v9 = vadd.f32 1.0, %v10697_v8 }
 0x8f9   :  { %v10699_v11 = vpop.eup %10698 }
 0x8fa   :  { %10700 = vrcp.f32 %v3781_v9  ;;  %v3788_v13 = vadd.f32 1.0, %v10699_v11 }
 0x8fc   :  { %10702 = vrcp.f32 %v3788_v13 }
 0x907   :  { %v10701_v15 = vpop.eup %10700 }
 0x908   :  { %v3791_v17 = vmul.f32 %v10701_v15, %v3772_v14 }
 0x909   :  { %v10703_v61 = vpop.eup %10702 }
 0x90a   :  { %v3792_v3 = vadd.f32 %v3791_v17, %v3513_v16  ;;  %v3794_v18 = vsub.f32 1.0, %v10703_v61  ;;  %v3796_v20 = vmul.f32 %v10703_v61, %v3258_v37 }
 0x90c   :  { %10704 = vtanh.f32 %v3792_v3 }
 0x919   :  { %v10705_v19 = vpop.eup %10704 }
 0x91a   :  { %v3795_v21 = vmul.f32 %v10705_v19, %v3794_v18 }
 0x91c   :  { %v11863_v22 = vadd.f32 %v3796_v20, %v3795_v21  ;;  %3806 = sbr.rel (%p8890_p1) target bundleno = 2340 (0x924), region = 77 }
 0x91e   :  { %v3798_v23 = vmax.f32 %v11863_v22, 0.0  ;;  %3801 = vst [vmem:[#allocation16 + $0x18] sm:$0xff] %v11863_v22 }
 0x920   :  { %3799 = vst [vmem:[#allocation2 + $0x8] sm:$0xff] %v3798_v23 }
 0x921   :  { %v3810_v24 = vld [vmem:[#allocation3 + $0xb0] sm:$0xff]  ;;  %v3811_v25 = vld [vmem:[#allocation3 + $0x68] sm:$0xff] }
 0x922   :  { %v3812_v26 = vld [vmem:[#allocation3 + $0x10] sm:$0xff]  ;;  %3813 = vst [vmem:[#allocation4 + $0x8] sm:$0xff] %v3810_v24  ;;  %3814 = vst [vmem:[#allocation4] sm:$0xff] %v3811_v25 }
 0x923   :  { %3815 = vst [vmem:[#allocation4 + $0x10] sm:$0xff] %v3812_v26 }
 0x924 PF:  { %p8891_p2 = scmp.gt.s32.totalorder %s11849_s11, 0 }
 0x926   :  { %3819 = sbr.rel (%p8891_p2) target bundleno = 2580 (0xa14), region = 81 }
 0x92b   :  { %v10706_v27 = vld [vmem:[#allocation13 + $0xac] ss:$12 sps:$4 sm:$0xff]   ;;  %v11489_v28 = vmov 0.0   ;;  %v10708_v29 = vld [vmem:[#allocation13 + $0xb0] ss:$12 sps:$4 sm:$0xff]   ;;  %vm11490_vm3 = vmmov 0   ;;  %v3820_v57 = vpack.c.bf16 %v11863_v22, %v11863_v22 }
 0x92c   :  { %9873 = vmatprep.subr.bf16.mxu1 %v11489_v28  ;;  %9889 = vmatprep.mubr.msk.bf16.mxu1 %vm11490_vm3, %v11489_v28  ;;  %v10709_v32 = vld [vmem:[#allocation13 + $0xa8] ss:$12 sps:$4 sm:$0xff]   ;;  %v11491_v37 = vmov 0   ;;  %v10712_v38 = vld [vmem:[#allocation13 + $0x98] ss:$12 sps:$4 sm:$0xff]  }
 0x92d   :  { %3998 = vmatprep.subr.bf16.mxu0 %v10706_v27  ;;  %9874 = vmatpush3.bf16.msra.mxu1 %v10708_v29  ;;  %v10710_v34 = vld [vmem:[#allocation13 + $0x94] ss:$12 sps:$4 sm:$0xff]   ;;  %v10713_v40 = vld [vmem:[#allocation13 + $0x90] ss:$12 sps:$4 sm:$0xff]   ;;  %v10717_v42 = vld [vmem:[#allocation13 + $0x78] ss:$12 sps:$4 sm:$0xff]  }
 0x92e   :  { %4030 = vmatprep.mubr.bf16.mxu0 %v11491_v37  ;;  %3999 = vmatpush1.bf16.msra.mxu0 %v10709_v32  ;;  %v10714_v35 = vld [vmem:[#allocation13 + $0x7c] ss:$12 sps:$4 sm:$0xff]   ;;  %v10716_v41 = vld [vmem:[#allocation13 + $0x80] ss:$12 sps:$4 sm:$0xff]   ;;  %v10718_v43 = vld [vmem:[#allocation13 + $0x64] ss:$12 sps:$4 sm:$0xff]  }
 0x92f   :  { %9875 = vmatprep.subr.bf16.mxu1 %v11489_v28  ;;  %4000 = vmatprep.subr.bf16.mxu0 %v10710_v34  ;;  %v10720_v44 = vld [vmem:[#allocation13 + $0x68] ss:$12 sps:$4 sm:$0xff]   ;;  %v10721_v45 = vld [vmem:[#allocation13 + $0x60] ss:$12 sps:$4 sm:$0xff]   ;;  %v10724_v47 = vld [vmem:[#allocation13 + $0x50] ss:$12 sps:$4 sm:$0xff]  }
 0x930   :  { %v10722_v46 = vld [vmem:[#allocation13 + $0x4c] ss:$12 sps:$4 sm:$0xff]   ;;  %v10725_v48 = vld [vmem:[#allocation13 + $0x48] ss:$12 sps:$4 sm:$0xff]   ;;  %v10729_v36 = vld [vmem:[#allocation13 + $0x30] ss:$12 sps:$4 sm:$0xff]  }
 0x931   :  { %9876 = vmatpush3.bf16.msra.mxu1 %v10712_v38  ;;  %v10726_v49 = vld [vmem:[#allocation13 + $0x34] ss:$12 sps:$4 sm:$0xff]   ;;  %v10728_v50 = vld [vmem:[#allocation13 + $0x38] ss:$12 sps:$4 sm:$0xff]   ;;  %v10730_v51 = vld [vmem:[#allocation13 + $0x1c] ss:$12 sps:$4 sm:$0xff]  }
 0x932   :  { %4001 = vmatpush1.bf16.msra.mxu0 %v10713_v40  ;;  %9877 = vmatprep.subr.bf16.mxu1 %v11489_v28  ;;  %v10732_v52 = vld [vmem:[#allocation13 + $0x20] ss:$12 sps:$4 sm:$0xff]   ;;  %v10733_v53 = vld [vmem:[#allocation13 + $0x18] ss:$12 sps:$4 sm:$0xff]   ;;  %v10736_v55 = vld [vmem:[#allocation13 + $0x8] ss:$12 sps:$4 sm:$0xff]  }
 0x933   :  { %4002 = vmatprep.subr.bf16.mxu0 %v10714_v35  ;;  %v10734_v54 = vld [vmem:[#allocation13 + $0x4] ss:$12 sps:$4 sm:$0xff]   ;;  %v10737_v56 = vld [vmem:[#allocation13] ss:$12 sps:$4 sm:$0xff]  }
 0x934   :  { %v3853_v58 = vld [vmem:[%s12177_s6] sm:$0x7] }
 0x935   :  { %9878 = vmatpush3.bf16.msra.mxu1 %v10716_v41  ;;  %v3866_v59 = vrot.slane %v3853_v58, %v11665_v39  ;;  %v3858_v60 = vrot.slane %v3853_v58, %v11651_v31  ;;  %v3862_v63 = vrot.slane %v3853_v58, %v11656_v33 }
 0x936   :  { %4003 = vmatpush1.bf16.msra.mxu0 %v10717_v42  ;;  %9879 = vmatprep.subr.bf16.mxu1 %v11489_v28 }
 0x937   :  { %4004 = vmatprep.subr.bf16.mxu0 %v10718_v43 }
 0x939   :  { %9880 = vmatpush3.bf16.msra.mxu1 %v10720_v44 }
 0x93a   :  { %4005 = vmatpush1.bf16.msra.mxu0 %v10721_v45  ;;  %9881 = vmatprep.subr.bf16.mxu1 %v11489_v28 }
 0x93b   :  { %4006 = vmatprep.subr.bf16.mxu0 %v10722_v46 }
 0x93d   :  { %9882 = vmatpush3.bf16.msra.mxu1 %v10724_v47 }
 0x93e   :  { %4007 = vmatpush1.bf16.msra.mxu0 %v10725_v48  ;;  %9883 = vmatprep.subr.bf16.mxu1 %v11489_v28 }
 0x93f   :  { %4008 = vmatprep.subr.bf16.mxu0 %v10726_v49 }
 0x941   :  { %9884 = vmatpush3.bf16.msra.mxu1 %v10728_v50 }
 0x942   :  { %4009 = vmatpush1.bf16.msra.mxu0 %v10729_v36  ;;  %9885 = vmatprep.subr.bf16.mxu1 %v11489_v28 }
 0x943   :  { %4010 = vmatprep.subr.bf16.mxu0 %v10730_v51 }
 0x945   :  { %9886 = vmatpush3.bf16.msra.mxu1 %v10732_v52 }
 0x946   :  { %4011 = vmatpush1.bf16.msra.mxu0 %v10733_v53  ;;  %9887 = vmatprep.subr.bf16.mxu1 %v11489_v28 }
 0x947   :  { %4012 = vmatprep.subr.bf16.mxu0 %v10734_v54 }
 0x949   :  { %9888 = vmatpush3.bf16.msra.mxu1 %v10736_v55 }
 0x94a   :  { %4013 = vmatpush1.bf16.msra.mxu0 %v10737_v56 }
 0x94c   :  { %9890 = vmatmul.mubr.bf16.vlgmr.msra.gmra.mxu1 %v3820_v57 }
 0x94d   :  { %4031 = vmatmul.mubr.bf16.vlgmr.msra.gmra.mxu0 %v3820_v57 }
 0xa0c   :  { %v4073_v62 = vpop.f32.mrf.mxu1 }
 0xa0d   :  { %v4074_v0 = vadd.f32 %v4073_v62, %v3866_v59  ;;  %v4032_v1 = vpop.f32.mrf.mxu0 }
 0xa0e   :  { %v4033_v4 = vadd.f32 %v4032_v1, %v3858_v60  ;;  %v9891_v5 = vpop.f32.mrf.mxu1 }
 0xa0f   :  { %4081 = vst [vmem:[#allocation4 + $0x10] sm:$0xff] %v4074_v0  ;;  %v4034_v6 = vpop.f32.mrf.mxu0 }
 0xa10   :  { %4079 = vst [vmem:[#allocation4 + $0x8] sm:$0xff] %v4033_v4  ;;  %v4035_v7 = vadd.f32 %v4034_v6, %v3862_v63  ;;  %v4076_v8 = vpop.f32.mrf.mxu1 }
 0xa11   :  { %v4036_v9 = vpop.f32.mrf.mxu0 }
 0xa12   :  { %4080 = vst [vmem:[#allocation4] sm:$0xff] %v4035_v7  ;;  %v9892_v10 = vpop.f32.mrf.mxu1 }
 0xa13   :  { %v4037_v11 = vpop.f32.mrf.mxu0 }
 0xa14 PF:  { %v10738_v12 = vld [vmem:[#allocation15 + $0xac] ss:$12 sps:$4 sm:$0xff]   ;;  %9893 = vmatprep.subr.bf16.mxu1 %v11481_v30  ;;  %4293 = vmatprep.mubr.bf16.mxu0 %v11480_v2  ;;  %v10740_v13 = vld [vmem:[#allocation15 + $0xa8] ss:$12 sps:$4 sm:$0xff]   ;;  %v10743_v15 = vld [vmem:[#allocation15 + $0x90] ss:$12 sps:$4 sm:$0xff]  }
 0xa15   :  { %9909 = vmatprep.mubr.msk.bf16.mxu1 %vm11482_vm0, %v11481_v30  ;;  %4261 = vmatprep.subr.bf16.mxu0 %v10738_v12  ;;  %v10741_v14 = vld [vmem:[#allocation15 + $0x94] ss:$12 sps:$4 sm:$0xff]   ;;  %v10744_v16 = vld [vmem:[#allocation15 + $0x7c] ss:$12 sps:$4 sm:$0xff]   ;;  %v10746_v17 = vld [vmem:[#allocation15 + $0x78] ss:$12 sps:$4 sm:$0xff]  }
 0xa16   :  { %4262 = vmatpush1.bf16.msra.mxu0 %v10740_v13  ;;  %v10747_v3 = vld [vmem:[#allocation15 + $0x64] ss:$12 sps:$4 sm:$0xff]   ;;  %v10749_v61 = vld [vmem:[#allocation15 + $0x60] ss:$12 sps:$4 sm:$0xff]   ;;  %v10752_v21 = vld [vmem:[#allocation15 + $0x48] ss:$12 sps:$4 sm:$0xff]  }
 0xa17   :  { %4263 = vmatprep.subr.bf16.mxu0 %v10741_v14  ;;  %v10762_v18 = vld [vmem:[#allocation15 + $0xb0] ss:$12 sps:$4 sm:$0xff]   ;;  %v10750_v19 = vld [vmem:[#allocation15 + $0x4c] ss:$12 sps:$4 sm:$0xff]   ;;  %v10753_v22 = vld [vmem:[#allocation15 + $0x34] ss:$12 sps:$4 sm:$0xff]  }
 0xa18   :  { %9894 = vmatpush3.bf16.msra.mxu1 %v10762_v18  ;;  %v10763_v20 = vld [vmem:[#allocation15 + $0x98] ss:$12 sps:$4 sm:$0xff]   ;;  %v10755_v23 = vld [vmem:[#allocation15 + $0x30] ss:$12 sps:$4 sm:$0xff]   ;;  %v10764_v24 = vld [vmem:[#allocation15 + $0x80] ss:$12 sps:$4 sm:$0xff]  }
 0xa19   :  { %9895 = vmatprep.subr.bf16.mxu1 %v11481_v30  ;;  %v10756_v25 = vld [vmem:[#allocation15 + $0x1c] ss:$12 sps:$4 sm:$0xff]   ;;  %v10758_v27 = vld [vmem:[#allocation15 + $0x18] ss:$12 sps:$4 sm:$0xff]   ;;  %v10761_v32 = vld [vmem:[#allocation15] ss:$12 sps:$4 sm:$0xff]  }
 0xa1a   :  { %4264 = vmatpush1.bf16.msra.mxu0 %v10743_v15  ;;  %v10765_v26 = vld [vmem:[#allocation15 + $0x68] ss:$12 sps:$4 sm:$0xff]   ;;  %v10759_v28 = vld [vmem:[#allocation15 + $0x4] ss:$12 sps:$4 sm:$0xff]   ;;  %v10768_v40 = vld [vmem:[#allocation15 + $0x20] ss:$12 sps:$4 sm:$0xff]  }
 0xa1b   :  { %4265 = vmatprep.subr.bf16.mxu0 %v10744_v16  ;;  %v10766_v29 = vld [vmem:[#allocation15 + $0x50] ss:$12 sps:$4 sm:$0xff]   ;;  %v11884_v34 = vld [vmem:[#allocation2] sm:$0xff]  ;;  %v10769_v35 = vld [vmem:[#allocation15 + $0x8] ss:$12 sps:$4 sm:$0xff]   ;;  %s11921_s18 = sld [smem:[#allocation5 + $0x4]] }
 0xa1c   :  { %9896 = vmatpush3.bf16.msra.mxu1 %v10763_v20  ;;  %v10767_v37 = vld [vmem:[#allocation15 + $0x38] ss:$12 sps:$4 sm:$0xff]   ;;  %v4083_v38 = vpack.c.bf16 %v11884_v34, %v11884_v34  ;;  %v10770_v42 = vld [vmem:[#allocation13 + $0x168] ss:$12 sps:$4 sm:$0xff]   ;;  %v10773_v43 = vld [vmem:[#allocation13 + $0x170] ss:$12 sps:$4 sm:$0xff]  }
 0xa1d   :  { %9897 = vmatprep.subr.bf16.mxu1 %v11481_v30  ;;  %v10772_v41 = vld [vmem:[#allocation13 + $0x16c] ss:$12 sps:$4 sm:$0xff]   ;;  %v10776_v44 = vld [vmem:[#allocation13 + $0x154] ss:$12 sps:$4 sm:$0xff]   ;;  %v10774_v45 = vld [vmem:[#allocation13 + $0x150] ss:$12 sps:$4 sm:$0xff]  }
 0xa1e   :  { %4266 = vmatpush1.bf16.msra.mxu0 %v10746_v17  ;;  %v10777_v46 = vld [vmem:[#allocation13 + $0x158] ss:$12 sps:$4 sm:$0xff]   ;;  %v10780_v47 = vld [vmem:[#allocation13 + $0x13c] ss:$12 sps:$4 sm:$0xff]   ;;  %v10781_v49 = vld [vmem:[#allocation13 + $0x140] ss:$12 sps:$4 sm:$0xff]  }
 0xa1f   :  { %4267 = vmatprep.subr.bf16.mxu0 %v10747_v3  ;;  %v10778_v48 = vld [vmem:[#allocation13 + $0x138] ss:$12 sps:$4 sm:$0xff]   ;;  %v10782_v36 = vld [vmem:[#allocation13 + $0x120] ss:$12 sps:$4 sm:$0xff]   ;;  %v10785_v51 = vld [vmem:[#allocation13 + $0x128] ss:$12 sps:$4 sm:$0xff]  }
 0xa20   :  { %9898 = vmatpush3.bf16.msra.mxu1 %v10764_v24  ;;  %v10784_v50 = vld [vmem:[#allocation13 + $0x124] ss:$12 sps:$4 sm:$0xff]   ;;  %v10786_v52 = vld [vmem:[#allocation13 + $0x108] ss:$12 sps:$4 sm:$0xff]   ;;  %v10788_v53 = vld [vmem:[#allocation13 + $0x10c] ss:$12 sps:$4 sm:$0xff]  }
 0xa21   :  { %9899 = vmatprep.subr.bf16.mxu1 %v11481_v30  ;;  %v10789_v54 = vld [vmem:[#allocation13 + $0x110] ss:$12 sps:$4 sm:$0xff]   ;;  %v10792_v55 = vld [vmem:[#allocation13 + $0xf4] ss:$12 sps:$4 sm:$0xff]   ;;  %v10793_v57 = vld [vmem:[#allocation13 + $0xf8] ss:$12 sps:$4 sm:$0xff]  }
 0xa22   :  { %4268 = vmatpush1.bf16.msra.mxu0 %v10749_v61  ;;  %v10790_v56 = vld [vmem:[#allocation13 + $0xf0] ss:$12 sps:$4 sm:$0xff]   ;;  %v10794_v59 = vld [vmem:[#allocation13 + $0xd8] ss:$12 sps:$4 sm:$0xff]   ;;  %v10797_v60 = vld [vmem:[#allocation13 + $0xe0] ss:$12 sps:$4 sm:$0xff]  }
 0xa23   :  { %4269 = vmatprep.subr.bf16.mxu0 %v10750_v19  ;;  %v10796_v58 = vld [vmem:[#allocation13 + $0xdc] ss:$12 sps:$4 sm:$0xff]   ;;  %v10800_v62 = vld [vmem:[#allocation13 + $0xc4] ss:$12 sps:$4 sm:$0xff]   ;;  %v10798_v63 = vld [vmem:[#allocation13 + $0xc0] ss:$12 sps:$4 sm:$0xff]  }
 0xa24   :  { %9900 = vmatpush3.bf16.msra.mxu1 %v10765_v26  ;;  %v10801_v0 = vld [vmem:[#allocation13 + $0xc8] ss:$12 sps:$4 sm:$0xff]   ;;  %v10804_v1 = vld [vmem:[#allocation15 + $0x16c] ss:$12 sps:$4 sm:$0xff]   ;;  %v4116_v4 = vld [vmem:[%s12178_s7] sm:$0x7] }
 0xa25   :  { %9901 = vmatprep.subr.bf16.mxu1 %v11481_v30  ;;  %v4121_v5 = vrot.slane %v4116_v4, %v11651_v31  ;;  %v4342_v7 = vld [vmem:[#allocation4 + $0x8] sm:$0xff]  ;;  %v4125_v9 = vrot.slane %v4116_v4, %v11656_v33  ;;  %v4343_v15 = vld [vmem:[#allocation4] sm:$0xff]  ;;  %p8995_p3 = scmp.le.s32.totalorder %s11921_s18, 0 }
 0xa26   :  { %4270 = vmatpush1.bf16.msra.mxu0 %v10752_v21 }
 0xa27   :  { %4271 = vmatprep.subr.bf16.mxu0 %v10753_v22 }
 0xa28   :  { %9902 = vmatpush3.bf16.msra.mxu1 %v10766_v29 }
 0xa29   :  { %9903 = vmatprep.subr.bf16.mxu1 %v11481_v30 }
 0xa2a   :  { %4272 = vmatpush1.bf16.msra.mxu0 %v10755_v23  ;;  %v4129_v23 = vrot.slane %v4116_v4, %v11665_v39  ;;  %v4368_v4 = vld [vmem:[#allocation2 + $0x8] sm:$0xff] }
 0xa2b   :  { %4273 = vmatprep.subr.bf16.mxu0 %v10756_v25 }
 0xa2c   :  { %9904 = vmatpush3.bf16.msra.mxu1 %v10767_v37 }
 0xa2d   :  { %9905 = vmatprep.subr.bf16.mxu1 %v11481_v30 }
 0xa2e   :  { %4274 = vmatpush1.bf16.msra.mxu0 %v10758_v27 }
 0xa2f   :  { %4275 = vmatprep.subr.bf16.mxu0 %v10759_v28  ;;  %v4344_v28 = vld [vmem:[#allocation4 + $0x10] sm:$0xff] }
 0xa30   :  { %9906 = vmatpush3.bf16.msra.mxu1 %v10768_v40 }
 0xa31   :  { %9907 = vmatprep.subr.bf16.mxu1 %v11481_v30 }
 0xa32   :  { %4276 = vmatpush1.bf16.msra.mxu0 %v10761_v32 }
 0xa33   :  { %4547 = vmatprep.subr.bf16.mxu0 %v10772_v41 }
 0xa34   :  { %9908 = vmatpush3.bf16.msra.mxu1 %v10769_v35 }
 0xa35   :  { %4294 = vmatmul.mubr.bf16.vlgmr.msra.gmra.mxu0 %v4083_v38  ;;  %9913 = vmatprep.subr.bf16.mxu1 %v11481_v30 }
 0xa36   :  { %4579 = vmatprep.mubr.bf16.mxu0 %v11480_v2  ;;  %4548 = vmatpush1.bf16.msra.mxu0 %v10770_v42 }
 0xa37   :  { %9910 = vmatmul.mubr.bf16.vlgmr.msra.gmra.mxu1 %v4083_v38  ;;  %4549 = vmatprep.subr.bf16.mxu0 %v10776_v44  ;;  %v10826_v44 = vld [vmem:[#allocation15 + $0x170] ss:$12 sps:$4 sm:$0xff]  }
 0xa38   :  { %9929 = vmatprep.mubr.msk.bf16.mxu1 %vm11482_vm0, %v11481_v30  ;;  %9914 = vmatpush3.bf16.msra.mxu1 %v10773_v43  ;;  %v10802_v43 = vld [vmem:[#allocation15 + $0x168] ss:$12 sps:$4 sm:$0xff]  }
 0xa39   :  { %9915 = vmatprep.subr.bf16.mxu1 %v11481_v30 }
 0xa3a   :  { %4550 = vmatpush1.bf16.msra.mxu0 %v10774_v45 }
 0xa3b   :  { %4551 = vmatprep.subr.bf16.mxu0 %v10780_v47  ;;  %v10807_v47 = vld [vmem:[#allocation15 + $0x154] ss:$12 sps:$4 sm:$0xff]  }
 0xa3c   :  { %9916 = vmatpush3.bf16.msra.mxu1 %v10777_v46 }
 0xa3d   :  { %9917 = vmatprep.subr.bf16.mxu1 %v11481_v30 }
 0xa3e   :  { %4552 = vmatpush1.bf16.msra.mxu0 %v10778_v48  ;;  %v10805_v48 = vld [vmem:[#allocation15 + $0x150] ss:$12 sps:$4 sm:$0xff]  }
 0xa3f   :  { %4553 = vmatprep.subr.bf16.mxu0 %v10784_v50  ;;  %v10810_v50 = vld [vmem:[#allocation15 + $0x13c] ss:$12 sps:$4 sm:$0xff]  }
 0xa40   :  { %9918 = vmatpush3.bf16.msra.mxu1 %v10781_v49  ;;  %v10827_v49 = vld [vmem:[#allocation15 + $0x158] ss:$12 sps:$4 sm:$0xff]  }
 0xa41   :  { %9919 = vmatprep.subr.bf16.mxu1 %v11481_v30 }
 0xa42   :  { %4554 = vmatpush1.bf16.msra.mxu0 %v10782_v36  ;;  %v10828_v36 = vld [vmem:[#allocation15 + $0x140] ss:$12 sps:$4 sm:$0xff]  }
 0xa43   :  { %4555 = vmatprep.subr.bf16.mxu0 %v10788_v53  ;;  %v10829_v53 = vld [vmem:[#allocation15 + $0x128] ss:$12 sps:$4 sm:$0xff]  }
 0xa44   :  { %9920 = vmatpush3.bf16.msra.mxu1 %v10785_v51  ;;  %v10813_v51 = vld [vmem:[#allocation15 + $0x124] ss:$12 sps:$4 sm:$0xff]  }
 0xa45   :  { %9921 = vmatprep.subr.bf16.mxu1 %v11481_v30 }
 0xa46   :  { %4556 = vmatpush1.bf16.msra.mxu0 %v10786_v52  ;;  %v10811_v52 = vld [vmem:[#allocation15 + $0x120] ss:$12 sps:$4 sm:$0xff]  }
 0xa47   :  { %4557 = vmatprep.subr.bf16.mxu0 %v10792_v55  ;;  %v10814_v55 = vld [vmem:[#allocation15 + $0x108] ss:$12 sps:$4 sm:$0xff]  }
 0xa48   :  { %9922 = vmatpush3.bf16.msra.mxu1 %v10789_v54  ;;  %v10816_v54 = vld [vmem:[#allocation15 + $0x10c] ss:$12 sps:$4 sm:$0xff]  }
 0xa49   :  { %9923 = vmatprep.subr.bf16.mxu1 %v11481_v30 }
 0xa4a   :  { %4558 = vmatpush1.bf16.msra.mxu0 %v10790_v56  ;;  %v10830_v56 = vld [vmem:[#allocation15 + $0x110] ss:$12 sps:$4 sm:$0xff]  }
 0xa4b   :  { %4559 = vmatprep.subr.bf16.mxu0 %v10796_v58  ;;  %v10817_v58 = vld [vmem:[#allocation15 + $0xf0] ss:$12 sps:$4 sm:$0xff]  }
 0xa4c   :  { %9924 = vmatpush3.bf16.msra.mxu1 %v10793_v57  ;;  %v10819_v57 = vld [vmem:[#allocation15 + $0xf4] ss:$12 sps:$4 sm:$0xff]  }
 0xa4d   :  { %9925 = vmatprep.subr.bf16.mxu1 %v11481_v30 }
 0xa4e   :  { %4560 = vmatpush1.bf16.msra.mxu0 %v10794_v59  ;;  %v10831_v59 = vld [vmem:[#allocation15 + $0xf8] ss:$12 sps:$4 sm:$0xff]  }
 0xa4f   :  { %4561 = vmatprep.subr.bf16.mxu0 %v10800_v62  ;;  %v10820_v62 = vld [vmem:[#allocation15 + $0xd8] ss:$12 sps:$4 sm:$0xff]  }
 0xa50   :  { %9926 = vmatpush3.bf16.msra.mxu1 %v10797_v60  ;;  %v10822_v60 = vld [vmem:[#allocation15 + $0xdc] ss:$12 sps:$4 sm:$0xff]  }
 0xa51   :  { %9927 = vmatprep.subr.bf16.mxu1 %v11481_v30 }
 0xa52   :  { %4562 = vmatpush1.bf16.msra.mxu0 %v10798_v63  ;;  %v10832_v63 = vld [vmem:[#allocation15 + $0xe0] ss:$12 sps:$4 sm:$0xff]  }
 0xa53   :  { %4806 = vmatprep.subr.bf16.mxu0 %v10804_v1  ;;  %v10823_v1 = vld [vmem:[#allocation15 + $0xc0] ss:$12 sps:$4 sm:$0xff]  }
 0xa54   :  { %9928 = vmatpush3.bf16.msra.mxu1 %v10801_v0  ;;  %v10825_v0 = vld [vmem:[#allocation15 + $0xc4] ss:$12 sps:$4 sm:$0xff]  }
 0xa55   :  { %9933 = vmatprep.subr.bf16.mxu1 %v11481_v30 }
 0xaf5   :  { %v4295_v6 = vpop.f32.mrf.mxu0 }
 0xaf6   :  { %v4296_v8 = vadd.f32 %v4295_v6, %v4121_v5  ;;  %v10833_v5 = vld [vmem:[#allocation15 + $0xc8] ss:$12 sps:$4 sm:$0xff]   ;;  %v4628_v6 = vpack.c.bf16 %v4368_v4, %v4368_v4 }
 0xaf7   :  { %v4297_v10 = vpop.f32.mrf.mxu0  ;;  %v4336_v3 = vpop.f32.mrf.mxu1 }
 0xaf8   :  { %v4345_v11 = vadd.f32 %v4342_v7, %v4296_v8  ;;  %v4298_v14 = vadd.f32 %v4297_v10, %v4125_v9  ;;  %v4337_v26 = vadd.f32 %v4336_v3, %v4129_v23 }
 0xaf9   :  { %v4299_v12 = vpop.f32.mrf.mxu0  ;;  %v9911_v61 = vpop.f32.mrf.mxu1 }
 0xafa   :  { %v8940_v13 = vmul.f32 -1.442695, %v4345_v11  ;;  %v4352_v17 = vadd.f32 %v4343_v15, %v4298_v14  ;;  %v8942_v15 = vld [vmem:[%s12177_s6 + $0x3] sm:$0x7] }
 0xafb   :  { %v4300_v16 = vpop.f32.mrf.mxu0  ;;  %v4339_v19 = vpop.f32.mrf.mxu1 }
 0xafc   :  { %10834 = vpow2.f32 %v8940_v13  ;;  %v8941_v18 = vmul.f32 -1.442695, %v4352_v17  ;;  %v8967_v16 = vld [vmem:[%s12178_s7 + $0x3] sm:$0x7]  ;;  %v4407_v17 = vrot.slane %v8942_v15, %v11651_v31 }
 0xafd   :  { %v9912_v20 = vpop.f32.mrf.mxu1  ;;  %v4666_v3 = vrot.slane %v8967_v16, %v11651_v31 }
 0xafe   :  { %10836 = vpow2.f32 %v8941_v18 }
 0xb09   :  { %v10835_v21 = vpop.eup %10834 }
 0xb0a   :  { %v4349_v22 = vadd.f32 1.0, %v10835_v21  ;;  %v4670_v21 = vrot.slane %v8967_v16, %v11656_v33 }
 0xb0b   :  { %v10837_v24 = vpop.eup %10836 }
 0xb0c   :  { %10838 = vrcp.f32 %v4349_v22  ;;  %v4356_v25 = vadd.f32 1.0, %v10837_v24  ;;  %v4411_v24 = vrot.slane %v8942_v15, %v11656_v33 }
 0xb0e   :  { %10840 = vrcp.f32 %v4356_v25 }
 0xb19   :  { %v10839_v27 = vpop.eup %10838 }
 0xb1a   :  { %v4359_v29 = vmul.f32 %v10839_v27, %v4337_v26 }
 0xb1b   :  { %v10841_v37 = vpop.eup %10840 }
 0xb1c   :  { %v4360_v32 = vadd.f32 %v4359_v29, %v4344_v28  ;;  %v4362_v38 = vsub.f32 1.0, %v10841_v37  ;;  %v4364_v41 = vmul.f32 %v10841_v37, %v11884_v34  ;;  %v10808_v34 = vld [vmem:[#allocation15 + $0x138] ss:$12 sps:$4 sm:$0xff]  }
 0xb1e   :  { %10842 = vtanh.f32 %v4360_v32 }
 0xb2b   :  { %v10843_v40 = vpop.eup %10842 }
 0xb2c   :  { %v4363_v35 = vmul.f32 %v10843_v40, %v4362_v38 }
 0xb2e   :  { %v4365_v42 = vadd.f32 %v4364_v41, %v4363_v35 }
 0xb30   :  { %v4366_v45 = vmax.f32 %v4365_v42, 0.0  ;;  %v4369_v46 = vpack.c.bf16 %v4365_v42, %v4365_v42 }
 0xb32   :  { %4367 = vst [vmem:[#allocation2] sm:$0xff] %v4366_v45  ;;  %4580 = vmatmul.mubr.bf16.vlgmr.msra.gmra.mxu0 %v4369_v46  ;;  %9930 = vmatmul.mubr.bf16.vlgmr.msra.gmra.mxu1 %v4369_v46  ;;  %v4415_v45 = vrot.slane %v8942_v15, %v11665_v39 }
 0xb33   :  { %4807 = vmatpush1.bf16.msra.mxu0 %v10802_v43  ;;  %9934 = vmatpush3.bf16.msra.mxu1 %v10826_v44  ;;  %v4674_v43 = vrot.slane %v8967_v16, %v11665_v39 }
 0xb34   :  { %4808 = vmatprep.subr.bf16.mxu0 %v10807_v47  ;;  %4838 = vmatprep.mubr.bf16.mxu0 %v11480_v2 }
 0xb35   :  { %9935 = vmatprep.subr.bf16.mxu1 %v11481_v30  ;;  %9949 = vmatprep.mubr.msk.bf16.mxu1 %vm11482_vm0, %v11481_v30 }
 0xb37   :  { %4809 = vmatpush1.bf16.msra.mxu0 %v10805_v48  ;;  %9936 = vmatpush3.bf16.msra.mxu1 %v10827_v49 }
 0xb38   :  { %4810 = vmatprep.subr.bf16.mxu0 %v10810_v50  ;;  %9937 = vmatprep.subr.bf16.mxu1 %v11481_v30 }
 0xb3b   :  { %4811 = vmatpush1.bf16.msra.mxu0 %v10808_v34  ;;  %9938 = vmatpush3.bf16.msra.mxu1 %v10828_v36 }
 0xb3c   :  { %4812 = vmatprep.subr.bf16.mxu0 %v10813_v51  ;;  %9939 = vmatprep.subr.bf16.mxu1 %v11481_v30 }
 0xb3f   :  { %4813 = vmatpush1.bf16.msra.mxu0 %v10811_v52  ;;  %9940 = vmatpush3.bf16.msra.mxu1 %v10829_v53 }
 0xb40   :  { %4814 = vmatprep.subr.bf16.mxu0 %v10816_v54  ;;  %9941 = vmatprep.subr.bf16.mxu1 %v11481_v30 }
 0xb43   :  { %4815 = vmatpush1.bf16.msra.mxu0 %v10814_v55  ;;  %9942 = vmatpush3.bf16.msra.mxu1 %v10830_v56 }
 0xb44   :  { %4816 = vmatprep.subr.bf16.mxu0 %v10819_v57  ;;  %9943 = vmatprep.subr.bf16.mxu1 %v11481_v30 }
 0xb47   :  { %4817 = vmatpush1.bf16.msra.mxu0 %v10817_v58  ;;  %9944 = vmatpush3.bf16.msra.mxu1 %v10831_v59 }
 0xb48   :  { %4818 = vmatprep.subr.bf16.mxu0 %v10822_v60  ;;  %9945 = vmatprep.subr.bf16.mxu1 %v11481_v30 }
 0xb4b   :  { %4819 = vmatpush1.bf16.msra.mxu0 %v10820_v62  ;;  %9946 = vmatpush3.bf16.msra.mxu1 %v10832_v63 }
 0xb4c   :  { %4820 = vmatprep.subr.bf16.mxu0 %v10825_v0  ;;  %9947 = vmatprep.subr.bf16.mxu1 %v11481_v30 }
 0xb4f   :  { %4821 = vmatpush1.bf16.msra.mxu0 %v10823_v1  ;;  %9948 = vmatpush3.bf16.msra.mxu1 %v10833_v5 }
 0xb52   :  { %4839 = vmatmul.mubr.bf16.vlgmr.msra.gmra.mxu0 %v4628_v6  ;;  %9950 = vmatmul.mubr.bf16.vlgmr.msra.gmra.mxu1 %v4628_v6 }
 0xbf2   :  { %v4581_v7 = vpop.f32.mrf.mxu0  ;;  %v4622_v8 = vpop.f32.mrf.mxu1 }
 0xbf3   :  { %v4582_v19 = vadd.f32 %v4581_v7, %v4407_v17  ;;  %v4623_v49 = vadd.f32 %v4622_v8, %v4415_v45 }
 0xbf4   :  { %v4583_v9 = vpop.f32.mrf.mxu0  ;;  %v9931_v10 = vpop.f32.mrf.mxu1 }
 0xbf5   :  { %v4584_v38 = vadd.f32 %v4583_v9, %v4411_v24 }
 0xbf6   :  { %v4585_v11 = vpop.f32.mrf.mxu0  ;;  %v4625_v12 = vpop.f32.mrf.mxu1 }
 0xbf8   :  { %v4586_v13 = vpop.f32.mrf.mxu0  ;;  %v9932_v14 = vpop.f32.mrf.mxu1 }
 0xc12   :  { %v4840_v61 = vpop.f32.mrf.mxu0  ;;  %v4881_v18 = vpop.f32.mrf.mxu1 }
 0xc13   :  { %v4841_v20 = vadd.f32 %v4840_v61, %v4666_v3  ;;  %v4882_v47 = vadd.f32 %v4881_v18, %v4674_v43 }
 0xc14   :  { %v4842_v22 = vpop.f32.mrf.mxu0  ;;  %v9951_v23 = vpop.f32.mrf.mxu1 }
 0xc15   :  { %v4887_v25 = vadd.f32 %v4841_v20, %v4582_v19  ;;  %v4843_v29 = vadd.f32 %v4842_v22, %v4670_v21 }
 0xc16   :  { %v4844_v26 = vpop.f32.mrf.mxu0  ;;  %v4884_v27 = vpop.f32.mrf.mxu1 }
 0xc17   :  { %v8992_v28 = vmul.f32 -1.442695, %v4887_v25  ;;  %v4894_v40 = vadd.f32 %v4843_v29, %v4584_v38 }
 0xc18   :  { %v4845_v32 = vpop.f32.mrf.mxu0  ;;  %v9952_v37 = vpop.f32.mrf.mxu1 }
 0xc19   :  { %10844 = vpow2.f32 %v8992_v28  ;;  %v8993_v35 = vmul.f32 -1.442695, %v4894_v40 }
 0xc1b   :  { %10846 = vpow2.f32 %v8993_v35 }
 0xc26   :  { %v10845_v41 = vpop.eup %10844 }
 0xc27   :  { %v4891_v42 = vadd.f32 1.0, %v10845_v41 }
 0xc28   :  { %v10847_v44 = vpop.eup %10846 }
 0xc29   :  { %10848 = vrcp.f32 %v4891_v42  ;;  %v4898_v46 = vadd.f32 1.0, %v10847_v44 }
 0xc2b   :  { %10850 = vrcp.f32 %v4898_v46 }
 0xc36   :  { %v10849_v48 = vpop.eup %10848 }
 0xc37   :  { %v4901_v50 = vmul.f32 %v10849_v48, %v4882_v47 }
 0xc38   :  { %v10851_v36 = vpop.eup %10850 }
 0xc39   :  { %v4902_v34 = vadd.f32 %v4901_v50, %v4623_v49  ;;  %v4904_v51 = vsub.f32 1.0, %v10851_v36  ;;  %v4906_v53 = vmul.f32 %v10851_v36, %v4368_v4 }
 0xc3b   :  { %10852 = vtanh.f32 %v4902_v34 }
 0xc48   :  { %v10853_v52 = vpop.eup %10852 }
 0xc49   :  { %v4905_v54 = vmul.f32 %v10853_v52, %v4904_v51 }
 0xc4b   :  { %v11935_v55 = vadd.f32 %v4906_v53, %v4905_v54  ;;  %4916 = sbr.rel (%p8995_p3) target bundleno = 3155 (0xc53), region = 85 }
 0xc4d   :  { %v4908_v56 = vmax.f32 %v11935_v55, 0.0  ;;  %4911 = vst [vmem:[#allocation16 + $0x20] sm:$0xff] %v11935_v55 }
 0xc4f   :  { %4909 = vst [vmem:[#allocation2 + $0x8] sm:$0xff] %v4908_v56 }
 0xc50   :  { %v4920_v57 = vld [vmem:[#allocation3 + $0x60] sm:$0xff]  ;;  %v4921_v58 = vld [vmem:[#allocation3 + $0x90] sm:$0xff]  ;;  %v4922_v59 = vld [vmem:[#allocation3 + $0x98] sm:$0xff] }
 0xc51   :  { %4923 = vst [vmem:[#allocation4 + $0x8] sm:$0xff] %v4920_v57  ;;  %4924 = vst [vmem:[#allocation4] sm:$0xff] %v4921_v58 }
 0xc52   :  { %4925 = vst [vmem:[#allocation4 + $0x10] sm:$0xff] %v4922_v59 }
 0xc53 PF:  { %p8996_p4 = scmp.gt.s32.totalorder %s11921_s18, 0 }
 0xc55   :  { %4929 = sbr.rel (%p8996_p4) target bundleno = 3395 (0xd43), region = 89 }
 0xc5a   :  { %v10854_v60 = vld [vmem:[#allocation13 + $0xac] ss:$12 sps:$4 sm:$0xff]   ;;  %v11492_v62 = vmov 0.0   ;;  %v10856_v63 = vld [vmem:[#allocation13 + $0xb0] ss:$12 sps:$4 sm:$0xff]   ;;  %vm11493_vm4 = vmmov 0   ;;  %v4930_v23 = vpack.c.bf16 %v11935_v55, %v11935_v55 }
 0xc5b   :  { %9953 = vmatprep.subr.bf16.mxu1 %v11492_v62  ;;  %9969 = vmatprep.mubr.msk.bf16.mxu1 %vm11493_vm4, %v11492_v62  ;;  %v10857_v0 = vld [vmem:[#allocation13 + $0xa8] ss:$12 sps:$4 sm:$0xff]   ;;  %v11494_v4 = vmov 0   ;;  %v10860_v5 = vld [vmem:[#allocation13 + $0x98] ss:$12 sps:$4 sm:$0xff]  }
 0xc5c   :  { %5108 = vmatprep.subr.bf16.mxu0 %v10854_v60  ;;  %9954 = vmatpush3.bf16.msra.mxu1 %v10856_v63  ;;  %v10858_v1 = vld [vmem:[#allocation13 + $0x94] ss:$12 sps:$4 sm:$0xff]   ;;  %v10861_v6 = vld [vmem:[#allocation13 + $0x90] ss:$12 sps:$4 sm:$0xff]   ;;  %v10865_v9 = vld [vmem:[#allocation13 + $0x78] ss:$12 sps:$4 sm:$0xff]  }
 0xc5d   :  { %5140 = vmatprep.mubr.bf16.mxu0 %v11494_v4  ;;  %5109 = vmatpush1.bf16.msra.mxu0 %v10857_v0  ;;  %v10862_v7 = vld [vmem:[#allocation13 + $0x7c] ss:$12 sps:$4 sm:$0xff]   ;;  %v10864_v8 = vld [vmem:[#allocation13 + $0x80] ss:$12 sps:$4 sm:$0xff]   ;;  %v10866_v10 = vld [vmem:[#allocation13 + $0x64] ss:$12 sps:$4 sm:$0xff]  }
 0xc5e   :  { %9955 = vmatprep.subr.bf16.mxu1 %v11492_v62  ;;  %5110 = vmatprep.subr.bf16.mxu0 %v10858_v1  ;;  %v10868_v11 = vld [vmem:[#allocation13 + $0x68] ss:$12 sps:$4 sm:$0xff]   ;;  %v10869_v12 = vld [vmem:[#allocation13 + $0x60] ss:$12 sps:$4 sm:$0xff]   ;;  %v10872_v14 = vld [vmem:[#allocation13 + $0x50] ss:$12 sps:$4 sm:$0xff]  }
 0xc5f   :  { %v10870_v13 = vld [vmem:[#allocation13 + $0x4c] ss:$12 sps:$4 sm:$0xff]   ;;  %v10873_v15 = vld [vmem:[#allocation13 + $0x48] ss:$12 sps:$4 sm:$0xff]   ;;  %v10877_v3 = vld [vmem:[#allocation13 + $0x30] ss:$12 sps:$4 sm:$0xff]  }
 0xc60   :  { %9956 = vmatpush3.bf16.msra.mxu1 %v10860_v5  ;;  %v10874_v16 = vld [vmem:[#allocation13 + $0x34] ss:$12 sps:$4 sm:$0xff]   ;;  %v10876_v17 = vld [vmem:[#allocation13 + $0x38] ss:$12 sps:$4 sm:$0xff]   ;;  %v10878_v61 = vld [vmem:[#allocation13 + $0x1c] ss:$12 sps:$4 sm:$0xff]  }
 0xc61   :  { %5111 = vmatpush1.bf16.msra.mxu0 %v10861_v6  ;;  %9957 = vmatprep.subr.bf16.mxu1 %v11492_v62  ;;  %v10880_v18 = vld [vmem:[#allocation13 + $0x20] ss:$12 sps:$4 sm:$0xff]   ;;  %v10881_v19 = vld [vmem:[#allocation13 + $0x18] ss:$12 sps:$4 sm:$0xff]   ;;  %v10884_v21 = vld [vmem:[#allocation13 + $0x8] ss:$12 sps:$4 sm:$0xff]  }
 0xc62   :  { %5112 = vmatprep.subr.bf16.mxu0 %v10862_v7  ;;  %v10882_v20 = vld [vmem:[#allocation13 + $0x4] ss:$12 sps:$4 sm:$0xff]   ;;  %v10885_v22 = vld [vmem:[#allocation13] ss:$12 sps:$4 sm:$0xff]  }
 0xc63   :  { %v4963_v24 = vld [vmem:[%s12177_s6] sm:$0x7] }
 0xc64   :  { %9958 = vmatpush3.bf16.msra.mxu1 %v10864_v8  ;;  %v4976_v25 = vrot.slane %v4963_v24, %v11665_v39  ;;  %v4968_v26 = vrot.slane %v4963_v24, %v11651_v31  ;;  %v4972_v28 = vrot.slane %v4963_v24, %v11656_v33 }
 0xc65   :  { %5113 = vmatpush1.bf16.msra.mxu0 %v10865_v9  ;;  %9959 = vmatprep.subr.bf16.mxu1 %v11492_v62 }
 0xc66   :  { %5114 = vmatprep.subr.bf16.mxu0 %v10866_v10 }
 0xc68   :  { %9960 = vmatpush3.bf16.msra.mxu1 %v10868_v11 }
 0xc69   :  { %5115 = vmatpush1.bf16.msra.mxu0 %v10869_v12  ;;  %9961 = vmatprep.subr.bf16.mxu1 %v11492_v62 }
 0xc6a   :  { %5116 = vmatprep.subr.bf16.mxu0 %v10870_v13 }
 0xc6c   :  { %9962 = vmatpush3.bf16.msra.mxu1 %v10872_v14 }
 0xc6d   :  { %5117 = vmatpush1.bf16.msra.mxu0 %v10873_v15  ;;  %9963 = vmatprep.subr.bf16.mxu1 %v11492_v62 }
 0xc6e   :  { %5118 = vmatprep.subr.bf16.mxu0 %v10874_v16 }
 0xc70   :  { %9964 = vmatpush3.bf16.msra.mxu1 %v10876_v17 }
 0xc71   :  { %5119 = vmatpush1.bf16.msra.mxu0 %v10877_v3  ;;  %9965 = vmatprep.subr.bf16.mxu1 %v11492_v62 }
 0xc72   :  { %5120 = vmatprep.subr.bf16.mxu0 %v10878_v61 }
 0xc74   :  { %9966 = vmatpush3.bf16.msra.mxu1 %v10880_v18 }
 0xc75   :  { %5121 = vmatpush1.bf16.msra.mxu0 %v10881_v19  ;;  %9967 = vmatprep.subr.bf16.mxu1 %v11492_v62 }
 0xc76   :  { %5122 = vmatprep.subr.bf16.mxu0 %v10882_v20 }
 0xc78   :  { %9968 = vmatpush3.bf16.msra.mxu1 %v10884_v21 }
 0xc79   :  { %5123 = vmatpush1.bf16.msra.mxu0 %v10885_v22 }
 0xc7b   :  { %9970 = vmatmul.mubr.bf16.vlgmr.msra.gmra.mxu1 %v4930_v23 }
 0xc7c   :  { %5141 = vmatmul.mubr.bf16.vlgmr.msra.gmra.mxu0 %v4930_v23 }
 0xd3b   :  { %v5183_v27 = vpop.f32.mrf.mxu1 }
 0xd3c   :  { %v5184_v29 = vadd.f32 %v5183_v27, %v4976_v25  ;;  %v5142_v32 = vpop.f32.mrf.mxu0 }
 0xd3d   :  { %v5143_v37 = vadd.f32 %v5142_v32, %v4968_v26  ;;  %v9971_v38 = vpop.f32.mrf.mxu1 }
 0xd3e   :  { %5191 = vst [vmem:[#allocation4 + $0x10] sm:$0xff] %v5184_v29  ;;  %v5144_v40 = vpop.f32.mrf.mxu0 }
 0xd3f   :  { %5189 = vst [vmem:[#allocation4 + $0x8] sm:$0xff] %v5143_v37  ;;  %v5145_v35 = vadd.f32 %v5144_v40, %v4972_v28  ;;  %v5186_v41 = vpop.f32.mrf.mxu1 }
 0xd40   :  { %v5146_v42 = vpop.f32.mrf.mxu0 }
 0xd41   :  { %5190 = vst [vmem:[#allocation4] sm:$0xff] %v5145_v35  ;;  %v9972_v43 = vpop.f32.mrf.mxu1 }
 0xd42   :  { %v5147_v44 = vpop.f32.mrf.mxu0 }
 0xd43 PF:  { %v10886_v45 = vld [vmem:[#allocation15 + $0xac] ss:$12 sps:$4 sm:$0xff]   ;;  %9973 = vmatprep.subr.bf16.mxu1 %v11481_v30  ;;  %5403 = vmatprep.mubr.bf16.mxu0 %v11480_v2  ;;  %v10888_v46 = vld [vmem:[#allocation15 + $0xa8] ss:$12 sps:$4 sm:$0xff]   ;;  %v10891_v48 = vld [vmem:[#allocation15 + $0x90] ss:$12 sps:$4 sm:$0xff]  }
 0xd44   :  { %9989 = vmatprep.mubr.msk.bf16.mxu1 %vm11482_vm0, %v11481_v30  ;;  %5371 = vmatprep.subr.bf16.mxu0 %v10886_v45  ;;  %v10889_v47 = vld [vmem:[#allocation15 + $0x94] ss:$12 sps:$4 sm:$0xff]   ;;  %v10892_v49 = vld [vmem:[#allocation15 + $0x7c] ss:$12 sps:$4 sm:$0xff]   ;;  %v10894_v50 = vld [vmem:[#allocation15 + $0x78] ss:$12 sps:$4 sm:$0xff]  }
 0xd45   :  { %5372 = vmatpush1.bf16.msra.mxu0 %v10888_v46  ;;  %v10895_v34 = vld [vmem:[#allocation15 + $0x64] ss:$12 sps:$4 sm:$0xff]   ;;  %v10897_v36 = vld [vmem:[#allocation15 + $0x60] ss:$12 sps:$4 sm:$0xff]   ;;  %v10900_v54 = vld [vmem:[#allocation15 + $0x48] ss:$12 sps:$4 sm:$0xff]  }
 0xd46   :  { %5373 = vmatprep.subr.bf16.mxu0 %v10889_v47  ;;  %v10910_v51 = vld [vmem:[#allocation15 + $0xb0] ss:$12 sps:$4 sm:$0xff]   ;;  %v10898_v52 = vld [vmem:[#allocation15 + $0x4c] ss:$12 sps:$4 sm:$0xff]   ;;  %v10901_v55 = vld [vmem:[#allocation15 + $0x34] ss:$12 sps:$4 sm:$0xff]  }
 0xd47   :  { %9974 = vmatpush3.bf16.msra.mxu1 %v10910_v51  ;;  %v10911_v53 = vld [vmem:[#allocation15 + $0x98] ss:$12 sps:$4 sm:$0xff]   ;;  %v10903_v56 = vld [vmem:[#allocation15 + $0x30] ss:$12 sps:$4 sm:$0xff]   ;;  %v10912_v57 = vld [vmem:[#allocation15 + $0x80] ss:$12 sps:$4 sm:$0xff]  }
 0xd48   :  { %9975 = vmatprep.subr.bf16.mxu1 %v11481_v30  ;;  %v10904_v58 = vld [vmem:[#allocation15 + $0x1c] ss:$12 sps:$4 sm:$0xff]   ;;  %v10906_v60 = vld [vmem:[#allocation15 + $0x18] ss:$12 sps:$4 sm:$0xff]   ;;  %v10909_v0 = vld [vmem:[#allocation15] ss:$12 sps:$4 sm:$0xff]  }
 0xd49   :  { %5374 = vmatpush1.bf16.msra.mxu0 %v10891_v48  ;;  %v10913_v59 = vld [vmem:[#allocation15 + $0x68] ss:$12 sps:$4 sm:$0xff]   ;;  %v10907_v62 = vld [vmem:[#allocation15 + $0x4] ss:$12 sps:$4 sm:$0xff]   ;;  %v10916_v6 = vld [vmem:[#allocation15 + $0x20] ss:$12 sps:$4 sm:$0xff]  }
 0xd4a   :  { %5375 = vmatprep.subr.bf16.mxu0 %v10892_v49  ;;  %v10914_v63 = vld [vmem:[#allocation15 + $0x50] ss:$12 sps:$4 sm:$0xff]   ;;  %v11956_v1 = vld [vmem:[#allocation2] sm:$0xff]  ;;  %v10917_v7 = vld [vmem:[#allocation15 + $0x8] ss:$12 sps:$4 sm:$0xff]   ;;  %s11993_s26 = sld [smem:[#allocation5 + $0x5]] }
 0xd4b   :  { %9976 = vmatpush3.bf16.msra.mxu1 %v10911_v53  ;;  %v10915_v4 = vld [vmem:[#allocation15 + $0x38] ss:$12 sps:$4 sm:$0xff]   ;;  %v5193_v5 = vpack.c.bf16 %v11956_v1, %v11956_v1  ;;  %v10918_v9 = vld [vmem:[#allocation13 + $0x168] ss:$12 sps:$4 sm:$0xff]   ;;  %v10921_v10 = vld [vmem:[#allocation13 + $0x170] ss:$12 sps:$4 sm:$0xff]  }
 0xd4c   :  { %9977 = vmatprep.subr.bf16.mxu1 %v11481_v30  ;;  %v10920_v8 = vld [vmem:[#allocation13 + $0x16c] ss:$12 sps:$4 sm:$0xff]   ;;  %v10924_v11 = vld [vmem:[#allocation13 + $0x154] ss:$12 sps:$4 sm:$0xff]   ;;  %v10922_v12 = vld [vmem:[#allocation13 + $0x150] ss:$12 sps:$4 sm:$0xff]  }
 0xd4d   :  { %5376 = vmatpush1.bf16.msra.mxu0 %v10894_v50  ;;  %v10925_v13 = vld [vmem:[#allocation13 + $0x158] ss:$12 sps:$4 sm:$0xff]   ;;  %v10928_v14 = vld [vmem:[#allocation13 + $0x13c] ss:$12 sps:$4 sm:$0xff]   ;;  %v10929_v16 = vld [vmem:[#allocation13 + $0x140] ss:$12 sps:$4 sm:$0xff]  }
 0xd4e   :  { %5377 = vmatprep.subr.bf16.mxu0 %v10895_v34  ;;  %v10926_v15 = vld [vmem:[#allocation13 + $0x138] ss:$12 sps:$4 sm:$0xff]   ;;  %v10930_v3 = vld [vmem:[#allocation13 + $0x120] ss:$12 sps:$4 sm:$0xff]   ;;  %v10933_v61 = vld [vmem:[#allocation13 + $0x128] ss:$12 sps:$4 sm:$0xff]  }
 0xd4f   :  { %9978 = vmatpush3.bf16.msra.mxu1 %v10912_v57  ;;  %v10932_v17 = vld [vmem:[#allocation13 + $0x124] ss:$12 sps:$4 sm:$0xff]   ;;  %v10934_v18 = vld [vmem:[#allocation13 + $0x108] ss:$12 sps:$4 sm:$0xff]   ;;  %v10936_v19 = vld [vmem:[#allocation13 + $0x10c] ss:$12 sps:$4 sm:$0xff]  }
 0xd50   :  { %9979 = vmatprep.subr.bf16.mxu1 %v11481_v30  ;;  %v10937_v20 = vld [vmem:[#allocation13 + $0x110] ss:$12 sps:$4 sm:$0xff]   ;;  %v10940_v21 = vld [vmem:[#allocation13 + $0xf4] ss:$12 sps:$4 sm:$0xff]   ;;  %v10941_v23 = vld [vmem:[#allocation13 + $0xf8] ss:$12 sps:$4 sm:$0xff]  }
 0xd51   :  { %5378 = vmatpush1.bf16.msra.mxu0 %v10897_v36  ;;  %v10938_v22 = vld [vmem:[#allocation13 + $0xf0] ss:$12 sps:$4 sm:$0xff]   ;;  %v10942_v25 = vld [vmem:[#allocation13 + $0xd8] ss:$12 sps:$4 sm:$0xff]   ;;  %v10945_v26 = vld [vmem:[#allocation13 + $0xe0] ss:$12 sps:$4 sm:$0xff]  }
 0xd52   :  { %5379 = vmatprep.subr.bf16.mxu0 %v10898_v52  ;;  %v10944_v24 = vld [vmem:[#allocation13 + $0xdc] ss:$12 sps:$4 sm:$0xff]   ;;  %v10948_v27 = vld [vmem:[#allocation13 + $0xc4] ss:$12 sps:$4 sm:$0xff]   ;;  %v10946_v28 = vld [vmem:[#allocation13 + $0xc0] ss:$12 sps:$4 sm:$0xff]  }
 0xd53   :  { %9980 = vmatpush3.bf16.msra.mxu1 %v10913_v59  ;;  %v10949_v29 = vld [vmem:[#allocation13 + $0xc8] ss:$12 sps:$4 sm:$0xff]   ;;  %v10952_v32 = vld [vmem:[#allocation15 + $0x16c] ss:$12 sps:$4 sm:$0xff]   ;;  %v5226_v37 = vld [vmem:[%s12178_s7] sm:$0x7] }
 0xd54   :  { %9981 = vmatprep.subr.bf16.mxu1 %v11481_v30  ;;  %v5231_v38 = vrot.slane %v5226_v37, %v11651_v31  ;;  %v5452_v35 = vld [vmem:[#allocation4 + $0x8] sm:$0xff]  ;;  %v5235_v42 = vrot.slane %v5226_v37, %v11656_v33  ;;  %v5453_v48 = vld [vmem:[#allocation4] sm:$0xff]  ;;  %p9100_p5 = scmp.le.s32.totalorder %s11993_s26, 0 }
 0xd55   :  { %5380 = vmatpush1.bf16.msra.mxu0 %v10900_v54 }
 0xd56   :  { %5381 = vmatprep.subr.bf16.mxu0 %v10901_v55 }
 0xd57   :  { %9982 = vmatpush3.bf16.msra.mxu1 %v10914_v63 }
 0xd58   :  { %9983 = vmatprep.subr.bf16.mxu1 %v11481_v30 }
 0xd59   :  { %5382 = vmatpush1.bf16.msra.mxu0 %v10903_v56  ;;  %v5239_v56 = vrot.slane %v5226_v37, %v11665_v39  ;;  %v5478_v37 = vld [vmem:[#allocation2 + $0x8] sm:$0xff] }
 0xd5a   :  { %5383 = vmatprep.subr.bf16.mxu0 %v10904_v58 }
 0xd5b   :  { %9984 = vmatpush3.bf16.msra.mxu1 %v10915_v4 }
 0xd5c   :  { %9985 = vmatprep.subr.bf16.mxu1 %v11481_v30 }
 0xd5d   :  { %5384 = vmatpush1.bf16.msra.mxu0 %v10906_v60 }
 0xd5e   :  { %5385 = vmatprep.subr.bf16.mxu0 %v10907_v62  ;;  %v5454_v62 = vld [vmem:[#allocation4 + $0x10] sm:$0xff] }
 0xd5f   :  { %9986 = vmatpush3.bf16.msra.mxu1 %v10916_v6 }
 0xd60   :  { %9987 = vmatprep.subr.bf16.mxu1 %v11481_v30 }
 0xd61   :  { %5386 = vmatpush1.bf16.msra.mxu0 %v10909_v0 }
 0xd62   :  { %5657 = vmatprep.subr.bf16.mxu0 %v10920_v8 }
 0xd63   :  { %9988 = vmatpush3.bf16.msra.mxu1 %v10917_v7 }
 0xd64   :  { %5404 = vmatmul.mubr.bf16.vlgmr.msra.gmra.mxu0 %v5193_v5  ;;  %9993 = vmatprep.subr.bf16.mxu1 %v11481_v30 }
 0xd65   :  { %5689 = vmatprep.mubr.bf16.mxu0 %v11480_v2  ;;  %5658 = vmatpush1.bf16.msra.mxu0 %v10918_v9 }
 0xd66   :  { %9990 = vmatmul.mubr.bf16.vlgmr.msra.gmra.mxu1 %v5193_v5  ;;  %5659 = vmatprep.subr.bf16.mxu0 %v10924_v11  ;;  %v10974_v11 = vld [vmem:[#allocation15 + $0x170] ss:$12 sps:$4 sm:$0xff]  }
 0xd67   :  { %10009 = vmatprep.mubr.msk.bf16.mxu1 %vm11482_vm0, %v11481_v30  ;;  %9994 = vmatpush3.bf16.msra.mxu1 %v10921_v10  ;;  %v10950_v10 = vld [vmem:[#allocation15 + $0x168] ss:$12 sps:$4 sm:$0xff]  }
 0xd68   :  { %9995 = vmatprep.subr.bf16.mxu1 %v11481_v30 }
 0xd69   :  { %5660 = vmatpush1.bf16.msra.mxu0 %v10922_v12 }
 0xd6a   :  { %5661 = vmatprep.subr.bf16.mxu0 %v10928_v14  ;;  %v10955_v14 = vld [vmem:[#allocation15 + $0x154] ss:$12 sps:$4 sm:$0xff]  }
 0xd6b   :  { %9996 = vmatpush3.bf16.msra.mxu1 %v10925_v13 }
 0xd6c   :  { %9997 = vmatprep.subr.bf16.mxu1 %v11481_v30 }
 0xd6d   :  { %5662 = vmatpush1.bf16.msra.mxu0 %v10926_v15  ;;  %v10953_v15 = vld [vmem:[#allocation15 + $0x150] ss:$12 sps:$4 sm:$0xff]  }
 0xd6e   :  { %5663 = vmatprep.subr.bf16.mxu0 %v10932_v17  ;;  %v10958_v17 = vld [vmem:[#allocation15 + $0x13c] ss:$12 sps:$4 sm:$0xff]  }
 0xd6f   :  { %9998 = vmatpush3.bf16.msra.mxu1 %v10929_v16  ;;  %v10975_v16 = vld [vmem:[#allocation15 + $0x158] ss:$12 sps:$4 sm:$0xff]  }
 0xd70   :  { %9999 = vmatprep.subr.bf16.mxu1 %v11481_v30 }
 0xd71   :  { %5664 = vmatpush1.bf16.msra.mxu0 %v10930_v3  ;;  %v10976_v3 = vld [vmem:[#allocation15 + $0x140] ss:$12 sps:$4 sm:$0xff]  }
 0xd72   :  { %5665 = vmatprep.subr.bf16.mxu0 %v10936_v19  ;;  %v10977_v19 = vld [vmem:[#allocation15 + $0x128] ss:$12 sps:$4 sm:$0xff]  }
 0xd73   :  { %10000 = vmatpush3.bf16.msra.mxu1 %v10933_v61  ;;  %v10961_v61 = vld [vmem:[#allocation15 + $0x124] ss:$12 sps:$4 sm:$0xff]  }
 0xd74   :  { %10001 = vmatprep.subr.bf16.mxu1 %v11481_v30 }
 0xd75   :  { %5666 = vmatpush1.bf16.msra.mxu0 %v10934_v18  ;;  %v10959_v18 = vld [vmem:[#allocation15 + $0x120] ss:$12 sps:$4 sm:$0xff]  }
 0xd76   :  { %5667 = vmatprep.subr.bf16.mxu0 %v10940_v21  ;;  %v10962_v21 = vld [vmem:[#allocation15 + $0x108] ss:$12 sps:$4 sm:$0xff]  }
 0xd77   :  { %10002 = vmatpush3.bf16.msra.mxu1 %v10937_v20  ;;  %v10964_v20 = vld [vmem:[#allocation15 + $0x10c] ss:$12 sps:$4 sm:$0xff]  }
 0xd78   :  { %10003 = vmatprep.subr.bf16.mxu1 %v11481_v30 }
 0xd79   :  { %5668 = vmatpush1.bf16.msra.mxu0 %v10938_v22  ;;  %v10978_v22 = vld [vmem:[#allocation15 + $0x110] ss:$12 sps:$4 sm:$0xff]  }
 0xd7a   :  { %5669 = vmatprep.subr.bf16.mxu0 %v10944_v24  ;;  %v10965_v24 = vld [vmem:[#allocation15 + $0xf0] ss:$12 sps:$4 sm:$0xff]  }
 0xd7b   :  { %10004 = vmatpush3.bf16.msra.mxu1 %v10941_v23  ;;  %v10967_v23 = vld [vmem:[#allocation15 + $0xf4] ss:$12 sps:$4 sm:$0xff]  }
 0xd7c   :  { %10005 = vmatprep.subr.bf16.mxu1 %v11481_v30 }
 0xd7d   :  { %5670 = vmatpush1.bf16.msra.mxu0 %v10942_v25  ;;  %v10979_v25 = vld [vmem:[#allocation15 + $0xf8] ss:$12 sps:$4 sm:$0xff]  }
 0xd7e   :  { %5671 = vmatprep.subr.bf16.mxu0 %v10948_v27  ;;  %v10968_v27 = vld [vmem:[#allocation15 + $0xd8] ss:$12 sps:$4 sm:$0xff]  }
 0xd7f   :  { %10006 = vmatpush3.bf16.msra.mxu1 %v10945_v26  ;;  %v10970_v26 = vld [vmem:[#allocation15 + $0xdc] ss:$12 sps:$4 sm:$0xff]  }
 0xd80   :  { %10007 = vmatprep.subr.bf16.mxu1 %v11481_v30 }
 0xd81   :  { %5672 = vmatpush1.bf16.msra.mxu0 %v10946_v28  ;;  %v10980_v28 = vld [vmem:[#allocation15 + $0xe0] ss:$12 sps:$4 sm:$0xff]  }
 0xd82   :  { %5916 = vmatprep.subr.bf16.mxu0 %v10952_v32  ;;  %v10971_v32 = vld [vmem:[#allocation15 + $0xc0] ss:$12 sps:$4 sm:$0xff]  }
 0xd83   :  { %10008 = vmatpush3.bf16.msra.mxu1 %v10949_v29  ;;  %v10973_v29 = vld [vmem:[#allocation15 + $0xc4] ss:$12 sps:$4 sm:$0xff]  }
 0xd84   :  { %10013 = vmatprep.subr.bf16.mxu1 %v11481_v30 }
 0xe24   :  { %v5405_v40 = vpop.f32.mrf.mxu0 }
 0xe25   :  { %v5406_v41 = vadd.f32 %v5405_v40, %v5231_v38  ;;  %v10981_v38 = vld [vmem:[#allocation15 + $0xc8] ss:$12 sps:$4 sm:$0xff]   ;;  %v5738_v40 = vpack.c.bf16 %v5478_v37, %v5478_v37 }
 0xe26   :  { %v5407_v43 = vpop.f32.mrf.mxu0  ;;  %v5446_v34 = vpop.f32.mrf.mxu1 }
 0xe27   :  { %v5455_v44 = vadd.f32 %v5452_v35, %v5406_v41  ;;  %v5408_v47 = vadd.f32 %v5407_v43, %v5235_v42  ;;  %v5447_v59 = vadd.f32 %v5446_v34, %v5239_v56 }
 0xe28   :  { %v5409_v45 = vpop.f32.mrf.mxu0  ;;  %v9991_v36 = vpop.f32.mrf.mxu1 }
 0xe29   :  { %v9045_v46 = vmul.f32 -1.442695, %v5455_v44  ;;  %v5462_v50 = vadd.f32 %v5453_v48, %v5408_v47  ;;  %v9047_v48 = vld [vmem:[%s12177_s6 + $0x3] sm:$0x7] }
 0xe2a   :  { %v5410_v49 = vpop.f32.mrf.mxu0  ;;  %v5449_v52 = vpop.f32.mrf.mxu1 }
 0xe2b   :  { %10982 = vpow2.f32 %v9045_v46  ;;  %v9046_v51 = vmul.f32 -1.442695, %v5462_v50  ;;  %v9072_v49 = vld [vmem:[%s12178_s7 + $0x3] sm:$0x7]  ;;  %v5517_v50 = vrot.slane %v9047_v48, %v11651_v31 }
 0xe2c   :  { %v9992_v53 = vpop.f32.mrf.mxu1  ;;  %v5776_v34 = vrot.slane %v9072_v49, %v11651_v31 }
 0xe2d   :  { %10984 = vpow2.f32 %v9046_v51 }
 0xe38   :  { %v10983_v54 = vpop.eup %10982 }
 0xe39   :  { %v5459_v55 = vadd.f32 1.0, %v10983_v54  ;;  %v5780_v54 = vrot.slane %v9072_v49, %v11656_v33 }
 0xe3a   :  { %v10985_v57 = vpop.eup %10984 }
 0xe3b   :  { %10986 = vrcp.f32 %v5459_v55  ;;  %v5466_v58 = vadd.f32 1.0, %v10985_v57  ;;  %v5521_v57 = vrot.slane %v9047_v48, %v11656_v33 }
 0xe3d   :  { %10988 = vrcp.f32 %v5466_v58 }
 0xe48   :  { %v10987_v60 = vpop.eup %10986 }
 0xe49   :  { %v5469_v63 = vmul.f32 %v10987_v60, %v5447_v59 }
 0xe4a   :  { %v10989_v4 = vpop.eup %10988 }
 0xe4b   :  { %v5470_v0 = vadd.f32 %v5469_v63, %v5454_v62  ;;  %v5472_v5 = vsub.f32 1.0, %v10989_v4  ;;  %v5474_v8 = vmul.f32 %v10989_v4, %v11956_v1  ;;  %v10956_v1 = vld [vmem:[#allocation15 + $0x138] ss:$12 sps:$4 sm:$0xff]  }
 0xe4d   :  { %10990 = vtanh.f32 %v5470_v0 }
 0xe5a   :  { %v10991_v6 = vpop.eup %10990 }
 0xe5b   :  { %v5473_v7 = vmul.f32 %v10991_v6, %v5472_v5 }
 0xe5d   :  { %v5475_v9 = vadd.f32 %v5474_v8, %v5473_v7 }
 0xe5f   :  { %v5476_v12 = vmax.f32 %v5475_v9, 0.0  ;;  %v5479_v13 = vpack.c.bf16 %v5475_v9, %v5475_v9 }
 0xe61   :  { %5477 = vst [vmem:[#allocation2] sm:$0xff] %v5476_v12  ;;  %5690 = vmatmul.mubr.bf16.vlgmr.msra.gmra.mxu0 %v5479_v13  ;;  %10010 = vmatmul.mubr.bf16.vlgmr.msra.gmra.mxu1 %v5479_v13  ;;  %v5525_v12 = vrot.slane %v9047_v48, %v11665_v39 }
 0xe62   :  { %5917 = vmatpush1.bf16.msra.mxu0 %v10950_v10  ;;  %10014 = vmatpush3.bf16.msra.mxu1 %v10974_v11  ;;  %v5784_v10 = vrot.slane %v9072_v49, %v11665_v39 }
 0xe63   :  { %5918 = vmatprep.subr.bf16.mxu0 %v10955_v14  ;;  %5948 = vmatprep.mubr.bf16.mxu0 %v11480_v2 }
 0xe64   :  { %10015 = vmatprep.subr.bf16.mxu1 %v11481_v30  ;;  %10029 = vmatprep.mubr.msk.bf16.mxu1 %vm11482_vm0, %v11481_v30 }
 0xe66   :  { %5919 = vmatpush1.bf16.msra.mxu0 %v10953_v15  ;;  %10016 = vmatpush3.bf16.msra.mxu1 %v10975_v16 }
 0xe67   :  { %5920 = vmatprep.subr.bf16.mxu0 %v10958_v17  ;;  %10017 = vmatprep.subr.bf16.mxu1 %v11481_v30 }
 0xe6a   :  { %5921 = vmatpush1.bf16.msra.mxu0 %v10956_v1  ;;  %10018 = vmatpush3.bf16.msra.mxu1 %v10976_v3 }
 0xe6b   :  { %5922 = vmatprep.subr.bf16.mxu0 %v10961_v61  ;;  %10019 = vmatprep.subr.bf16.mxu1 %v11481_v30 }
 0xe6e   :  { %5923 = vmatpush1.bf16.msra.mxu0 %v10959_v18  ;;  %10020 = vmatpush3.bf16.msra.mxu1 %v10977_v19 }
 0xe6f   :  { %5924 = vmatprep.subr.bf16.mxu0 %v10964_v20  ;;  %10021 = vmatprep.subr.bf16.mxu1 %v11481_v30 }
 0xe72   :  { %5925 = vmatpush1.bf16.msra.mxu0 %v10962_v21  ;;  %10022 = vmatpush3.bf16.msra.mxu1 %v10978_v22 }
 0xe73   :  { %5926 = vmatprep.subr.bf16.mxu0 %v10967_v23  ;;  %10023 = vmatprep.subr.bf16.mxu1 %v11481_v30 }
 0xe76   :  { %5927 = vmatpush1.bf16.msra.mxu0 %v10965_v24  ;;  %10024 = vmatpush3.bf16.msra.mxu1 %v10979_v25 }
 0xe77   :  { %5928 = vmatprep.subr.bf16.mxu0 %v10970_v26  ;;  %10025 = vmatprep.subr.bf16.mxu1 %v11481_v30 }
 0xe7a   :  { %5929 = vmatpush1.bf16.msra.mxu0 %v10968_v27  ;;  %10026 = vmatpush3.bf16.msra.mxu1 %v10980_v28 }
 0xe7b   :  { %5930 = vmatprep.subr.bf16.mxu0 %v10973_v29  ;;  %10027 = vmatprep.subr.bf16.mxu1 %v11481_v30 }
 0xe7e   :  { %5931 = vmatpush1.bf16.msra.mxu0 %v10971_v32  ;;  %10028 = vmatpush3.bf16.msra.mxu1 %v10981_v38 }
 0xe81   :  { %5949 = vmatmul.mubr.bf16.vlgmr.msra.gmra.mxu0 %v5738_v40  ;;  %10030 = vmatmul.mubr.bf16.vlgmr.msra.gmra.mxu1 %v5738_v40 }
 0xf21   :  { %v5691_v35 = vpop.f32.mrf.mxu0  ;;  %v5732_v41 = vpop.f32.mrf.mxu1 }
 0xf22   :  { %v5692_v52 = vadd.f32 %v5691_v35, %v5517_v50  ;;  %v5733_v16 = vadd.f32 %v5732_v41, %v5525_v12 }
 0xf23   :  { %v5693_v42 = vpop.f32.mrf.mxu0  ;;  %v10011_v43 = vpop.f32.mrf.mxu1 }
 0xf24   :  { %v5694_v5 = vadd.f32 %v5693_v42, %v5521_v57 }
 0xf25   :  { %v5695_v44 = vpop.f32.mrf.mxu0  ;;  %v5735_v45 = vpop.f32.mrf.mxu1 }
 0xf27   :  { %v5696_v46 = vpop.f32.mrf.mxu0  ;;  %v10012_v47 = vpop.f32.mrf.mxu1 }
 0xf41   :  { %v5950_v36 = vpop.f32.mrf.mxu0  ;;  %v5991_v51 = vpop.f32.mrf.mxu1 }
 0xf42   :  { %v5951_v53 = vadd.f32 %v5950_v36, %v5776_v34  ;;  %v5992_v14 = vadd.f32 %v5991_v51, %v5784_v10 }
 0xf43   :  { %v5952_v55 = vpop.f32.mrf.mxu0  ;;  %v10031_v56 = vpop.f32.mrf.mxu1 }
 0xf44   :  { %v5997_v58 = vadd.f32 %v5951_v53, %v5692_v52  ;;  %v5953_v63 = vadd.f32 %v5952_v55, %v5780_v54 }
 0xf45   :  { %v5954_v59 = vpop.f32.mrf.mxu0  ;;  %v5994_v60 = vpop.f32.mrf.mxu1 }
 0xf46   :  { %v9097_v62 = vmul.f32 -1.442695, %v5997_v58  ;;  %v6004_v6 = vadd.f32 %v5953_v63, %v5694_v5 }
 0xf47   :  { %v5955_v0 = vpop.f32.mrf.mxu0  ;;  %v10032_v4 = vpop.f32.mrf.mxu1 }
 0xf48   :  { %10992 = vpow2.f32 %v9097_v62  ;;  %v9098_v7 = vmul.f32 -1.442695, %v6004_v6 }
 0xf4a   :  { %10994 = vpow2.f32 %v9098_v7 }
 0xf55   :  { %v10993_v8 = vpop.eup %10992 }
 0xf56   :  { %v6001_v9 = vadd.f32 1.0, %v10993_v8 }
 0xf57   :  { %v10995_v11 = vpop.eup %10994 }
 0xf58   :  { %10996 = vrcp.f32 %v6001_v9  ;;  %v6008_v13 = vadd.f32 1.0, %v10995_v11 }
 0xf5a   :  { %10998 = vrcp.f32 %v6008_v13 }
 0xf65   :  { %v10997_v15 = vpop.eup %10996 }
 0xf66   :  { %v6011_v17 = vmul.f32 %v10997_v15, %v5992_v14 }
 0xf67   :  { %v10999_v3 = vpop.eup %10998 }
 0xf68   :  { %v6012_v1 = vadd.f32 %v6011_v17, %v5733_v16  ;;  %v6014_v61 = vsub.f32 1.0, %v10999_v3  ;;  %v6016_v19 = vmul.f32 %v10999_v3, %v5478_v37 }
 0xf6a   :  { %11000 = vtanh.f32 %v6012_v1 }
 0xf77   :  { %v11001_v18 = vpop.eup %11000 }
 0xf78   :  { %v6015_v20 = vmul.f32 %v11001_v18, %v6014_v61 }
 0xf7a   :  { %v12007_v21 = vadd.f32 %v6016_v19, %v6015_v20  ;;  %6026 = sbr.rel (%p9100_p5) target bundleno = 3970 (0xf82), region = 93 }
 0xf7c   :  { %v6018_v22 = vmax.f32 %v12007_v21, 0.0  ;;  %6021 = vst [vmem:[#allocation16 + $0x28] sm:$0xff] %v12007_v21 }
 0xf7e   :  { %6019 = vst [vmem:[#allocation2 + $0x8] sm:$0xff] %v6018_v22 }
 0xf7f   :  { %v6030_v23 = vld [vmem:[#allocation3 + $0x18] sm:$0xff]  ;;  %v6031_v24 = vld [vmem:[#allocation3 + $0x28] sm:$0xff] }
 0xf80   :  { %v6032_v25 = vld [vmem:[#allocation3 + $0x88] sm:$0xff]  ;;  %6033 = vst [vmem:[#allocation4 + $0x8] sm:$0xff] %v6030_v23  ;;  %6034 = vst [vmem:[#allocation4] sm:$0xff] %v6031_v24 }
 0xf81   :  { %6035 = vst [vmem:[#allocation4 + $0x10] sm:$0xff] %v6032_v25 }
 0xf82 PF:  { %p9101_p6 = scmp.gt.s32.totalorder %s11993_s26, 0 }
 0xf84   :  { %6039 = sbr.rel (%p9101_p6) target bundleno = 4210 (0x1072), region = 97 }
 0xf89   :  { %v11002_v26 = vld [vmem:[#allocation13 + $0xac] ss:$12 sps:$4 sm:$0xff]   ;;  %v11495_v27 = vmov 0.0   ;;  %v11004_v28 = vld [vmem:[#allocation13 + $0xb0] ss:$12 sps:$4 sm:$0xff]   ;;  %vm11496_vm5 = vmmov 0   ;;  %v6040_v56 = vpack.c.bf16 %v12007_v21, %v12007_v21 }
 0xf8a   :  { %10033 = vmatprep.subr.bf16.mxu1 %v11495_v27  ;;  %10049 = vmatprep.mubr.msk.bf16.mxu1 %vm11496_vm5, %v11495_v27  ;;  %v11005_v29 = vld [vmem:[#allocation13 + $0xa8] ss:$12 sps:$4 sm:$0xff]   ;;  %v11497_v37 = vmov 0   ;;  %v11008_v38 = vld [vmem:[#allocation13 + $0x98] ss:$12 sps:$4 sm:$0xff]  }
 0xf8b   :  { %6218 = vmatprep.subr.bf16.mxu0 %v11002_v26  ;;  %10034 = vmatpush3.bf16.msra.mxu1 %v11004_v28  ;;  %v11006_v32 = vld [vmem:[#allocation13 + $0x94] ss:$12 sps:$4 sm:$0xff]   ;;  %v11009_v40 = vld [vmem:[#allocation13 + $0x90] ss:$12 sps:$4 sm:$0xff]   ;;  %v11013_v42 = vld [vmem:[#allocation13 + $0x78] ss:$12 sps:$4 sm:$0xff]  }
 0xf8c   :  { %6250 = vmatprep.mubr.bf16.mxu0 %v11497_v37  ;;  %6219 = vmatpush1.bf16.msra.mxu0 %v11005_v29  ;;  %v11010_v35 = vld [vmem:[#allocation13 + $0x7c] ss:$12 sps:$4 sm:$0xff]   ;;  %v11012_v41 = vld [vmem:[#allocation13 + $0x80] ss:$12 sps:$4 sm:$0xff]   ;;  %v11014_v43 = vld [vmem:[#allocation13 + $0x64] ss:$12 sps:$4 sm:$0xff]  }
 0xf8d   :  { %10035 = vmatprep.subr.bf16.mxu1 %v11495_v27  ;;  %6220 = vmatprep.subr.bf16.mxu0 %v11006_v32  ;;  %v11016_v44 = vld [vmem:[#allocation13 + $0x68] ss:$12 sps:$4 sm:$0xff]   ;;  %v11017_v45 = vld [vmem:[#allocation13 + $0x60] ss:$12 sps:$4 sm:$0xff]   ;;  %v11020_v47 = vld [vmem:[#allocation13 + $0x50] ss:$12 sps:$4 sm:$0xff]  }
 0xf8e   :  { %v11018_v46 = vld [vmem:[#allocation13 + $0x4c] ss:$12 sps:$4 sm:$0xff]   ;;  %v11021_v48 = vld [vmem:[#allocation13 + $0x48] ss:$12 sps:$4 sm:$0xff]   ;;  %v11025_v34 = vld [vmem:[#allocation13 + $0x30] ss:$12 sps:$4 sm:$0xff]  }
 0xf8f   :  { %10036 = vmatpush3.bf16.msra.mxu1 %v11008_v38  ;;  %v11022_v49 = vld [vmem:[#allocation13 + $0x34] ss:$12 sps:$4 sm:$0xff]   ;;  %v11024_v50 = vld [vmem:[#allocation13 + $0x38] ss:$12 sps:$4 sm:$0xff]   ;;  %v11026_v36 = vld [vmem:[#allocation13 + $0x1c] ss:$12 sps:$4 sm:$0xff]  }
 0xf90   :  { %6221 = vmatpush1.bf16.msra.mxu0 %v11009_v40  ;;  %10037 = vmatprep.subr.bf16.mxu1 %v11495_v27  ;;  %v11028_v51 = vld [vmem:[#allocation13 + $0x20] ss:$12 sps:$4 sm:$0xff]   ;;  %v11029_v52 = vld [vmem:[#allocation13 + $0x18] ss:$12 sps:$4 sm:$0xff]   ;;  %v11032_v54 = vld [vmem:[#allocation13 + $0x8] ss:$12 sps:$4 sm:$0xff]  }
 0xf91   :  { %6222 = vmatprep.subr.bf16.mxu0 %v11010_v35  ;;  %v11030_v53 = vld [vmem:[#allocation13 + $0x4] ss:$12 sps:$4 sm:$0xff]   ;;  %v11033_v55 = vld [vmem:[#allocation13] ss:$12 sps:$4 sm:$0xff]  }
 0xf92   :  { %v6073_v57 = vld [vmem:[%s12177_s6] sm:$0x7] }
 0xf93   :  { %10038 = vmatpush3.bf16.msra.mxu1 %v11012_v41  ;;  %v6086_v58 = vrot.slane %v6073_v57, %v11665_v39  ;;  %v6078_v59 = vrot.slane %v6073_v57, %v11651_v31  ;;  %v6082_v62 = vrot.slane %v6073_v57, %v11656_v33 }
 0xf94   :  { %6223 = vmatpush1.bf16.msra.mxu0 %v11013_v42  ;;  %10039 = vmatprep.subr.bf16.mxu1 %v11495_v27 }
 0xf95   :  { %6224 = vmatprep.subr.bf16.mxu0 %v11014_v43 }
 0xf97   :  { %10040 = vmatpush3.bf16.msra.mxu1 %v11016_v44 }
 0xf98   :  { %6225 = vmatpush1.bf16.msra.mxu0 %v11017_v45  ;;  %10041 = vmatprep.subr.bf16.mxu1 %v11495_v27 }
 0xf99   :  { %6226 = vmatprep.subr.bf16.mxu0 %v11018_v46 }
 0xf9b   :  { %10042 = vmatpush3.bf16.msra.mxu1 %v11020_v47 }
 0xf9c   :  { %6227 = vmatpush1.bf16.msra.mxu0 %v11021_v48  ;;  %10043 = vmatprep.subr.bf16.mxu1 %v11495_v27 }
 0xf9d   :  { %6228 = vmatprep.subr.bf16.mxu0 %v11022_v49 }
 0xf9f   :  { %10044 = vmatpush3.bf16.msra.mxu1 %v11024_v50 }
 0xfa0   :  { %6229 = vmatpush1.bf16.msra.mxu0 %v11025_v34  ;;  %10045 = vmatprep.subr.bf16.mxu1 %v11495_v27 }
 0xfa1   :  { %6230 = vmatprep.subr.bf16.mxu0 %v11026_v36 }
 0xfa3   :  { %10046 = vmatpush3.bf16.msra.mxu1 %v11028_v51 }
 0xfa4   :  { %6231 = vmatpush1.bf16.msra.mxu0 %v11029_v52  ;;  %10047 = vmatprep.subr.bf16.mxu1 %v11495_v27 }
 0xfa5   :  { %6232 = vmatprep.subr.bf16.mxu0 %v11030_v53 }
 0xfa7   :  { %10048 = vmatpush3.bf16.msra.mxu1 %v11032_v54 }
 0xfa8   :  { %6233 = vmatpush1.bf16.msra.mxu0 %v11033_v55 }
 0xfaa   :  { %10050 = vmatmul.mubr.bf16.vlgmr.msra.gmra.mxu1 %v6040_v56 }
 0xfab   :  { %6251 = vmatmul.mubr.bf16.vlgmr.msra.gmra.mxu0 %v6040_v56 }
0x106a   :  { %v6293_v60 = vpop.f32.mrf.mxu1 }
0x106b   :  { %v6294_v63 = vadd.f32 %v6293_v60, %v6086_v58  ;;  %v6252_v0 = vpop.f32.mrf.mxu0 }
0x106c   :  { %v6253_v4 = vadd.f32 %v6252_v0, %v6078_v59  ;;  %v10051_v5 = vpop.f32.mrf.mxu1 }
0x106d   :  { %6301 = vst [vmem:[#allocation4 + $0x10] sm:$0xff] %v6294_v63  ;;  %v6254_v6 = vpop.f32.mrf.mxu0 }
0x106e   :  { %6299 = vst [vmem:[#allocation4 + $0x8] sm:$0xff] %v6253_v4  ;;  %v6255_v7 = vadd.f32 %v6254_v6, %v6082_v62  ;;  %v6296_v8 = vpop.f32.mrf.mxu1 }
0x106f   :  { %v6256_v9 = vpop.f32.mrf.mxu0 }
0x1070   :  { %6300 = vst [vmem:[#allocation4] sm:$0xff] %v6255_v7  ;;  %v10052_v10 = vpop.f32.mrf.mxu1 }
0x1071   :  { %v6257_v11 = vpop.f32.mrf.mxu0 }
0x1072 PF:  { %v11034_v12 = vld [vmem:[#allocation15 + $0xac] ss:$12 sps:$4 sm:$0xff]   ;;  %10053 = vmatprep.subr.bf16.mxu1 %v11481_v30  ;;  %6513 = vmatprep.mubr.bf16.mxu0 %v11480_v2  ;;  %v11036_v13 = vld [vmem:[#allocation15 + $0xa8] ss:$12 sps:$4 sm:$0xff]   ;;  %v11039_v15 = vld [vmem:[#allocation15 + $0x90] ss:$12 sps:$4 sm:$0xff]  }
0x1073   :  { %10069 = vmatprep.mubr.msk.bf16.mxu1 %vm11482_vm0, %v11481_v30  ;;  %6481 = vmatprep.subr.bf16.mxu0 %v11034_v12  ;;  %v11037_v14 = vld [vmem:[#allocation15 + $0x94] ss:$12 sps:$4 sm:$0xff]   ;;  %v11040_v16 = vld [vmem:[#allocation15 + $0x7c] ss:$12 sps:$4 sm:$0xff]   ;;  %v11042_v17 = vld [vmem:[#allocation15 + $0x78] ss:$12 sps:$4 sm:$0xff]  }
0x1074   :  { %6482 = vmatpush1.bf16.msra.mxu0 %v11036_v13  ;;  %v11043_v1 = vld [vmem:[#allocation15 + $0x64] ss:$12 sps:$4 sm:$0xff]   ;;  %v11045_v3 = vld [vmem:[#allocation15 + $0x60] ss:$12 sps:$4 sm:$0xff]   ;;  %v11048_v20 = vld [vmem:[#allocation15 + $0x48] ss:$12 sps:$4 sm:$0xff]  }
0x1075   :  { %6483 = vmatprep.subr.bf16.mxu0 %v11037_v14  ;;  %v11058_v61 = vld [vmem:[#allocation15 + $0xb0] ss:$12 sps:$4 sm:$0xff]   ;;  %v11046_v18 = vld [vmem:[#allocation15 + $0x4c] ss:$12 sps:$4 sm:$0xff]   ;;  %v11049_v21 = vld [vmem:[#allocation15 + $0x34] ss:$12 sps:$4 sm:$0xff]  }
0x1076   :  { %10054 = vmatpush3.bf16.msra.mxu1 %v11058_v61  ;;  %v11059_v19 = vld [vmem:[#allocation15 + $0x98] ss:$12 sps:$4 sm:$0xff]   ;;  %v11051_v22 = vld [vmem:[#allocation15 + $0x30] ss:$12 sps:$4 sm:$0xff]   ;;  %v11060_v23 = vld [vmem:[#allocation15 + $0x80] ss:$12 sps:$4 sm:$0xff]  }
0x1077   :  { %10055 = vmatprep.subr.bf16.mxu1 %v11481_v30  ;;  %v11052_v24 = vld [vmem:[#allocation15 + $0x1c] ss:$12 sps:$4 sm:$0xff]   ;;  %v11054_v26 = vld [vmem:[#allocation15 + $0x18] ss:$12 sps:$4 sm:$0xff]   ;;  %v11057_v29 = vld [vmem:[#allocation15] ss:$12 sps:$4 sm:$0xff]  }
0x1078   :  { %6484 = vmatpush1.bf16.msra.mxu0 %v11039_v15  ;;  %v11061_v25 = vld [vmem:[#allocation15 + $0x68] ss:$12 sps:$4 sm:$0xff]   ;;  %v11055_v27 = vld [vmem:[#allocation15 + $0x4] ss:$12 sps:$4 sm:$0xff]   ;;  %v11064_v40 = vld [vmem:[#allocation15 + $0x20] ss:$12 sps:$4 sm:$0xff]  }
0x1079   :  { %6485 = vmatprep.subr.bf16.mxu0 %v11040_v16  ;;  %v11062_v28 = vld [vmem:[#allocation15 + $0x50] ss:$12 sps:$4 sm:$0xff]   ;;  %v12028_v32 = vld [vmem:[#allocation2] sm:$0xff]  ;;  %v11065_v35 = vld [vmem:[#allocation15 + $0x8] ss:$12 sps:$4 sm:$0xff]   ;;  %s12065_s12 = sld [smem:[#allocation5 + $0x6]] }
0x107a   :  { %10056 = vmatpush3.bf16.msra.mxu1 %v11059_v19  ;;  %v11063_v37 = vld [vmem:[#allocation15 + $0x38] ss:$12 sps:$4 sm:$0xff]   ;;  %v6303_v38 = vpack.c.bf16 %v12028_v32, %v12028_v32  ;;  %v11066_v42 = vld [vmem:[#allocation13 + $0x168] ss:$12 sps:$4 sm:$0xff]   ;;  %v11069_v43 = vld [vmem:[#allocation13 + $0x170] ss:$12 sps:$4 sm:$0xff]  }
0x107b   :  { %10057 = vmatprep.subr.bf16.mxu1 %v11481_v30  ;;  %v11068_v41 = vld [vmem:[#allocation13 + $0x16c] ss:$12 sps:$4 sm:$0xff]   ;;  %v11072_v44 = vld [vmem:[#allocation13 + $0x154] ss:$12 sps:$4 sm:$0xff]   ;;  %v11070_v45 = vld [vmem:[#allocation13 + $0x150] ss:$12 sps:$4 sm:$0xff]  }
0x107c   :  { %6486 = vmatpush1.bf16.msra.mxu0 %v11042_v17  ;;  %v11073_v46 = vld [vmem:[#allocation13 + $0x158] ss:$12 sps:$4 sm:$0xff]   ;;  %v11076_v47 = vld [vmem:[#allocation13 + $0x13c] ss:$12 sps:$4 sm:$0xff]   ;;  %v11077_v49 = vld [vmem:[#allocation13 + $0x140] ss:$12 sps:$4 sm:$0xff]  }
0x107d   :  { %6487 = vmatprep.subr.bf16.mxu0 %v11043_v1  ;;  %v11074_v48 = vld [vmem:[#allocation13 + $0x138] ss:$12 sps:$4 sm:$0xff]   ;;  %v11078_v34 = vld [vmem:[#allocation13 + $0x120] ss:$12 sps:$4 sm:$0xff]   ;;  %v11081_v36 = vld [vmem:[#allocation13 + $0x128] ss:$12 sps:$4 sm:$0xff]  }
0x107e   :  { %10058 = vmatpush3.bf16.msra.mxu1 %v11060_v23  ;;  %v11080_v50 = vld [vmem:[#allocation13 + $0x124] ss:$12 sps:$4 sm:$0xff]   ;;  %v11082_v51 = vld [vmem:[#allocation13 + $0x108] ss:$12 sps:$4 sm:$0xff]   ;;  %v11084_v52 = vld [vmem:[#allocation13 + $0x10c] ss:$12 sps:$4 sm:$0xff]  }
0x107f   :  { %10059 = vmatprep.subr.bf16.mxu1 %v11481_v30  ;;  %v11085_v53 = vld [vmem:[#allocation13 + $0x110] ss:$12 sps:$4 sm:$0xff]   ;;  %v11088_v54 = vld [vmem:[#allocation13 + $0xf4] ss:$12 sps:$4 sm:$0xff]   ;;  %v11089_v56 = vld [vmem:[#allocation13 + $0xf8] ss:$12 sps:$4 sm:$0xff]  }
0x1080   :  { %6488 = vmatpush1.bf16.msra.mxu0 %v11045_v3  ;;  %v11086_v55 = vld [vmem:[#allocation13 + $0xf0] ss:$12 sps:$4 sm:$0xff]   ;;  %v11090_v58 = vld [vmem:[#allocation13 + $0xd8] ss:$12 sps:$4 sm:$0xff]   ;;  %v11093_v59 = vld [vmem:[#allocation13 + $0xe0] ss:$12 sps:$4 sm:$0xff]  }
0x1081   :  { %6489 = vmatprep.subr.bf16.mxu0 %v11046_v18  ;;  %v11092_v57 = vld [vmem:[#allocation13 + $0xdc] ss:$12 sps:$4 sm:$0xff]   ;;  %v11096_v60 = vld [vmem:[#allocation13 + $0xc4] ss:$12 sps:$4 sm:$0xff]   ;;  %v11094_v62 = vld [vmem:[#allocation13 + $0xc0] ss:$12 sps:$4 sm:$0xff]  }
0x1082   :  { %10060 = vmatpush3.bf16.msra.mxu1 %v11061_v25  ;;  %v11097_v63 = vld [vmem:[#allocation13 + $0xc8] ss:$12 sps:$4 sm:$0xff]   ;;  %v11100_v0 = vld [vmem:[#allocation15 + $0x16c] ss:$12 sps:$4 sm:$0xff]   ;;  %v6336_v4 = vld [vmem:[%s12178_s7] sm:$0x7] }
0x1083   :  { %10061 = vmatprep.subr.bf16.mxu1 %v11481_v30  ;;  %v6341_v5 = vrot.slane %v6336_v4, %v11651_v31  ;;  %v6562_v7 = vld [vmem:[#allocation4 + $0x8] sm:$0xff]  ;;  %v6345_v9 = vrot.slane %v6336_v4, %v11656_v33  ;;  %v6563_v15 = vld [vmem:[#allocation4] sm:$0xff]  ;;  %p9205_p7 = scmp.le.s32.totalorder %s12065_s12, 0 }
0x1084   :  { %6490 = vmatpush1.bf16.msra.mxu0 %v11048_v20 }
0x1085   :  { %6491 = vmatprep.subr.bf16.mxu0 %v11049_v21 }
0x1086   :  { %10062 = vmatpush3.bf16.msra.mxu1 %v11062_v28 }
0x1087   :  { %10063 = vmatprep.subr.bf16.mxu1 %v11481_v30 }
0x1088   :  { %6492 = vmatpush1.bf16.msra.mxu0 %v11051_v22  ;;  %v6349_v22 = vrot.slane %v6336_v4, %v11665_v39  ;;  %v6588_v4 = vld [vmem:[#allocation2 + $0x8] sm:$0xff] }
0x1089   :  { %6493 = vmatprep.subr.bf16.mxu0 %v11052_v24 }
0x108a   :  { %10064 = vmatpush3.bf16.msra.mxu1 %v11063_v37 }
0x108b   :  { %10065 = vmatprep.subr.bf16.mxu1 %v11481_v30 }
0x108c   :  { %6494 = vmatpush1.bf16.msra.mxu0 %v11054_v26 }
0x108d   :  { %6495 = vmatprep.subr.bf16.mxu0 %v11055_v27  ;;  %v6564_v27 = vld [vmem:[#allocation4 + $0x10] sm:$0xff] }
0x108e   :  { %10066 = vmatpush3.bf16.msra.mxu1 %v11064_v40 }
0x108f   :  { %10067 = vmatprep.subr.bf16.mxu1 %v11481_v30 }
0x1090   :  { %6496 = vmatpush1.bf16.msra.mxu0 %v11057_v29 }
0x1091   :  { %6767 = vmatprep.subr.bf16.mxu0 %v11068_v41 }
0x1092   :  { %10068 = vmatpush3.bf16.msra.mxu1 %v11065_v35 }
0x1093   :  { %6514 = vmatmul.mubr.bf16.vlgmr.msra.gmra.mxu0 %v6303_v38  ;;  %10073 = vmatprep.subr.bf16.mxu1 %v11481_v30 }
0x1094   :  { %6799 = vmatprep.mubr.bf16.mxu0 %v11480_v2  ;;  %6768 = vmatpush1.bf16.msra.mxu0 %v11066_v42 }
0x1095   :  { %10070 = vmatmul.mubr.bf16.vlgmr.msra.gmra.mxu1 %v6303_v38  ;;  %6769 = vmatprep.subr.bf16.mxu0 %v11072_v44  ;;  %v11122_v44 = vld [vmem:[#allocation15 + $0x170] ss:$12 sps:$4 sm:$0xff]  }
0x1096   :  { %10089 = vmatprep.mubr.msk.bf16.mxu1 %vm11482_vm0, %v11481_v30  ;;  %10074 = vmatpush3.bf16.msra.mxu1 %v11069_v43  ;;  %v11098_v43 = vld [vmem:[#allocation15 + $0x168] ss:$12 sps:$4 sm:$0xff]  }
0x1097   :  { %10075 = vmatprep.subr.bf16.mxu1 %v11481_v30 }
0x1098   :  { %6770 = vmatpush1.bf16.msra.mxu0 %v11070_v45 }
0x1099   :  { %6771 = vmatprep.subr.bf16.mxu0 %v11076_v47  ;;  %v11103_v47 = vld [vmem:[#allocation15 + $0x154] ss:$12 sps:$4 sm:$0xff]  }
0x109a   :  { %10076 = vmatpush3.bf16.msra.mxu1 %v11073_v46 }
0x109b   :  { %10077 = vmatprep.subr.bf16.mxu1 %v11481_v30 }
0x109c   :  { %6772 = vmatpush1.bf16.msra.mxu0 %v11074_v48  ;;  %v11101_v48 = vld [vmem:[#allocation15 + $0x150] ss:$12 sps:$4 sm:$0xff]  }
0x109d   :  { %6773 = vmatprep.subr.bf16.mxu0 %v11080_v50  ;;  %v11106_v50 = vld [vmem:[#allocation15 + $0x13c] ss:$12 sps:$4 sm:$0xff]  }
0x109e   :  { %10078 = vmatpush3.bf16.msra.mxu1 %v11077_v49  ;;  %v11123_v49 = vld [vmem:[#allocation15 + $0x158] ss:$12 sps:$4 sm:$0xff]  }
0x109f   :  { %10079 = vmatprep.subr.bf16.mxu1 %v11481_v30 }
0x10a0   :  { %6774 = vmatpush1.bf16.msra.mxu0 %v11078_v34  ;;  %v11124_v34 = vld [vmem:[#allocation15 + $0x140] ss:$12 sps:$4 sm:$0xff]  }
0x10a1   :  { %6775 = vmatprep.subr.bf16.mxu0 %v11084_v52  ;;  %v11125_v52 = vld [vmem:[#allocation15 + $0x128] ss:$12 sps:$4 sm:$0xff]  }
0x10a2   :  { %10080 = vmatpush3.bf16.msra.mxu1 %v11081_v36  ;;  %v11109_v36 = vld [vmem:[#allocation15 + $0x124] ss:$12 sps:$4 sm:$0xff]  }
0x10a3   :  { %10081 = vmatprep.subr.bf16.mxu1 %v11481_v30 }
0x10a4   :  { %6776 = vmatpush1.bf16.msra.mxu0 %v11082_v51  ;;  %v11107_v51 = vld [vmem:[#allocation15 + $0x120] ss:$12 sps:$4 sm:$0xff]  }
0x10a5   :  { %6777 = vmatprep.subr.bf16.mxu0 %v11088_v54  ;;  %v11110_v54 = vld [vmem:[#allocation15 + $0x108] ss:$12 sps:$4 sm:$0xff]  }
0x10a6   :  { %10082 = vmatpush3.bf16.msra.mxu1 %v11085_v53  ;;  %v11112_v53 = vld [vmem:[#allocation15 + $0x10c] ss:$12 sps:$4 sm:$0xff]  }
0x10a7   :  { %10083 = vmatprep.subr.bf16.mxu1 %v11481_v30 }
0x10a8   :  { %6778 = vmatpush1.bf16.msra.mxu0 %v11086_v55  ;;  %v11126_v55 = vld [vmem:[#allocation15 + $0x110] ss:$12 sps:$4 sm:$0xff]  }
0x10a9   :  { %6779 = vmatprep.subr.bf16.mxu0 %v11092_v57  ;;  %v11113_v57 = vld [vmem:[#allocation15 + $0xf0] ss:$12 sps:$4 sm:$0xff]  }
0x10aa   :  { %10084 = vmatpush3.bf16.msra.mxu1 %v11089_v56  ;;  %v11115_v56 = vld [vmem:[#allocation15 + $0xf4] ss:$12 sps:$4 sm:$0xff]  }
0x10ab   :  { %10085 = vmatprep.subr.bf16.mxu1 %v11481_v30 }
0x10ac   :  { %6780 = vmatpush1.bf16.msra.mxu0 %v11090_v58  ;;  %v11127_v58 = vld [vmem:[#allocation15 + $0xf8] ss:$12 sps:$4 sm:$0xff]  }
0x10ad   :  { %6781 = vmatprep.subr.bf16.mxu0 %v11096_v60  ;;  %v11116_v60 = vld [vmem:[#allocation15 + $0xd8] ss:$12 sps:$4 sm:$0xff]  }
0x10ae   :  { %10086 = vmatpush3.bf16.msra.mxu1 %v11093_v59  ;;  %v11118_v59 = vld [vmem:[#allocation15 + $0xdc] ss:$12 sps:$4 sm:$0xff]  }
0x10af   :  { %10087 = vmatprep.subr.bf16.mxu1 %v11481_v30 }
0x10b0   :  { %6782 = vmatpush1.bf16.msra.mxu0 %v11094_v62  ;;  %v11128_v62 = vld [vmem:[#allocation15 + $0xe0] ss:$12 sps:$4 sm:$0xff]  }
0x10b1   :  { %7026 = vmatprep.subr.bf16.mxu0 %v11100_v0  ;;  %v11119_v0 = vld [vmem:[#allocation15 + $0xc0] ss:$12 sps:$4 sm:$0xff]  }
0x10b2   :  { %10088 = vmatpush3.bf16.msra.mxu1 %v11097_v63  ;;  %v11121_v63 = vld [vmem:[#allocation15 + $0xc4] ss:$12 sps:$4 sm:$0xff]  }
0x10b3   :  { %10093 = vmatprep.subr.bf16.mxu1 %v11481_v30 }
0x1153   :  { %v6515_v6 = vpop.f32.mrf.mxu0 }
0x1154   :  { %v6516_v8 = vadd.f32 %v6515_v6, %v6341_v5  ;;  %v11129_v5 = vld [vmem:[#allocation15 + $0xc8] ss:$12 sps:$4 sm:$0xff]   ;;  %v6848_v6 = vpack.c.bf16 %v6588_v4, %v6588_v4 }
0x1155   :  { %v6517_v10 = vpop.f32.mrf.mxu0  ;;  %v6556_v1 = vpop.f32.mrf.mxu1 }
0x1156   :  { %v6565_v11 = vadd.f32 %v6562_v7, %v6516_v8  ;;  %v6518_v14 = vadd.f32 %v6517_v10, %v6345_v9  ;;  %v6557_v25 = vadd.f32 %v6556_v1, %v6349_v22 }
0x1157   :  { %v6519_v12 = vpop.f32.mrf.mxu0  ;;  %v10071_v3 = vpop.f32.mrf.mxu1 }
0x1158   :  { %v9150_v13 = vmul.f32 -1.442695, %v6565_v11  ;;  %v6572_v17 = vadd.f32 %v6563_v15, %v6518_v14  ;;  %v9152_v15 = vld [vmem:[%s12177_s6 + $0x3] sm:$0x7] }
0x1159   :  { %v6520_v16 = vpop.f32.mrf.mxu0  ;;  %v6559_v18 = vpop.f32.mrf.mxu1 }
0x115a   :  { %11130 = vpow2.f32 %v9150_v13  ;;  %v9151_v61 = vmul.f32 -1.442695, %v6572_v17  ;;  %v9177_v16 = vld [vmem:[%s12178_s7 + $0x3] sm:$0x7]  ;;  %v6627_v17 = vrot.slane %v9152_v15, %v11651_v31 }
0x115b   :  { %v10072_v19 = vpop.f32.mrf.mxu1  ;;  %v6886_v1 = vrot.slane %v9177_v16, %v11651_v31 }
0x115c   :  { %11132 = vpow2.f32 %v9151_v61 }
0x1167   :  { %v11131_v20 = vpop.eup %11130 }
0x1168   :  { %v6569_v21 = vadd.f32 1.0, %v11131_v20  ;;  %v6890_v20 = vrot.slane %v9177_v16, %v11656_v33 }
0x1169   :  { %v11133_v23 = vpop.eup %11132 }
0x116a   :  { %11134 = vrcp.f32 %v6569_v21  ;;  %v6576_v24 = vadd.f32 1.0, %v11133_v23  ;;  %v6631_v23 = vrot.slane %v9152_v15, %v11656_v33 }
0x116c   :  { %11136 = vrcp.f32 %v6576_v24 }
0x1177   :  { %v11135_v26 = vpop.eup %11134 }
0x1178   :  { %v6579_v28 = vmul.f32 %v11135_v26, %v6557_v25 }
0x1179   :  { %v11137_v37 = vpop.eup %11136 }
0x117a   :  { %v6580_v29 = vadd.f32 %v6579_v28, %v6564_v27  ;;  %v6582_v38 = vsub.f32 1.0, %v11137_v37  ;;  %v6584_v41 = vmul.f32 %v11137_v37, %v12028_v32  ;;  %v11104_v32 = vld [vmem:[#allocation15 + $0x138] ss:$12 sps:$4 sm:$0xff]  }
0x117c   :  { %11138 = vtanh.f32 %v6580_v29 }
0x1189   :  { %v11139_v40 = vpop.eup %11138 }
0x118a   :  { %v6583_v35 = vmul.f32 %v11139_v40, %v6582_v38 }
0x118c   :  { %v6585_v42 = vadd.f32 %v6584_v41, %v6583_v35 }
0x118e   :  { %v6586_v45 = vmax.f32 %v6585_v42, 0.0  ;;  %v6589_v46 = vpack.c.bf16 %v6585_v42, %v6585_v42 }
0x1190   :  { %6587 = vst [vmem:[#allocation2] sm:$0xff] %v6586_v45  ;;  %6800 = vmatmul.mubr.bf16.vlgmr.msra.gmra.mxu0 %v6589_v46  ;;  %10090 = vmatmul.mubr.bf16.vlgmr.msra.gmra.mxu1 %v6589_v46  ;;  %v6635_v45 = vrot.slane %v9152_v15, %v11665_v39 }
0x1191   :  { %7027 = vmatpush1.bf16.msra.mxu0 %v11098_v43  ;;  %10094 = vmatpush3.bf16.msra.mxu1 %v11122_v44  ;;  %v6894_v43 = vrot.slane %v9177_v16, %v11665_v39 }
0x1192   :  { %7028 = vmatprep.subr.bf16.mxu0 %v11103_v47  ;;  %7058 = vmatprep.mubr.bf16.mxu0 %v11480_v2 }
0x1193   :  { %10095 = vmatprep.subr.bf16.mxu1 %v11481_v30  ;;  %10109 = vmatprep.mubr.msk.bf16.mxu1 %vm11482_vm0, %v11481_v30 }
0x1195   :  { %7029 = vmatpush1.bf16.msra.mxu0 %v11101_v48  ;;  %10096 = vmatpush3.bf16.msra.mxu1 %v11123_v49 }
0x1196   :  { %7030 = vmatprep.subr.bf16.mxu0 %v11106_v50  ;;  %10097 = vmatprep.subr.bf16.mxu1 %v11481_v30 }
0x1199   :  { %7031 = vmatpush1.bf16.msra.mxu0 %v11104_v32  ;;  %10098 = vmatpush3.bf16.msra.mxu1 %v11124_v34 }
0x119a   :  { %7032 = vmatprep.subr.bf16.mxu0 %v11109_v36  ;;  %10099 = vmatprep.subr.bf16.mxu1 %v11481_v30 }
0x119d   :  { %7033 = vmatpush1.bf16.msra.mxu0 %v11107_v51  ;;  %10100 = vmatpush3.bf16.msra.mxu1 %v11125_v52 }
0x119e   :  { %7034 = vmatprep.subr.bf16.mxu0 %v11112_v53  ;;  %10101 = vmatprep.subr.bf16.mxu1 %v11481_v30 }
0x11a1   :  { %7035 = vmatpush1.bf16.msra.mxu0 %v11110_v54  ;;  %10102 = vmatpush3.bf16.msra.mxu1 %v11126_v55 }
0x11a2   :  { %7036 = vmatprep.subr.bf16.mxu0 %v11115_v56  ;;  %10103 = vmatprep.subr.bf16.mxu1 %v11481_v30 }
0x11a5   :  { %7037 = vmatpush1.bf16.msra.mxu0 %v11113_v57  ;;  %10104 = vmatpush3.bf16.msra.mxu1 %v11127_v58 }
0x11a6   :  { %7038 = vmatprep.subr.bf16.mxu0 %v11118_v59  ;;  %10105 = vmatprep.subr.bf16.mxu1 %v11481_v30 }
0x11a9   :  { %7039 = vmatpush1.bf16.msra.mxu0 %v11116_v60  ;;  %10106 = vmatpush3.bf16.msra.mxu1 %v11128_v62 }
0x11aa   :  { %7040 = vmatprep.subr.bf16.mxu0 %v11121_v63  ;;  %10107 = vmatprep.subr.bf16.mxu1 %v11481_v30 }
0x11ad   :  { %7041 = vmatpush1.bf16.msra.mxu0 %v11119_v0  ;;  %10108 = vmatpush3.bf16.msra.mxu1 %v11129_v5 }
0x11b0   :  { %7059 = vmatmul.mubr.bf16.vlgmr.msra.gmra.mxu0 %v6848_v6  ;;  %10110 = vmatmul.mubr.bf16.vlgmr.msra.gmra.mxu1 %v6848_v6 }
0x1250   :  { %v6801_v7 = vpop.f32.mrf.mxu0  ;;  %v6842_v8 = vpop.f32.mrf.mxu1 }
0x1251   :  { %v6802_v18 = vadd.f32 %v6801_v7, %v6627_v17  ;;  %v6843_v49 = vadd.f32 %v6842_v8, %v6635_v45 }
0x1252   :  { %v6803_v9 = vpop.f32.mrf.mxu0  ;;  %v10091_v10 = vpop.f32.mrf.mxu1 }
0x1253   :  { %v6804_v38 = vadd.f32 %v6803_v9, %v6631_v23 }
0x1254   :  { %v6805_v11 = vpop.f32.mrf.mxu0  ;;  %v6845_v12 = vpop.f32.mrf.mxu1 }
0x1256   :  { %v6806_v13 = vpop.f32.mrf.mxu0  ;;  %v10092_v14 = vpop.f32.mrf.mxu1 }
0x1270   :  { %v7060_v3 = vpop.f32.mrf.mxu0  ;;  %v7101_v61 = vpop.f32.mrf.mxu1 }
0x1271   :  { %v7061_v19 = vadd.f32 %v7060_v3, %v6886_v1  ;;  %v7102_v47 = vadd.f32 %v7101_v61, %v6894_v43 }
0x1272   :  { %v7062_v21 = vpop.f32.mrf.mxu0  ;;  %v10111_v22 = vpop.f32.mrf.mxu1 }
0x1273   :  { %v7107_v24 = vadd.f32 %v7061_v19, %v6802_v18  ;;  %v7063_v28 = vadd.f32 %v7062_v21, %v6890_v20 }
0x1274   :  { %v7064_v25 = vpop.f32.mrf.mxu0  ;;  %v7104_v26 = vpop.f32.mrf.mxu1 }
0x1275   :  { %v9202_v27 = vmul.f32 -1.442695, %v7107_v24  ;;  %v7114_v40 = vadd.f32 %v7063_v28, %v6804_v38 }
0x1276   :  { %v7065_v29 = vpop.f32.mrf.mxu0  ;;  %v10112_v37 = vpop.f32.mrf.mxu1 }
0x1277   :  { %11140 = vpow2.f32 %v9202_v27  ;;  %v9203_v35 = vmul.f32 -1.442695, %v7114_v40 }
0x1279   :  { %11142 = vpow2.f32 %v9203_v35 }
0x1284   :  { %v11141_v41 = vpop.eup %11140 }
0x1285   :  { %v7111_v42 = vadd.f32 1.0, %v11141_v41 }
0x1286   :  { %v11143_v44 = vpop.eup %11142 }
0x1287   :  { %11144 = vrcp.f32 %v7111_v42  ;;  %v7118_v46 = vadd.f32 1.0, %v11143_v44 }
0x1289   :  { %11146 = vrcp.f32 %v7118_v46 }
0x1294   :  { %v11145_v48 = vpop.eup %11144 }
0x1295   :  { %v7121_v50 = vmul.f32 %v11145_v48, %v7102_v47 }
0x1296   :  { %v11147_v34 = vpop.eup %11146 }
0x1297   :  { %v7122_v32 = vadd.f32 %v7121_v50, %v6843_v49  ;;  %v7124_v36 = vsub.f32 1.0, %v11147_v34  ;;  %v7126_v52 = vmul.f32 %v11147_v34, %v6588_v4 }
0x1299   :  { %11148 = vtanh.f32 %v7122_v32 }
0x12a6   :  { %v11149_v51 = vpop.eup %11148 }
0x12a7   :  { %v7125_v53 = vmul.f32 %v11149_v51, %v7124_v36 }
0x12a9   :  { %v12079_v54 = vadd.f32 %v7126_v52, %v7125_v53  ;;  %7136 = sbr.rel (%p9205_p7) target bundleno = 4785 (0x12b1), region = 101 }
0x12ab   :  { %v7128_v55 = vmax.f32 %v12079_v54, 0.0  ;;  %7131 = vst [vmem:[#allocation16 + $0x30] sm:$0xff] %v12079_v54 }
0x12ad   :  { %7129 = vst [vmem:[#allocation2 + $0x8] sm:$0xff] %v7128_v55 }
0x12ae   :  { %v7140_v56 = vld [vmem:[#allocation3 + $0x30] sm:$0xff]  ;;  %v7142_v58 = vld [vmem:[#allocation3 + $0x48] sm:$0xff] }
0x12af   :  { %v7141_v57 = vld [vmem:[#allocation3 + $0x50] sm:$0xff]  ;;  %7143 = vst [vmem:[#allocation4 + $0x8] sm:$0xff] %v7140_v56  ;;  %7145 = vst [vmem:[#allocation4 + $0x10] sm:$0xff] %v7142_v58 }
0x12b0   :  { %7144 = vst [vmem:[#allocation4] sm:$0xff] %v7141_v57 }
0x12b1 PF:  { %p9206_p8 = scmp.gt.s32.totalorder %s12065_s12, 0 }
0x12b3   :  { %7149 = sbr.rel (%p9206_p8) target bundleno = 5025 (0x13a1), region = 105 }
0x12b8   :  { %v11150_v59 = vld [vmem:[#allocation13 + $0xac] ss:$12 sps:$4 sm:$0xff]   ;;  %v11498_v60 = vmov 0.0   ;;  %v11152_v62 = vld [vmem:[#allocation13 + $0xb0] ss:$12 sps:$4 sm:$0xff]   ;;  %vm11499_vm6 = vmmov 0   ;;  %v7150_v22 = vpack.c.bf16 %v12079_v54, %v12079_v54 }
0x12b9   :  { %10113 = vmatprep.subr.bf16.mxu1 %v11498_v60  ;;  %10129 = vmatprep.mubr.msk.bf16.mxu1 %vm11499_vm6, %v11498_v60  ;;  %v11153_v63 = vld [vmem:[#allocation13 + $0xa8] ss:$12 sps:$4 sm:$0xff]   ;;  %v11500_v4 = vmov 0   ;;  %v11156_v5 = vld [vmem:[#allocation13 + $0x98] ss:$12 sps:$4 sm:$0xff]  }
0x12ba   :  { %7328 = vmatprep.subr.bf16.mxu0 %v11150_v59  ;;  %10114 = vmatpush3.bf16.msra.mxu1 %v11152_v62  ;;  %v11154_v0 = vld [vmem:[#allocation13 + $0x94] ss:$12 sps:$4 sm:$0xff]   ;;  %v11157_v6 = vld [vmem:[#allocation13 + $0x90] ss:$12 sps:$4 sm:$0xff]   ;;  %v11161_v9 = vld [vmem:[#allocation13 + $0x78] ss:$12 sps:$4 sm:$0xff]  }
0x12bb   :  { %7360 = vmatprep.mubr.bf16.mxu0 %v11500_v4  ;;  %7329 = vmatpush1.bf16.msra.mxu0 %v11153_v63  ;;  %v11158_v7 = vld [vmem:[#allocation13 + $0x7c] ss:$12 sps:$4 sm:$0xff]   ;;  %v11160_v8 = vld [vmem:[#allocation13 + $0x80] ss:$12 sps:$4 sm:$0xff]   ;;  %v11162_v10 = vld [vmem:[#allocation13 + $0x64] ss:$12 sps:$4 sm:$0xff]  }
0x12bc   :  { %10115 = vmatprep.subr.bf16.mxu1 %v11498_v60  ;;  %7330 = vmatprep.subr.bf16.mxu0 %v11154_v0  ;;  %v11164_v11 = vld [vmem:[#allocation13 + $0x68] ss:$12 sps:$4 sm:$0xff]   ;;  %v11165_v12 = vld [vmem:[#allocation13 + $0x60] ss:$12 sps:$4 sm:$0xff]   ;;  %v11168_v14 = vld [vmem:[#allocation13 + $0x50] ss:$12 sps:$4 sm:$0xff]  }
0x12bd   :  { %v11166_v13 = vld [vmem:[#allocation13 + $0x4c] ss:$12 sps:$4 sm:$0xff]   ;;  %v11169_v15 = vld [vmem:[#allocation13 + $0x48] ss:$12 sps:$4 sm:$0xff]   ;;  %v11173_v1 = vld [vmem:[#allocation13 + $0x30] ss:$12 sps:$4 sm:$0xff]  }
0x12be   :  { %10116 = vmatpush3.bf16.msra.mxu1 %v11156_v5  ;;  %v11170_v16 = vld [vmem:[#allocation13 + $0x34] ss:$12 sps:$4 sm:$0xff]   ;;  %v11172_v17 = vld [vmem:[#allocation13 + $0x38] ss:$12 sps:$4 sm:$0xff]   ;;  %v11174_v3 = vld [vmem:[#allocation13 + $0x1c] ss:$12 sps:$4 sm:$0xff]  }
0x12bf   :  { %7331 = vmatpush1.bf16.msra.mxu0 %v11157_v6  ;;  %10117 = vmatprep.subr.bf16.mxu1 %v11498_v60  ;;  %v11176_v61 = vld [vmem:[#allocation13 + $0x20] ss:$12 sps:$4 sm:$0xff]   ;;  %v11177_v18 = vld [vmem:[#allocation13 + $0x18] ss:$12 sps:$4 sm:$0xff]   ;;  %v11180_v20 = vld [vmem:[#allocation13 + $0x8] ss:$12 sps:$4 sm:$0xff]  }
0x12c0   :  { %7332 = vmatprep.subr.bf16.mxu0 %v11158_v7  ;;  %v11178_v19 = vld [vmem:[#allocation13 + $0x4] ss:$12 sps:$4 sm:$0xff]   ;;  %v11181_v21 = vld [vmem:[#allocation13] ss:$12 sps:$4 sm:$0xff]  }
0x12c1   :  { %v7183_v23 = vld [vmem:[%s12177_s6] sm:$0x7] }
0x12c2   :  { %10118 = vmatpush3.bf16.msra.mxu1 %v11160_v8  ;;  %v7196_v24 = vrot.slane %v7183_v23, %v11665_v39  ;;  %v7188_v25 = vrot.slane %v7183_v23, %v11651_v31  ;;  %v7192_v27 = vrot.slane %v7183_v23, %v11656_v33 }
0x12c3   :  { %7333 = vmatpush1.bf16.msra.mxu0 %v11161_v9  ;;  %10119 = vmatprep.subr.bf16.mxu1 %v11498_v60 }
0x12c4   :  { %7334 = vmatprep.subr.bf16.mxu0 %v11162_v10 }
0x12c6   :  { %10120 = vmatpush3.bf16.msra.mxu1 %v11164_v11 }
0x12c7   :  { %7335 = vmatpush1.bf16.msra.mxu0 %v11165_v12  ;;  %10121 = vmatprep.subr.bf16.mxu1 %v11498_v60 }
0x12c8   :  { %7336 = vmatprep.subr.bf16.mxu0 %v11166_v13 }
0x12ca   :  { %10122 = vmatpush3.bf16.msra.mxu1 %v11168_v14 }
0x12cb   :  { %7337 = vmatpush1.bf16.msra.mxu0 %v11169_v15  ;;  %10123 = vmatprep.subr.bf16.mxu1 %v11498_v60 }
0x12cc   :  { %7338 = vmatprep.subr.bf16.mxu0 %v11170_v16 }
0x12ce   :  { %10124 = vmatpush3.bf16.msra.mxu1 %v11172_v17 }
0x12cf   :  { %7339 = vmatpush1.bf16.msra.mxu0 %v11173_v1  ;;  %10125 = vmatprep.subr.bf16.mxu1 %v11498_v60 }
0x12d0   :  { %7340 = vmatprep.subr.bf16.mxu0 %v11174_v3 }
0x12d2   :  { %10126 = vmatpush3.bf16.msra.mxu1 %v11176_v61 }
0x12d3   :  { %7341 = vmatpush1.bf16.msra.mxu0 %v11177_v18  ;;  %10127 = vmatprep.subr.bf16.mxu1 %v11498_v60 }
0x12d4   :  { %7342 = vmatprep.subr.bf16.mxu0 %v11178_v19 }
0x12d6   :  { %10128 = vmatpush3.bf16.msra.mxu1 %v11180_v20 }
0x12d7   :  { %7343 = vmatpush1.bf16.msra.mxu0 %v11181_v21 }
0x12d9   :  { %10130 = vmatmul.mubr.bf16.vlgmr.msra.gmra.mxu1 %v7150_v22 }
0x12da   :  { %7361 = vmatmul.mubr.bf16.vlgmr.msra.gmra.mxu0 %v7150_v22 }
0x1399   :  { %v7403_v26 = vpop.f32.mrf.mxu1 }
0x139a   :  { %v7404_v28 = vadd.f32 %v7403_v26, %v7196_v24  ;;  %v7362_v29 = vpop.f32.mrf.mxu0 }
0x139b   :  { %v7363_v37 = vadd.f32 %v7362_v29, %v7188_v25  ;;  %v10131_v38 = vpop.f32.mrf.mxu1 }
0x139c   :  { %7411 = vst [vmem:[#allocation4 + $0x10] sm:$0xff] %v7404_v28  ;;  %v7364_v40 = vpop.f32.mrf.mxu0 }
0x139d   :  { %7409 = vst [vmem:[#allocation4 + $0x8] sm:$0xff] %v7363_v37  ;;  %v7365_v35 = vadd.f32 %v7364_v40, %v7192_v27  ;;  %v7406_v41 = vpop.f32.mrf.mxu1 }
0x139e   :  { %v7366_v42 = vpop.f32.mrf.mxu0 }
0x139f   :  { %7410 = vst [vmem:[#allocation4] sm:$0xff] %v7365_v35  ;;  %v10132_v43 = vpop.f32.mrf.mxu1 }
0x13a0   :  { %v7367_v44 = vpop.f32.mrf.mxu0 }
0x13a1 PF:  { %v11182_v45 = vld [vmem:[#allocation15 + $0xac] ss:$12 sps:$4 sm:$0xff]   ;;  %10133 = vmatprep.subr.bf16.mxu1 %v11481_v30  ;;  %7623 = vmatprep.mubr.bf16.mxu0 %v11480_v2  ;;  %v11184_v46 = vld [vmem:[#allocation15 + $0xa8] ss:$12 sps:$4 sm:$0xff]   ;;  %v11187_v48 = vld [vmem:[#allocation15 + $0x90] ss:$12 sps:$4 sm:$0xff]  }
0x13a2   :  { %10149 = vmatprep.mubr.msk.bf16.mxu1 %vm11482_vm0, %v11481_v30  ;;  %7591 = vmatprep.subr.bf16.mxu0 %v11182_v45  ;;  %v11185_v47 = vld [vmem:[#allocation15 + $0x94] ss:$12 sps:$4 sm:$0xff]   ;;  %v11188_v49 = vld [vmem:[#allocation15 + $0x7c] ss:$12 sps:$4 sm:$0xff]   ;;  %v11190_v50 = vld [vmem:[#allocation15 + $0x78] ss:$12 sps:$4 sm:$0xff]  }
0x13a3   :  { %7592 = vmatpush1.bf16.msra.mxu0 %v11184_v46  ;;  %v11191_v32 = vld [vmem:[#allocation15 + $0x64] ss:$12 sps:$4 sm:$0xff]   ;;  %v11193_v34 = vld [vmem:[#allocation15 + $0x60] ss:$12 sps:$4 sm:$0xff]   ;;  %v11196_v53 = vld [vmem:[#allocation15 + $0x48] ss:$12 sps:$4 sm:$0xff]  }
0x13a4   :  { %7593 = vmatprep.subr.bf16.mxu0 %v11185_v47  ;;  %v11206_v36 = vld [vmem:[#allocation15 + $0xb0] ss:$12 sps:$4 sm:$0xff]   ;;  %v11194_v51 = vld [vmem:[#allocation15 + $0x4c] ss:$12 sps:$4 sm:$0xff]   ;;  %v11197_v54 = vld [vmem:[#allocation15 + $0x34] ss:$12 sps:$4 sm:$0xff]  }
0x13a5   :  { %10134 = vmatpush3.bf16.msra.mxu1 %v11206_v36  ;;  %v11207_v52 = vld [vmem:[#allocation15 + $0x98] ss:$12 sps:$4 sm:$0xff]   ;;  %v11199_v55 = vld [vmem:[#allocation15 + $0x30] ss:$12 sps:$4 sm:$0xff]   ;;  %v11208_v56 = vld [vmem:[#allocation15 + $0x80] ss:$12 sps:$4 sm:$0xff]  }
0x13a6   :  { %10135 = vmatprep.subr.bf16.mxu1 %v11481_v30  ;;  %v11200_v57 = vld [vmem:[#allocation15 + $0x1c] ss:$12 sps:$4 sm:$0xff]   ;;  %v11202_v59 = vld [vmem:[#allocation15 + $0x18] ss:$12 sps:$4 sm:$0xff]   ;;  %v11205_v63 = vld [vmem:[#allocation15] ss:$12 sps:$4 sm:$0xff]  }
0x13a7   :  { %7594 = vmatpush1.bf16.msra.mxu0 %v11187_v48  ;;  %v11209_v58 = vld [vmem:[#allocation15 + $0x68] ss:$12 sps:$4 sm:$0xff]   ;;  %v11203_v60 = vld [vmem:[#allocation15 + $0x4] ss:$12 sps:$4 sm:$0xff]   ;;  %v11212_v6 = vld [vmem:[#allocation15 + $0x20] ss:$12 sps:$4 sm:$0xff]  }
0x13a8   :  { %7595 = vmatprep.subr.bf16.mxu0 %v11188_v49  ;;  %v11210_v62 = vld [vmem:[#allocation15 + $0x50] ss:$12 sps:$4 sm:$0xff]   ;;  %v12100_v0 = vld [vmem:[#allocation2] sm:$0xff]  ;;  %v11213_v7 = vld [vmem:[#allocation15 + $0x8] ss:$12 sps:$4 sm:$0xff]   ;;  %s12137_s2 = sld [smem:[#allocation5 + $0x7]] }
0x13a9   :  { %10136 = vmatpush3.bf16.msra.mxu1 %v11207_v52  ;;  %v11211_v4 = vld [vmem:[#allocation15 + $0x38] ss:$12 sps:$4 sm:$0xff]   ;;  %v7413_v5 = vpack.c.bf16 %v12100_v0, %v12100_v0  ;;  %v11214_v9 = vld [vmem:[#allocation13 + $0x168] ss:$12 sps:$4 sm:$0xff]   ;;  %v11217_v10 = vld [vmem:[#allocation13 + $0x170] ss:$12 sps:$4 sm:$0xff]  }
0x13aa   :  { %10137 = vmatprep.subr.bf16.mxu1 %v11481_v30  ;;  %v11216_v8 = vld [vmem:[#allocation13 + $0x16c] ss:$12 sps:$4 sm:$0xff]   ;;  %v11220_v11 = vld [vmem:[#allocation13 + $0x154] ss:$12 sps:$4 sm:$0xff]   ;;  %v11218_v12 = vld [vmem:[#allocation13 + $0x150] ss:$12 sps:$4 sm:$0xff]  }
0x13ab   :  { %7596 = vmatpush1.bf16.msra.mxu0 %v11190_v50  ;;  %v11221_v13 = vld [vmem:[#allocation13 + $0x158] ss:$12 sps:$4 sm:$0xff]   ;;  %v11224_v14 = vld [vmem:[#allocation13 + $0x13c] ss:$12 sps:$4 sm:$0xff]   ;;  %v11225_v16 = vld [vmem:[#allocation13 + $0x140] ss:$12 sps:$4 sm:$0xff]  }
0x13ac   :  { %7597 = vmatprep.subr.bf16.mxu0 %v11191_v32  ;;  %v11222_v15 = vld [vmem:[#allocation13 + $0x138] ss:$12 sps:$4 sm:$0xff]   ;;  %v11226_v1 = vld [vmem:[#allocation13 + $0x120] ss:$12 sps:$4 sm:$0xff]   ;;  %v11229_v3 = vld [vmem:[#allocation13 + $0x128] ss:$12 sps:$4 sm:$0xff]  }
0x13ad   :  { %10138 = vmatpush3.bf16.msra.mxu1 %v11208_v56  ;;  %v11228_v17 = vld [vmem:[#allocation13 + $0x124] ss:$12 sps:$4 sm:$0xff]   ;;  %v11230_v61 = vld [vmem:[#allocation13 + $0x108] ss:$12 sps:$4 sm:$0xff]   ;;  %v11232_v18 = vld [vmem:[#allocation13 + $0x10c] ss:$12 sps:$4 sm:$0xff]  }
0x13ae   :  { %10139 = vmatprep.subr.bf16.mxu1 %v11481_v30  ;;  %v11233_v19 = vld [vmem:[#allocation13 + $0x110] ss:$12 sps:$4 sm:$0xff]   ;;  %v11236_v20 = vld [vmem:[#allocation13 + $0xf4] ss:$12 sps:$4 sm:$0xff]   ;;  %v11237_v22 = vld [vmem:[#allocation13 + $0xf8] ss:$12 sps:$4 sm:$0xff]  }
0x13af   :  { %7598 = vmatpush1.bf16.msra.mxu0 %v11193_v34  ;;  %v11234_v21 = vld [vmem:[#allocation13 + $0xf0] ss:$12 sps:$4 sm:$0xff]   ;;  %v11238_v24 = vld [vmem:[#allocation13 + $0xd8] ss:$12 sps:$4 sm:$0xff]   ;;  %v11241_v25 = vld [vmem:[#allocation13 + $0xe0] ss:$12 sps:$4 sm:$0xff]  }
0x13b0   :  { %7599 = vmatprep.subr.bf16.mxu0 %v11194_v51  ;;  %v11240_v23 = vld [vmem:[#allocation13 + $0xdc] ss:$12 sps:$4 sm:$0xff]   ;;  %v11244_v26 = vld [vmem:[#allocation13 + $0xc4] ss:$12 sps:$4 sm:$0xff]   ;;  %v11242_v27 = vld [vmem:[#allocation13 + $0xc0] ss:$12 sps:$4 sm:$0xff]  }
0x13b1   :  { %10140 = vmatpush3.bf16.msra.mxu1 %v11209_v58  ;;  %v11245_v28 = vld [vmem:[#allocation13 + $0xc8] ss:$12 sps:$4 sm:$0xff]   ;;  %v11248_v29 = vld [vmem:[#allocation15 + $0x16c] ss:$12 sps:$4 sm:$0xff]   ;;  %v7446_v37 = vld [vmem:[%s12178_s7] sm:$0x7] }
0x13b2   :  { %10141 = vmatprep.subr.bf16.mxu1 %v11481_v30  ;;  %v7451_v38 = vrot.slane %v7446_v37, %v11651_v31  ;;  %v7672_v35 = vld [vmem:[#allocation4 + $0x8] sm:$0xff]  ;;  %v7455_v42 = vrot.slane %v7446_v37, %v11656_v33  ;;  %v7673_v48 = vld [vmem:[#allocation4] sm:$0xff]  ;;  %p9310_p9 = scmp.le.s32.totalorder %s12137_s2, 0 }
0x13b3   :  { %7600 = vmatpush1.bf16.msra.mxu0 %v11196_v53 }
0x13b4   :  { %7601 = vmatprep.subr.bf16.mxu0 %v11197_v54 }
0x13b5   :  { %10142 = vmatpush3.bf16.msra.mxu1 %v11210_v62 }
0x13b6   :  { %10143 = vmatprep.subr.bf16.mxu1 %v11481_v30 }
0x13b7   :  { %7602 = vmatpush1.bf16.msra.mxu0 %v11199_v55  ;;  %v7459_v55 = vrot.slane %v7446_v37, %v11665_v39  ;;  %v11277_v37 = vld [vmem:[#allocation15 + $0xc8] ss:$12 sps:$4 sm:$0xff]  }
0x13b8   :  { %7603 = vmatprep.subr.bf16.mxu0 %v11200_v57 }
0x13b9   :  { %10144 = vmatpush3.bf16.msra.mxu1 %v11211_v4 }
0x13ba   :  { %10145 = vmatprep.subr.bf16.mxu1 %v11481_v30 }
0x13bb   :  { %7604 = vmatpush1.bf16.msra.mxu0 %v11202_v59 }
0x13bc   :  { %7605 = vmatprep.subr.bf16.mxu0 %v11203_v60  ;;  %v7674_v60 = vld [vmem:[#allocation4 + $0x10] sm:$0xff] }
0x13bd   :  { %10146 = vmatpush3.bf16.msra.mxu1 %v11212_v6 }
0x13be   :  { %10147 = vmatprep.subr.bf16.mxu1 %v11481_v30 }
0x13bf   :  { %7606 = vmatpush1.bf16.msra.mxu0 %v11205_v63 }
0x13c0   :  { %7877 = vmatprep.subr.bf16.mxu0 %v11216_v8 }
0x13c1   :  { %10148 = vmatpush3.bf16.msra.mxu1 %v11213_v7 }
0x13c2   :  { %7624 = vmatmul.mubr.bf16.vlgmr.msra.gmra.mxu0 %v7413_v5  ;;  %10153 = vmatprep.subr.bf16.mxu1 %v11481_v30 }
0x13c3   :  { %7909 = vmatprep.mubr.bf16.mxu0 %v11480_v2  ;;  %7878 = vmatpush1.bf16.msra.mxu0 %v11214_v9 }
0x13c4   :  { %10150 = vmatmul.mubr.bf16.vlgmr.msra.gmra.mxu1 %v7413_v5  ;;  %7879 = vmatprep.subr.bf16.mxu0 %v11220_v11  ;;  %v11270_v11 = vld [vmem:[#allocation15 + $0x170] ss:$12 sps:$4 sm:$0xff]  }
0x13c5   :  { %10169 = vmatprep.mubr.msk.bf16.mxu1 %vm11482_vm0, %v11481_v30  ;;  %10154 = vmatpush3.bf16.msra.mxu1 %v11217_v10  ;;  %v11246_v10 = vld [vmem:[#allocation15 + $0x168] ss:$12 sps:$4 sm:$0xff]  }
0x13c6   :  { %10155 = vmatprep.subr.bf16.mxu1 %v11481_v30 }
0x13c7   :  { %7880 = vmatpush1.bf16.msra.mxu0 %v11218_v12 }
0x13c8   :  { %7881 = vmatprep.subr.bf16.mxu0 %v11224_v14  ;;  %v11251_v14 = vld [vmem:[#allocation15 + $0x154] ss:$12 sps:$4 sm:$0xff]  }
0x13c9   :  { %10156 = vmatpush3.bf16.msra.mxu1 %v11221_v13 }
0x13ca   :  { %10157 = vmatprep.subr.bf16.mxu1 %v11481_v30 }
0x13cb   :  { %7882 = vmatpush1.bf16.msra.mxu0 %v11222_v15  ;;  %v11249_v15 = vld [vmem:[#allocation15 + $0x150] ss:$12 sps:$4 sm:$0xff]  }
0x13cc   :  { %7883 = vmatprep.subr.bf16.mxu0 %v11228_v17  ;;  %v11254_v17 = vld [vmem:[#allocation15 + $0x13c] ss:$12 sps:$4 sm:$0xff]  }
0x13cd   :  { %10158 = vmatpush3.bf16.msra.mxu1 %v11225_v16  ;;  %v11271_v16 = vld [vmem:[#allocation15 + $0x158] ss:$12 sps:$4 sm:$0xff]  }
0x13ce   :  { %10159 = vmatprep.subr.bf16.mxu1 %v11481_v30 }
0x13cf   :  { %7884 = vmatpush1.bf16.msra.mxu0 %v11226_v1  ;;  %v11272_v1 = vld [vmem:[#allocation15 + $0x140] ss:$12 sps:$4 sm:$0xff]  }
0x13d0   :  { %7885 = vmatprep.subr.bf16.mxu0 %v11232_v18  ;;  %v11273_v18 = vld [vmem:[#allocation15 + $0x128] ss:$12 sps:$4 sm:$0xff]  }
0x13d1   :  { %10160 = vmatpush3.bf16.msra.mxu1 %v11229_v3  ;;  %v11257_v3 = vld [vmem:[#allocation15 + $0x124] ss:$12 sps:$4 sm:$0xff]  }
0x13d2   :  { %10161 = vmatprep.subr.bf16.mxu1 %v11481_v30 }
0x13d3   :  { %7886 = vmatpush1.bf16.msra.mxu0 %v11230_v61  ;;  %v11255_v61 = vld [vmem:[#allocation15 + $0x120] ss:$12 sps:$4 sm:$0xff]  }
0x13d4   :  { %7887 = vmatprep.subr.bf16.mxu0 %v11236_v20  ;;  %v11274_v20 = vld [vmem:[#allocation15 + $0x110] ss:$12 sps:$4 sm:$0xff]  }
0x13d5   :  { %10162 = vmatpush3.bf16.msra.mxu1 %v11233_v19  ;;  %v11260_v19 = vld [vmem:[#allocation15 + $0x10c] ss:$12 sps:$4 sm:$0xff]  }
0x13d6   :  { %10163 = vmatprep.subr.bf16.mxu1 %v11481_v30 }
0x13d7   :  { %7888 = vmatpush1.bf16.msra.mxu0 %v11234_v21  ;;  %v11263_v21 = vld [vmem:[#allocation15 + $0xf4] ss:$12 sps:$4 sm:$0xff]  }
0x13d8   :  { %7889 = vmatprep.subr.bf16.mxu0 %v11240_v23  ;;  %v11275_v23 = vld [vmem:[#allocation15 + $0xf8] ss:$12 sps:$4 sm:$0xff]  }
0x13d9   :  { %10164 = vmatpush3.bf16.msra.mxu1 %v11237_v22  ;;  %v11261_v22 = vld [vmem:[#allocation15 + $0xf0] ss:$12 sps:$4 sm:$0xff]  }
0x13da   :  { %10165 = vmatprep.subr.bf16.mxu1 %v11481_v30 }
0x13db   :  { %7890 = vmatpush1.bf16.msra.mxu0 %v11238_v24  ;;  %v11266_v24 = vld [vmem:[#allocation15 + $0xdc] ss:$12 sps:$4 sm:$0xff]  }
0x13dc   :  { %7891 = vmatprep.subr.bf16.mxu0 %v11244_v26  ;;  %v11276_v26 = vld [vmem:[#allocation15 + $0xe0] ss:$12 sps:$4 sm:$0xff]  }
0x13dd   :  { %10166 = vmatpush3.bf16.msra.mxu1 %v11241_v25  ;;  %v11264_v25 = vld [vmem:[#allocation15 + $0xd8] ss:$12 sps:$4 sm:$0xff]  }
0x13de   :  { %10167 = vmatprep.subr.bf16.mxu1 %v11481_v30 }
0x13df   :  { %7892 = vmatpush1.bf16.msra.mxu0 %v11242_v27  ;;  %v11269_v27 = vld [vmem:[#allocation15 + $0xc4] ss:$12 sps:$4 sm:$0xff]  }
0x13e0   :  { %8136 = vmatprep.subr.bf16.mxu0 %v11248_v29  ;;  %v7698_v29 = vld [vmem:[#allocation2 + $0x8] sm:$0xff] }
0x13e1   :  { %10168 = vmatpush3.bf16.msra.mxu1 %v11245_v28  ;;  %v11267_v28 = vld [vmem:[#allocation15 + $0xc0] ss:$12 sps:$4 sm:$0xff]  }
0x13e2   :  { %10173 = vmatprep.subr.bf16.mxu1 %v11481_v30 }
0x1482   :  { %v7625_v40 = vpop.f32.mrf.mxu0 }
0x1483   :  { %v7626_v41 = vadd.f32 %v7625_v40, %v7451_v38  ;;  %v7958_v38 = vpack.c.bf16 %v7698_v29, %v7698_v29 }
0x1484   :  { %v7627_v43 = vpop.f32.mrf.mxu0  ;;  %v7666_v32 = vpop.f32.mrf.mxu1 }
0x1485   :  { %v7675_v44 = vadd.f32 %v7672_v35, %v7626_v41  ;;  %v7628_v47 = vadd.f32 %v7627_v43, %v7455_v42  ;;  %v7667_v58 = vadd.f32 %v7666_v32, %v7459_v55 }
0x1486   :  { %v7629_v45 = vpop.f32.mrf.mxu0  ;;  %v10151_v34 = vpop.f32.mrf.mxu1 }
0x1487   :  { %v9255_v46 = vmul.f32 -1.442695, %v7675_v44  ;;  %v7682_v50 = vadd.f32 %v7673_v48, %v7628_v47  ;;  %v9257_v47 = vld [vmem:[%s12177_s6 + $0x3] sm:$0x7] }
0x1488   :  { %v7630_v49 = vpop.f32.mrf.mxu0  ;;  %v7669_v51 = vpop.f32.mrf.mxu1  ;;  %v7737_v48 = vrot.slane %v9257_v47, %v11651_v31 }
0x1489   :  { %11278 = vpow2.f32 %v9255_v46  ;;  %v9256_v36 = vmul.f32 -1.442695, %v7682_v50 }
0x148a   :  { %v10152_v52 = vpop.f32.mrf.mxu1 }
0x148b   :  { %11280 = vpow2.f32 %v9256_v36 }
0x1496   :  { %v11279_v53 = vpop.eup %11278 }
0x1497   :  { %v7679_v54 = vadd.f32 1.0, %v11279_v53 }
0x1498   :  { %v11281_v56 = vpop.eup %11280 }
0x1499   :  { %11282 = vrcp.f32 %v7679_v54  ;;  %v7686_v57 = vadd.f32 1.0, %v11281_v56  ;;  %v7741_v54 = vrot.slane %v9257_v47, %v11656_v33 }
0x149b   :  { %11284 = vrcp.f32 %v7686_v57 }
0x14a6   :  { %v11283_v59 = vpop.eup %11282 }
0x14a7   :  { %v7689_v62 = vmul.f32 %v11283_v59, %v7667_v58 }
0x14a8   :  { %v11285_v4 = vpop.eup %11284 }
0x14a9   :  { %v7690_v63 = vadd.f32 %v7689_v62, %v7674_v60  ;;  %v7692_v5 = vsub.f32 1.0, %v11285_v4  ;;  %v7694_v8 = vmul.f32 %v11285_v4, %v12100_v0  ;;  %v11252_v0 = vld [vmem:[#allocation15 + $0x138] ss:$12 sps:$4 sm:$0xff]  }
0x14ab   :  { %11286 = vtanh.f32 %v7690_v63 }
0x14b8   :  { %v11287_v6 = vpop.eup %11286 }
0x14b9   :  { %v7693_v7 = vmul.f32 %v11287_v6, %v7692_v5 }
0x14bb   :  { %v7695_v9 = vadd.f32 %v7694_v8, %v7693_v7 }
0x14bd   :  { %v7696_v12 = vmax.f32 %v7695_v9, 0.0  ;;  %v7699_v13 = vpack.c.bf16 %v7695_v9, %v7695_v9 }
0x14bf   :  { %7697 = vst [vmem:[#allocation2] sm:$0xff] %v7696_v12  ;;  %7910 = vmatmul.mubr.bf16.vlgmr.msra.gmra.mxu0 %v7699_v13  ;;  %10170 = vmatmul.mubr.bf16.vlgmr.msra.gmra.mxu1 %v7699_v13 }
0x14c0   :  { %8137 = vmatpush1.bf16.msra.mxu0 %v11246_v10  ;;  %10174 = vmatpush3.bf16.msra.mxu1 %v11270_v11  ;;  %v7745_v10 = vrot.slane %v9257_v47, %v11665_v39 }
0x14c1   :  { %8138 = vmatprep.subr.bf16.mxu0 %v11251_v14  ;;  %8168 = vmatprep.mubr.bf16.mxu0 %v11480_v2  ;;  %v11258_v2 = vld [vmem:[#allocation15 + $0x108] ss:$12 sps:$4 sm:$0xff]  }
0x14c2   :  { %10175 = vmatprep.subr.bf16.mxu1 %v11481_v30  ;;  %10189 = vmatprep.mubr.msk.bf16.mxu1 %vm11482_vm0, %v11481_v30 }
0x14c4   :  { %8139 = vmatpush1.bf16.msra.mxu0 %v11249_v15  ;;  %10176 = vmatpush3.bf16.msra.mxu1 %v11271_v16 }
0x14c5   :  { %8140 = vmatprep.subr.bf16.mxu0 %v11254_v17  ;;  %10177 = vmatprep.subr.bf16.mxu1 %v11481_v30 }
0x14c8   :  { %8141 = vmatpush1.bf16.msra.mxu0 %v11252_v0  ;;  %10178 = vmatpush3.bf16.msra.mxu1 %v11272_v1 }
0x14c9   :  { %8142 = vmatprep.subr.bf16.mxu0 %v11257_v3  ;;  %10179 = vmatprep.subr.bf16.mxu1 %v11481_v30 }
0x14cc   :  { %8143 = vmatpush1.bf16.msra.mxu0 %v11255_v61  ;;  %10180 = vmatpush3.bf16.msra.mxu1 %v11273_v18 }
0x14cd   :  { %8144 = vmatprep.subr.bf16.mxu0 %v11260_v19  ;;  %10181 = vmatprep.subr.bf16.mxu1 %v11481_v30 }
0x14d0   :  { %8145 = vmatpush1.bf16.msra.mxu0 %v11258_v2  ;;  %10182 = vmatpush3.bf16.msra.mxu1 %v11274_v20 }
0x14d1   :  { %8146 = vmatprep.subr.bf16.mxu0 %v11263_v21  ;;  %10183 = vmatprep.subr.bf16.mxu1 %v11481_v30 }
0x14d4   :  { %8147 = vmatpush1.bf16.msra.mxu0 %v11261_v22  ;;  %10184 = vmatpush3.bf16.msra.mxu1 %v11275_v23 }
0x14d5   :  { %8148 = vmatprep.subr.bf16.mxu0 %v11266_v24  ;;  %10185 = vmatprep.subr.bf16.mxu1 %v11481_v30 }
0x14d8   :  { %8149 = vmatpush1.bf16.msra.mxu0 %v11264_v25  ;;  %10186 = vmatpush3.bf16.msra.mxu1 %v11276_v26 }
0x14d9   :  { %8150 = vmatprep.subr.bf16.mxu0 %v11269_v27  ;;  %10187 = vmatprep.subr.bf16.mxu1 %v11481_v30  ;;  %v9282_v30 = vld [vmem:[%s12178_s7 + $0x3] sm:$0x7] }
0x14da   :  { %v7996_v49 = vrot.slane %v9282_v30, %v11651_v31  ;;  %v8000_v51 = vrot.slane %v9282_v30, %v11656_v33  ;;  %v8004_v8 = vrot.slane %v9282_v30, %v11665_v39 }
0x14dc   :  { %8151 = vmatpush1.bf16.msra.mxu0 %v11267_v28  ;;  %10188 = vmatpush3.bf16.msra.mxu1 %v11277_v37 }
0x14df   :  { %8169 = vmatmul.mubr.bf16.vlgmr.msra.gmra.mxu0 %v7958_v38  ;;  %10190 = vmatmul.mubr.bf16.vlgmr.msra.gmra.mxu1 %v7958_v38 }
0x157f   :  { %v7911_v40 = vpop.f32.mrf.mxu0  ;;  %v7952_v35 = vpop.f32.mrf.mxu1 }
0x1580   :  { %v7912_v34 = vadd.f32 %v7911_v40, %v7737_v48  ;;  %v7953_v14 = vadd.f32 %v7952_v35, %v7745_v10 }
0x1581   :  { %v7913_v41 = vpop.f32.mrf.mxu0  ;;  %v10171_v42 = vpop.f32.mrf.mxu1 }
0x1582   :  { %v7914_v63 = vadd.f32 %v7913_v41, %v7741_v54 }
0x1583   :  { %v7915_v43 = vpop.f32.mrf.mxu0  ;;  %v7955_v44 = vpop.f32.mrf.mxu1 }
0x1585   :  { %v7916_v45 = vpop.f32.mrf.mxu0  ;;  %v10172_v46 = vpop.f32.mrf.mxu1 }
0x159f   :  { %v8170_v50 = vpop.f32.mrf.mxu0  ;;  %v8211_v32 = vpop.f32.mrf.mxu1 }
0x15a0   :  { %v8171_v36 = vadd.f32 %v8170_v50, %v7996_v49  ;;  %v8212_v12 = vadd.f32 %v8211_v32, %v8004_v8 }
0x15a1   :  { %v8172_v52 = vpop.f32.mrf.mxu0  ;;  %v10191_v53 = vpop.f32.mrf.mxu1 }
0x15a2   :  { %v8217_v55 = vadd.f32 %v8171_v36, %v7912_v34  ;;  %v8173_v59 = vadd.f32 %v8172_v52, %v8000_v51 }
0x15a3   :  { %v8174_v56 = vpop.f32.mrf.mxu0  ;;  %v8214_v57 = vpop.f32.mrf.mxu1 }
0x15a4   :  { %v9307_v58 = vmul.f32 -1.442695, %v8217_v55  ;;  %v8224_v4 = vadd.f32 %v8173_v59, %v7914_v63 }
0x15a5   :  { %v8175_v60 = vpop.f32.mrf.mxu0  ;;  %v10192_v62 = vpop.f32.mrf.mxu1 }
0x15a6   :  { %11288 = vpow2.f32 %v9307_v58  ;;  %v9308_v5 = vmul.f32 -1.442695, %v8224_v4 }
0x15a8   :  { %11290 = vpow2.f32 %v9308_v5 }
0x15b3   :  { %v11289_v6 = vpop.eup %11288 }
0x15b4   :  { %v8221_v7 = vadd.f32 1.0, %v11289_v6 }
0x15b5   :  { %v11291_v9 = vpop.eup %11290 }
0x15b6   :  { %11292 = vrcp.f32 %v8221_v7  ;;  %v8228_v11 = vadd.f32 1.0, %v11291_v9 }
0x15b8   :  { %11294 = vrcp.f32 %v8228_v11 }
0x15c3   :  { %v11293_v13 = vpop.eup %11292 }
0x15c4   :  { %v8231_v15 = vmul.f32 %v11293_v13, %v8212_v12 }
0x15c5   :  { %v11295_v17 = vpop.eup %11294 }
0x15c6   :  { %v8232_v16 = vadd.f32 %v8231_v15, %v7953_v14  ;;  %v8234_v0 = vsub.f32 1.0, %v11295_v17  ;;  %v8236_v3 = vmul.f32 %v11295_v17, %v7698_v29 }
0x15c8   :  { %11296 = vtanh.f32 %v8232_v16 }
0x15d5   :  { %v11297_v1 = vpop.eup %11296 }
0x15d6   :  { %v8235_v61 = vmul.f32 %v11297_v1, %v8234_v0 }
0x15d8   :  { %v12151_v18 = vadd.f32 %v8236_v3, %v8235_v61  ;;  %8246 = sbr.rel (%p9310_p9) target bundleno = 5600 (0x15e0), region = 109 }
0x15da   :  { %v8238_v19 = vmax.f32 %v12151_v18, 0.0  ;;  %8241 = vst [vmem:[#allocation16 + $0x38] sm:$0xff] %v12151_v18 }
0x15dc   :  { %8239 = vst [vmem:[#allocation2 + $0x8] sm:$0xff] %v8238_v19 }
0x15dd   :  { %v8250_v2 = vld [vmem:[#allocation3] sm:$0xff]  ;;  %v8252_v21 = vld [vmem:[#allocation3 + $0xb8] sm:$0xff] }
0x15de   :  { %v8251_v20 = vld [vmem:[#allocation3 + $0xa0] sm:$0xff]  ;;  %8253 = vst [vmem:[#allocation4 + $0x8] sm:$0xff] %v8250_v2  ;;  %8255 = vst [vmem:[#allocation4 + $0x10] sm:$0xff] %v8252_v21 }
0x15df   :  { %8254 = vst [vmem:[#allocation4] sm:$0xff] %v8251_v20 }
0x15e0 PF:  { %p9311_p10 = scmp.gt.s32.totalorder %s12137_s2, 0 }
0x15e2   :  { %8259 = sbr.rel (%p9311_p10) target bundleno = 5840 (0x16d0), region = 113 }
0x15e7   :  { %v11298_v22 = vld [vmem:[#allocation13 + $0xac] ss:$12 sps:$4 sm:$0xff]   ;;  %v11501_v23 = vmov 0.0   ;;  %v11300_v24 = vld [vmem:[#allocation13 + $0xb0] ss:$12 sps:$4 sm:$0xff]   ;;  %vm11502_vm7 = vmmov 0   ;;  %v8260_v51 = vpack.c.bf16 %v12151_v18, %v12151_v18 }
0x15e8   :  { %10193 = vmatprep.subr.bf16.mxu1 %v11501_v23  ;;  %10209 = vmatprep.mubr.msk.bf16.mxu1 %vm11502_vm7, %v11501_v23  ;;  %v11301_v25 = vld [vmem:[#allocation13 + $0xa8] ss:$12 sps:$4 sm:$0xff]   ;;  %v11503_v27 = vmov 0   ;;  %v11304_v28 = vld [vmem:[#allocation13 + $0x98] ss:$12 sps:$4 sm:$0xff]  }
0x15e9   :  { %8438 = vmatprep.subr.bf16.mxu0 %v11298_v22  ;;  %10194 = vmatpush3.bf16.msra.mxu1 %v11300_v24  ;;  %v11302_v26 = vld [vmem:[#allocation13 + $0x94] ss:$12 sps:$4 sm:$0xff]   ;;  %v11305_v29 = vld [vmem:[#allocation13 + $0x90] ss:$12 sps:$4 sm:$0xff]   ;;  %v11309_v40 = vld [vmem:[#allocation13 + $0x78] ss:$12 sps:$4 sm:$0xff]  }
0x15ea   :  { %8470 = vmatprep.mubr.bf16.mxu0 %v11503_v27  ;;  %8439 = vmatpush1.bf16.msra.mxu0 %v11301_v25  ;;  %v11306_v37 = vld [vmem:[#allocation13 + $0x7c] ss:$12 sps:$4 sm:$0xff]   ;;  %v11308_v38 = vld [vmem:[#allocation13 + $0x80] ss:$12 sps:$4 sm:$0xff]   ;;  %v11310_v35 = vld [vmem:[#allocation13 + $0x64] ss:$12 sps:$4 sm:$0xff]  }
0x15eb   :  { %10195 = vmatprep.subr.bf16.mxu1 %v11501_v23  ;;  %8440 = vmatprep.subr.bf16.mxu0 %v11302_v26  ;;  %v11312_v41 = vld [vmem:[#allocation13 + $0x68] ss:$12 sps:$4 sm:$0xff]   ;;  %v11313_v42 = vld [vmem:[#allocation13 + $0x60] ss:$12 sps:$4 sm:$0xff]   ;;  %v11316_v44 = vld [vmem:[#allocation13 + $0x50] ss:$12 sps:$4 sm:$0xff]  }
0x15ec   :  { %v11314_v43 = vld [vmem:[#allocation13 + $0x4c] ss:$12 sps:$4 sm:$0xff]   ;;  %v11317_v45 = vld [vmem:[#allocation13 + $0x48] ss:$12 sps:$4 sm:$0xff]   ;;  %v11321_v30 = vld [vmem:[#allocation13 + $0x30] ss:$12 sps:$4 sm:$0xff]  }
0x15ed   :  { %10196 = vmatpush3.bf16.msra.mxu1 %v11304_v28  ;;  %v11318_v46 = vld [vmem:[#allocation13 + $0x34] ss:$12 sps:$4 sm:$0xff]   ;;  %v11320_v47 = vld [vmem:[#allocation13 + $0x38] ss:$12 sps:$4 sm:$0xff]   ;;  %v11322_v48 = vld [vmem:[#allocation13 + $0x1c] ss:$12 sps:$4 sm:$0xff]  }
0x15ee   :  { %8441 = vmatpush1.bf16.msra.mxu0 %v11305_v29  ;;  %10197 = vmatprep.subr.bf16.mxu1 %v11501_v23  ;;  %v11324_v49 = vld [vmem:[#allocation13 + $0x20] ss:$12 sps:$4 sm:$0xff]   ;;  %v11325_v50 = vld [vmem:[#allocation13 + $0x18] ss:$12 sps:$4 sm:$0xff]   ;;  %v11328_v34 = vld [vmem:[#allocation13 + $0x8] ss:$12 sps:$4 sm:$0xff]  }
0x15ef   :  { %8442 = vmatprep.subr.bf16.mxu0 %v11306_v37  ;;  %v11326_v32 = vld [vmem:[#allocation13 + $0x4] ss:$12 sps:$4 sm:$0xff]   ;;  %v11329_v36 = vld [vmem:[#allocation13] ss:$12 sps:$4 sm:$0xff]  }
0x15f0   :  { %v8293_v52 = vld [vmem:[%s12177_s6] sm:$0x7] }
0x15f1   :  { %10198 = vmatpush3.bf16.msra.mxu1 %v11308_v38  ;;  %v8306_v53 = vrot.slane %v8293_v52, %v11665_v39  ;;  %v8298_v54 = vrot.slane %v8293_v52, %v11651_v31  ;;  %v8302_v56 = vrot.slane %v8293_v52, %v11656_v33 }
0x15f2   :  { %8443 = vmatpush1.bf16.msra.mxu0 %v11309_v40  ;;  %10199 = vmatprep.subr.bf16.mxu1 %v11501_v23 }
0x15f3   :  { %8444 = vmatprep.subr.bf16.mxu0 %v11310_v35 }
0x15f5   :  { %10200 = vmatpush3.bf16.msra.mxu1 %v11312_v41 }
0x15f6   :  { %8445 = vmatpush1.bf16.msra.mxu0 %v11313_v42  ;;  %10201 = vmatprep.subr.bf16.mxu1 %v11501_v23 }
0x15f7   :  { %8446 = vmatprep.subr.bf16.mxu0 %v11314_v43 }
0x15f9   :  { %10202 = vmatpush3.bf16.msra.mxu1 %v11316_v44 }
0x15fa   :  { %8447 = vmatpush1.bf16.msra.mxu0 %v11317_v45  ;;  %10203 = vmatprep.subr.bf16.mxu1 %v11501_v23 }
0x15fb   :  { %8448 = vmatprep.subr.bf16.mxu0 %v11318_v46 }
0x15fd   :  { %10204 = vmatpush3.bf16.msra.mxu1 %v11320_v47 }
0x15fe   :  { %8449 = vmatpush1.bf16.msra.mxu0 %v11321_v30  ;;  %10205 = vmatprep.subr.bf16.mxu1 %v11501_v23 }
0x15ff   :  { %8450 = vmatprep.subr.bf16.mxu0 %v11322_v48 }
0x1601   :  { %10206 = vmatpush3.bf16.msra.mxu1 %v11324_v49 }
0x1602   :  { %8451 = vmatpush1.bf16.msra.mxu0 %v11325_v50  ;;  %10207 = vmatprep.subr.bf16.mxu1 %v11501_v23 }
0x1603   :  { %8452 = vmatprep.subr.bf16.mxu0 %v11326_v32 }
0x1605   :  { %10208 = vmatpush3.bf16.msra.mxu1 %v11328_v34 }
0x1606   :  { %8453 = vmatpush1.bf16.msra.mxu0 %v11329_v36 }
0x1608   :  { %10210 = vmatmul.mubr.bf16.vlgmr.msra.gmra.mxu1 %v8260_v51 }
0x1609   :  { %8471 = vmatmul.mubr.bf16.vlgmr.msra.gmra.mxu0 %v8260_v51 }
0x16c8   :  { %v8513_v55 = vpop.f32.mrf.mxu1 }
0x16c9   :  { %v8514_v57 = vadd.f32 %v8513_v55, %v8306_v53  ;;  %v8472_v58 = vpop.f32.mrf.mxu0 }
0x16ca   :  { %v8473_v59 = vadd.f32 %v8472_v58, %v8298_v54  ;;  %v10211_v60 = vpop.f32.mrf.mxu1 }
0x16cb   :  { %8521 = vst [vmem:[#allocation4 + $0x10] sm:$0xff] %v8514_v57  ;;  %v8474_v62 = vpop.f32.mrf.mxu0 }
0x16cc   :  { %8519 = vst [vmem:[#allocation4 + $0x8] sm:$0xff] %v8473_v59  ;;  %v8475_v63 = vadd.f32 %v8474_v62, %v8302_v56  ;;  %v8516_v4 = vpop.f32.mrf.mxu1 }
0x16cd   :  { %v8476_v5 = vpop.f32.mrf.mxu0 }
0x16ce   :  { %8520 = vst [vmem:[#allocation4] sm:$0xff] %v8475_v63  ;;  %v10212_v6 = vpop.f32.mrf.mxu1 }
0x16cf   :  { %v8477_v7 = vpop.f32.mrf.mxu0 }
0x16d0 PF:  { %s11504_s6 = smov [#allocation16]  }
0x16d1   :  { %s8527_s24 = sshll.u32 %s11504_s6, 4  ;;  %s8528_s24 = int_to_ptr.vmem [resolvable:$true] %s8527_s24 }
0x16d2   :  { %s11438_s25 = scalar_lea.vmem %s8528_s24, 1024  ;;  %p11443_p12 = scmp.lt.s32.totalorder %s8528_s24, %s8528_s24 }
0x16d3   :  { %p11439_p11 = scmp.ne.s32.totalorder %s8528_s24, %s11438_s25  ;;  %p11444_p13 = scmp.lt.s32.totalorder %s11438_s25, %s11438_s25 }
0x16d5   :  { %p11445_p0 = por %p11444_p13, %p11443_p12 }
0x16d7   :  { %p11446_p1 = pnand %p11445_p0, %p11439_p11 }
0x16d9   :  { %11449 = shalt.err (!%p11446_p1)
}
0x16da   :  { %8533 = dma.vmem_to_hbm [thread:$0]  %s8528_s24, 1024, %s12179_s8, [#allocation7], %s11477_s0, %s11477_s0, %s11478_s28  }
0x16db   :  { %11466 = dma.done.wait [#allocation7], 1024  }
0x16dc   :  { %11467 = vsyncadd [#allocation7], 4294966272 }
0x16dd   :  { %8537 = vsyncpa [#allocation6], 1 }
0x16de   :  { %8538 = vsyncpa [#allocation11], 1 }
0x16df   :  { %8539 = vsyncpa [#allocation14], 1 }
0x16e0   :  { %8540 = vsyncpa [#allocation7], 1 }
0x16e1   :  { %8541 = vsyncpa [#allocation8], 1 }

</bundles_post_ra>
